<compile_context>
chip_gen: v7x
topology: tpu7x:2x2x1
jax: 0.10.0
libtpu: 0.0.40
codegen_flags: <defaults>
</compile_context>

<pallas_src>
import numpy as np
import jax
import jax.numpy as jnp
from jax import lax
from jax.experimental import pallas as pl
from jax.experimental.pallas import tpu as pltpu


def _rot_kernel(k_ref, x_ref, y_ref, xo_ref, yo_ref):
    """One grid step: rotate `bt` images (only the drawn branch runs per image)
    and remap their (y[1], y[2]) coordinates.

    k_ref : (B,) int32 in SMEM (scalar prefetch) -- per-image rotation count.
    x_ref : (bt, C, H, W) VMEM block.
    y_ref : (bt, ylen)    VMEM block.
    """
    bt, C, H, W = x_ref.shape
    n = W
    ylen = y_ref.shape[1]
    base = pl.program_id(0) * bt
    xdt = xo_ref.dtype
    # bf16 inputs: 0/1 permutation matmuls are exact in bf16 -> skip the 3x
    # f32 MXU-emulation path (matters most on v5e).
    cdt = jnp.bfloat16 if x_ref.dtype == jnp.bfloat16 else jnp.float32

    def flip_mat():
        # Anti-identity J (J[i, j] = 1 iff i + j == n - 1):
        #   A @ J reverses the lane axis, J @ A reverses the sublane axis.
        # Built only inside the rotation branches so the identity path never
        # pays for it.
        row = lax.broadcasted_iota(jnp.int32, (n, n), 0)
        col = lax.broadcasted_iota(jnp.int32, (n, n), 1)
        return (row + col == n - 1).astype(cdt)

    # Per-image k scalars (SMEM reads are cheap scalar work).
    ks = [k_ref[base + i] for i in range(bt)]

    # ---------------- image rotation: only the drawn branch executes ---------
    for i in range(bt):
        kv = ks[i]

        @pl.when(kv == 0)
        def _(i=i):
            xo_ref[i] = x_ref[i]                      # identity: pure VMEM copy

        @pl.when(kv == 1)
        def _(i=i):
            J = flip_mat()
            for c in range(C):
                xc = x_ref[i, c].astype(cdt)
                # rot90(A, 1) = (A @ J)^T   (fliplr then transpose)
                xo_ref[i, c] = jnp.dot(
                    xc, J, preferred_element_type=jnp.float32).T.astype(xdt)

        @pl.when(kv == 2)
        def _(i=i):
            J = flip_mat()
            for c in range(C):
                xc = x_ref[i, c].astype(cdt)
                # rot90(A, 2) = J @ (A @ J)  (fliplr then flipud)
                r = jnp.dot(xc, J, preferred_element_type=jnp.float32)
                xo_ref[i, c] = jnp.dot(
                    J, r.astype(cdt),
                    preferred_element_type=jnp.float32).astype(xdt)

        @pl.when(kv == 3)
        def _(i=i):
            J = flip_mat()
            for c in range(C):
                xc = x_ref[i, c].astype(cdt)
                # rot90(A, 3) = A^T @ J      (transpose then fliplr)
                xo_ref[i, c] = jnp.dot(
                    xc.T, J, preferred_element_type=jnp.float32).astype(xdt)

    # ---------------- label remap: vectorized over all bt rows ---------------
    yv = y_ref[...].astype(jnp.float32)                       # (bt, ylen)
    rows = lax.broadcasted_iota(jnp.int32, (bt, 1), 0)
    kcol = jnp.zeros((bt, 1), jnp.int32)
    for i in range(bt):
        kcol = jnp.where(rows == i, ks[i], kcol)              # (bt, 1) per-row k
    y1 = yv[:, 1:2]
    y2 = yv[:, 2:3]
    new1 = jnp.where(kcol == 0, y1,
           jnp.where(kcol == 1, 1.0 - y2,
           jnp.where(kcol == 2, 1.0 - y1, y2)))
    new2 = jnp.where(kcol == 0, y2,
           jnp.where(kcol == 1, y1,
           jnp.where(kcol == 2, 1.0 - y2, 1.0 - y1)))
    cols = lax.broadcasted_iota(jnp.int32, (bt, ylen), 1)
    out_y = jnp.where(cols == 1, new1, jnp.where(cols == 2, new2, yv))
    yo_ref[...] = out_y.astype(yo_ref.dtype)


def _rotate_batch(x, y, k):
    """rot90(x[b], k[b], (1, 2)) for every image b, plus the y[:,1], y[:,2] remap.

    x: (B, C, H, W), y: (B, ylen >= 3), k: (B,) int32 in [0, 4).
    """
    B, C, H, W = x.shape
    assert W % 2 == 1, "The shape of the image must be odd"
    assert H == W, "square image expected for 90-deg rotation"
    ylen = y.shape[1]
    assert ylen >= 3, "y must have at least 3 entries (y[1], y[2] are remapped)"
    assert k.shape == (B,)

    # Images per grid step (static unroll inside the kernel). Small on purpose:
    # it already amortizes the per-step overhead; block footprint stays well
    # under the v7x 32 MiB scoped-VMEM default even double-buffered.
    bt = next(d for d in (8, 4, 2, 1) if B % d == 0)
    grid = (B // bt,)

    return pl.pallas_call(
        _rot_kernel,
        out_shape=(
            jax.ShapeDtypeStruct((B, C, H, W), x.dtype),
            jax.ShapeDtypeStruct((B, ylen), y.dtype),
        ),
        grid_spec=pltpu.PrefetchScalarGridSpec(
            num_scalar_prefetch=1,                     # k -> SMEM before the grid
            grid=grid,
            in_specs=[
                pl.BlockSpec((bt, C, H, W), lambda b, k_ref: (b, 0, 0, 0)),
                pl.BlockSpec((bt, ylen), lambda b, k_ref: (b, 0)),
            ],
            out_specs=(
                pl.BlockSpec((bt, C, H, W), lambda b, k_ref: (b, 0, 0, 0)),
                pl.BlockSpec((bt, ylen), lambda b, k_ref: (b, 0)),
            ),
        ),
        compiler_params=pltpu.CompilerParams(
            dimension_semantics=("parallel",),         # both v7x TCs
        ),
    )(k, x, y)


def my_random_rotation(x, y, key):
    """Pallas equivalent of MyRandomRotation.forward(x, y) for one (C, H, W) image."""
    assert x.shape[-1] % 2 == 1, "The shape of the image must be odd"
    assert x.shape[-2] == x.shape[-1], "square image expected for 90-deg rotation"
    k = jax.random.randint(key, (1,), 0, 4, dtype=jnp.int32)
    xr, yr = _rotate_batch(x[None], y[None], k)
    return xr[0], yr[0]


def my_random_rotation_batched(x, y, key):
    """Throughput path: (B, C, H, W) images, an independent k per image, one call."""
    assert x.shape[-1] % 2 == 1, "The shape of the image must be odd"
    assert x.shape[-2] == x.shape[-1], "square image expected for 90-deg rotation"
    B = x.shape[0]
    k = jax.random.randint(key, (B,), 0, 4, dtype=jnp.int32)
    return _rotate_batch(x, y, k)


if __name__ == "__main__":
    key = jax.random.PRNGKey(0)
    kx, ky, kk, kk2 = jax.random.split(key, 4)

    B, C, H, W = 8, 3, 17, 17          # small, odd & square as the module requires
    ylen = 3
    x = jax.random.normal(kx, (B, C, H, W), dtype=jnp.float32)
    y = jax.random.uniform(ky, (B, ylen), dtype=jnp.float32)

    xn = np.asarray(x)
    yn = np.asarray(y)

    def ref_one(xi, yi, k):
        rx = np.rot90(xi, k, (1, 2))
        ry = yi.copy()
        if k == 0:
            e1, e2 = yi[1], yi[2]
        elif k == 1:
            e1, e2 = 1.0 - yi[2], yi[1]
        elif k == 2:
            e1, e2 = 1.0 - yi[1], 1.0 - yi[2]
        else:
            e1, e2 = yi[2], 1.0 - yi[1]
        ry[1], ry[2] = e1, e2
        return rx, ry

    def check(kvec, xr, yr):
        xr = np.asarray(xr)
        yr = np.asarray(yr)
        for b in range(B):
            rx, ry = ref_one(xn[b], yn[b], int(kvec[b]))
            assert np.allclose(xr[b], rx, atol=1e-5), f"image mismatch b={b} k={int(kvec[b])}"
            assert np.allclose(yr[b], ry, atol=1e-6), f"label mismatch b={b} k={int(kvec[b])}"

    # Deterministic check of each rotation branch over the whole batch.
    for kval in range(4):
        kvec = jnp.full((B,), kval, dtype=jnp.int32)
        xr, yr = _rotate_batch(x, y, kvec)
        jax.block_until_ready((xr, yr))
        check(np.asarray(kvec), xr, yr)

    # Mixed per-image k in one call.
    kvec = jnp.array([0, 1, 2, 3, 3, 2, 1, 0], dtype=jnp.int32)
    xr, yr = _rotate_batch(x, y, kvec)
    jax.block_until_ready((xr, yr))
    check(np.asarray(kvec), xr, yr)

    # Random batched path.
    xr, yr = my_random_rotation_batched(x, y, kk)
    jax.block_until_ready((xr, yr))
    k_drawn = np.asarray(jax.random.randint(kk, (B,), 0, 4, dtype=jnp.int32))
    check(k_drawn, xr, yr)

    # Single-image path (matches MyRandomRotation.forward semantics exactly).
    xr1, yr1 = my_random_rotation(x[0], y[0], kk2)
    jax.block_until_ready((xr1, yr1))
    k1 = int(jax.random.randint(kk2, (1,), 0, 4, dtype=jnp.int32)[0])
    rx, ry = ref_one(xn[0], yn[0], k1)
    assert np.allclose(np.asarray(xr1), rx, atol=1e-5), "single-image mismatch"
    assert np.allclose(np.asarray(yr1), ry, atol=1e-6), "single-label mismatch"

    print("KERNEL_OK")
</pallas_src>

<mosaic_0001>
module attributes {stable_mosaic.version = 11 : i64} {
  func.func @_rot_kernel(%arg0: i32, %arg1: memref<8xi32, #tpu.memory_space<smem>>, %arg2: memref<8x3x17x17xf32, #tpu.memory_space<vmem>>, %arg3: memref<8x3xf32, #tpu.memory_space<vmem>>, %arg4: memref<8x3x17x17xf32, #tpu.memory_space<vmem>>, %arg5: memref<8x3xf32, #tpu.memory_space<vmem>>) attributes {dimension_semantics = [#tpu.dimension_semantics<parallel>], iteration_bounds = array<i64: 1>, scalar_prefetch = 1 : i64, scratch_operands = 0 : i64, tpu.core_type = #tpu.core_type<tc>, window_params = [{transform_indices = @transform_0, window_bounds = array<i64: 8, 3, 17, 17>}, {transform_indices = @transform_1, window_bounds = array<i64: 8, 3>}, {transform_indices = @transform_2, window_bounds = array<i64: 8, 3, 17, 17>}, {transform_indices = @transform_3, window_bounds = array<i64: 8, 3>}]} {
    %c8_i32 = arith.constant 8 : i32
    %0 = arith.muli %arg0, %c8_i32 : i32
    %c0_i32 = arith.constant 0 : i32
    %1 = arith.addi %0, %c0_i32 : i32
    %2 = arith.index_cast %1 : i32 to index
    %3 = memref.load %arg1[%2] : memref<8xi32, #tpu.memory_space<smem>>
    %c1_i32 = arith.constant 1 : i32
    %4 = arith.addi %0, %c1_i32 : i32
    %5 = arith.index_cast %4 : i32 to index
    %6 = memref.load %arg1[%5] : memref<8xi32, #tpu.memory_space<smem>>
    %c2_i32 = arith.constant 2 : i32
    %7 = arith.addi %0, %c2_i32 : i32
    %8 = arith.index_cast %7 : i32 to index
    %9 = memref.load %arg1[%8] : memref<8xi32, #tpu.memory_space<smem>>
    %c3_i32 = arith.constant 3 : i32
    %10 = arith.addi %0, %c3_i32 : i32
    %11 = arith.index_cast %10 : i32 to index
    %12 = memref.load %arg1[%11] : memref<8xi32, #tpu.memory_space<smem>>
    %c4_i32 = arith.constant 4 : i32
    %13 = arith.addi %0, %c4_i32 : i32
    %14 = arith.index_cast %13 : i32 to index
    %15 = memref.load %arg1[%14] : memref<8xi32, #tpu.memory_space<smem>>
    %c5_i32 = arith.constant 5 : i32
    %16 = arith.addi %0, %c5_i32 : i32
    %17 = arith.index_cast %16 : i32 to index
    %18 = memref.load %arg1[%17] : memref<8xi32, #tpu.memory_space<smem>>
    %c6_i32 = arith.constant 6 : i32
    %19 = arith.addi %0, %c6_i32 : i32
    %20 = arith.index_cast %19 : i32 to index
    %21 = memref.load %arg1[%20] : memref<8xi32, #tpu.memory_space<smem>>
    %c7_i32 = arith.constant 7 : i32
    %22 = arith.addi %0, %c7_i32 : i32
    %23 = arith.index_cast %22 : i32 to index
    %24 = memref.load %arg1[%23] : memref<8xi32, #tpu.memory_space<smem>>
    %c0_i32_0 = arith.constant 0 : i32
    %25 = arith.cmpi eq, %3, %c0_i32_0 : i32
    %26 = arith.extui %25 : i1 to i32
    %c0_i32_1 = arith.constant 0 : i32
    %27 = arith.cmpi ne, %26, %c0_i32_1 : i32
    scf.if %27 {
      %c0_87 = arith.constant 0 : index
      %c0_88 = arith.constant 0 : index
      %c0_89 = arith.constant 0 : index
      %c0_90 = arith.constant 0 : index
      %196 = vector.load %arg2[%c0_87, %c0_88, %c0_89, %c0_90] : memref<8x3x17x17xf32, #tpu.memory_space<vmem>>, vector<1x3x17x17xf32>
      %197 = vector.shape_cast %196 : vector<1x3x17x17xf32> to vector<3x17x17xf32>
      %c0_91 = arith.constant 0 : index
      %c0_92 = arith.constant 0 : index
      %c0_93 = arith.constant 0 : index
      %c0_94 = arith.constant 0 : index
      %198 = vector.load %arg4[%c0_91, %c0_92, %c0_93, %c0_94] : memref<8x3x17x17xf32, #tpu.memory_space<vmem>>, vector<1x3x17x17xf32>
      %199 = vector.shape_cast %198 : vector<1x3x17x17xf32> to vector<3x17x17xf32>
      %200 = vector.shape_cast %197 : vector<3x17x17xf32> to vector<1x3x17x17xf32>
      tpu.vector_store %arg4[%c0_91, %c0_92, %c0_93, %c0_94], %200 {strides = array<i32>} : memref<8x3x17x17xf32, #tpu.memory_space<vmem>>, vector<1x3x17x17xf32>,
    } else {
    }
    %c1_i32_2 = arith.constant 1 : i32
    %28 = arith.cmpi eq, %3, %c1_i32_2 : i32
    %29 = arith.extui %28 : i1 to i32
    %c0_i32_3 = arith.constant 0 : i32
    %30 = arith.cmpi ne, %29, %c0_i32_3 : i32
    scf.if %30 {
      %196 = tpu.iota {dimensions = array<i32: 0>} : vector<17x17xi32>
      %197 = tpu.iota {dimensions = array<i32: 1>} : vector<17x17xi32>
      %198 = arith.addi %196, %197 : vector<17x17xi32>
      %c16_i32 = arith.constant 16 : i32
      %199 = vector.broadcast %c16_i32 : i32 to vector<17x17xi32>
      %200 = arith.cmpi eq, %198, %199 : vector<17x17xi32>
      %201 = arith.extui %200 : vector<17x17xi1> to vector<17x17xi32>
      %202 = arith.sitofp %201 : vector<17x17xi32> to vector<17x17xf32>
      %c0_87 = arith.constant 0 : index
      %c0_88 = arith.constant 0 : index
      %c0_89 = arith.constant 0 : index
      %c0_90 = arith.constant 0 : index
      %203 = vector.load %arg2[%c0_87, %c0_88, %c0_89, %c0_90] : memref<8x3x17x17xf32, #tpu.memory_space<vmem>>, vector<1x1x17x17xf32>
      %204 = vector.shape_cast %203 : vector<1x1x17x17xf32> to vector<17x17xf32>
      %cst_91 = arith.constant dense<0.000000e+00> : vector<17x17xf32>
      %205 = tpu.matmul %204, %202, %cst_91 {dimension_numbers = #tpu.dot_dimension_numbers<[1], [0], [0], [1], [0, 0, 1, 1], [], []>} : vector<17x17xf32>, vector<17x17xf32>, vector<17x17xf32> -> vector<17x17xf32>
      %206 = tpu.transpose %205, [1, 0] : vector<17x17xf32> -> vector<17x17xf32>
      %c0_92 = arith.constant 0 : index
      %c0_93 = arith.constant 0 : index
      %c0_94 = arith.constant 0 : index
      %c0_95 = arith.constant 0 : index
      %207 = vector.load %arg4[%c0_92, %c0_93, %c0_94, %c0_95] : memref<8x3x17x17xf32, #tpu.memory_space<vmem>>, vector<1x1x17x17xf32>
      %208 = vector.shape_cast %207 : vector<1x1x17x17xf32> to vector<17x17xf32>
      %209 = vector.shape_cast %206 : vector<17x17xf32> to vector<1x1x17x17xf32>
      tpu.vector_store %arg4[%c0_92, %c0_93, %c0_94, %c0_95], %209 {strides = array<i32>} : memref<8x3x17x17xf32, #tpu.memory_space<vmem>>, vector<1x1x17x17xf32>,
      %c0_96 = arith.constant 0 : index
      %c1 = arith.constant 1 : index
      %c0_97 = arith.constant 0 : index
      %c0_98 = arith.constant 0 : index
      %210 = vector.load %arg2[%c0_96, %c1, %c0_97, %c0_98] : memref<8x3x17x17xf32, #tpu.memory_space<vmem>>, vector<1x1x17x17xf32>
      %211 = vector.shape_cast %210 : vector<1x1x17x17xf32> to vector<17x17xf32>
      %cst_99 = arith.constant dense<0.000000e+00> : vector<17x17xf32>
      %212 = tpu.matmul %211, %202, %cst_99 {dimension_numbers = #tpu.dot_dimension_numbers<[1], [0], [0], [1], [0, 0, 1, 1], [], []>} : vector<17x17xf32>, vector<17x17xf32>, vector<17x17xf32> -> vector<17x17xf32>
      %213 = tpu.transpose %212, [1, 0] : vector<17x17xf32> -> vector<17x17xf32>
      %c0_100 = arith.constant 0 : index
      %c1_101 = arith.constant 1 : index
      %c0_102 = arith.constant 0 : index
      %c0_103 = arith.constant 0 : index
      %214 = vector.load %arg4[%c0_100, %c1_101, %c0_102, %c0_103] : memref<8x3x17x17xf32, #tpu.memory_space<vmem>>, vector<1x1x17x17xf32>
      %215 = vector.shape_cast %214 : vector<1x1x17x17xf32> to vector<17x17xf32>
      %216 = vector.shape_cast %213 : vector<17x17xf32> to vector<1x1x17x17xf32>
      tpu.vector_store %arg4[%c0_100, %c1_101, %c0_102, %c0_103], %216 {strides = array<i32>} : memref<8x3x17x17xf32, #tpu.memory_space<vmem>>, vector<1x1x17x17xf32>,
      %c0_104 = arith.constant 0 : index
      %c2 = arith.constant 2 : index
      %c0_105 = arith.constant 0 : index
      %c0_106 = arith.constant 0 : index
      %217 = vector.load %arg2[%c0_104, %c2, %c0_105, %c0_106] : memref<8x3x17x17xf32, #tpu.memory_space<vmem>>, vector<1x1x17x17xf32>
      %218 = vector.shape_cast %217 : vector<1x1x17x17xf32> to vector<17x17xf32>
      %cst_107 = arith.constant dense<0.000000e+00> : vector<17x17xf32>
      %219 = tpu.matmul %218, %202, %cst_107 {dimension_numbers = #tpu.dot_dimension_numbers<[1], [0], [0], [1], [0, 0, 1, 1], [], []>} : vector<17x17xf32>, vector<17x17xf32>, vector<17x17xf32> -> vector<17x17xf32>
      %220 = tpu.transpose %219, [1, 0] : vector<17x17xf32> -> vector<17x17xf32>
      %c0_108 = arith.constant 0 : index
      %c2_109 = arith.constant 2 : index
      %c0_110 = arith.constant 0 : index
      %c0_111 = arith.constant 0 : index
      %221 = vector.load %arg4[%c0_108, %c2_109, %c0_110, %c0_111] : memref<8x3x17x17xf32, #tpu.memory_space<vmem>>, vector<1x1x17x17xf32>
      %222 = vector.shape_cast %221 : vector<1x1x17x17xf32> to vector<17x17xf32>
      %223 = vector.shape_cast %220 : vector<17x17xf32> to vector<1x1x17x17xf32>
      tpu.vector_store %arg4[%c0_108, %c2_109, %c0_110, %c0_111], %223 {strides = array<i32>} : memref<8x3x17x17xf32, #tpu.memory_space<vmem>>, vector<1x1x17x17xf32>,
    } else {
    }
    %c2_i32_4 = arith.constant 2 : i32
    %31 = arith.cmpi eq, %3, %c2_i32_4 : i32
    %32 = arith.extui %31 : i1 to i32
    %c0_i32_5 = arith.constant 0 : i32
    %33 = arith.cmpi ne, %32, %c0_i32_5 : i32
    scf.if %33 {
      %196 = tpu.iota {dimensions = array<i32: 0>} : vector<17x17xi32>
      %197 = tpu.iota {dimensions = array<i32: 1>} : vector<17x17xi32>
      %198 = arith.addi %196, %197 : vector<17x17xi32>
      %c16_i32 = arith.constant 16 : i32
      %199 = vector.broadcast %c16_i32 : i32 to vector<17x17xi32>
      %200 = arith.cmpi eq, %198, %199 : vector<17x17xi32>
      %201 = arith.extui %200 : vector<17x17xi1> to vector<17x17xi32>
      %202 = arith.sitofp %201 : vector<17x17xi32> to vector<17x17xf32>
      %c0_87 = arith.constant 0 : index
      %c0_88 = arith.constant 0 : index
      %c0_89 = arith.constant 0 : index
      %c0_90 = arith.constant 0 : index
      %203 = vector.load %arg2[%c0_87, %c0_88, %c0_89, %c0_90] : memref<8x3x17x17xf32, #tpu.memory_space<vmem>>, vector<1x1x17x17xf32>
      %204 = vector.shape_cast %203 : vector<1x1x17x17xf32> to vector<17x17xf32>
      %cst_91 = arith.constant dense<0.000000e+00> : vector<17x17xf32>
      %205 = tpu.matmul %204, %202, %cst_91 {dimension_numbers = #tpu.dot_dimension_numbers<[1], [0], [0], [1], [0, 0, 1, 1], [], []>} : vector<17x17xf32>, vector<17x17xf32>, vector<17x17xf32> -> vector<17x17xf32>
      %cst_92 = arith.constant dense<0.000000e+00> : vector<17x17xf32>
      %206 = tpu.matmul %202, %205, %cst_92 {dimension_numbers = #tpu.dot_dimension_numbers<[1], [0], [0], [1], [0, 0, 1, 1], [], []>} : vector<17x17xf32>, vector<17x17xf32>, vector<17x17xf32> -> vector<17x17xf32>
      %c0_93 = arith.constant 0 : index
      %c0_94 = arith.constant 0 : index
      %c0_95 = arith.constant 0 : index
      %c0_96 = arith.constant 0 : index
      %207 = vector.load %arg4[%c0_93, %c0_94, %c0_95, %c0_96] : memref<8x3x17x17xf32, #tpu.memory_space<vmem>>, vector<1x1x17x17xf32>
      %208 = vector.shape_cast %207 : vector<1x1x17x17xf32> to vector<17x17xf32>
      %209 = vector.shape_cast %206 : vector<17x17xf32> to vector<1x1x17x17xf32>
      tpu.vector_store %arg4[%c0_93, %c0_94, %c0_95, %c0_96], %209 {strides = array<i32>} : memref<8x3x17x17xf32, #tpu.memory_space<vmem>>, vector<1x1x17x17xf32>,
      %c0_97 = arith.constant 0 : index
      %c1 = arith.constant 1 : index
      %c0_98 = arith.constant 0 : index
      %c0_99 = arith.constant 0 : index
      %210 = vector.load %arg2[%c0_97, %c1, %c0_98, %c0_99] : memref<8x3x17x17xf32, #tpu.memory_space<vmem>>, vector<1x1x17x17xf32>
      %211 = vector.shape_cast %210 : vector<1x1x17x17xf32> to vector<17x17xf32>
      %cst_100 = arith.constant dense<0.000000e+00> : vector<17x17xf32>
      %212 = tpu.matmul %211, %202, %cst_100 {dimension_numbers = #tpu.dot_dimension_numbers<[1], [0], [0], [1], [0, 0, 1, 1], [], []>} : vector<17x17xf32>, vector<17x17xf32>, vector<17x17xf32> -> vector<17x17xf32>
      %cst_101 = arith.constant dense<0.000000e+00> : vector<17x17xf32>
      %213 = tpu.matmul %202, %212, %cst_101 {dimension_numbers = #tpu.dot_dimension_numbers<[1], [0], [0], [1], [0, 0, 1, 1], [], []>} : vector<17x17xf32>, vector<17x17xf32>, vector<17x17xf32> -> vector<17x17xf32>
      %c0_102 = arith.constant 0 : index
      %c1_103 = arith.constant 1 : index
      %c0_104 = arith.constant 0 : index
      %c0_105 = arith.constant 0 : index
      %214 = vector.load %arg4[%c0_102, %c1_103, %c0_104, %c0_105] : memref<8x3x17x17xf32, #tpu.memory_space<vmem>>, vector<1x1x17x17xf32>
      %215 = vector.shape_cast %214 : vector<1x1x17x17xf32> to vector<17x17xf32>
      %216 = vector.shape_cast %213 : vector<17x17xf32> to vector<1x1x17x17xf32>
      tpu.vector_store %arg4[%c0_102, %c1_103, %c0_104, %c0_105], %216 {strides = array<i32>} : memref<8x3x17x17xf32, #tpu.memory_space<vmem>>, vector<1x1x17x17xf32>,
      %c0_106 = arith.constant 0 : index
      %c2 = arith.constant 2 : index
      %c0_107 = arith.constant 0 : index
      %c0_108 = arith.constant 0 : index
      %217 = vector.load %arg2[%c0_106, %c2, %c0_107, %c0_108] : memref<8x3x17x17xf32, #tpu.memory_space<vmem>>, vector<1x1x17x17xf32>
      %218 = vector.shape_cast %217 : vector<1x1x17x17xf32> to vector<17x17xf32>
      %cst_109 = arith.constant dense<0.000000e+00> : vector<17x17xf32>
      %219 = tpu.matmul %218, %202, %cst_109 {dimension_numbers = #tpu.dot_dimension_numbers<[1], [0], [0], [1], [0, 0, 1, 1], [], []>} : vector<17x17xf32>, vector<17x17xf32>, vector<17x17xf32> -> vector<17x17xf32>
      %cst_110 = arith.constant dense<0.000000e+00> : vector<17x17xf32>
      %220 = tpu.matmul %202, %219, %cst_110 {dimension_numbers = #tpu.dot_dimension_numbers<[1], [0], [0], [1], [0, 0, 1, 1], [], []>} : vector<17x17xf32>, vector<17x17xf32>, vector<17x17xf32> -> vector<17x17xf32>
      %c0_111 = arith.constant 0 : index
      %c2_112 = arith.constant 2 : index
      %c0_113 = arith.constant 0 : index
      %c0_114 = arith.constant 0 : index
      %221 = vector.load %arg4[%c0_111, %c2_112, %c0_113, %c0_114] : memref<8x3x17x17xf32, #tpu.memory_space<vmem>>, vector<1x1x17x17xf32>
      %222 = vector.shape_cast %221 : vector<1x1x17x17xf32> to vector<17x17xf32>
      %223 = vector.shape_cast %220 : vector<17x17xf32> to vector<1x1x17x17xf32>
      tpu.vector_store %arg4[%c0_111, %c2_112, %c0_113, %c0_114], %223 {strides = array<i32>} : memref<8x3x17x17xf32, #tpu.memory_space<vmem>>, vector<1x1x17x17xf32>,
    } else {
    }
    %c3_i32_6 = arith.constant 3 : i32
    %34 = arith.cmpi eq, %3, %c3_i32_6 : i32
    %35 = arith.extui %34 : i1 to i32
    %c0_i32_7 = arith.constant 0 : i32
    %36 = arith.cmpi ne, %35, %c0_i32_7 : i32
    scf.if %36 {
      %196 = tpu.iota {dimensions = array<i32: 0>} : vector<17x17xi32>
      %197 = tpu.iota {dimensions = array<i32: 1>} : vector<17x17xi32>
      %198 = arith.addi %196, %197 : vector<17x17xi32>
      %c16_i32 = arith.constant 16 : i32
      %199 = vector.broadcast %c16_i32 : i32 to vector<17x17xi32>
      %200 = arith.cmpi eq, %198, %199 : vector<17x17xi32>
      %201 = arith.extui %200 : vector<17x17xi1> to vector<17x17xi32>
      %202 = arith.sitofp %201 : vector<17x17xi32> to vector<17x17xf32>
      %c0_87 = arith.constant 0 : index
      %c0_88 = arith.constant 0 : index
      %c0_89 = arith.constant 0 : index
      %c0_90 = arith.constant 0 : index
      %203 = vector.load %arg2[%c0_87, %c0_88, %c0_89, %c0_90] : memref<8x3x17x17xf32, #tpu.memory_space<vmem>>, vector<1x1x17x17xf32>
      %204 = vector.shape_cast %203 : vector<1x1x17x17xf32> to vector<17x17xf32>
      %205 = tpu.transpose %204, [1, 0] : vector<17x17xf32> -> vector<17x17xf32>
      %cst_91 = arith.constant dense<0.000000e+00> : vector<17x17xf32>
      %206 = tpu.matmul %205, %202, %cst_91 {dimension_numbers = #tpu.dot_dimension_numbers<[1], [0], [0], [1], [0, 0, 1, 1], [], []>} : vector<17x17xf32>, vector<17x17xf32>, vector<17x17xf32> -> vector<17x17xf32>
      %c0_92 = arith.constant 0 : index
      %c0_93 = arith.constant 0 : index
      %c0_94 = arith.constant 0 : index
      %c0_95 = arith.constant 0 : index
      %207 = vector.load %arg4[%c0_92, %c0_93, %c0_94, %c0_95] : memref<8x3x17x17xf32, #tpu.memory_space<vmem>>, vector<1x1x17x17xf32>
      %208 = vector.shape_cast %207 : vector<1x1x17x17xf32> to vector<17x17xf32>
      %209 = vector.shape_cast %206 : vector<17x17xf32> to vector<1x1x17x17xf32>
      tpu.vector_store %arg4[%c0_92, %c0_93, %c0_94, %c0_95], %209 {strides = array<i32>} : memref<8x3x17x17xf32, #tpu.memory_space<vmem>>, vector<1x1x17x17xf32>,
      %c0_96 = arith.constant 0 : index
      %c1 = arith.constant 1 : index
      %c0_97 = arith.constant 0 : index
      %c0_98 = arith.constant 0 : index
      %210 = vector.load %arg2[%c0_96, %c1, %c0_97, %c0_98] : memref<8x3x17x17xf32, #tpu.memory_space<vmem>>, vector<1x1x17x17xf32>
      %211 = vector.shape_cast %210 : vector<1x1x17x17xf32> to vector<17x17xf32>
      %212 = tpu.transpose %211, [1, 0] : vector<17x17xf32> -> vector<17x17xf32>
      %cst_99 = arith.constant dense<0.000000e+00> : vector<17x17xf32>
      %213 = tpu.matmul %212, %202, %cst_99 {dimension_numbers = #tpu.dot_dimension_numbers<[1], [0], [0], [1], [0, 0, 1, 1], [], []>} : vector<17x17xf32>, vector<17x17xf32>, vector<17x17xf32> -> vector<17x17xf32>
      %c0_100 = arith.constant 0 : index
      %c1_101 = arith.constant 1 : index
      %c0_102 = arith.constant 0 : index
      %c0_103 = arith.constant 0 : index
      %214 = vector.load %arg4[%c0_100, %c1_101, %c0_102, %c0_103] : memref<8x3x17x17xf32, #tpu.memory_space<vmem>>, vector<1x1x17x17xf32>
      %215 = vector.shape_cast %214 : vector<1x1x17x17xf32> to vector<17x17xf32>
      %216 = vector.shape_cast %213 : vector<17x17xf32> to vector<1x1x17x17xf32>
      tpu.vector_store %arg4[%c0_100, %c1_101, %c0_102, %c0_103], %216 {strides = array<i32>} : memref<8x3x17x17xf32, #tpu.memory_space<vmem>>, vector<1x1x17x17xf32>,
      %c0_104 = arith.constant 0 : index
      %c2 = arith.constant 2 : index
      %c0_105 = arith.constant 0 : index
      %c0_106 = arith.constant 0 : index
      %217 = vector.load %arg2[%c0_104, %c2, %c0_105, %c0_106] : memref<8x3x17x17xf32, #tpu.memory_space<vmem>>, vector<1x1x17x17xf32>
      %218 = vector.shape_cast %217 : vector<1x1x17x17xf32> to vector<17x17xf32>
      %219 = tpu.transpose %218, [1, 0] : vector<17x17xf32> -> vector<17x17xf32>
      %cst_107 = arith.constant dense<0.000000e+00> : vector<17x17xf32>
      %220 = tpu.matmul %219, %202, %cst_107 {dimension_numbers = #tpu.dot_dimension_numbers<[1], [0], [0], [1], [0, 0, 1, 1], [], []>} : vector<17x17xf32>, vector<17x17xf32>, vector<17x17xf32> -> vector<17x17xf32>
      %c0_108 = arith.constant 0 : index
      %c2_109 = arith.constant 2 : index
      %c0_110 = arith.constant 0 : index
      %c0_111 = arith.constant 0 : index
      %221 = vector.load %arg4[%c0_108, %c2_109, %c0_110, %c0_111] : memref<8x3x17x17xf32, #tpu.memory_space<vmem>>, vector<1x1x17x17xf32>
      %222 = vector.shape_cast %221 : vector<1x1x17x17xf32> to vector<17x17xf32>
      %223 = vector.shape_cast %220 : vector<17x17xf32> to vector<1x1x17x17xf32>
      tpu.vector_store %arg4[%c0_108, %c2_109, %c0_110, %c0_111], %223 {strides = array<i32>} : memref<8x3x17x17xf32, #tpu.memory_space<vmem>>, vector<1x1x17x17xf32>,
    } else {
    }
    %c0_i32_8 = arith.constant 0 : i32
    %37 = arith.cmpi eq, %6, %c0_i32_8 : i32
    %38 = arith.extui %37 : i1 to i32
    %c0_i32_9 = arith.constant 0 : i32
    %39 = arith.cmpi ne, %38, %c0_i32_9 : i32
    scf.if %39 {
      %c1 = arith.constant 1 : index
      %c0_87 = arith.constant 0 : index
      %c0_88 = arith.constant 0 : index
      %c0_89 = arith.constant 0 : index
      %196 = vector.load %arg2[%c1, %c0_87, %c0_88, %c0_89] : memref<8x3x17x17xf32, #tpu.memory_space<vmem>>, vector<1x3x17x17xf32>
      %197 = vector.shape_cast %196 : vector<1x3x17x17xf32> to vector<3x17x17xf32>
      %c1_90 = arith.constant 1 : index
      %c0_91 = arith.constant 0 : index
      %c0_92 = arith.constant 0 : index
      %c0_93 = arith.constant 0 : index
      %198 = vector.load %arg4[%c1_90, %c0_91, %c0_92, %c0_93] : memref<8x3x17x17xf32, #tpu.memory_space<vmem>>, vector<1x3x17x17xf32>
      %199 = vector.shape_cast %198 : vector<1x3x17x17xf32> to vector<3x17x17xf32>
      %200 = vector.shape_cast %197 : vector<3x17x17xf32> to vector<1x3x17x17xf32>
      tpu.vector_store %arg4[%c1_90, %c0_91, %c0_92, %c0_93], %200 {strides = array<i32>} : memref<8x3x17x17xf32, #tpu.memory_space<vmem>>, vector<1x3x17x17xf32>,
    } else {
    }
    %c1_i32_10 = arith.constant 1 : i32
    %40 = arith.cmpi eq, %6, %c1_i32_10 : i32
    %41 = arith.extui %40 : i1 to i32
    %c0_i32_11 = arith.constant 0 : i32
    %42 = arith.cmpi ne, %41, %c0_i32_11 : i32
    scf.if %42 {
      %196 = tpu.iota {dimensions = array<i32: 0>} : vector<17x17xi32>
      %197 = tpu.iota {dimensions = array<i32: 1>} : vector<17x17xi32>
      %198 = arith.addi %196, %197 : vector<17x17xi32>
      %c16_i32 = arith.constant 16 : i32
      %199 = vector.broadcast %c16_i32 : i32 to vector<17x17xi32>
      %200 = arith.cmpi eq, %198, %199 : vector<17x17xi32>
      %201 = arith.extui %200 : vector<17x17xi1> to vector<17x17xi32>
      %202 = arith.sitofp %201 : vector<17x17xi32> to vector<17x17xf32>
      %c1 = arith.constant 1 : index
      %c0_87 = arith.constant 0 : index
      %c0_88 = arith.constant 0 : index
      %c0_89 = arith.constant 0 : index
      %203 = vector.load %arg2[%c1, %c0_87, %c0_88, %c0_89] : memref<8x3x17x17xf32, #tpu.memory_space<vmem>>, vector<1x1x17x17xf32>
      %204 = vector.shape_cast %203 : vector<1x1x17x17xf32> to vector<17x17xf32>
      %cst_90 = arith.constant dense<0.000000e+00> : vector<17x17xf32>
      %205 = tpu.matmul %204, %202, %cst_90 {dimension_numbers = #tpu.dot_dimension_numbers<[1], [0], [0], [1], [0, 0, 1, 1], [], []>} : vector<17x17xf32>, vector<17x17xf32>, vector<17x17xf32> -> vector<17x17xf32>
      %206 = tpu.transpose %205, [1, 0] : vector<17x17xf32> -> vector<17x17xf32>
      %c1_91 = arith.constant 1 : index
      %c0_92 = arith.constant 0 : index
      %c0_93 = arith.constant 0 : index
      %c0_94 = arith.constant 0 : index
      %207 = vector.load %arg4[%c1_91, %c0_92, %c0_93, %c0_94] : memref<8x3x17x17xf32, #tpu.memory_space<vmem>>, vector<1x1x17x17xf32>
      %208 = vector.shape_cast %207 : vector<1x1x17x17xf32> to vector<17x17xf32>
      %209 = vector.shape_cast %206 : vector<17x17xf32> to vector<1x1x17x17xf32>
      tpu.vector_store %arg4[%c1_91, %c0_92, %c0_93, %c0_94], %209 {strides = array<i32>} : memref<8x3x17x17xf32, #tpu.memory_space<vmem>>, vector<1x1x17x17xf32>,
      %c1_95 = arith.constant 1 : index
      %c1_96 = arith.constant 1 : index
      %c0_97 = arith.constant 0 : index
      %c0_98 = arith.constant 0 : index
      %210 = vector.load %arg2[%c1_95, %c1_96, %c0_97, %c0_98] : memref<8x3x17x17xf32, #tpu.memory_space<vmem>>, vector<1x1x17x17xf32>
      %211 = vector.shape_cast %210 : vector<1x1x17x17xf32> to vector<17x17xf32>
      %cst_99 = arith.constant dense<0.000000e+00> : vector<17x17xf32>
      %212 = tpu.matmul %211, %202, %cst_99 {dimension_numbers = #tpu.dot_dimension_numbers<[1], [0], [0], [1], [0, 0, 1, 1], [], []>} : vector<17x17xf32>, vector<17x17xf32>, vector<17x17xf32> -> vector<17x17xf32>
      %213 = tpu.transpose %212, [1, 0] : vector<17x17xf32> -> vector<17x17xf32>
      %c1_100 = arith.constant 1 : index
      %c1_101 = arith.constant 1 : index
      %c0_102 = arith.constant 0 : index
      %c0_103 = arith.constant 0 : index
      %214 = vector.load %arg4[%c1_100, %c1_101, %c0_102, %c0_103] : memref<8x3x17x17xf32, #tpu.memory_space<vmem>>, vector<1x1x17x17xf32>
      %215 = vector.shape_cast %214 : vector<1x1x17x17xf32> to vector<17x17xf32>
      %216 = vector.shape_cast %213 : vector<17x17xf32> to vector<1x1x17x17xf32>
      tpu.vector_store %arg4[%c1_100, %c1_101, %c0_102, %c0_103], %216 {strides = array<i32>} : memref<8x3x17x17xf32, #tpu.memory_space<vmem>>, vector<1x1x17x17xf32>,
      %c1_104 = arith.constant 1 : index
      %c2 = arith.constant 2 : index
      %c0_105 = arith.constant 0 : index
      %c0_106 = arith.constant 0 : index
      %217 = vector.load %arg2[%c1_104, %c2, %c0_105, %c0_106] : memref<8x3x17x17xf32, #tpu.memory_space<vmem>>, vector<1x1x17x17xf32>
      %218 = vector.shape_cast %217 : vector<1x1x17x17xf32> to vector<17x17xf32>
      %cst_107 = arith.constant dense<0.000000e+00> : vector<17x17xf32>
      %219 = tpu.matmul %218, %202, %cst_107 {dimension_numbers = #tpu.dot_dimension_numbers<[1], [0], [0], [1], [0, 0, 1, 1], [], []>} : vector<17x17xf32>, vector<17x17xf32>, vector<17x17xf32> -> vector<17x17xf32>
      %220 = tpu.transpose %219, [1, 0] : vector<17x17xf32> -> vector<17x17xf32>
      %c1_108 = arith.constant 1 : index
      %c2_109 = arith.constant 2 : index
      %c0_110 = arith.constant 0 : index
      %c0_111 = arith.constant 0 : index
      %221 = vector.load %arg4[%c1_108, %c2_109, %c0_110, %c0_111] : memref<8x3x17x17xf32, #tpu.memory_space<vmem>>, vector<1x1x17x17xf32>
      %222 = vector.shape_cast %221 : vector<1x1x17x17xf32> to vector<17x17xf32>
      %223 = vector.shape_cast %220 : vector<17x17xf32> to vector<1x1x17x17xf32>
      tpu.vector_store %arg4[%c1_108, %c2_109, %c0_110, %c0_111], %223 {strides = array<i32>} : memref<8x3x17x17xf32, #tpu.memory_space<vmem>>, vector<1x1x17x17xf32>,
    } else {
    }
    %c2_i32_12 = arith.constant 2 : i32
    %43 = arith.cmpi eq, %6, %c2_i32_12 : i32
    %44 = arith.extui %43 : i1 to i32
    %c0_i32_13 = arith.constant 0 : i32
    %45 = arith.cmpi ne, %44, %c0_i32_13 : i32
    scf.if %45 {
      %196 = tpu.iota {dimensions = array<i32: 0>} : vector<17x17xi32>
      %197 = tpu.iota {dimensions = array<i32: 1>} : vector<17x17xi32>
      %198 = arith.addi %196, %197 : vector<17x17xi32>
      %c16_i32 = arith.constant 16 : i32
      %199 = vector.broadcast %c16_i32 : i32 to vector<17x17xi32>
      %200 = arith.cmpi eq, %198, %199 : vector<17x17xi32>
      %201 = arith.extui %200 : vector<17x17xi1> to vector<17x17xi32>
      %202 = arith.sitofp %201 : vector<17x17xi32> to vector<17x17xf32>
      %c1 = arith.constant 1 : index
      %c0_87 = arith.constant 0 : index
      %c0_88 = arith.constant 0 : index
      %c0_89 = arith.constant 0 : index
      %203 = vector.load %arg2[%c1, %c0_87, %c0_88, %c0_89] : memref<8x3x17x17xf32, #tpu.memory_space<vmem>>, vector<1x1x17x17xf32>
      %204 = vector.shape_cast %203 : vector<1x1x17x17xf32> to vector<17x17xf32>
      %cst_90 = arith.constant dense<0.000000e+00> : vector<17x17xf32>
      %205 = tpu.matmul %204, %202, %cst_90 {dimension_numbers = #tpu.dot_dimension_numbers<[1], [0], [0], [1], [0, 0, 1, 1], [], []>} : vector<17x17xf32>, vector<17x17xf32>, vector<17x17xf32> -> vector<17x17xf32>
      %cst_91 = arith.constant dense<0.000000e+00> : vector<17x17xf32>
      %206 = tpu.matmul %202, %205, %cst_91 {dimension_numbers = #tpu.dot_dimension_numbers<[1], [0], [0], [1], [0, 0, 1, 1], [], []>} : vector<17x17xf32>, vector<17x17xf32>, vector<17x17xf32> -> vector<17x17xf32>
      %c1_92 = arith.constant 1 : index
      %c0_93 = arith.constant 0 : index
      %c0_94 = arith.constant 0 : index
      %c0_95 = arith.constant 0 : index
      %207 = vector.load %arg4[%c1_92, %c0_93, %c0_94, %c0_95] : memref<8x3x17x17xf32, #tpu.memory_space<vmem>>, vector<1x1x17x17xf32>
      %208 = vector.shape_cast %207 : vector<1x1x17x17xf32> to vector<17x17xf32>
      %209 = vector.shape_cast %206 : vector<17x17xf32> to vector<1x1x17x17xf32>
      tpu.vector_store %arg4[%c1_92, %c0_93, %c0_94, %c0_95], %209 {strides = array<i32>} : memref<8x3x17x17xf32, #tpu.memory_space<vmem>>, vector<1x1x17x17xf32>,
      %c1_96 = arith.constant 1 : index
      %c1_97 = arith.constant 1 : index
      %c0_98 = arith.constant 0 : index
      %c0_99 = arith.constant 0 : index
      %210 = vector.load %arg2[%c1_96, %c1_97, %c0_98, %c0_99] : memref<8x3x17x17xf32, #tpu.memory_space<vmem>>, vector<1x1x17x17xf32>
      %211 = vector.shape_cast %210 : vector<1x1x17x17xf32> to vector<17x17xf32>
      %cst_100 = arith.constant dense<0.000000e+00> : vector<17x17xf32>
      %212 = tpu.matmul %211, %202, %cst_100 {dimension_numbers = #tpu.dot_dimension_numbers<[1], [0], [0], [1], [0, 0, 1, 1], [], []>} : vector<17x17xf32>, vector<17x17xf32>, vector<17x17xf32> -> vector<17x17xf32>
      %cst_101 = arith.constant dense<0.000000e+00> : vector<17x17xf32>
      %213 = tpu.matmul %202, %212, %cst_101 {dimension_numbers = #tpu.dot_dimension_numbers<[1], [0], [0], [1], [0, 0, 1, 1], [], []>} : vector<17x17xf32>, vector<17x17xf32>, vector<17x17xf32> -> vector<17x17xf32>
      %c1_102 = arith.constant 1 : index
      %c1_103 = arith.constant 1 : index
      %c0_104 = arith.constant 0 : index
      %c0_105 = arith.constant 0 : index
      %214 = vector.load %arg4[%c1_102, %c1_103, %c0_104, %c0_105] : memref<8x3x17x17xf32, #tpu.memory_space<vmem>>, vector<1x1x17x17xf32>
      %215 = vector.shape_cast %214 : vector<1x1x17x17xf32> to vector<17x17xf32>
      %216 = vector.shape_cast %213 : vector<17x17xf32> to vector<1x1x17x17xf32>
      tpu.vector_store %arg4[%c1_102, %c1_103, %c0_104, %c0_105], %216 {strides = array<i32>} : memref<8x3x17x17xf32, #tpu.memory_space<vmem>>, vector<1x1x17x17xf32>,
      %c1_106 = arith.constant 1 : index
      %c2 = arith.constant 2 : index
      %c0_107 = arith.constant 0 : index
      %c0_108 = arith.constant 0 : index
      %217 = vector.load %arg2[%c1_106, %c2, %c0_107, %c0_108] : memref<8x3x17x17xf32, #tpu.memory_space<vmem>>, vector<1x1x17x17xf32>
      %218 = vector.shape_cast %217 : vector<1x1x17x17xf32> to vector<17x17xf32>
      %cst_109 = arith.constant dense<0.000000e+00> : vector<17x17xf32>
      %219 = tpu.matmul %218, %202, %cst_109 {dimension_numbers = #tpu.dot_dimension_numbers<[1], [0], [0], [1], [0, 0, 1, 1], [], []>} : vector<17x17xf32>, vector<17x17xf32>, vector<17x17xf32> -> vector<17x17xf32>
      %cst_110 = arith.constant dense<0.000000e+00> : vector<17x17xf32>
      %220 = tpu.matmul %202, %219, %cst_110 {dimension_numbers = #tpu.dot_dimension_numbers<[1], [0], [0], [1], [0, 0, 1, 1], [], []>} : vector<17x17xf32>, vector<17x17xf32>, vector<17x17xf32> -> vector<17x17xf32>
      %c1_111 = arith.constant 1 : index
      %c2_112 = arith.constant 2 : index
      %c0_113 = arith.constant 0 : index
      %c0_114 = arith.constant 0 : index
      %221 = vector.load %arg4[%c1_111, %c2_112, %c0_113, %c0_114] : memref<8x3x17x17xf32, #tpu.memory_space<vmem>>, vector<1x1x17x17xf32>
      %222 = vector.shape_cast %221 : vector<1x1x17x17xf32> to vector<17x17xf32>
      %223 = vector.shape_cast %220 : vector<17x17xf32> to vector<1x1x17x17xf32>
      tpu.vector_store %arg4[%c1_111, %c2_112, %c0_113, %c0_114], %223 {strides = array<i32>} : memref<8x3x17x17xf32, #tpu.memory_space<vmem>>, vector<1x1x17x17xf32>,
    } else {
    }
    %c3_i32_14 = arith.constant 3 : i32
    %46 = arith.cmpi eq, %6, %c3_i32_14 : i32
    %47 = arith.extui %46 : i1 to i32
    %c0_i32_15 = arith.constant 0 : i32
    %48 = arith.cmpi ne, %47, %c0_i32_15 : i32
    scf.if %48 {
      %196 = tpu.iota {dimensions = array<i32: 0>} : vector<17x17xi32>
      %197 = tpu.iota {dimensions = array<i32: 1>} : vector<17x17xi32>
      %198 = arith.addi %196, %197 : vector<17x17xi32>
      %c16_i32 = arith.constant 16 : i32
      %199 = vector.broadcast %c16_i32 : i32 to vector<17x17xi32>
      %200 = arith.cmpi eq, %198, %199 : vector<17x17xi32>
      %201 = arith.extui %200 : vector<17x17xi1> to vector<17x17xi32>
      %202 = arith.sitofp %201 : vector<17x17xi32> to vector<17x17xf32>
      %c1 = arith.constant 1 : index
      %c0_87 = arith.constant 0 : index
      %c0_88 = arith.constant 0 : index
      %c0_89 = arith.constant 0 : index
      %203 = vector.load %arg2[%c1, %c0_87, %c0_88, %c0_89] : memref<8x3x17x17xf32, #tpu.memory_space<vmem>>, vector<1x1x17x17xf32>
      %204 = vector.shape_cast %203 : vector<1x1x17x17xf32> to vector<17x17xf32>
      %205 = tpu.transpose %204, [1, 0] : vector<17x17xf32> -> vector<17x17xf32>
      %cst_90 = arith.constant dense<0.000000e+00> : vector<17x17xf32>
      %206 = tpu.matmul %205, %202, %cst_90 {dimension_numbers = #tpu.dot_dimension_numbers<[1], [0], [0], [1], [0, 0, 1, 1], [], []>} : vector<17x17xf32>, vector<17x17xf32>, vector<17x17xf32> -> vector<17x17xf32>
      %c1_91 = arith.constant 1 : index
      %c0_92 = arith.constant 0 : index
      %c0_93 = arith.constant 0 : index
      %c0_94 = arith.constant 0 : index
      %207 = vector.load %arg4[%c1_91, %c0_92, %c0_93, %c0_94] : memref<8x3x17x17xf32, #tpu.memory_space<vmem>>, vector<1x1x17x17xf32>
      %208 = vector.shape_cast %207 : vector<1x1x17x17xf32> to vector<17x17xf32>
      %209 = vector.shape_cast %206 : vector<17x17xf32> to vector<1x1x17x17xf32>
      tpu.vector_store %arg4[%c1_91, %c0_92, %c0_93, %c0_94], %209 {strides = array<i32>} : memref<8x3x17x17xf32, #tpu.memory_space<vmem>>, vector<1x1x17x17xf32>,
      %c1_95 = arith.constant 1 : index
      %c1_96 = arith.constant 1 : index
      %c0_97 = arith.constant 0 : index
      %c0_98 = arith.constant 0 : index
      %210 = vector.load %arg2[%c1_95, %c1_96, %c0_97, %c0_98] : memref<8x3x17x17xf32, #tpu.memory_space<vmem>>, vector<1x1x17x17xf32>
      %211 = vector.shape_cast %210 : vector<1x1x17x17xf32> to vector<17x17xf32>
      %212 = tpu.transpose %211, [1, 0] : vector<17x17xf32> -> vector<17x17xf32>
      %cst_99 = arith.constant dense<0.000000e+00> : vector<17x17xf32>
      %213 = tpu.matmul %212, %202, %cst_99 {dimension_numbers = #tpu.dot_dimension_numbers<[1], [0], [0], [1], [0, 0, 1, 1], [], []>} : vector<17x17xf32>, vector<17x17xf32>, vector<17x17xf32> -> vector<17x17xf32>
      %c1_100 = arith.constant 1 : index
      %c1_101 = arith.constant 1 : index
      %c0_102 = arith.constant 0 : index
      %c0_103 = arith.constant 0 : index
      %214 = vector.load %arg4[%c1_100, %c1_101, %c0_102, %c0_103] : memref<8x3x17x17xf32, #tpu.memory_space<vmem>>, vector<1x1x17x17xf32>
      %215 = vector.shape_cast %214 : vector<1x1x17x17xf32> to vector<17x17xf32>
      %216 = vector.shape_cast %213 : vector<17x17xf32> to vector<1x1x17x17xf32>
      tpu.vector_store %arg4[%c1_100, %c1_101, %c0_102, %c0_103], %216 {strides = array<i32>} : memref<8x3x17x17xf32, #tpu.memory_space<vmem>>, vector<1x1x17x17xf32>,
      %c1_104 = arith.constant 1 : index
      %c2 = arith.constant 2 : index
      %c0_105 = arith.constant 0 : index
      %c0_106 = arith.constant 0 : index
      %217 = vector.load %arg2[%c1_104, %c2, %c0_105, %c0_106] : memref<8x3x17x17xf32, #tpu.memory_space<vmem>>, vector<1x1x17x17xf32>
      %218 = vector.shape_cast %217 : vector<1x1x17x17xf32> to vector<17x17xf32>
      %219 = tpu.transpose %218, [1, 0] : vector<17x17xf32> -> vector<17x17xf32>
      %cst_107 = arith.constant dense<0.000000e+00> : vector<17x17xf32>
      %220 = tpu.matmul %219, %202, %cst_107 {dimension_numbers = #tpu.dot_dimension_numbers<[1], [0], [0], [1], [0, 0, 1, 1], [], []>} : vector<17x17xf32>, vector<17x17xf32>, vector<17x17xf32> -> vector<17x17xf32>
      %c1_108 = arith.constant 1 : index
      %c2_109 = arith.constant 2 : index
      %c0_110 = arith.constant 0 : index
      %c0_111 = arith.constant 0 : index
      %221 = vector.load %arg4[%c1_108, %c2_109, %c0_110, %c0_111] : memref<8x3x17x17xf32, #tpu.memory_space<vmem>>, vector<1x1x17x17xf32>
      %222 = vector.shape_cast %221 : vector<1x1x17x17xf32> to vector<17x17xf32>
      %223 = vector.shape_cast %220 : vector<17x17xf32> to vector<1x1x17x17xf32>
      tpu.vector_store %arg4[%c1_108, %c2_109, %c0_110, %c0_111], %223 {strides = array<i32>} : memref<8x3x17x17xf32, #tpu.memory_space<vmem>>, vector<1x1x17x17xf32>,
    } else {
    }
    %c0_i32_16 = arith.constant 0 : i32
    %49 = arith.cmpi eq, %9, %c0_i32_16 : i32
    %50 = arith.extui %49 : i1 to i32
    %c0_i32_17 = arith.constant 0 : i32
    %51 = arith.cmpi ne, %50, %c0_i32_17 : i32
    scf.if %51 {
      %c2 = arith.constant 2 : index
      %c0_87 = arith.constant 0 : index
      %c0_88 = arith.constant 0 : index
      %c0_89 = arith.constant 0 : index
      %196 = vector.load %arg2[%c2, %c0_87, %c0_88, %c0_89] : memref<8x3x17x17xf32, #tpu.memory_space<vmem>>, vector<1x3x17x17xf32>
      %197 = vector.shape_cast %196 : vector<1x3x17x17xf32> to vector<3x17x17xf32>
      %c2_90 = arith.constant 2 : index
      %c0_91 = arith.constant 0 : index
      %c0_92 = arith.constant 0 : index
      %c0_93 = arith.constant 0 : index
      %198 = vector.load %arg4[%c2_90, %c0_91, %c0_92, %c0_93] : memref<8x3x17x17xf32, #tpu.memory_space<vmem>>, vector<1x3x17x17xf32>
      %199 = vector.shape_cast %198 : vector<1x3x17x17xf32> to vector<3x17x17xf32>
      %200 = vector.shape_cast %197 : vector<3x17x17xf32> to vector<1x3x17x17xf32>
      tpu.vector_store %arg4[%c2_90, %c0_91, %c0_92, %c0_93], %200 {strides = array<i32>} : memref<8x3x17x17xf32, #tpu.memory_space<vmem>>, vector<1x3x17x17xf32>,
    } else {
    }
    %c1_i32_18 = arith.constant 1 : i32
    %52 = arith.cmpi eq, %9, %c1_i32_18 : i32
    %53 = arith.extui %52 : i1 to i32
    %c0_i32_19 = arith.constant 0 : i32
    %54 = arith.cmpi ne, %53, %c0_i32_19 : i32
    scf.if %54 {
      %196 = tpu.iota {dimensions = array<i32: 0>} : vector<17x17xi32>
      %197 = tpu.iota {dimensions = array<i32: 1>} : vector<17x17xi32>
      %198 = arith.addi %196, %197 : vector<17x17xi32>
      %c16_i32 = arith.constant 16 : i32
      %199 = vector.broadcast %c16_i32 : i32 to vector<17x17xi32>
      %200 = arith.cmpi eq, %198, %199 : vector<17x17xi32>
      %201 = arith.extui %200 : vector<17x17xi1> to vector<17x17xi32>
      %202 = arith.sitofp %201 : vector<17x17xi32> to vector<17x17xf32>
      %c2 = arith.constant 2 : index
      %c0_87 = arith.constant 0 : index
      %c0_88 = arith.constant 0 : index
      %c0_89 = arith.constant 0 : index
      %203 = vector.load %arg2[%c2, %c0_87, %c0_88, %c0_89] : memref<8x3x17x17xf32, #tpu.memory_space<vmem>>, vector<1x1x17x17xf32>
      %204 = vector.shape_cast %203 : vector<1x1x17x17xf32> to vector<17x17xf32>
      %cst_90 = arith.constant dense<0.000000e+00> : vector<17x17xf32>
      %205 = tpu.matmul %204, %202, %cst_90 {dimension_numbers = #tpu.dot_dimension_numbers<[1], [0], [0], [1], [0, 0, 1, 1], [], []>} : vector<17x17xf32>, vector<17x17xf32>, vector<17x17xf32> -> vector<17x17xf32>
      %206 = tpu.transpose %205, [1, 0] : vector<17x17xf32> -> vector<17x17xf32>
      %c2_91 = arith.constant 2 : index
      %c0_92 = arith.constant 0 : index
      %c0_93 = arith.constant 0 : index
      %c0_94 = arith.constant 0 : index
      %207 = vector.load %arg4[%c2_91, %c0_92, %c0_93, %c0_94] : memref<8x3x17x17xf32, #tpu.memory_space<vmem>>, vector<1x1x17x17xf32>
      %208 = vector.shape_cast %207 : vector<1x1x17x17xf32> to vector<17x17xf32>
      %209 = vector.shape_cast %206 : vector<17x17xf32> to vector<1x1x17x17xf32>
      tpu.vector_store %arg4[%c2_91, %c0_92, %c0_93, %c0_94], %209 {strides = array<i32>} : memref<8x3x17x17xf32, #tpu.memory_space<vmem>>, vector<1x1x17x17xf32>,
      %c2_95 = arith.constant 2 : index
      %c1 = arith.constant 1 : index
      %c0_96 = arith.constant 0 : index
      %c0_97 = arith.constant 0 : index
      %210 = vector.load %arg2[%c2_95, %c1, %c0_96, %c0_97] : memref<8x3x17x17xf32, #tpu.memory_space<vmem>>, vector<1x1x17x17xf32>
      %211 = vector.shape_cast %210 : vector<1x1x17x17xf32> to vector<17x17xf32>
      %cst_98 = arith.constant dense<0.000000e+00> : vector<17x17xf32>
      %212 = tpu.matmul %211, %202, %cst_98 {dimension_numbers = #tpu.dot_dimension_numbers<[1], [0], [0], [1], [0, 0, 1, 1], [], []>} : vector<17x17xf32>, vector<17x17xf32>, vector<17x17xf32> -> vector<17x17xf32>
      %213 = tpu.transpose %212, [1, 0] : vector<17x17xf32> -> vector<17x17xf32>
      %c2_99 = arith.constant 2 : index
      %c1_100 = arith.constant 1 : index
      %c0_101 = arith.constant 0 : index
      %c0_102 = arith.constant 0 : index
      %214 = vector.load %arg4[%c2_99, %c1_100, %c0_101, %c0_102] : memref<8x3x17x17xf32, #tpu.memory_space<vmem>>, vector<1x1x17x17xf32>
      %215 = vector.shape_cast %214 : vector<1x1x17x17xf32> to vector<17x17xf32>
      %216 = vector.shape_cast %213 : vector<17x17xf32> to vector<1x1x17x17xf32>
      tpu.vector_store %arg4[%c2_99, %c1_100, %c0_101, %c0_102], %216 {strides = array<i32>} : memref<8x3x17x17xf32, #tpu.memory_space<vmem>>, vector<1x1x17x17xf32>,
      %c2_103 = arith.constant 2 : index
      %c2_104 = arith.constant 2 : index
      %c0_105 = arith.constant 0 : index
      %c0_106 = arith.constant 0 : index
      %217 = vector.load %arg2[%c2_103, %c2_104, %c0_105, %c0_106] : memref<8x3x17x17xf32, #tpu.memory_space<vmem>>, vector<1x1x17x17xf32>
      %218 = vector.shape_cast %217 : vector<1x1x17x17xf32> to vector<17x17xf32>
      %cst_107 = arith.constant dense<0.000000e+00> : vector<17x17xf32>
      %219 = tpu.matmul %218, %202, %cst_107 {dimension_numbers = #tpu.dot_dimension_numbers<[1], [0], [0], [1], [0, 0, 1, 1], [], []>} : vector<17x17xf32>, vector<17x17xf32>, vector<17x17xf32> -> vector<17x17xf32>
      %220 = tpu.transpose %219, [1, 0] : vector<17x17xf32> -> vector<17x17xf32>
      %c2_108 = arith.constant 2 : index
      %c2_109 = arith.constant 2 : index
      %c0_110 = arith.constant 0 : index
      %c0_111 = arith.constant 0 : index
      %221 = vector.load %arg4[%c2_108, %c2_109, %c0_110, %c0_111] : memref<8x3x17x17xf32, #tpu.memory_space<vmem>>, vector<1x1x17x17xf32>
      %222 = vector.shape_cast %221 : vector<1x1x17x17xf32> to vector<17x17xf32>
      %223 = vector.shape_cast %220 : vector<17x17xf32> to vector<1x1x17x17xf32>
      tpu.vector_store %arg4[%c2_108, %c2_109, %c0_110, %c0_111], %223 {strides = array<i32>} : memref<8x3x17x17xf32, #tpu.memory_space<vmem>>, vector<1x1x17x17xf32>,
    } else {
    }
    %c2_i32_20 = arith.constant 2 : i32
    %55 = arith.cmpi eq, %9, %c2_i32_20 : i32
    %56 = arith.extui %55 : i1 to i32
    %c0_i32_21 = arith.constant 0 : i32
    %57 = arith.cmpi ne, %56, %c0_i32_21 : i32
    scf.if %57 {
      %196 = tpu.iota {dimensions = array<i32: 0>} : vector<17x17xi32>
      %197 = tpu.iota {dimensions = array<i32: 1>} : vector<17x17xi32>
      %198 = arith.addi %196, %197 : vector<17x17xi32>
      %c16_i32 = arith.constant 16 : i32
      %199 = vector.broadcast %c16_i32 : i32 to vector<17x17xi32>
      %200 = arith.cmpi eq, %198, %199 : vector<17x17xi32>
      %201 = arith.extui %200 : vector<17x17xi1> to vector<17x17xi32>
      %202 = arith.sitofp %201 : vector<17x17xi32> to vector<17x17xf32>
      %c2 = arith.constant 2 : index
      %c0_87 = arith.constant 0 : index
      %c0_88 = arith.constant 0 : index
      %c0_89 = arith.constant 0 : index
      %203 = vector.load %arg2[%c2, %c0_87, %c0_88, %c0_89] : memref<8x3x17x17xf32, #tpu.memory_space<vmem>>, vector<1x1x17x17xf32>
      %204 = vector.shape_cast %203 : vector<1x1x17x17xf32> to vector<17x17xf32>
      %cst_90 = arith.constant dense<0.000000e+00> : vector<17x17xf32>
      %205 = tpu.matmul %204, %202, %cst_90 {dimension_numbers = #tpu.dot_dimension_numbers<[1], [0], [0], [1], [0, 0, 1, 1], [], []>} : vector<17x17xf32>, vector<17x17xf32>, vector<17x17xf32> -> vector<17x17xf32>
      %cst_91 = arith.constant dense<0.000000e+00> : vector<17x17xf32>
      %206 = tpu.matmul %202, %205, %cst_91 {dimension_numbers = #tpu.dot_dimension_numbers<[1], [0], [0], [1], [0, 0, 1, 1], [], []>} : vector<17x17xf32>, vector<17x17xf32>, vector<17x17xf32> -> vector<17x17xf32>
      %c2_92 = arith.constant 2 : index
      %c0_93 = arith.constant 0 : index
      %c0_94 = arith.constant 0 : index
      %c0_95 = arith.constant 0 : index
      %207 = vector.load %arg4[%c2_92, %c0_93, %c0_94, %c0_95] : memref<8x3x17x17xf32, #tpu.memory_space<vmem>>, vector<1x1x17x17xf32>
      %208 = vector.shape_cast %207 : vector<1x1x17x17xf32> to vector<17x17xf32>
      %209 = vector.shape_cast %206 : vector<17x17xf32> to vector<1x1x17x17xf32>
      tpu.vector_store %arg4[%c2_92, %c0_93, %c0_94, %c0_95], %209 {strides = array<i32>} : memref<8x3x17x17xf32, #tpu.memory_space<vmem>>, vector<1x1x17x17xf32>,
      %c2_96 = arith.constant 2 : index
      %c1 = arith.constant 1 : index
      %c0_97 = arith.constant 0 : index
      %c0_98 = arith.constant 0 : index
      %210 = vector.load %arg2[%c2_96, %c1, %c0_97, %c0_98] : memref<8x3x17x17xf32, #tpu.memory_space<vmem>>, vector<1x1x17x17xf32>
      %211 = vector.shape_cast %210 : vector<1x1x17x17xf32> to vector<17x17xf32>
      %cst_99 = arith.constant dense<0.000000e+00> : vector<17x17xf32>
      %212 = tpu.matmul %211, %202, %cst_99 {dimension_numbers = #tpu.dot_dimension_numbers<[1], [0], [0], [1], [0, 0, 1, 1], [], []>} : vector<17x17xf32>, vector<17x17xf32>, vector<17x17xf32> -> vector<17x17xf32>
      %cst_100 = arith.constant dense<0.000000e+00> : vector<17x17xf32>
      %213 = tpu.matmul %202, %212, %cst_100 {dimension_numbers = #tpu.dot_dimension_numbers<[1], [0], [0], [1], [0, 0, 1, 1], [], []>} : vector<17x17xf32>, vector<17x17xf32>, vector<17x17xf32> -> vector<17x17xf32>
      %c2_101 = arith.constant 2 : index
      %c1_102 = arith.constant 1 : index
      %c0_103 = arith.constant 0 : index
      %c0_104 = arith.constant 0 : index
      %214 = vector.load %arg4[%c2_101, %c1_102, %c0_103, %c0_104] : memref<8x3x17x17xf32, #tpu.memory_space<vmem>>, vector<1x1x17x17xf32>
      %215 = vector.shape_cast %214 : vector<1x1x17x17xf32> to vector<17x17xf32>
      %216 = vector.shape_cast %213 : vector<17x17xf32> to vector<1x1x17x17xf32>
      tpu.vector_store %arg4[%c2_101, %c1_102, %c0_103, %c0_104], %216 {strides = array<i32>} : memref<8x3x17x17xf32, #tpu.memory_space<vmem>>, vector<1x1x17x17xf32>,
      %c2_105 = arith.constant 2 : index
      %c2_106 = arith.constant 2 : index
      %c0_107 = arith.constant 0 : index
      %c0_108 = arith.constant 0 : index
      %217 = vector.load %arg2[%c2_105, %c2_106, %c0_107, %c0_108] : memref<8x3x17x17xf32, #tpu.memory_space<vmem>>, vector<1x1x17x17xf32>
      %218 = vector.shape_cast %217 : vector<1x1x17x17xf32> to vector<17x17xf32>
      %cst_109 = arith.constant dense<0.000000e+00> : vector<17x17xf32>
      %219 = tpu.matmul %218, %202, %cst_109 {dimension_numbers = #tpu.dot_dimension_numbers<[1], [0], [0], [1], [0, 0, 1, 1], [], []>} : vector<17x17xf32>, vector<17x17xf32>, vector<17x17xf32> -> vector<17x17xf32>
      %cst_110 = arith.constant dense<0.000000e+00> : vector<17x17xf32>
      %220 = tpu.matmul %202, %219, %cst_110 {dimension_numbers = #tpu.dot_dimension_numbers<[1], [0], [0], [1], [0, 0, 1, 1], [], []>} : vector<17x17xf32>, vector<17x17xf32>, vector<17x17xf32> -> vector<17x17xf32>
      %c2_111 = arith.constant 2 : index
      %c2_112 = arith.constant 2 : index
      %c0_113 = arith.constant 0 : index
      %c0_114 = arith.constant 0 : index
      %221 = vector.load %arg4[%c2_111, %c2_112, %c0_113, %c0_114] : memref<8x3x17x17xf32, #tpu.memory_space<vmem>>, vector<1x1x17x17xf32>
      %222 = vector.shape_cast %221 : vector<1x1x17x17xf32> to vector<17x17xf32>
      %223 = vector.shape_cast %220 : vector<17x17xf32> to vector<1x1x17x17xf32>
      tpu.vector_store %arg4[%c2_111, %c2_112, %c0_113, %c0_114], %223 {strides = array<i32>} : memref<8x3x17x17xf32, #tpu.memory_space<vmem>>, vector<1x1x17x17xf32>,
    } else {
    }
    %c3_i32_22 = arith.constant 3 : i32
    %58 = arith.cmpi eq, %9, %c3_i32_22 : i32
    %59 = arith.extui %58 : i1 to i32
    %c0_i32_23 = arith.constant 0 : i32
    %60 = arith.cmpi ne, %59, %c0_i32_23 : i32
    scf.if %60 {
      %196 = tpu.iota {dimensions = array<i32: 0>} : vector<17x17xi32>
      %197 = tpu.iota {dimensions = array<i32: 1>} : vector<17x17xi32>
      %198 = arith.addi %196, %197 : vector<17x17xi32>
      %c16_i32 = arith.constant 16 : i32
      %199 = vector.broadcast %c16_i32 : i32 to vector<17x17xi32>
      %200 = arith.cmpi eq, %198, %199 : vector<17x17xi32>
      %201 = arith.extui %200 : vector<17x17xi1> to vector<17x17xi32>
      %202 = arith.sitofp %201 : vector<17x17xi32> to vector<17x17xf32>
      %c2 = arith.constant 2 : index
      %c0_87 = arith.constant 0 : index
      %c0_88 = arith.constant 0 : index
      %c0_89 = arith.constant 0 : index
      %203 = vector.load %arg2[%c2, %c0_87, %c0_88, %c0_89] : memref<8x3x17x17xf32, #tpu.memory_space<vmem>>, vector<1x1x17x17xf32>
      %204 = vector.shape_cast %203 : vector<1x1x17x17xf32> to vector<17x17xf32>
      %205 = tpu.transpose %204, [1, 0] : vector<17x17xf32> -> vector<17x17xf32>
      %cst_90 = arith.constant dense<0.000000e+00> : vector<17x17xf32>
      %206 = tpu.matmul %205, %202, %cst_90 {dimension_numbers = #tpu.dot_dimension_numbers<[1], [0], [0], [1], [0, 0, 1, 1], [], []>} : vector<17x17xf32>, vector<17x17xf32>, vector<17x17xf32> -> vector<17x17xf32>
      %c2_91 = arith.constant 2 : index
      %c0_92 = arith.constant 0 : index
      %c0_93 = arith.constant 0 : index
      %c0_94 = arith.constant 0 : index
      %207 = vector.load %arg4[%c2_91, %c0_92, %c0_93, %c0_94] : memref<8x3x17x17xf32, #tpu.memory_space<vmem>>, vector<1x1x17x17xf32>
      %208 = vector.shape_cast %207 : vector<1x1x17x17xf32> to vector<17x17xf32>
      %209 = vector.shape_cast %206 : vector<17x17xf32> to vector<1x1x17x17xf32>
      tpu.vector_store %arg4[%c2_91, %c0_92, %c0_93, %c0_94], %209 {strides = array<i32>} : memref<8x3x17x17xf32, #tpu.memory_space<vmem>>, vector<1x1x17x17xf32>,
      %c2_95 = arith.constant 2 : index
      %c1 = arith.constant 1 : index
      %c0_96 = arith.constant 0 : index
      %c0_97 = arith.constant 0 : index
      %210 = vector.load %arg2[%c2_95, %c1, %c0_96, %c0_97] : memref<8x3x17x17xf32, #tpu.memory_space<vmem>>, vector<1x1x17x17xf32>
      %211 = vector.shape_cast %210 : vector<1x1x17x17xf32> to vector<17x17xf32>
      %212 = tpu.transpose %211, [1, 0] : vector<17x17xf32> -> vector<17x17xf32>
      %cst_98 = arith.constant dense<0.000000e+00> : vector<17x17xf32>
      %213 = tpu.matmul %212, %202, %cst_98 {dimension_numbers = #tpu.dot_dimension_numbers<[1], [0], [0], [1], [0, 0, 1, 1], [], []>} : vector<17x17xf32>, vector<17x17xf32>, vector<17x17xf32> -> vector<17x17xf32>
      %c2_99 = arith.constant 2 : index
      %c1_100 = arith.constant 1 : index
      %c0_101 = arith.constant 0 : index
      %c0_102 = arith.constant 0 : index
      %214 = vector.load %arg4[%c2_99, %c1_100, %c0_101, %c0_102] : memref<8x3x17x17xf32, #tpu.memory_space<vmem>>, vector<1x1x17x17xf32>
      %215 = vector.shape_cast %214 : vector<1x1x17x17xf32> to vector<17x17xf32>
      %216 = vector.shape_cast %213 : vector<17x17xf32> to vector<1x1x17x17xf32>
      tpu.vector_store %arg4[%c2_99, %c1_100, %c0_101, %c0_102], %216 {strides = array<i32>} : memref<8x3x17x17xf32, #tpu.memory_space<vmem>>, vector<1x1x17x17xf32>,
      %c2_103 = arith.constant 2 : index
      %c2_104 = arith.constant 2 : index
      %c0_105 = arith.constant 0 : index
      %c0_106 = arith.constant 0 : index
      %217 = vector.load %arg2[%c2_103, %c2_104, %c0_105, %c0_106] : memref<8x3x17x17xf32, #tpu.memory_space<vmem>>, vector<1x1x17x17xf32>
      %218 = vector.shape_cast %217 : vector<1x1x17x17xf32> to vector<17x17xf32>
      %219 = tpu.transpose %218, [1, 0] : vector<17x17xf32> -> vector<17x17xf32>
      %cst_107 = arith.constant dense<0.000000e+00> : vector<17x17xf32>
      %220 = tpu.matmul %219, %202, %cst_107 {dimension_numbers = #tpu.dot_dimension_numbers<[1], [0], [0], [1], [0, 0, 1, 1], [], []>} : vector<17x17xf32>, vector<17x17xf32>, vector<17x17xf32> -> vector<17x17xf32>
      %c2_108 = arith.constant 2 : index
      %c2_109 = arith.constant 2 : index
      %c0_110 = arith.constant 0 : index
      %c0_111 = arith.constant 0 : index
      %221 = vector.load %arg4[%c2_108, %c2_109, %c0_110, %c0_111] : memref<8x3x17x17xf32, #tpu.memory_space<vmem>>, vector<1x1x17x17xf32>
      %222 = vector.shape_cast %221 : vector<1x1x17x17xf32> to vector<17x17xf32>
      %223 = vector.shape_cast %220 : vector<17x17xf32> to vector<1x1x17x17xf32>
      tpu.vector_store %arg4[%c2_108, %c2_109, %c0_110, %c0_111], %223 {strides = array<i32>} : memref<8x3x17x17xf32, #tpu.memory_space<vmem>>, vector<1x1x17x17xf32>,
    } else {
    }
    %c0_i32_24 = arith.constant 0 : i32
    %61 = arith.cmpi eq, %12, %c0_i32_24 : i32
    %62 = arith.extui %61 : i1 to i32
    %c0_i32_25 = arith.constant 0 : i32
    %63 = arith.cmpi ne, %62, %c0_i32_25 : i32
    scf.if %63 {
      %c3 = arith.constant 3 : index
      %c0_87 = arith.constant 0 : index
      %c0_88 = arith.constant 0 : index
      %c0_89 = arith.constant 0 : index
      %196 = vector.load %arg2[%c3, %c0_87, %c0_88, %c0_89] : memref<8x3x17x17xf32, #tpu.memory_space<vmem>>, vector<1x3x17x17xf32>
      %197 = vector.shape_cast %196 : vector<1x3x17x17xf32> to vector<3x17x17xf32>
      %c3_90 = arith.constant 3 : index
      %c0_91 = arith.constant 0 : index
      %c0_92 = arith.constant 0 : index
      %c0_93 = arith.constant 0 : index
      %198 = vector.load %arg4[%c3_90, %c0_91, %c0_92, %c0_93] : memref<8x3x17x17xf32, #tpu.memory_space<vmem>>, vector<1x3x17x17xf32>
      %199 = vector.shape_cast %198 : vector<1x3x17x17xf32> to vector<3x17x17xf32>
      %200 = vector.shape_cast %197 : vector<3x17x17xf32> to vector<1x3x17x17xf32>
      tpu.vector_store %arg4[%c3_90, %c0_91, %c0_92, %c0_93], %200 {strides = array<i32>} : memref<8x3x17x17xf32, #tpu.memory_space<vmem>>, vector<1x3x17x17xf32>,
    } else {
    }
    %c1_i32_26 = arith.constant 1 : i32
    %64 = arith.cmpi eq, %12, %c1_i32_26 : i32
    %65 = arith.extui %64 : i1 to i32
    %c0_i32_27 = arith.constant 0 : i32
    %66 = arith.cmpi ne, %65, %c0_i32_27 : i32
    scf.if %66 {
      %196 = tpu.iota {dimensions = array<i32: 0>} : vector<17x17xi32>
      %197 = tpu.iota {dimensions = array<i32: 1>} : vector<17x17xi32>
      %198 = arith.addi %196, %197 : vector<17x17xi32>
      %c16_i32 = arith.constant 16 : i32
      %199 = vector.broadcast %c16_i32 : i32 to vector<17x17xi32>
      %200 = arith.cmpi eq, %198, %199 : vector<17x17xi32>
      %201 = arith.extui %200 : vector<17x17xi1> to vector<17x17xi32>
      %202 = arith.sitofp %201 : vector<17x17xi32> to vector<17x17xf32>
      %c3 = arith.constant 3 : index
      %c0_87 = arith.constant 0 : index
      %c0_88 = arith.constant 0 : index
      %c0_89 = arith.constant 0 : index
      %203 = vector.load %arg2[%c3, %c0_87, %c0_88, %c0_89] : memref<8x3x17x17xf32, #tpu.memory_space<vmem>>, vector<1x1x17x17xf32>
      %204 = vector.shape_cast %203 : vector<1x1x17x17xf32> to vector<17x17xf32>
      %cst_90 = arith.constant dense<0.000000e+00> : vector<17x17xf32>
      %205 = tpu.matmul %204, %202, %cst_90 {dimension_numbers = #tpu.dot_dimension_numbers<[1], [0], [0], [1], [0, 0, 1, 1], [], []>} : vector<17x17xf32>, vector<17x17xf32>, vector<17x17xf32> -> vector<17x17xf32>
      %206 = tpu.transpose %205, [1, 0] : vector<17x17xf32> -> vector<17x17xf32>
      %c3_91 = arith.constant 3 : index
      %c0_92 = arith.constant 0 : index
      %c0_93 = arith.constant 0 : index
      %c0_94 = arith.constant 0 : index
      %207 = vector.load %arg4[%c3_91, %c0_92, %c0_93, %c0_94] : memref<8x3x17x17xf32, #tpu.memory_space<vmem>>, vector<1x1x17x17xf32>
      %208 = vector.shape_cast %207 : vector<1x1x17x17xf32> to vector<17x17xf32>
      %209 = vector.shape_cast %206 : vector<17x17xf32> to vector<1x1x17x17xf32>
      tpu.vector_store %arg4[%c3_91, %c0_92, %c0_93, %c0_94], %209 {strides = array<i32>} : memref<8x3x17x17xf32, #tpu.memory_space<vmem>>, vector<1x1x17x17xf32>,
      %c3_95 = arith.constant 3 : index
      %c1 = arith.constant 1 : index
      %c0_96 = arith.constant 0 : index
      %c0_97 = arith.constant 0 : index
      %210 = vector.load %arg2[%c3_95, %c1, %c0_96, %c0_97] : memref<8x3x17x17xf32, #tpu.memory_space<vmem>>, vector<1x1x17x17xf32>
      %211 = vector.shape_cast %210 : vector<1x1x17x17xf32> to vector<17x17xf32>
      %cst_98 = arith.constant dense<0.000000e+00> : vector<17x17xf32>
      %212 = tpu.matmul %211, %202, %cst_98 {dimension_numbers = #tpu.dot_dimension_numbers<[1], [0], [0], [1], [0, 0, 1, 1], [], []>} : vector<17x17xf32>, vector<17x17xf32>, vector<17x17xf32> -> vector<17x17xf32>
      %213 = tpu.transpose %212, [1, 0] : vector<17x17xf32> -> vector<17x17xf32>
      %c3_99 = arith.constant 3 : index
      %c1_100 = arith.constant 1 : index
      %c0_101 = arith.constant 0 : index
      %c0_102 = arith.constant 0 : index
      %214 = vector.load %arg4[%c3_99, %c1_100, %c0_101, %c0_102] : memref<8x3x17x17xf32, #tpu.memory_space<vmem>>, vector<1x1x17x17xf32>
      %215 = vector.shape_cast %214 : vector<1x1x17x17xf32> to vector<17x17xf32>
      %216 = vector.shape_cast %213 : vector<17x17xf32> to vector<1x1x17x17xf32>
      tpu.vector_store %arg4[%c3_99, %c1_100, %c0_101, %c0_102], %216 {strides = array<i32>} : memref<8x3x17x17xf32, #tpu.memory_space<vmem>>, vector<1x1x17x17xf32>,
      %c3_103 = arith.constant 3 : index
      %c2 = arith.constant 2 : index
      %c0_104 = arith.constant 0 : index
      %c0_105 = arith.constant 0 : index
      %217 = vector.load %arg2[%c3_103, %c2, %c0_104, %c0_105] : memref<8x3x17x17xf32, #tpu.memory_space<vmem>>, vector<1x1x17x17xf32>
      %218 = vector.shape_cast %217 : vector<1x1x17x17xf32> to vector<17x17xf32>
      %cst_106 = arith.constant dense<0.000000e+00> : vector<17x17xf32>
      %219 = tpu.matmul %218, %202, %cst_106 {dimension_numbers = #tpu.dot_dimension_numbers<[1], [0], [0], [1], [0, 0, 1, 1], [], []>} : vector<17x17xf32>, vector<17x17xf32>, vector<17x17xf32> -> vector<17x17xf32>
      %220 = tpu.transpose %219, [1, 0] : vector<17x17xf32> -> vector<17x17xf32>
      %c3_107 = arith.constant 3 : index
      %c2_108 = arith.constant 2 : index
      %c0_109 = arith.constant 0 : index
      %c0_110 = arith.constant 0 : index
      %221 = vector.load %arg4[%c3_107, %c2_108, %c0_109, %c0_110] : memref<8x3x17x17xf32, #tpu.memory_space<vmem>>, vector<1x1x17x17xf32>
      %222 = vector.shape_cast %221 : vector<1x1x17x17xf32> to vector<17x17xf32>
      %223 = vector.shape_cast %220 : vector<17x17xf32> to vector<1x1x17x17xf32>
      tpu.vector_store %arg4[%c3_107, %c2_108, %c0_109, %c0_110], %223 {strides = array<i32>} : memref<8x3x17x17xf32, #tpu.memory_space<vmem>>, vector<1x1x17x17xf32>,
    } else {
    }
    %c2_i32_28 = arith.constant 2 : i32
    %67 = arith.cmpi eq, %12, %c2_i32_28 : i32
    %68 = arith.extui %67 : i1 to i32
    %c0_i32_29 = arith.constant 0 : i32
    %69 = arith.cmpi ne, %68, %c0_i32_29 : i32
    scf.if %69 {
      %196 = tpu.iota {dimensions = array<i32: 0>} : vector<17x17xi32>
      %197 = tpu.iota {dimensions = array<i32: 1>} : vector<17x17xi32>
      %198 = arith.addi %196, %197 : vector<17x17xi32>
      %c16_i32 = arith.constant 16 : i32
      %199 = vector.broadcast %c16_i32 : i32 to vector<17x17xi32>
      %200 = arith.cmpi eq, %198, %199 : vector<17x17xi32>
      %201 = arith.extui %200 : vector<17x17xi1> to vector<17x17xi32>
      %202 = arith.sitofp %201 : vector<17x17xi32> to vector<17x17xf32>
      %c3 = arith.constant 3 : index
      %c0_87 = arith.constant 0 : index
      %c0_88 = arith.constant 0 : index
      %c0_89 = arith.constant 0 : index
      %203 = vector.load %arg2[%c3, %c0_87, %c0_88, %c0_89] : memref<8x3x17x17xf32, #tpu.memory_space<vmem>>, vector<1x1x17x17xf32>
      %204 = vector.shape_cast %203 : vector<1x1x17x17xf32> to vector<17x17xf32>
      %cst_90 = arith.constant dense<0.000000e+00> : vector<17x17xf32>
      %205 = tpu.matmul %204, %202, %cst_90 {dimension_numbers = #tpu.dot_dimension_numbers<[1], [0], [0], [1], [0, 0, 1, 1], [], []>} : vector<17x17xf32>, vector<17x17xf32>, vector<17x17xf32> -> vector<17x17xf32>
      %cst_91 = arith.constant dense<0.000000e+00> : vector<17x17xf32>
      %206 = tpu.matmul %202, %205, %cst_91 {dimension_numbers = #tpu.dot_dimension_numbers<[1], [0], [0], [1], [0, 0, 1, 1], [], []>} : vector<17x17xf32>, vector<17x17xf32>, vector<17x17xf32> -> vector<17x17xf32>
      %c3_92 = arith.constant 3 : index
      %c0_93 = arith.constant 0 : index
      %c0_94 = arith.constant 0 : index
      %c0_95 = arith.constant 0 : index
      %207 = vector.load %arg4[%c3_92, %c0_93, %c0_94, %c0_95] : memref<8x3x17x17xf32, #tpu.memory_space<vmem>>, vector<1x1x17x17xf32>
      %208 = vector.shape_cast %207 : vector<1x1x17x17xf32> to vector<17x17xf32>
      %209 = vector.shape_cast %206 : vector<17x17xf32> to vector<1x1x17x17xf32>
      tpu.vector_store %arg4[%c3_92, %c0_93, %c0_94, %c0_95], %209 {strides = array<i32>} : memref<8x3x17x17xf32, #tpu.memory_space<vmem>>, vector<1x1x17x17xf32>,
      %c3_96 = arith.constant 3 : index
      %c1 = arith.constant 1 : index
      %c0_97 = arith.constant 0 : index
      %c0_98 = arith.constant 0 : index
      %210 = vector.load %arg2[%c3_96, %c1, %c0_97, %c0_98] : memref<8x3x17x17xf32, #tpu.memory_space<vmem>>, vector<1x1x17x17xf32>
      %211 = vector.shape_cast %210 : vector<1x1x17x17xf32> to vector<17x17xf32>
      %cst_99 = arith.constant dense<0.000000e+00> : vector<17x17xf32>
      %212 = tpu.matmul %211, %202, %cst_99 {dimension_numbers = #tpu.dot_dimension_numbers<[1], [0], [0], [1], [0, 0, 1, 1], [], []>} : vector<17x17xf32>, vector<17x17xf32>, vector<17x17xf32> -> vector<17x17xf32>
      %cst_100 = arith.constant dense<0.000000e+00> : vector<17x17xf32>
      %213 = tpu.matmul %202, %212, %cst_100 {dimension_numbers = #tpu.dot_dimension_numbers<[1], [0], [0], [1], [0, 0, 1, 1], [], []>} : vector<17x17xf32>, vector<17x17xf32>, vector<17x17xf32> -> vector<17x17xf32>
      %c3_101 = arith.constant 3 : index
      %c1_102 = arith.constant 1 : index
      %c0_103 = arith.constant 0 : index
      %c0_104 = arith.constant 0 : index
      %214 = vector.load %arg4[%c3_101, %c1_102, %c0_103, %c0_104] : memref<8x3x17x17xf32, #tpu.memory_space<vmem>>, vector<1x1x17x17xf32>
      %215 = vector.shape_cast %214 : vector<1x1x17x17xf32> to vector<17x17xf32>
      %216 = vector.shape_cast %213 : vector<17x17xf32> to vector<1x1x17x17xf32>
      tpu.vector_store %arg4[%c3_101, %c1_102, %c0_103, %c0_104], %216 {strides = array<i32>} : memref<8x3x17x17xf32, #tpu.memory_space<vmem>>, vector<1x1x17x17xf32>,
      %c3_105 = arith.constant 3 : index
      %c2 = arith.constant 2 : index
      %c0_106 = arith.constant 0 : index
      %c0_107 = arith.constant 0 : index
      %217 = vector.load %arg2[%c3_105, %c2, %c0_106, %c0_107] : memref<8x3x17x17xf32, #tpu.memory_space<vmem>>, vector<1x1x17x17xf32>
      %218 = vector.shape_cast %217 : vector<1x1x17x17xf32> to vector<17x17xf32>
      %cst_108 = arith.constant dense<0.000000e+00> : vector<17x17xf32>
      %219 = tpu.matmul %218, %202, %cst_108 {dimension_numbers = #tpu.dot_dimension_numbers<[1], [0], [0], [1], [0, 0, 1, 1], [], []>} : vector<17x17xf32>, vector<17x17xf32>, vector<17x17xf32> -> vector<17x17xf32>
      %cst_109 = arith.constant dense<0.000000e+00> : vector<17x17xf32>
      %220 = tpu.matmul %202, %219, %cst_109 {dimension_numbers = #tpu.dot_dimension_numbers<[1], [0], [0], [1], [0, 0, 1, 1], [], []>} : vector<17x17xf32>, vector<17x17xf32>, vector<17x17xf32> -> vector<17x17xf32>
      %c3_110 = arith.constant 3 : index
      %c2_111 = arith.constant 2 : index
      %c0_112 = arith.constant 0 : index
      %c0_113 = arith.constant 0 : index
      %221 = vector.load %arg4[%c3_110, %c2_111, %c0_112, %c0_113] : memref<8x3x17x17xf32, #tpu.memory_space<vmem>>, vector<1x1x17x17xf32>
      %222 = vector.shape_cast %221 : vector<1x1x17x17xf32> to vector<17x17xf32>
      %223 = vector.shape_cast %220 : vector<17x17xf32> to vector<1x1x17x17xf32>
      tpu.vector_store %arg4[%c3_110, %c2_111, %c0_112, %c0_113], %223 {strides = array<i32>} : memref<8x3x17x17xf32, #tpu.memory_space<vmem>>, vector<1x1x17x17xf32>,
    } else {
    }
    %c3_i32_30 = arith.constant 3 : i32
    %70 = arith.cmpi eq, %12, %c3_i32_30 : i32
    %71 = arith.extui %70 : i1 to i32
    %c0_i32_31 = arith.constant 0 : i32
    %72 = arith.cmpi ne, %71, %c0_i32_31 : i32
    scf.if %72 {
      %196 = tpu.iota {dimensions = array<i32: 0>} : vector<17x17xi32>
      %197 = tpu.iota {dimensions = array<i32: 1>} : vector<17x17xi32>
      %198 = arith.addi %196, %197 : vector<17x17xi32>
      %c16_i32 = arith.constant 16 : i32
      %199 = vector.broadcast %c16_i32 : i32 to vector<17x17xi32>
      %200 = arith.cmpi eq, %198, %199 : vector<17x17xi32>
      %201 = arith.extui %200 : vector<17x17xi1> to vector<17x17xi32>
      %202 = arith.sitofp %201 : vector<17x17xi32> to vector<17x17xf32>
      %c3 = arith.constant 3 : index
      %c0_87 = arith.constant 0 : index
      %c0_88 = arith.constant 0 : index
      %c0_89 = arith.constant 0 : index
      %203 = vector.load %arg2[%c3, %c0_87, %c0_88, %c0_89] : memref<8x3x17x17xf32, #tpu.memory_space<vmem>>, vector<1x1x17x17xf32>
      %204 = vector.shape_cast %203 : vector<1x1x17x17xf32> to vector<17x17xf32>
      %205 = tpu.transpose %204, [1, 0] : vector<17x17xf32> -> vector<17x17xf32>
      %cst_90 = arith.constant dense<0.000000e+00> : vector<17x17xf32>
      %206 = tpu.matmul %205, %202, %cst_90 {dimension_numbers = #tpu.dot_dimension_numbers<[1], [0], [0], [1], [0, 0, 1, 1], [], []>} : vector<17x17xf32>, vector<17x17xf32>, vector<17x17xf32> -> vector<17x17xf32>
      %c3_91 = arith.constant 3 : index
      %c0_92 = arith.constant 0 : index
      %c0_93 = arith.constant 0 : index
      %c0_94 = arith.constant 0 : index
      %207 = vector.load %arg4[%c3_91, %c0_92, %c0_93, %c0_94] : memref<8x3x17x17xf32, #tpu.memory_space<vmem>>, vector<1x1x17x17xf32>
      %208 = vector.shape_cast %207 : vector<1x1x17x17xf32> to vector<17x17xf32>
      %209 = vector.shape_cast %206 : vector<17x17xf32> to vector<1x1x17x17xf32>
      tpu.vector_store %arg4[%c3_91, %c0_92, %c0_93, %c0_94], %209 {strides = array<i32>} : memref<8x3x17x17xf32, #tpu.memory_space<vmem>>, vector<1x1x17x17xf32>,
      %c3_95 = arith.constant 3 : index
      %c1 = arith.constant 1 : index
      %c0_96 = arith.constant 0 : index
      %c0_97 = arith.constant 0 : index
      %210 = vector.load %arg2[%c3_95, %c1, %c0_96, %c0_97] : memref<8x3x17x17xf32, #tpu.memory_space<vmem>>, vector<1x1x17x17xf32>
      %211 = vector.shape_cast %210 : vector<1x1x17x17xf32> to vector<17x17xf32>
      %212 = tpu.transpose %211, [1, 0] : vector<17x17xf32> -> vector<17x17xf32>
      %cst_98 = arith.constant dense<0.000000e+00> : vector<17x17xf32>
      %213 = tpu.matmul %212, %202, %cst_98 {dimension_numbers = #tpu.dot_dimension_numbers<[1], [0], [0], [1], [0, 0, 1, 1], [], []>} : vector<17x17xf32>, vector<17x17xf32>, vector<17x17xf32> -> vector<17x17xf32>
      %c3_99 = arith.constant 3 : index
      %c1_100 = arith.constant 1 : index
      %c0_101 = arith.constant 0 : index
      %c0_102 = arith.constant 0 : index
      %214 = vector.load %arg4[%c3_99, %c1_100, %c0_101, %c0_102] : memref<8x3x17x17xf32, #tpu.memory_space<vmem>>, vector<1x1x17x17xf32>
      %215 = vector.shape_cast %214 : vector<1x1x17x17xf32> to vector<17x17xf32>
      %216 = vector.shape_cast %213 : vector<17x17xf32> to vector<1x1x17x17xf32>
      tpu.vector_store %arg4[%c3_99, %c1_100, %c0_101, %c0_102], %216 {strides = array<i32>} : memref<8x3x17x17xf32, #tpu.memory_space<vmem>>, vector<1x1x17x17xf32>,
      %c3_103 = arith.constant 3 : index
      %c2 = arith.constant 2 : index
      %c0_104 = arith.constant 0 : index
      %c0_105 = arith.constant 0 : index
      %217 = vector.load %arg2[%c3_103, %c2, %c0_104, %c0_105] : memref<8x3x17x17xf32, #tpu.memory_space<vmem>>, vector<1x1x17x17xf32>
      %218 = vector.shape_cast %217 : vector<1x1x17x17xf32> to vector<17x17xf32>
      %219 = tpu.transpose %218, [1, 0] : vector<17x17xf32> -> vector<17x17xf32>
      %cst_106 = arith.constant dense<0.000000e+00> : vector<17x17xf32>
      %220 = tpu.matmul %219, %202, %cst_106 {dimension_numbers = #tpu.dot_dimension_numbers<[1], [0], [0], [1], [0, 0, 1, 1], [], []>} : vector<17x17xf32>, vector<17x17xf32>, vector<17x17xf32> -> vector<17x17xf32>
      %c3_107 = arith.constant 3 : index
      %c2_108 = arith.constant 2 : index
      %c0_109 = arith.constant 0 : index
      %c0_110 = arith.constant 0 : index
      %221 = vector.load %arg4[%c3_107, %c2_108, %c0_109, %c0_110] : memref<8x3x17x17xf32, #tpu.memory_space<vmem>>, vector<1x1x17x17xf32>
      %222 = vector.shape_cast %221 : vector<1x1x17x17xf32> to vector<17x17xf32>
      %223 = vector.shape_cast %220 : vector<17x17xf32> to vector<1x1x17x17xf32>
      tpu.vector_store %arg4[%c3_107, %c2_108, %c0_109, %c0_110], %223 {strides = array<i32>} : memref<8x3x17x17xf32, #tpu.memory_space<vmem>>, vector<1x1x17x17xf32>,
    } else {
    }
    %c0_i32_32 = arith.constant 0 : i32
    %73 = arith.cmpi eq, %15, %c0_i32_32 : i32
    %74 = arith.extui %73 : i1 to i32
    %c0_i32_33 = arith.constant 0 : i32
    %75 = arith.cmpi ne, %74, %c0_i32_33 : i32
    scf.if %75 {
      %c4 = arith.constant 4 : index
      %c0_87 = arith.constant 0 : index
      %c0_88 = arith.constant 0 : index
      %c0_89 = arith.constant 0 : index
      %196 = vector.load %arg2[%c4, %c0_87, %c0_88, %c0_89] : memref<8x3x17x17xf32, #tpu.memory_space<vmem>>, vector<1x3x17x17xf32>
      %197 = vector.shape_cast %196 : vector<1x3x17x17xf32> to vector<3x17x17xf32>
      %c4_90 = arith.constant 4 : index
      %c0_91 = arith.constant 0 : index
      %c0_92 = arith.constant 0 : index
      %c0_93 = arith.constant 0 : index
      %198 = vector.load %arg4[%c4_90, %c0_91, %c0_92, %c0_93] : memref<8x3x17x17xf32, #tpu.memory_space<vmem>>, vector<1x3x17x17xf32>
      %199 = vector.shape_cast %198 : vector<1x3x17x17xf32> to vector<3x17x17xf32>
      %200 = vector.shape_cast %197 : vector<3x17x17xf32> to vector<1x3x17x17xf32>
      tpu.vector_store %arg4[%c4_90, %c0_91, %c0_92, %c0_93], %200 {strides = array<i32>} : memref<8x3x17x17xf32, #tpu.memory_space<vmem>>, vector<1x3x17x17xf32>,
    } else {
    }
    %c1_i32_34 = arith.constant 1 : i32
    %76 = arith.cmpi eq, %15, %c1_i32_34 : i32
    %77 = arith.extui %76 : i1 to i32
    %c0_i32_35 = arith.constant 0 : i32
    %78 = arith.cmpi ne, %77, %c0_i32_35 : i32
    scf.if %78 {
      %196 = tpu.iota {dimensions = array<i32: 0>} : vector<17x17xi32>
      %197 = tpu.iota {dimensions = array<i32: 1>} : vector<17x17xi32>
      %198 = arith.addi %196, %197 : vector<17x17xi32>
      %c16_i32 = arith.constant 16 : i32
      %199 = vector.broadcast %c16_i32 : i32 to vector<17x17xi32>
      %200 = arith.cmpi eq, %198, %199 : vector<17x17xi32>
      %201 = arith.extui %200 : vector<17x17xi1> to vector<17x17xi32>
      %202 = arith.sitofp %201 : vector<17x17xi32> to vector<17x17xf32>
      %c4 = arith.constant 4 : index
      %c0_87 = arith.constant 0 : index
      %c0_88 = arith.constant 0 : index
      %c0_89 = arith.constant 0 : index
      %203 = vector.load %arg2[%c4, %c0_87, %c0_88, %c0_89] : memref<8x3x17x17xf32, #tpu.memory_space<vmem>>, vector<1x1x17x17xf32>
      %204 = vector.shape_cast %203 : vector<1x1x17x17xf32> to vector<17x17xf32>
      %cst_90 = arith.constant dense<0.000000e+00> : vector<17x17xf32>
      %205 = tpu.matmul %204, %202, %cst_90 {dimension_numbers = #tpu.dot_dimension_numbers<[1], [0], [0], [1], [0, 0, 1, 1], [], []>} : vector<17x17xf32>, vector<17x17xf32>, vector<17x17xf32> -> vector<17x17xf32>
      %206 = tpu.transpose %205, [1, 0] : vector<17x17xf32> -> vector<17x17xf32>
      %c4_91 = arith.constant 4 : index
      %c0_92 = arith.constant 0 : index
      %c0_93 = arith.constant 0 : index
      %c0_94 = arith.constant 0 : index
      %207 = vector.load %arg4[%c4_91, %c0_92, %c0_93, %c0_94] : memref<8x3x17x17xf32, #tpu.memory_space<vmem>>, vector<1x1x17x17xf32>
      %208 = vector.shape_cast %207 : vector<1x1x17x17xf32> to vector<17x17xf32>
      %209 = vector.shape_cast %206 : vector<17x17xf32> to vector<1x1x17x17xf32>
      tpu.vector_store %arg4[%c4_91, %c0_92, %c0_93, %c0_94], %209 {strides = array<i32>} : memref<8x3x17x17xf32, #tpu.memory_space<vmem>>, vector<1x1x17x17xf32>,
      %c4_95 = arith.constant 4 : index
      %c1 = arith.constant 1 : index
      %c0_96 = arith.constant 0 : index
      %c0_97 = arith.constant 0 : index
      %210 = vector.load %arg2[%c4_95, %c1, %c0_96, %c0_97] : memref<8x3x17x17xf32, #tpu.memory_space<vmem>>, vector<1x1x17x17xf32>
      %211 = vector.shape_cast %210 : vector<1x1x17x17xf32> to vector<17x17xf32>
      %cst_98 = arith.constant dense<0.000000e+00> : vector<17x17xf32>
      %212 = tpu.matmul %211, %202, %cst_98 {dimension_numbers = #tpu.dot_dimension_numbers<[1], [0], [0], [1], [0, 0, 1, 1], [], []>} : vector<17x17xf32>, vector<17x17xf32>, vector<17x17xf32> -> vector<17x17xf32>
      %213 = tpu.transpose %212, [1, 0] : vector<17x17xf32> -> vector<17x17xf32>
      %c4_99 = arith.constant 4 : index
      %c1_100 = arith.constant 1 : index
      %c0_101 = arith.constant 0 : index
      %c0_102 = arith.constant 0 : index
      %214 = vector.load %arg4[%c4_99, %c1_100, %c0_101, %c0_102] : memref<8x3x17x17xf32, #tpu.memory_space<vmem>>, vector<1x1x17x17xf32>
      %215 = vector.shape_cast %214 : vector<1x1x17x17xf32> to vector<17x17xf32>
      %216 = vector.shape_cast %213 : vector<17x17xf32> to vector<1x1x17x17xf32>
      tpu.vector_store %arg4[%c4_99, %c1_100, %c0_101, %c0_102], %216 {strides = array<i32>} : memref<8x3x17x17xf32, #tpu.memory_space<vmem>>, vector<1x1x17x17xf32>,
      %c4_103 = arith.constant 4 : index
      %c2 = arith.constant 2 : index
      %c0_104 = arith.constant 0 : index
      %c0_105 = arith.constant 0 : index
      %217 = vector.load %arg2[%c4_103, %c2, %c0_104, %c0_105] : memref<8x3x17x17xf32, #tpu.memory_space<vmem>>, vector<1x1x17x17xf32>
      %218 = vector.shape_cast %217 : vector<1x1x17x17xf32> to vector<17x17xf32>
      %cst_106 = arith.constant dense<0.000000e+00> : vector<17x17xf32>
      %219 = tpu.matmul %218, %202, %cst_106 {dimension_numbers = #tpu.dot_dimension_numbers<[1], [0], [0], [1], [0, 0, 1, 1], [], []>} : vector<17x17xf32>, vector<17x17xf32>, vector<17x17xf32> -> vector<17x17xf32>
      %220 = tpu.transpose %219, [1, 0] : vector<17x17xf32> -> vector<17x17xf32>
      %c4_107 = arith.constant 4 : index
      %c2_108 = arith.constant 2 : index
      %c0_109 = arith.constant 0 : index
      %c0_110 = arith.constant 0 : index
      %221 = vector.load %arg4[%c4_107, %c2_108, %c0_109, %c0_110] : memref<8x3x17x17xf32, #tpu.memory_space<vmem>>, vector<1x1x17x17xf32>
      %222 = vector.shape_cast %221 : vector<1x1x17x17xf32> to vector<17x17xf32>
      %223 = vector.shape_cast %220 : vector<17x17xf32> to vector<1x1x17x17xf32>
      tpu.vector_store %arg4[%c4_107, %c2_108, %c0_109, %c0_110], %223 {strides = array<i32>} : memref<8x3x17x17xf32, #tpu.memory_space<vmem>>, vector<1x1x17x17xf32>,
    } else {
    }
    %c2_i32_36 = arith.constant 2 : i32
    %79 = arith.cmpi eq, %15, %c2_i32_36 : i32
    %80 = arith.extui %79 : i1 to i32
    %c0_i32_37 = arith.constant 0 : i32
    %81 = arith.cmpi ne, %80, %c0_i32_37 : i32
    scf.if %81 {
      %196 = tpu.iota {dimensions = array<i32: 0>} : vector<17x17xi32>
      %197 = tpu.iota {dimensions = array<i32: 1>} : vector<17x17xi32>
      %198 = arith.addi %196, %197 : vector<17x17xi32>
      %c16_i32 = arith.constant 16 : i32
      %199 = vector.broadcast %c16_i32 : i32 to vector<17x17xi32>
      %200 = arith.cmpi eq, %198, %199 : vector<17x17xi32>
      %201 = arith.extui %200 : vector<17x17xi1> to vector<17x17xi32>
      %202 = arith.sitofp %201 : vector<17x17xi32> to vector<17x17xf32>
      %c4 = arith.constant 4 : index
      %c0_87 = arith.constant 0 : index
      %c0_88 = arith.constant 0 : index
      %c0_89 = arith.constant 0 : index
      %203 = vector.load %arg2[%c4, %c0_87, %c0_88, %c0_89] : memref<8x3x17x17xf32, #tpu.memory_space<vmem>>, vector<1x1x17x17xf32>
      %204 = vector.shape_cast %203 : vector<1x1x17x17xf32> to vector<17x17xf32>
      %cst_90 = arith.constant dense<0.000000e+00> : vector<17x17xf32>
      %205 = tpu.matmul %204, %202, %cst_90 {dimension_numbers = #tpu.dot_dimension_numbers<[1], [0], [0], [1], [0, 0, 1, 1], [], []>} : vector<17x17xf32>, vector<17x17xf32>, vector<17x17xf32> -> vector<17x17xf32>
      %cst_91 = arith.constant dense<0.000000e+00> : vector<17x17xf32>
      %206 = tpu.matmul %202, %205, %cst_91 {dimension_numbers = #tpu.dot_dimension_numbers<[1], [0], [0], [1], [0, 0, 1, 1], [], []>} : vector<17x17xf32>, vector<17x17xf32>, vector<17x17xf32> -> vector<17x17xf32>
      %c4_92 = arith.constant 4 : index
      %c0_93 = arith.constant 0 : index
      %c0_94 = arith.constant 0 : index
      %c0_95 = arith.constant 0 : index
      %207 = vector.load %arg4[%c4_92, %c0_93, %c0_94, %c0_95] : memref<8x3x17x17xf32, #tpu.memory_space<vmem>>, vector<1x1x17x17xf32>
      %208 = vector.shape_cast %207 : vector<1x1x17x17xf32> to vector<17x17xf32>
      %209 = vector.shape_cast %206 : vector<17x17xf32> to vector<1x1x17x17xf32>
      tpu.vector_store %arg4[%c4_92, %c0_93, %c0_94, %c0_95], %209 {strides = array<i32>} : memref<8x3x17x17xf32, #tpu.memory_space<vmem>>, vector<1x1x17x17xf32>,
      %c4_96 = arith.constant 4 : index
      %c1 = arith.constant 1 : index
      %c0_97 = arith.constant 0 : index
      %c0_98 = arith.constant 0 : index
      %210 = vector.load %arg2[%c4_96, %c1, %c0_97, %c0_98] : memref<8x3x17x17xf32, #tpu.memory_space<vmem>>, vector<1x1x17x17xf32>
      %211 = vector.shape_cast %210 : vector<1x1x17x17xf32> to vector<17x17xf32>
      %cst_99 = arith.constant dense<0.000000e+00> : vector<17x17xf32>
      %212 = tpu.matmul %211, %202, %cst_99 {dimension_numbers = #tpu.dot_dimension_numbers<[1], [0], [0], [1], [0, 0, 1, 1], [], []>} : vector<17x17xf32>, vector<17x17xf32>, vector<17x17xf32> -> vector<17x17xf32>
      %cst_100 = arith.constant dense<0.000000e+00> : vector<17x17xf32>
      %213 = tpu.matmul %202, %212, %cst_100 {dimension_numbers = #tpu.dot_dimension_numbers<[1], [0], [0], [1], [0, 0, 1, 1], [], []>} : vector<17x17xf32>, vector<17x17xf32>, vector<17x17xf32> -> vector<17x17xf32>
      %c4_101 = arith.constant 4 : index
      %c1_102 = arith.constant 1 : index
      %c0_103 = arith.constant 0 : index
      %c0_104 = arith.constant 0 : index
      %214 = vector.load %arg4[%c4_101, %c1_102, %c0_103, %c0_104] : memref<8x3x17x17xf32, #tpu.memory_space<vmem>>, vector<1x1x17x17xf32>
      %215 = vector.shape_cast %214 : vector<1x1x17x17xf32> to vector<17x17xf32>
      %216 = vector.shape_cast %213 : vector<17x17xf32> to vector<1x1x17x17xf32>
      tpu.vector_store %arg4[%c4_101, %c1_102, %c0_103, %c0_104], %216 {strides = array<i32>} : memref<8x3x17x17xf32, #tpu.memory_space<vmem>>, vector<1x1x17x17xf32>,
      %c4_105 = arith.constant 4 : index
      %c2 = arith.constant 2 : index
      %c0_106 = arith.constant 0 : index
      %c0_107 = arith.constant 0 : index
      %217 = vector.load %arg2[%c4_105, %c2, %c0_106, %c0_107] : memref<8x3x17x17xf32, #tpu.memory_space<vmem>>, vector<1x1x17x17xf32>
      %218 = vector.shape_cast %217 : vector<1x1x17x17xf32> to vector<17x17xf32>
      %cst_108 = arith.constant dense<0.000000e+00> : vector<17x17xf32>
      %219 = tpu.matmul %218, %202, %cst_108 {dimension_numbers = #tpu.dot_dimension_numbers<[1], [0], [0], [1], [0, 0, 1, 1], [], []>} : vector<17x17xf32>, vector<17x17xf32>, vector<17x17xf32> -> vector<17x17xf32>
      %cst_109 = arith.constant dense<0.000000e+00> : vector<17x17xf32>
      %220 = tpu.matmul %202, %219, %cst_109 {dimension_numbers = #tpu.dot_dimension_numbers<[1], [0], [0], [1], [0, 0, 1, 1], [], []>} : vector<17x17xf32>, vector<17x17xf32>, vector<17x17xf32> -> vector<17x17xf32>
      %c4_110 = arith.constant 4 : index
      %c2_111 = arith.constant 2 : index
      %c0_112 = arith.constant 0 : index
      %c0_113 = arith.constant 0 : index
      %221 = vector.load %arg4[%c4_110, %c2_111, %c0_112, %c0_113] : memref<8x3x17x17xf32, #tpu.memory_space<vmem>>, vector<1x1x17x17xf32>
      %222 = vector.shape_cast %221 : vector<1x1x17x17xf32> to vector<17x17xf32>
      %223 = vector.shape_cast %220 : vector<17x17xf32> to vector<1x1x17x17xf32>
      tpu.vector_store %arg4[%c4_110, %c2_111, %c0_112, %c0_113], %223 {strides = array<i32>} : memref<8x3x17x17xf32, #tpu.memory_space<vmem>>, vector<1x1x17x17xf32>,
    } else {
    }
    %c3_i32_38 = arith.constant 3 : i32
    %82 = arith.cmpi eq, %15, %c3_i32_38 : i32
    %83 = arith.extui %82 : i1 to i32
    %c0_i32_39 = arith.constant 0 : i32
    %84 = arith.cmpi ne, %83, %c0_i32_39 : i32
    scf.if %84 {
      %196 = tpu.iota {dimensions = array<i32: 0>} : vector<17x17xi32>
      %197 = tpu.iota {dimensions = array<i32: 1>} : vector<17x17xi32>
      %198 = arith.addi %196, %197 : vector<17x17xi32>
      %c16_i32 = arith.constant 16 : i32
      %199 = vector.broadcast %c16_i32 : i32 to vector<17x17xi32>
      %200 = arith.cmpi eq, %198, %199 : vector<17x17xi32>
      %201 = arith.extui %200 : vector<17x17xi1> to vector<17x17xi32>
      %202 = arith.sitofp %201 : vector<17x17xi32> to vector<17x17xf32>
      %c4 = arith.constant 4 : index
      %c0_87 = arith.constant 0 : index
      %c0_88 = arith.constant 0 : index
      %c0_89 = arith.constant 0 : index
      %203 = vector.load %arg2[%c4, %c0_87, %c0_88, %c0_89] : memref<8x3x17x17xf32, #tpu.memory_space<vmem>>, vector<1x1x17x17xf32>
      %204 = vector.shape_cast %203 : vector<1x1x17x17xf32> to vector<17x17xf32>
      %205 = tpu.transpose %204, [1, 0] : vector<17x17xf32> -> vector<17x17xf32>
      %cst_90 = arith.constant dense<0.000000e+00> : vector<17x17xf32>
      %206 = tpu.matmul %205, %202, %cst_90 {dimension_numbers = #tpu.dot_dimension_numbers<[1], [0], [0], [1], [0, 0, 1, 1], [], []>} : vector<17x17xf32>, vector<17x17xf32>, vector<17x17xf32> -> vector<17x17xf32>
      %c4_91 = arith.constant 4 : index
      %c0_92 = arith.constant 0 : index
      %c0_93 = arith.constant 0 : index
      %c0_94 = arith.constant 0 : index
      %207 = vector.load %arg4[%c4_91, %c0_92, %c0_93, %c0_94] : memref<8x3x17x17xf32, #tpu.memory_space<vmem>>, vector<1x1x17x17xf32>
      %208 = vector.shape_cast %207 : vector<1x1x17x17xf32> to vector<17x17xf32>
      %209 = vector.shape_cast %206 : vector<17x17xf32> to vector<1x1x17x17xf32>
      tpu.vector_store %arg4[%c4_91, %c0_92, %c0_93, %c0_94], %209 {strides = array<i32>} : memref<8x3x17x17xf32, #tpu.memory_space<vmem>>, vector<1x1x17x17xf32>,
      %c4_95 = arith.constant 4 : index
      %c1 = arith.constant 1 : index
      %c0_96 = arith.constant 0 : index
      %c0_97 = arith.constant 0 : index
      %210 = vector.load %arg2[%c4_95, %c1, %c0_96, %c0_97] : memref<8x3x17x17xf32, #tpu.memory_space<vmem>>, vector<1x1x17x17xf32>
      %211 = vector.shape_cast %210 : vector<1x1x17x17xf32> to vector<17x17xf32>
      %212 = tpu.transpose %211, [1, 0] : vector<17x17xf32> -> vector<17x17xf32>
      %cst_98 = arith.constant dense<0.000000e+00> : vector<17x17xf32>
      %213 = tpu.matmul %212, %202, %cst_98 {dimension_numbers = #tpu.dot_dimension_numbers<[1], [0], [0], [1], [0, 0, 1, 1], [], []>} : vector<17x17xf32>, vector<17x17xf32>, vector<17x17xf32> -> vector<17x17xf32>
      %c4_99 = arith.constant 4 : index
      %c1_100 = arith.constant 1 : index
      %c0_101 = arith.constant 0 : index
      %c0_102 = arith.constant 0 : index
      %214 = vector.load %arg4[%c4_99, %c1_100, %c0_101, %c0_102] : memref<8x3x17x17xf32, #tpu.memory_space<vmem>>, vector<1x1x17x17xf32>
      %215 = vector.shape_cast %214 : vector<1x1x17x17xf32> to vector<17x17xf32>
      %216 = vector.shape_cast %213 : vector<17x17xf32> to vector<1x1x17x17xf32>
      tpu.vector_store %arg4[%c4_99, %c1_100, %c0_101, %c0_102], %216 {strides = array<i32>} : memref<8x3x17x17xf32, #tpu.memory_space<vmem>>, vector<1x1x17x17xf32>,
      %c4_103 = arith.constant 4 : index
      %c2 = arith.constant 2 : index
      %c0_104 = arith.constant 0 : index
      %c0_105 = arith.constant 0 : index
      %217 = vector.load %arg2[%c4_103, %c2, %c0_104, %c0_105] : memref<8x3x17x17xf32, #tpu.memory_space<vmem>>, vector<1x1x17x17xf32>
      %218 = vector.shape_cast %217 : vector<1x1x17x17xf32> to vector<17x17xf32>
      %219 = tpu.transpose %218, [1, 0] : vector<17x17xf32> -> vector<17x17xf32>
      %cst_106 = arith.constant dense<0.000000e+00> : vector<17x17xf32>
      %220 = tpu.matmul %219, %202, %cst_106 {dimension_numbers = #tpu.dot_dimension_numbers<[1], [0], [0], [1], [0, 0, 1, 1], [], []>} : vector<17x17xf32>, vector<17x17xf32>, vector<17x17xf32> -> vector<17x17xf32>
      %c4_107 = arith.constant 4 : index
      %c2_108 = arith.constant 2 : index
      %c0_109 = arith.constant 0 : index
      %c0_110 = arith.constant 0 : index
      %221 = vector.load %arg4[%c4_107, %c2_108, %c0_109, %c0_110] : memref<8x3x17x17xf32, #tpu.memory_space<vmem>>, vector<1x1x17x17xf32>
      %222 = vector.shape_cast %221 : vector<1x1x17x17xf32> to vector<17x17xf32>
      %223 = vector.shape_cast %220 : vector<17x17xf32> to vector<1x1x17x17xf32>
      tpu.vector_store %arg4[%c4_107, %c2_108, %c0_109, %c0_110], %223 {strides = array<i32>} : memref<8x3x17x17xf32, #tpu.memory_space<vmem>>, vector<1x1x17x17xf32>,
    } else {
    }
    %c0_i32_40 = arith.constant 0 : i32
    %85 = arith.cmpi eq, %18, %c0_i32_40 : i32
    %86 = arith.extui %85 : i1 to i32
    %c0_i32_41 = arith.constant 0 : i32
    %87 = arith.cmpi ne, %86, %c0_i32_41 : i32
    scf.if %87 {
      %c5 = arith.constant 5 : index
      %c0_87 = arith.constant 0 : index
      %c0_88 = arith.constant 0 : index
      %c0_89 = arith.constant 0 : index
      %196 = vector.load %arg2[%c5, %c0_87, %c0_88, %c0_89] : memref<8x3x17x17xf32, #tpu.memory_space<vmem>>, vector<1x3x17x17xf32>
      %197 = vector.shape_cast %196 : vector<1x3x17x17xf32> to vector<3x17x17xf32>
      %c5_90 = arith.constant 5 : index
      %c0_91 = arith.constant 0 : index
      %c0_92 = arith.constant 0 : index
      %c0_93 = arith.constant 0 : index
      %198 = vector.load %arg4[%c5_90, %c0_91, %c0_92, %c0_93] : memref<8x3x17x17xf32, #tpu.memory_space<vmem>>, vector<1x3x17x17xf32>
      %199 = vector.shape_cast %198 : vector<1x3x17x17xf32> to vector<3x17x17xf32>
      %200 = vector.shape_cast %197 : vector<3x17x17xf32> to vector<1x3x17x17xf32>
      tpu.vector_store %arg4[%c5_90, %c0_91, %c0_92, %c0_93], %200 {strides = array<i32>} : memref<8x3x17x17xf32, #tpu.memory_space<vmem>>, vector<1x3x17x17xf32>,
    } else {
    }
    %c1_i32_42 = arith.constant 1 : i32
    %88 = arith.cmpi eq, %18, %c1_i32_42 : i32
    %89 = arith.extui %88 : i1 to i32
    %c0_i32_43 = arith.constant 0 : i32
    %90 = arith.cmpi ne, %89, %c0_i32_43 : i32
    scf.if %90 {
      %196 = tpu.iota {dimensions = array<i32: 0>} : vector<17x17xi32>
      %197 = tpu.iota {dimensions = array<i32: 1>} : vector<17x17xi32>
      %198 = arith.addi %196, %197 : vector<17x17xi32>
      %c16_i32 = arith.constant 16 : i32
      %199 = vector.broadcast %c16_i32 : i32 to vector<17x17xi32>
      %200 = arith.cmpi eq, %198, %199 : vector<17x17xi32>
      %201 = arith.extui %200 : vector<17x17xi1> to vector<17x17xi32>
      %202 = arith.sitofp %201 : vector<17x17xi32> to vector<17x17xf32>
      %c5 = arith.constant 5 : index
      %c0_87 = arith.constant 0 : index
      %c0_88 = arith.constant 0 : index
      %c0_89 = arith.constant 0 : index
      %203 = vector.load %arg2[%c5, %c0_87, %c0_88, %c0_89] : memref<8x3x17x17xf32, #tpu.memory_space<vmem>>, vector<1x1x17x17xf32>
      %204 = vector.shape_cast %203 : vector<1x1x17x17xf32> to vector<17x17xf32>
      %cst_90 = arith.constant dense<0.000000e+00> : vector<17x17xf32>
      %205 = tpu.matmul %204, %202, %cst_90 {dimension_numbers = #tpu.dot_dimension_numbers<[1], [0], [0], [1], [0, 0, 1, 1], [], []>} : vector<17x17xf32>, vector<17x17xf32>, vector<17x17xf32> -> vector<17x17xf32>
      %206 = tpu.transpose %205, [1, 0] : vector<17x17xf32> -> vector<17x17xf32>
      %c5_91 = arith.constant 5 : index
      %c0_92 = arith.constant 0 : index
      %c0_93 = arith.constant 0 : index
      %c0_94 = arith.constant 0 : index
      %207 = vector.load %arg4[%c5_91, %c0_92, %c0_93, %c0_94] : memref<8x3x17x17xf32, #tpu.memory_space<vmem>>, vector<1x1x17x17xf32>
      %208 = vector.shape_cast %207 : vector<1x1x17x17xf32> to vector<17x17xf32>
      %209 = vector.shape_cast %206 : vector<17x17xf32> to vector<1x1x17x17xf32>
      tpu.vector_store %arg4[%c5_91, %c0_92, %c0_93, %c0_94], %209 {strides = array<i32>} : memref<8x3x17x17xf32, #tpu.memory_space<vmem>>, vector<1x1x17x17xf32>,
      %c5_95 = arith.constant 5 : index
      %c1 = arith.constant 1 : index
      %c0_96 = arith.constant 0 : index
      %c0_97 = arith.constant 0 : index
      %210 = vector.load %arg2[%c5_95, %c1, %c0_96, %c0_97] : memref<8x3x17x17xf32, #tpu.memory_space<vmem>>, vector<1x1x17x17xf32>
      %211 = vector.shape_cast %210 : vector<1x1x17x17xf32> to vector<17x17xf32>
      %cst_98 = arith.constant dense<0.000000e+00> : vector<17x17xf32>
      %212 = tpu.matmul %211, %202, %cst_98 {dimension_numbers = #tpu.dot_dimension_numbers<[1], [0], [0], [1], [0, 0, 1, 1], [], []>} : vector<17x17xf32>, vector<17x17xf32>, vector<17x17xf32> -> vector<17x17xf32>
      %213 = tpu.transpose %212, [1, 0] : vector<17x17xf32> -> vector<17x17xf32>
      %c5_99 = arith.constant 5 : index
      %c1_100 = arith.constant 1 : index
      %c0_101 = arith.constant 0 : index
      %c0_102 = arith.constant 0 : index
      %214 = vector.load %arg4[%c5_99, %c1_100, %c0_101, %c0_102] : memref<8x3x17x17xf32, #tpu.memory_space<vmem>>, vector<1x1x17x17xf32>
      %215 = vector.shape_cast %214 : vector<1x1x17x17xf32> to vector<17x17xf32>
      %216 = vector.shape_cast %213 : vector<17x17xf32> to vector<1x1x17x17xf32>
      tpu.vector_store %arg4[%c5_99, %c1_100, %c0_101, %c0_102], %216 {strides = array<i32>} : memref<8x3x17x17xf32, #tpu.memory_space<vmem>>, vector<1x1x17x17xf32>,
      %c5_103 = arith.constant 5 : index
      %c2 = arith.constant 2 : index
      %c0_104 = arith.constant 0 : index
      %c0_105 = arith.constant 0 : index
      %217 = vector.load %arg2[%c5_103, %c2, %c0_104, %c0_105] : memref<8x3x17x17xf32, #tpu.memory_space<vmem>>, vector<1x1x17x17xf32>
      %218 = vector.shape_cast %217 : vector<1x1x17x17xf32> to vector<17x17xf32>
      %cst_106 = arith.constant dense<0.000000e+00> : vector<17x17xf32>
      %219 = tpu.matmul %218, %202, %cst_106 {dimension_numbers = #tpu.dot_dimension_numbers<[1], [0], [0], [1], [0, 0, 1, 1], [], []>} : vector<17x17xf32>, vector<17x17xf32>, vector<17x17xf32> -> vector<17x17xf32>
      %220 = tpu.transpose %219, [1, 0] : vector<17x17xf32> -> vector<17x17xf32>
      %c5_107 = arith.constant 5 : index
      %c2_108 = arith.constant 2 : index
      %c0_109 = arith.constant 0 : index
      %c0_110 = arith.constant 0 : index
      %221 = vector.load %arg4[%c5_107, %c2_108, %c0_109, %c0_110] : memref<8x3x17x17xf32, #tpu.memory_space<vmem>>, vector<1x1x17x17xf32>
      %222 = vector.shape_cast %221 : vector<1x1x17x17xf32> to vector<17x17xf32>
      %223 = vector.shape_cast %220 : vector<17x17xf32> to vector<1x1x17x17xf32>
      tpu.vector_store %arg4[%c5_107, %c2_108, %c0_109, %c0_110], %223 {strides = array<i32>} : memref<8x3x17x17xf32, #tpu.memory_space<vmem>>, vector<1x1x17x17xf32>,
    } else {
    }
    %c2_i32_44 = arith.constant 2 : i32
    %91 = arith.cmpi eq, %18, %c2_i32_44 : i32
    %92 = arith.extui %91 : i1 to i32
    %c0_i32_45 = arith.constant 0 : i32
    %93 = arith.cmpi ne, %92, %c0_i32_45 : i32
    scf.if %93 {
      %196 = tpu.iota {dimensions = array<i32: 0>} : vector<17x17xi32>
      %197 = tpu.iota {dimensions = array<i32: 1>} : vector<17x17xi32>
      %198 = arith.addi %196, %197 : vector<17x17xi32>
      %c16_i32 = arith.constant 16 : i32
      %199 = vector.broadcast %c16_i32 : i32 to vector<17x17xi32>
      %200 = arith.cmpi eq, %198, %199 : vector<17x17xi32>
      %201 = arith.extui %200 : vector<17x17xi1> to vector<17x17xi32>
      %202 = arith.sitofp %201 : vector<17x17xi32> to vector<17x17xf32>
      %c5 = arith.constant 5 : index
      %c0_87 = arith.constant 0 : index
      %c0_88 = arith.constant 0 : index
      %c0_89 = arith.constant 0 : index
      %203 = vector.load %arg2[%c5, %c0_87, %c0_88, %c0_89] : memref<8x3x17x17xf32, #tpu.memory_space<vmem>>, vector<1x1x17x17xf32>
      %204 = vector.shape_cast %203 : vector<1x1x17x17xf32> to vector<17x17xf32>
      %cst_90 = arith.constant dense<0.000000e+00> : vector<17x17xf32>
      %205 = tpu.matmul %204, %202, %cst_90 {dimension_numbers = #tpu.dot_dimension_numbers<[1], [0], [0], [1], [0, 0, 1, 1], [], []>} : vector<17x17xf32>, vector<17x17xf32>, vector<17x17xf32> -> vector<17x17xf32>
      %cst_91 = arith.constant dense<0.000000e+00> : vector<17x17xf32>
      %206 = tpu.matmul %202, %205, %cst_91 {dimension_numbers = #tpu.dot_dimension_numbers<[1], [0], [0], [1], [0, 0, 1, 1], [], []>} : vector<17x17xf32>, vector<17x17xf32>, vector<17x17xf32> -> vector<17x17xf32>
      %c5_92 = arith.constant 5 : index
      %c0_93 = arith.constant 0 : index
      %c0_94 = arith.constant 0 : index
      %c0_95 = arith.constant 0 : index
      %207 = vector.load %arg4[%c5_92, %c0_93, %c0_94, %c0_95] : memref<8x3x17x17xf32, #tpu.memory_space<vmem>>, vector<1x1x17x17xf32>
      %208 = vector.shape_cast %207 : vector<1x1x17x17xf32> to vector<17x17xf32>
      %209 = vector.shape_cast %206 : vector<17x17xf32> to vector<1x1x17x17xf32>
      tpu.vector_store %arg4[%c5_92, %c0_93, %c0_94, %c0_95], %209 {strides = array<i32>} : memref<8x3x17x17xf32, #tpu.memory_space<vmem>>, vector<1x1x17x17xf32>,
      %c5_96 = arith.constant 5 : index
      %c1 = arith.constant 1 : index
      %c0_97 = arith.constant 0 : index
      %c0_98 = arith.constant 0 : index
      %210 = vector.load %arg2[%c5_96, %c1, %c0_97, %c0_98] : memref<8x3x17x17xf32, #tpu.memory_space<vmem>>, vector<1x1x17x17xf32>
      %211 = vector.shape_cast %210 : vector<1x1x17x17xf32> to vector<17x17xf32>
      %cst_99 = arith.constant dense<0.000000e+00> : vector<17x17xf32>
      %212 = tpu.matmul %211, %202, %cst_99 {dimension_numbers = #tpu.dot_dimension_numbers<[1], [0], [0], [1], [0, 0, 1, 1], [], []>} : vector<17x17xf32>, vector<17x17xf32>, vector<17x17xf32> -> vector<17x17xf32>
      %cst_100 = arith.constant dense<0.000000e+00> : vector<17x17xf32>
      %213 = tpu.matmul %202, %212, %cst_100 {dimension_numbers = #tpu.dot_dimension_numbers<[1], [0], [0], [1], [0, 0, 1, 1], [], []>} : vector<17x17xf32>, vector<17x17xf32>, vector<17x17xf32> -> vector<17x17xf32>
      %c5_101 = arith.constant 5 : index
      %c1_102 = arith.constant 1 : index
      %c0_103 = arith.constant 0 : index
      %c0_104 = arith.constant 0 : index
      %214 = vector.load %arg4[%c5_101, %c1_102, %c0_103, %c0_104] : memref<8x3x17x17xf32, #tpu.memory_space<vmem>>, vector<1x1x17x17xf32>
      %215 = vector.shape_cast %214 : vector<1x1x17x17xf32> to vector<17x17xf32>
      %216 = vector.shape_cast %213 : vector<17x17xf32> to vector<1x1x17x17xf32>
      tpu.vector_store %arg4[%c5_101, %c1_102, %c0_103, %c0_104], %216 {strides = array<i32>} : memref<8x3x17x17xf32, #tpu.memory_space<vmem>>, vector<1x1x17x17xf32>,
      %c5_105 = arith.constant 5 : index
      %c2 = arith.constant 2 : index
      %c0_106 = arith.constant 0 : index
      %c0_107 = arith.constant 0 : index
      %217 = vector.load %arg2[%c5_105, %c2, %c0_106, %c0_107] : memref<8x3x17x17xf32, #tpu.memory_space<vmem>>, vector<1x1x17x17xf32>
      %218 = vector.shape_cast %217 : vector<1x1x17x17xf32> to vector<17x17xf32>
      %cst_108 = arith.constant dense<0.000000e+00> : vector<17x17xf32>
      %219 = tpu.matmul %218, %202, %cst_108 {dimension_numbers = #tpu.dot_dimension_numbers<[1], [0], [0], [1], [0, 0, 1, 1], [], []>} : vector<17x17xf32>, vector<17x17xf32>, vector<17x17xf32> -> vector<17x17xf32>
      %cst_109 = arith.constant dense<0.000000e+00> : vector<17x17xf32>
      %220 = tpu.matmul %202, %219, %cst_109 {dimension_numbers = #tpu.dot_dimension_numbers<[1], [0], [0], [1], [0, 0, 1, 1], [], []>} : vector<17x17xf32>, vector<17x17xf32>, vector<17x17xf32> -> vector<17x17xf32>
      %c5_110 = arith.constant 5 : index
      %c2_111 = arith.constant 2 : index
      %c0_112 = arith.constant 0 : index
      %c0_113 = arith.constant 0 : index
      %221 = vector.load %arg4[%c5_110, %c2_111, %c0_112, %c0_113] : memref<8x3x17x17xf32, #tpu.memory_space<vmem>>, vector<1x1x17x17xf32>
      %222 = vector.shape_cast %221 : vector<1x1x17x17xf32> to vector<17x17xf32>
      %223 = vector.shape_cast %220 : vector<17x17xf32> to vector<1x1x17x17xf32>
      tpu.vector_store %arg4[%c5_110, %c2_111, %c0_112, %c0_113], %223 {strides = array<i32>} : memref<8x3x17x17xf32, #tpu.memory_space<vmem>>, vector<1x1x17x17xf32>,
    } else {
    }
    %c3_i32_46 = arith.constant 3 : i32
    %94 = arith.cmpi eq, %18, %c3_i32_46 : i32
    %95 = arith.extui %94 : i1 to i32
    %c0_i32_47 = arith.constant 0 : i32
    %96 = arith.cmpi ne, %95, %c0_i32_47 : i32
    scf.if %96 {
      %196 = tpu.iota {dimensions = array<i32: 0>} : vector<17x17xi32>
      %197 = tpu.iota {dimensions = array<i32: 1>} : vector<17x17xi32>
      %198 = arith.addi %196, %197 : vector<17x17xi32>
      %c16_i32 = arith.constant 16 : i32
      %199 = vector.broadcast %c16_i32 : i32 to vector<17x17xi32>
      %200 = arith.cmpi eq, %198, %199 : vector<17x17xi32>
      %201 = arith.extui %200 : vector<17x17xi1> to vector<17x17xi32>
      %202 = arith.sitofp %201 : vector<17x17xi32> to vector<17x17xf32>
      %c5 = arith.constant 5 : index
      %c0_87 = arith.constant 0 : index
      %c0_88 = arith.constant 0 : index
      %c0_89 = arith.constant 0 : index
      %203 = vector.load %arg2[%c5, %c0_87, %c0_88, %c0_89] : memref<8x3x17x17xf32, #tpu.memory_space<vmem>>, vector<1x1x17x17xf32>
      %204 = vector.shape_cast %203 : vector<1x1x17x17xf32> to vector<17x17xf32>
      %205 = tpu.transpose %204, [1, 0] : vector<17x17xf32> -> vector<17x17xf32>
      %cst_90 = arith.constant dense<0.000000e+00> : vector<17x17xf32>
      %206 = tpu.matmul %205, %202, %cst_90 {dimension_numbers = #tpu.dot_dimension_numbers<[1], [0], [0], [1], [0, 0, 1, 1], [], []>} : vector<17x17xf32>, vector<17x17xf32>, vector<17x17xf32> -> vector<17x17xf32>
      %c5_91 = arith.constant 5 : index
      %c0_92 = arith.constant 0 : index
      %c0_93 = arith.constant 0 : index
      %c0_94 = arith.constant 0 : index
      %207 = vector.load %arg4[%c5_91, %c0_92, %c0_93, %c0_94] : memref<8x3x17x17xf32, #tpu.memory_space<vmem>>, vector<1x1x17x17xf32>
      %208 = vector.shape_cast %207 : vector<1x1x17x17xf32> to vector<17x17xf32>
      %209 = vector.shape_cast %206 : vector<17x17xf32> to vector<1x1x17x17xf32>
      tpu.vector_store %arg4[%c5_91, %c0_92, %c0_93, %c0_94], %209 {strides = array<i32>} : memref<8x3x17x17xf32, #tpu.memory_space<vmem>>, vector<1x1x17x17xf32>,
      %c5_95 = arith.constant 5 : index
      %c1 = arith.constant 1 : index
      %c0_96 = arith.constant 0 : index
      %c0_97 = arith.constant 0 : index
      %210 = vector.load %arg2[%c5_95, %c1, %c0_96, %c0_97] : memref<8x3x17x17xf32, #tpu.memory_space<vmem>>, vector<1x1x17x17xf32>
      %211 = vector.shape_cast %210 : vector<1x1x17x17xf32> to vector<17x17xf32>
      %212 = tpu.transpose %211, [1, 0] : vector<17x17xf32> -> vector<17x17xf32>
      %cst_98 = arith.constant dense<0.000000e+00> : vector<17x17xf32>
      %213 = tpu.matmul %212, %202, %cst_98 {dimension_numbers = #tpu.dot_dimension_numbers<[1], [0], [0], [1], [0, 0, 1, 1], [], []>} : vector<17x17xf32>, vector<17x17xf32>, vector<17x17xf32> -> vector<17x17xf32>
      %c5_99 = arith.constant 5 : index
      %c1_100 = arith.constant 1 : index
      %c0_101 = arith.constant 0 : index
      %c0_102 = arith.constant 0 : index
      %214 = vector.load %arg4[%c5_99, %c1_100, %c0_101, %c0_102] : memref<8x3x17x17xf32, #tpu.memory_space<vmem>>, vector<1x1x17x17xf32>
      %215 = vector.shape_cast %214 : vector<1x1x17x17xf32> to vector<17x17xf32>
      %216 = vector.shape_cast %213 : vector<17x17xf32> to vector<1x1x17x17xf32>
      tpu.vector_store %arg4[%c5_99, %c1_100, %c0_101, %c0_102], %216 {strides = array<i32>} : memref<8x3x17x17xf32, #tpu.memory_space<vmem>>, vector<1x1x17x17xf32>,
      %c5_103 = arith.constant 5 : index
      %c2 = arith.constant 2 : index
      %c0_104 = arith.constant 0 : index
      %c0_105 = arith.constant 0 : index
      %217 = vector.load %arg2[%c5_103, %c2, %c0_104, %c0_105] : memref<8x3x17x17xf32, #tpu.memory_space<vmem>>, vector<1x1x17x17xf32>
      %218 = vector.shape_cast %217 : vector<1x1x17x17xf32> to vector<17x17xf32>
      %219 = tpu.transpose %218, [1, 0] : vector<17x17xf32> -> vector<17x17xf32>
      %cst_106 = arith.constant dense<0.000000e+00> : vector<17x17xf32>
      %220 = tpu.matmul %219, %202, %cst_106 {dimension_numbers = #tpu.dot_dimension_numbers<[1], [0], [0], [1], [0, 0, 1, 1], [], []>} : vector<17x17xf32>, vector<17x17xf32>, vector<17x17xf32> -> vector<17x17xf32>
      %c5_107 = arith.constant 5 : index
      %c2_108 = arith.constant 2 : index
      %c0_109 = arith.constant 0 : index
      %c0_110 = arith.constant 0 : index
      %221 = vector.load %arg4[%c5_107, %c2_108, %c0_109, %c0_110] : memref<8x3x17x17xf32, #tpu.memory_space<vmem>>, vector<1x1x17x17xf32>
      %222 = vector.shape_cast %221 : vector<1x1x17x17xf32> to vector<17x17xf32>
      %223 = vector.shape_cast %220 : vector<17x17xf32> to vector<1x1x17x17xf32>
      tpu.vector_store %arg4[%c5_107, %c2_108, %c0_109, %c0_110], %223 {strides = array<i32>} : memref<8x3x17x17xf32, #tpu.memory_space<vmem>>, vector<1x1x17x17xf32>,
    } else {
    }
    %c0_i32_48 = arith.constant 0 : i32
    %97 = arith.cmpi eq, %21, %c0_i32_48 : i32
    %98 = arith.extui %97 : i1 to i32
    %c0_i32_49 = arith.constant 0 : i32
    %99 = arith.cmpi ne, %98, %c0_i32_49 : i32
    scf.if %99 {
      %c6 = arith.constant 6 : index
      %c0_87 = arith.constant 0 : index
      %c0_88 = arith.constant 0 : index
      %c0_89 = arith.constant 0 : index
      %196 = vector.load %arg2[%c6, %c0_87, %c0_88, %c0_89] : memref<8x3x17x17xf32, #tpu.memory_space<vmem>>, vector<1x3x17x17xf32>
      %197 = vector.shape_cast %196 : vector<1x3x17x17xf32> to vector<3x17x17xf32>
      %c6_90 = arith.constant 6 : index
      %c0_91 = arith.constant 0 : index
      %c0_92 = arith.constant 0 : index
      %c0_93 = arith.constant 0 : index
      %198 = vector.load %arg4[%c6_90, %c0_91, %c0_92, %c0_93] : memref<8x3x17x17xf32, #tpu.memory_space<vmem>>, vector<1x3x17x17xf32>
      %199 = vector.shape_cast %198 : vector<1x3x17x17xf32> to vector<3x17x17xf32>
      %200 = vector.shape_cast %197 : vector<3x17x17xf32> to vector<1x3x17x17xf32>
      tpu.vector_store %arg4[%c6_90, %c0_91, %c0_92, %c0_93], %200 {strides = array<i32>} : memref<8x3x17x17xf32, #tpu.memory_space<vmem>>, vector<1x3x17x17xf32>,
    } else {
    }
    %c1_i32_50 = arith.constant 1 : i32
    %100 = arith.cmpi eq, %21, %c1_i32_50 : i32
    %101 = arith.extui %100 : i1 to i32
    %c0_i32_51 = arith.constant 0 : i32
    %102 = arith.cmpi ne, %101, %c0_i32_51 : i32
    scf.if %102 {
      %196 = tpu.iota {dimensions = array<i32: 0>} : vector<17x17xi32>
      %197 = tpu.iota {dimensions = array<i32: 1>} : vector<17x17xi32>
      %198 = arith.addi %196, %197 : vector<17x17xi32>
      %c16_i32 = arith.constant 16 : i32
      %199 = vector.broadcast %c16_i32 : i32 to vector<17x17xi32>
      %200 = arith.cmpi eq, %198, %199 : vector<17x17xi32>
      %201 = arith.extui %200 : vector<17x17xi1> to vector<17x17xi32>
      %202 = arith.sitofp %201 : vector<17x17xi32> to vector<17x17xf32>
      %c6 = arith.constant 6 : index
      %c0_87 = arith.constant 0 : index
      %c0_88 = arith.constant 0 : index
      %c0_89 = arith.constant 0 : index
      %203 = vector.load %arg2[%c6, %c0_87, %c0_88, %c0_89] : memref<8x3x17x17xf32, #tpu.memory_space<vmem>>, vector<1x1x17x17xf32>
      %204 = vector.shape_cast %203 : vector<1x1x17x17xf32> to vector<17x17xf32>
      %cst_90 = arith.constant dense<0.000000e+00> : vector<17x17xf32>
      %205 = tpu.matmul %204, %202, %cst_90 {dimension_numbers = #tpu.dot_dimension_numbers<[1], [0], [0], [1], [0, 0, 1, 1], [], []>} : vector<17x17xf32>, vector<17x17xf32>, vector<17x17xf32> -> vector<17x17xf32>
      %206 = tpu.transpose %205, [1, 0] : vector<17x17xf32> -> vector<17x17xf32>
      %c6_91 = arith.constant 6 : index
      %c0_92 = arith.constant 0 : index
      %c0_93 = arith.constant 0 : index
      %c0_94 = arith.constant 0 : index
      %207 = vector.load %arg4[%c6_91, %c0_92, %c0_93, %c0_94] : memref<8x3x17x17xf32, #tpu.memory_space<vmem>>, vector<1x1x17x17xf32>
      %208 = vector.shape_cast %207 : vector<1x1x17x17xf32> to vector<17x17xf32>
      %209 = vector.shape_cast %206 : vector<17x17xf32> to vector<1x1x17x17xf32>
      tpu.vector_store %arg4[%c6_91, %c0_92, %c0_93, %c0_94], %209 {strides = array<i32>} : memref<8x3x17x17xf32, #tpu.memory_space<vmem>>, vector<1x1x17x17xf32>,
      %c6_95 = arith.constant 6 : index
      %c1 = arith.constant 1 : index
      %c0_96 = arith.constant 0 : index
      %c0_97 = arith.constant 0 : index
      %210 = vector.load %arg2[%c6_95, %c1, %c0_96, %c0_97] : memref<8x3x17x17xf32, #tpu.memory_space<vmem>>, vector<1x1x17x17xf32>
      %211 = vector.shape_cast %210 : vector<1x1x17x17xf32> to vector<17x17xf32>
      %cst_98 = arith.constant dense<0.000000e+00> : vector<17x17xf32>
      %212 = tpu.matmul %211, %202, %cst_98 {dimension_numbers = #tpu.dot_dimension_numbers<[1], [0], [0], [1], [0, 0, 1, 1], [], []>} : vector<17x17xf32>, vector<17x17xf32>, vector<17x17xf32> -> vector<17x17xf32>
      %213 = tpu.transpose %212, [1, 0] : vector<17x17xf32> -> vector<17x17xf32>
      %c6_99 = arith.constant 6 : index
      %c1_100 = arith.constant 1 : index
      %c0_101 = arith.constant 0 : index
      %c0_102 = arith.constant 0 : index
      %214 = vector.load %arg4[%c6_99, %c1_100, %c0_101, %c0_102] : memref<8x3x17x17xf32, #tpu.memory_space<vmem>>, vector<1x1x17x17xf32>
      %215 = vector.shape_cast %214 : vector<1x1x17x17xf32> to vector<17x17xf32>
      %216 = vector.shape_cast %213 : vector<17x17xf32> to vector<1x1x17x17xf32>
      tpu.vector_store %arg4[%c6_99, %c1_100, %c0_101, %c0_102], %216 {strides = array<i32>} : memref<8x3x17x17xf32, #tpu.memory_space<vmem>>, vector<1x1x17x17xf32>,
      %c6_103 = arith.constant 6 : index
      %c2 = arith.constant 2 : index
      %c0_104 = arith.constant 0 : index
      %c0_105 = arith.constant 0 : index
      %217 = vector.load %arg2[%c6_103, %c2, %c0_104, %c0_105] : memref<8x3x17x17xf32, #tpu.memory_space<vmem>>, vector<1x1x17x17xf32>
      %218 = vector.shape_cast %217 : vector<1x1x17x17xf32> to vector<17x17xf32>
      %cst_106 = arith.constant dense<0.000000e+00> : vector<17x17xf32>
      %219 = tpu.matmul %218, %202, %cst_106 {dimension_numbers = #tpu.dot_dimension_numbers<[1], [0], [0], [1], [0, 0, 1, 1], [], []>} : vector<17x17xf32>, vector<17x17xf32>, vector<17x17xf32> -> vector<17x17xf32>
      %220 = tpu.transpose %219, [1, 0] : vector<17x17xf32> -> vector<17x17xf32>
      %c6_107 = arith.constant 6 : index
      %c2_108 = arith.constant 2 : index
      %c0_109 = arith.constant 0 : index
      %c0_110 = arith.constant 0 : index
      %221 = vector.load %arg4[%c6_107, %c2_108, %c0_109, %c0_110] : memref<8x3x17x17xf32, #tpu.memory_space<vmem>>, vector<1x1x17x17xf32>
      %222 = vector.shape_cast %221 : vector<1x1x17x17xf32> to vector<17x17xf32>
      %223 = vector.shape_cast %220 : vector<17x17xf32> to vector<1x1x17x17xf32>
      tpu.vector_store %arg4[%c6_107, %c2_108, %c0_109, %c0_110], %223 {strides = array<i32>} : memref<8x3x17x17xf32, #tpu.memory_space<vmem>>, vector<1x1x17x17xf32>,
    } else {
    }
    %c2_i32_52 = arith.constant 2 : i32
    %103 = arith.cmpi eq, %21, %c2_i32_52 : i32
    %104 = arith.extui %103 : i1 to i32
    %c0_i32_53 = arith.constant 0 : i32
    %105 = arith.cmpi ne, %104, %c0_i32_53 : i32
    scf.if %105 {
      %196 = tpu.iota {dimensions = array<i32: 0>} : vector<17x17xi32>
      %197 = tpu.iota {dimensions = array<i32: 1>} : vector<17x17xi32>
      %198 = arith.addi %196, %197 : vector<17x17xi32>
      %c16_i32 = arith.constant 16 : i32
      %199 = vector.broadcast %c16_i32 : i32 to vector<17x17xi32>
      %200 = arith.cmpi eq, %198, %199 : vector<17x17xi32>
      %201 = arith.extui %200 : vector<17x17xi1> to vector<17x17xi32>
      %202 = arith.sitofp %201 : vector<17x17xi32> to vector<17x17xf32>
      %c6 = arith.constant 6 : index
      %c0_87 = arith.constant 0 : index
      %c0_88 = arith.constant 0 : index
      %c0_89 = arith.constant 0 : index
      %203 = vector.load %arg2[%c6, %c0_87, %c0_88, %c0_89] : memref<8x3x17x17xf32, #tpu.memory_space<vmem>>, vector<1x1x17x17xf32>
      %204 = vector.shape_cast %203 : vector<1x1x17x17xf32> to vector<17x17xf32>
      %cst_90 = arith.constant dense<0.000000e+00> : vector<17x17xf32>
      %205 = tpu.matmul %204, %202, %cst_90 {dimension_numbers = #tpu.dot_dimension_numbers<[1], [0], [0], [1], [0, 0, 1, 1], [], []>} : vector<17x17xf32>, vector<17x17xf32>, vector<17x17xf32> -> vector<17x17xf32>
      %cst_91 = arith.constant dense<0.000000e+00> : vector<17x17xf32>
      %206 = tpu.matmul %202, %205, %cst_91 {dimension_numbers = #tpu.dot_dimension_numbers<[1], [0], [0], [1], [0, 0, 1, 1], [], []>} : vector<17x17xf32>, vector<17x17xf32>, vector<17x17xf32> -> vector<17x17xf32>
      %c6_92 = arith.constant 6 : index
      %c0_93 = arith.constant 0 : index
      %c0_94 = arith.constant 0 : index
      %c0_95 = arith.constant 0 : index
      %207 = vector.load %arg4[%c6_92, %c0_93, %c0_94, %c0_95] : memref<8x3x17x17xf32, #tpu.memory_space<vmem>>, vector<1x1x17x17xf32>
      %208 = vector.shape_cast %207 : vector<1x1x17x17xf32> to vector<17x17xf32>
      %209 = vector.shape_cast %206 : vector<17x17xf32> to vector<1x1x17x17xf32>
      tpu.vector_store %arg4[%c6_92, %c0_93, %c0_94, %c0_95], %209 {strides = array<i32>} : memref<8x3x17x17xf32, #tpu.memory_space<vmem>>, vector<1x1x17x17xf32>,
      %c6_96 = arith.constant 6 : index
      %c1 = arith.constant 1 : index
      %c0_97 = arith.constant 0 : index
      %c0_98 = arith.constant 0 : index
      %210 = vector.load %arg2[%c6_96, %c1, %c0_97, %c0_98] : memref<8x3x17x17xf32, #tpu.memory_space<vmem>>, vector<1x1x17x17xf32>
      %211 = vector.shape_cast %210 : vector<1x1x17x17xf32> to vector<17x17xf32>
      %cst_99 = arith.constant dense<0.000000e+00> : vector<17x17xf32>
      %212 = tpu.matmul %211, %202, %cst_99 {dimension_numbers = #tpu.dot_dimension_numbers<[1], [0], [0], [1], [0, 0, 1, 1], [], []>} : vector<17x17xf32>, vector<17x17xf32>, vector<17x17xf32> -> vector<17x17xf32>
      %cst_100 = arith.constant dense<0.000000e+00> : vector<17x17xf32>
      %213 = tpu.matmul %202, %212, %cst_100 {dimension_numbers = #tpu.dot_dimension_numbers<[1], [0], [0], [1], [0, 0, 1, 1], [], []>} : vector<17x17xf32>, vector<17x17xf32>, vector<17x17xf32> -> vector<17x17xf32>
      %c6_101 = arith.constant 6 : index
      %c1_102 = arith.constant 1 : index
      %c0_103 = arith.constant 0 : index
      %c0_104 = arith.constant 0 : index
      %214 = vector.load %arg4[%c6_101, %c1_102, %c0_103, %c0_104] : memref<8x3x17x17xf32, #tpu.memory_space<vmem>>, vector<1x1x17x17xf32>
      %215 = vector.shape_cast %214 : vector<1x1x17x17xf32> to vector<17x17xf32>
      %216 = vector.shape_cast %213 : vector<17x17xf32> to vector<1x1x17x17xf32>
      tpu.vector_store %arg4[%c6_101, %c1_102, %c0_103, %c0_104], %216 {strides = array<i32>} : memref<8x3x17x17xf32, #tpu.memory_space<vmem>>, vector<1x1x17x17xf32>,
      %c6_105 = arith.constant 6 : index
      %c2 = arith.constant 2 : index
      %c0_106 = arith.constant 0 : index
      %c0_107 = arith.constant 0 : index
      %217 = vector.load %arg2[%c6_105, %c2, %c0_106, %c0_107] : memref<8x3x17x17xf32, #tpu.memory_space<vmem>>, vector<1x1x17x17xf32>
      %218 = vector.shape_cast %217 : vector<1x1x17x17xf32> to vector<17x17xf32>
      %cst_108 = arith.constant dense<0.000000e+00> : vector<17x17xf32>
      %219 = tpu.matmul %218, %202, %cst_108 {dimension_numbers = #tpu.dot_dimension_numbers<[1], [0], [0], [1], [0, 0, 1, 1], [], []>} : vector<17x17xf32>, vector<17x17xf32>, vector<17x17xf32> -> vector<17x17xf32>
      %cst_109 = arith.constant dense<0.000000e+00> : vector<17x17xf32>
      %220 = tpu.matmul %202, %219, %cst_109 {dimension_numbers = #tpu.dot_dimension_numbers<[1], [0], [0], [1], [0, 0, 1, 1], [], []>} : vector<17x17xf32>, vector<17x17xf32>, vector<17x17xf32> -> vector<17x17xf32>
      %c6_110 = arith.constant 6 : index
      %c2_111 = arith.constant 2 : index
      %c0_112 = arith.constant 0 : index
      %c0_113 = arith.constant 0 : index
      %221 = vector.load %arg4[%c6_110, %c2_111, %c0_112, %c0_113] : memref<8x3x17x17xf32, #tpu.memory_space<vmem>>, vector<1x1x17x17xf32>
      %222 = vector.shape_cast %221 : vector<1x1x17x17xf32> to vector<17x17xf32>
      %223 = vector.shape_cast %220 : vector<17x17xf32> to vector<1x1x17x17xf32>
      tpu.vector_store %arg4[%c6_110, %c2_111, %c0_112, %c0_113], %223 {strides = array<i32>} : memref<8x3x17x17xf32, #tpu.memory_space<vmem>>, vector<1x1x17x17xf32>,
    } else {
    }
    %c3_i32_54 = arith.constant 3 : i32
    %106 = arith.cmpi eq, %21, %c3_i32_54 : i32
    %107 = arith.extui %106 : i1 to i32
    %c0_i32_55 = arith.constant 0 : i32
    %108 = arith.cmpi ne, %107, %c0_i32_55 : i32
    scf.if %108 {
      %196 = tpu.iota {dimensions = array<i32: 0>} : vector<17x17xi32>
      %197 = tpu.iota {dimensions = array<i32: 1>} : vector<17x17xi32>
      %198 = arith.addi %196, %197 : vector<17x17xi32>
      %c16_i32 = arith.constant 16 : i32
      %199 = vector.broadcast %c16_i32 : i32 to vector<17x17xi32>
      %200 = arith.cmpi eq, %198, %199 : vector<17x17xi32>
      %201 = arith.extui %200 : vector<17x17xi1> to vector<17x17xi32>
      %202 = arith.sitofp %201 : vector<17x17xi32> to vector<17x17xf32>
      %c6 = arith.constant 6 : index
      %c0_87 = arith.constant 0 : index
      %c0_88 = arith.constant 0 : index
      %c0_89 = arith.constant 0 : index
      %203 = vector.load %arg2[%c6, %c0_87, %c0_88, %c0_89] : memref<8x3x17x17xf32, #tpu.memory_space<vmem>>, vector<1x1x17x17xf32>
      %204 = vector.shape_cast %203 : vector<1x1x17x17xf32> to vector<17x17xf32>
      %205 = tpu.transpose %204, [1, 0] : vector<17x17xf32> -> vector<17x17xf32>
      %cst_90 = arith.constant dense<0.000000e+00> : vector<17x17xf32>
      %206 = tpu.matmul %205, %202, %cst_90 {dimension_numbers = #tpu.dot_dimension_numbers<[1], [0], [0], [1], [0, 0, 1, 1], [], []>} : vector<17x17xf32>, vector<17x17xf32>, vector<17x17xf32> -> vector<17x17xf32>
      %c6_91 = arith.constant 6 : index
      %c0_92 = arith.constant 0 : index
      %c0_93 = arith.constant 0 : index
      %c0_94 = arith.constant 0 : index
      %207 = vector.load %arg4[%c6_91, %c0_92, %c0_93, %c0_94] : memref<8x3x17x17xf32, #tpu.memory_space<vmem>>, vector<1x1x17x17xf32>
      %208 = vector.shape_cast %207 : vector<1x1x17x17xf32> to vector<17x17xf32>
      %209 = vector.shape_cast %206 : vector<17x17xf32> to vector<1x1x17x17xf32>
      tpu.vector_store %arg4[%c6_91, %c0_92, %c0_93, %c0_94], %209 {strides = array<i32>} : memref<8x3x17x17xf32, #tpu.memory_space<vmem>>, vector<1x1x17x17xf32>,
      %c6_95 = arith.constant 6 : index
      %c1 = arith.constant 1 : index
      %c0_96 = arith.constant 0 : index
      %c0_97 = arith.constant 0 : index
      %210 = vector.load %arg2[%c6_95, %c1, %c0_96, %c0_97] : memref<8x3x17x17xf32, #tpu.memory_space<vmem>>, vector<1x1x17x17xf32>
      %211 = vector.shape_cast %210 : vector<1x1x17x17xf32> to vector<17x17xf32>
      %212 = tpu.transpose %211, [1, 0] : vector<17x17xf32> -> vector<17x17xf32>
      %cst_98 = arith.constant dense<0.000000e+00> : vector<17x17xf32>
      %213 = tpu.matmul %212, %202, %cst_98 {dimension_numbers = #tpu.dot_dimension_numbers<[1], [0], [0], [1], [0, 0, 1, 1], [], []>} : vector<17x17xf32>, vector<17x17xf32>, vector<17x17xf32> -> vector<17x17xf32>
      %c6_99 = arith.constant 6 : index
      %c1_100 = arith.constant 1 : index
      %c0_101 = arith.constant 0 : index
      %c0_102 = arith.constant 0 : index
      %214 = vector.load %arg4[%c6_99, %c1_100, %c0_101, %c0_102] : memref<8x3x17x17xf32, #tpu.memory_space<vmem>>, vector<1x1x17x17xf32>
      %215 = vector.shape_cast %214 : vector<1x1x17x17xf32> to vector<17x17xf32>
      %216 = vector.shape_cast %213 : vector<17x17xf32> to vector<1x1x17x17xf32>
      tpu.vector_store %arg4[%c6_99, %c1_100, %c0_101, %c0_102], %216 {strides = array<i32>} : memref<8x3x17x17xf32, #tpu.memory_space<vmem>>, vector<1x1x17x17xf32>,
      %c6_103 = arith.constant 6 : index
      %c2 = arith.constant 2 : index
      %c0_104 = arith.constant 0 : index
      %c0_105 = arith.constant 0 : index
      %217 = vector.load %arg2[%c6_103, %c2, %c0_104, %c0_105] : memref<8x3x17x17xf32, #tpu.memory_space<vmem>>, vector<1x1x17x17xf32>
      %218 = vector.shape_cast %217 : vector<1x1x17x17xf32> to vector<17x17xf32>
      %219 = tpu.transpose %218, [1, 0] : vector<17x17xf32> -> vector<17x17xf32>
      %cst_106 = arith.constant dense<0.000000e+00> : vector<17x17xf32>
      %220 = tpu.matmul %219, %202, %cst_106 {dimension_numbers = #tpu.dot_dimension_numbers<[1], [0], [0], [1], [0, 0, 1, 1], [], []>} : vector<17x17xf32>, vector<17x17xf32>, vector<17x17xf32> -> vector<17x17xf32>
      %c6_107 = arith.constant 6 : index
      %c2_108 = arith.constant 2 : index
      %c0_109 = arith.constant 0 : index
      %c0_110 = arith.constant 0 : index
      %221 = vector.load %arg4[%c6_107, %c2_108, %c0_109, %c0_110] : memref<8x3x17x17xf32, #tpu.memory_space<vmem>>, vector<1x1x17x17xf32>
      %222 = vector.shape_cast %221 : vector<1x1x17x17xf32> to vector<17x17xf32>
      %223 = vector.shape_cast %220 : vector<17x17xf32> to vector<1x1x17x17xf32>
      tpu.vector_store %arg4[%c6_107, %c2_108, %c0_109, %c0_110], %223 {strides = array<i32>} : memref<8x3x17x17xf32, #tpu.memory_space<vmem>>, vector<1x1x17x17xf32>,
    } else {
    }
    %c0_i32_56 = arith.constant 0 : i32
    %109 = arith.cmpi eq, %24, %c0_i32_56 : i32
    %110 = arith.extui %109 : i1 to i32
    %c0_i32_57 = arith.constant 0 : i32
    %111 = arith.cmpi ne, %110, %c0_i32_57 : i32
    scf.if %111 {
      %c7 = arith.constant 7 : index
      %c0_87 = arith.constant 0 : index
      %c0_88 = arith.constant 0 : index
      %c0_89 = arith.constant 0 : index
      %196 = vector.load %arg2[%c7, %c0_87, %c0_88, %c0_89] : memref<8x3x17x17xf32, #tpu.memory_space<vmem>>, vector<1x3x17x17xf32>
      %197 = vector.shape_cast %196 : vector<1x3x17x17xf32> to vector<3x17x17xf32>
      %c7_90 = arith.constant 7 : index
      %c0_91 = arith.constant 0 : index
      %c0_92 = arith.constant 0 : index
      %c0_93 = arith.constant 0 : index
      %198 = vector.load %arg4[%c7_90, %c0_91, %c0_92, %c0_93] : memref<8x3x17x17xf32, #tpu.memory_space<vmem>>, vector<1x3x17x17xf32>
      %199 = vector.shape_cast %198 : vector<1x3x17x17xf32> to vector<3x17x17xf32>
      %200 = vector.shape_cast %197 : vector<3x17x17xf32> to vector<1x3x17x17xf32>
      tpu.vector_store %arg4[%c7_90, %c0_91, %c0_92, %c0_93], %200 {strides = array<i32>} : memref<8x3x17x17xf32, #tpu.memory_space<vmem>>, vector<1x3x17x17xf32>,
    } else {
    }
    %c1_i32_58 = arith.constant 1 : i32
    %112 = arith.cmpi eq, %24, %c1_i32_58 : i32
    %113 = arith.extui %112 : i1 to i32
    %c0_i32_59 = arith.constant 0 : i32
    %114 = arith.cmpi ne, %113, %c0_i32_59 : i32
    scf.if %114 {
      %196 = tpu.iota {dimensions = array<i32: 0>} : vector<17x17xi32>
      %197 = tpu.iota {dimensions = array<i32: 1>} : vector<17x17xi32>
      %198 = arith.addi %196, %197 : vector<17x17xi32>
      %c16_i32 = arith.constant 16 : i32
      %199 = vector.broadcast %c16_i32 : i32 to vector<17x17xi32>
      %200 = arith.cmpi eq, %198, %199 : vector<17x17xi32>
      %201 = arith.extui %200 : vector<17x17xi1> to vector<17x17xi32>
      %202 = arith.sitofp %201 : vector<17x17xi32> to vector<17x17xf32>
      %c7 = arith.constant 7 : index
      %c0_87 = arith.constant 0 : index
      %c0_88 = arith.constant 0 : index
      %c0_89 = arith.constant 0 : index
      %203 = vector.load %arg2[%c7, %c0_87, %c0_88, %c0_89] : memref<8x3x17x17xf32, #tpu.memory_space<vmem>>, vector<1x1x17x17xf32>
      %204 = vector.shape_cast %203 : vector<1x1x17x17xf32> to vector<17x17xf32>
      %cst_90 = arith.constant dense<0.000000e+00> : vector<17x17xf32>
      %205 = tpu.matmul %204, %202, %cst_90 {dimension_numbers = #tpu.dot_dimension_numbers<[1], [0], [0], [1], [0, 0, 1, 1], [], []>} : vector<17x17xf32>, vector<17x17xf32>, vector<17x17xf32> -> vector<17x17xf32>
      %206 = tpu.transpose %205, [1, 0] : vector<17x17xf32> -> vector<17x17xf32>
      %c7_91 = arith.constant 7 : index
      %c0_92 = arith.constant 0 : index
      %c0_93 = arith.constant 0 : index
      %c0_94 = arith.constant 0 : index
      %207 = vector.load %arg4[%c7_91, %c0_92, %c0_93, %c0_94] : memref<8x3x17x17xf32, #tpu.memory_space<vmem>>, vector<1x1x17x17xf32>
      %208 = vector.shape_cast %207 : vector<1x1x17x17xf32> to vector<17x17xf32>
      %209 = vector.shape_cast %206 : vector<17x17xf32> to vector<1x1x17x17xf32>
      tpu.vector_store %arg4[%c7_91, %c0_92, %c0_93, %c0_94], %209 {strides = array<i32>} : memref<8x3x17x17xf32, #tpu.memory_space<vmem>>, vector<1x1x17x17xf32>,
      %c7_95 = arith.constant 7 : index
      %c1 = arith.constant 1 : index
      %c0_96 = arith.constant 0 : index
      %c0_97 = arith.constant 0 : index
      %210 = vector.load %arg2[%c7_95, %c1, %c0_96, %c0_97] : memref<8x3x17x17xf32, #tpu.memory_space<vmem>>, vector<1x1x17x17xf32>
      %211 = vector.shape_cast %210 : vector<1x1x17x17xf32> to vector<17x17xf32>
      %cst_98 = arith.constant dense<0.000000e+00> : vector<17x17xf32>
      %212 = tpu.matmul %211, %202, %cst_98 {dimension_numbers = #tpu.dot_dimension_numbers<[1], [0], [0], [1], [0, 0, 1, 1], [], []>} : vector<17x17xf32>, vector<17x17xf32>, vector<17x17xf32> -> vector<17x17xf32>
      %213 = tpu.transpose %212, [1, 0] : vector<17x17xf32> -> vector<17x17xf32>
      %c7_99 = arith.constant 7 : index
      %c1_100 = arith.constant 1 : index
      %c0_101 = arith.constant 0 : index
      %c0_102 = arith.constant 0 : index
      %214 = vector.load %arg4[%c7_99, %c1_100, %c0_101, %c0_102] : memref<8x3x17x17xf32, #tpu.memory_space<vmem>>, vector<1x1x17x17xf32>
      %215 = vector.shape_cast %214 : vector<1x1x17x17xf32> to vector<17x17xf32>
      %216 = vector.shape_cast %213 : vector<17x17xf32> to vector<1x1x17x17xf32>
      tpu.vector_store %arg4[%c7_99, %c1_100, %c0_101, %c0_102], %216 {strides = array<i32>} : memref<8x3x17x17xf32, #tpu.memory_space<vmem>>, vector<1x1x17x17xf32>,
      %c7_103 = arith.constant 7 : index
      %c2 = arith.constant 2 : index
      %c0_104 = arith.constant 0 : index
      %c0_105 = arith.constant 0 : index
      %217 = vector.load %arg2[%c7_103, %c2, %c0_104, %c0_105] : memref<8x3x17x17xf32, #tpu.memory_space<vmem>>, vector<1x1x17x17xf32>
      %218 = vector.shape_cast %217 : vector<1x1x17x17xf32> to vector<17x17xf32>
      %cst_106 = arith.constant dense<0.000000e+00> : vector<17x17xf32>
      %219 = tpu.matmul %218, %202, %cst_106 {dimension_numbers = #tpu.dot_dimension_numbers<[1], [0], [0], [1], [0, 0, 1, 1], [], []>} : vector<17x17xf32>, vector<17x17xf32>, vector<17x17xf32> -> vector<17x17xf32>
      %220 = tpu.transpose %219, [1, 0] : vector<17x17xf32> -> vector<17x17xf32>
      %c7_107 = arith.constant 7 : index
      %c2_108 = arith.constant 2 : index
      %c0_109 = arith.constant 0 : index
      %c0_110 = arith.constant 0 : index
      %221 = vector.load %arg4[%c7_107, %c2_108, %c0_109, %c0_110] : memref<8x3x17x17xf32, #tpu.memory_space<vmem>>, vector<1x1x17x17xf32>
      %222 = vector.shape_cast %221 : vector<1x1x17x17xf32> to vector<17x17xf32>
      %223 = vector.shape_cast %220 : vector<17x17xf32> to vector<1x1x17x17xf32>
      tpu.vector_store %arg4[%c7_107, %c2_108, %c0_109, %c0_110], %223 {strides = array<i32>} : memref<8x3x17x17xf32, #tpu.memory_space<vmem>>, vector<1x1x17x17xf32>,
    } else {
    }
    %c2_i32_60 = arith.constant 2 : i32
    %115 = arith.cmpi eq, %24, %c2_i32_60 : i32
    %116 = arith.extui %115 : i1 to i32
    %c0_i32_61 = arith.constant 0 : i32
    %117 = arith.cmpi ne, %116, %c0_i32_61 : i32
    scf.if %117 {
      %196 = tpu.iota {dimensions = array<i32: 0>} : vector<17x17xi32>
      %197 = tpu.iota {dimensions = array<i32: 1>} : vector<17x17xi32>
      %198 = arith.addi %196, %197 : vector<17x17xi32>
      %c16_i32 = arith.constant 16 : i32
      %199 = vector.broadcast %c16_i32 : i32 to vector<17x17xi32>
      %200 = arith.cmpi eq, %198, %199 : vector<17x17xi32>
      %201 = arith.extui %200 : vector<17x17xi1> to vector<17x17xi32>
      %202 = arith.sitofp %201 : vector<17x17xi32> to vector<17x17xf32>
      %c7 = arith.constant 7 : index
      %c0_87 = arith.constant 0 : index
      %c0_88 = arith.constant 0 : index
      %c0_89 = arith.constant 0 : index
      %203 = vector.load %arg2[%c7, %c0_87, %c0_88, %c0_89] : memref<8x3x17x17xf32, #tpu.memory_space<vmem>>, vector<1x1x17x17xf32>
      %204 = vector.shape_cast %203 : vector<1x1x17x17xf32> to vector<17x17xf32>
      %cst_90 = arith.constant dense<0.000000e+00> : vector<17x17xf32>
      %205 = tpu.matmul %204, %202, %cst_90 {dimension_numbers = #tpu.dot_dimension_numbers<[1], [0], [0], [1], [0, 0, 1, 1], [], []>} : vector<17x17xf32>, vector<17x17xf32>, vector<17x17xf32> -> vector<17x17xf32>
      %cst_91 = arith.constant dense<0.000000e+00> : vector<17x17xf32>
      %206 = tpu.matmul %202, %205, %cst_91 {dimension_numbers = #tpu.dot_dimension_numbers<[1], [0], [0], [1], [0, 0, 1, 1], [], []>} : vector<17x17xf32>, vector<17x17xf32>, vector<17x17xf32> -> vector<17x17xf32>
      %c7_92 = arith.constant 7 : index
      %c0_93 = arith.constant 0 : index
      %c0_94 = arith.constant 0 : index
      %c0_95 = arith.constant 0 : index
      %207 = vector.load %arg4[%c7_92, %c0_93, %c0_94, %c0_95] : memref<8x3x17x17xf32, #tpu.memory_space<vmem>>, vector<1x1x17x17xf32>
      %208 = vector.shape_cast %207 : vector<1x1x17x17xf32> to vector<17x17xf32>
      %209 = vector.shape_cast %206 : vector<17x17xf32> to vector<1x1x17x17xf32>
      tpu.vector_store %arg4[%c7_92, %c0_93, %c0_94, %c0_95], %209 {strides = array<i32>} : memref<8x3x17x17xf32, #tpu.memory_space<vmem>>, vector<1x1x17x17xf32>,
      %c7_96 = arith.constant 7 : index
      %c1 = arith.constant 1 : index
      %c0_97 = arith.constant 0 : index
      %c0_98 = arith.constant 0 : index
      %210 = vector.load %arg2[%c7_96, %c1, %c0_97, %c0_98] : memref<8x3x17x17xf32, #tpu.memory_space<vmem>>, vector<1x1x17x17xf32>
      %211 = vector.shape_cast %210 : vector<1x1x17x17xf32> to vector<17x17xf32>
      %cst_99 = arith.constant dense<0.000000e+00> : vector<17x17xf32>
      %212 = tpu.matmul %211, %202, %cst_99 {dimension_numbers = #tpu.dot_dimension_numbers<[1], [0], [0], [1], [0, 0, 1, 1], [], []>} : vector<17x17xf32>, vector<17x17xf32>, vector<17x17xf32> -> vector<17x17xf32>
      %cst_100 = arith.constant dense<0.000000e+00> : vector<17x17xf32>
      %213 = tpu.matmul %202, %212, %cst_100 {dimension_numbers = #tpu.dot_dimension_numbers<[1], [0], [0], [1], [0, 0, 1, 1], [], []>} : vector<17x17xf32>, vector<17x17xf32>, vector<17x17xf32> -> vector<17x17xf32>
      %c7_101 = arith.constant 7 : index
      %c1_102 = arith.constant 1 : index
      %c0_103 = arith.constant 0 : index
      %c0_104 = arith.constant 0 : index
      %214 = vector.load %arg4[%c7_101, %c1_102, %c0_103, %c0_104] : memref<8x3x17x17xf32, #tpu.memory_space<vmem>>, vector<1x1x17x17xf32>
      %215 = vector.shape_cast %214 : vector<1x1x17x17xf32> to vector<17x17xf32>
      %216 = vector.shape_cast %213 : vector<17x17xf32> to vector<1x1x17x17xf32>
      tpu.vector_store %arg4[%c7_101, %c1_102, %c0_103, %c0_104], %216 {strides = array<i32>} : memref<8x3x17x17xf32, #tpu.memory_space<vmem>>, vector<1x1x17x17xf32>,
      %c7_105 = arith.constant 7 : index
      %c2 = arith.constant 2 : index
      %c0_106 = arith.constant 0 : index
      %c0_107 = arith.constant 0 : index
      %217 = vector.load %arg2[%c7_105, %c2, %c0_106, %c0_107] : memref<8x3x17x17xf32, #tpu.memory_space<vmem>>, vector<1x1x17x17xf32>
      %218 = vector.shape_cast %217 : vector<1x1x17x17xf32> to vector<17x17xf32>
      %cst_108 = arith.constant dense<0.000000e+00> : vector<17x17xf32>
      %219 = tpu.matmul %218, %202, %cst_108 {dimension_numbers = #tpu.dot_dimension_numbers<[1], [0], [0], [1], [0, 0, 1, 1], [], []>} : vector<17x17xf32>, vector<17x17xf32>, vector<17x17xf32> -> vector<17x17xf32>
      %cst_109 = arith.constant dense<0.000000e+00> : vector<17x17xf32>
      %220 = tpu.matmul %202, %219, %cst_109 {dimension_numbers = #tpu.dot_dimension_numbers<[1], [0], [0], [1], [0, 0, 1, 1], [], []>} : vector<17x17xf32>, vector<17x17xf32>, vector<17x17xf32> -> vector<17x17xf32>
      %c7_110 = arith.constant 7 : index
      %c2_111 = arith.constant 2 : index
      %c0_112 = arith.constant 0 : index
      %c0_113 = arith.constant 0 : index
      %221 = vector.load %arg4[%c7_110, %c2_111, %c0_112, %c0_113] : memref<8x3x17x17xf32, #tpu.memory_space<vmem>>, vector<1x1x17x17xf32>
      %222 = vector.shape_cast %221 : vector<1x1x17x17xf32> to vector<17x17xf32>
      %223 = vector.shape_cast %220 : vector<17x17xf32> to vector<1x1x17x17xf32>
      tpu.vector_store %arg4[%c7_110, %c2_111, %c0_112, %c0_113], %223 {strides = array<i32>} : memref<8x3x17x17xf32, #tpu.memory_space<vmem>>, vector<1x1x17x17xf32>,
    } else {
    }
    %c3_i32_62 = arith.constant 3 : i32
    %118 = arith.cmpi eq, %24, %c3_i32_62 : i32
    %119 = arith.extui %118 : i1 to i32
    %c0_i32_63 = arith.constant 0 : i32
    %120 = arith.cmpi ne, %119, %c0_i32_63 : i32
    scf.if %120 {
      %196 = tpu.iota {dimensions = array<i32: 0>} : vector<17x17xi32>
      %197 = tpu.iota {dimensions = array<i32: 1>} : vector<17x17xi32>
      %198 = arith.addi %196, %197 : vector<17x17xi32>
      %c16_i32 = arith.constant 16 : i32
      %199 = vector.broadcast %c16_i32 : i32 to vector<17x17xi32>
      %200 = arith.cmpi eq, %198, %199 : vector<17x17xi32>
      %201 = arith.extui %200 : vector<17x17xi1> to vector<17x17xi32>
      %202 = arith.sitofp %201 : vector<17x17xi32> to vector<17x17xf32>
      %c7 = arith.constant 7 : index
      %c0_87 = arith.constant 0 : index
      %c0_88 = arith.constant 0 : index
      %c0_89 = arith.constant 0 : index
      %203 = vector.load %arg2[%c7, %c0_87, %c0_88, %c0_89] : memref<8x3x17x17xf32, #tpu.memory_space<vmem>>, vector<1x1x17x17xf32>
      %204 = vector.shape_cast %203 : vector<1x1x17x17xf32> to vector<17x17xf32>
      %205 = tpu.transpose %204, [1, 0] : vector<17x17xf32> -> vector<17x17xf32>
      %cst_90 = arith.constant dense<0.000000e+00> : vector<17x17xf32>
      %206 = tpu.matmul %205, %202, %cst_90 {dimension_numbers = #tpu.dot_dimension_numbers<[1], [0], [0], [1], [0, 0, 1, 1], [], []>} : vector<17x17xf32>, vector<17x17xf32>, vector<17x17xf32> -> vector<17x17xf32>
      %c7_91 = arith.constant 7 : index
      %c0_92 = arith.constant 0 : index
      %c0_93 = arith.constant 0 : index
      %c0_94 = arith.constant 0 : index
      %207 = vector.load %arg4[%c7_91, %c0_92, %c0_93, %c0_94] : memref<8x3x17x17xf32, #tpu.memory_space<vmem>>, vector<1x1x17x17xf32>
      %208 = vector.shape_cast %207 : vector<1x1x17x17xf32> to vector<17x17xf32>
      %209 = vector.shape_cast %206 : vector<17x17xf32> to vector<1x1x17x17xf32>
      tpu.vector_store %arg4[%c7_91, %c0_92, %c0_93, %c0_94], %209 {strides = array<i32>} : memref<8x3x17x17xf32, #tpu.memory_space<vmem>>, vector<1x1x17x17xf32>,
      %c7_95 = arith.constant 7 : index
      %c1 = arith.constant 1 : index
      %c0_96 = arith.constant 0 : index
      %c0_97 = arith.constant 0 : index
      %210 = vector.load %arg2[%c7_95, %c1, %c0_96, %c0_97] : memref<8x3x17x17xf32, #tpu.memory_space<vmem>>, vector<1x1x17x17xf32>
      %211 = vector.shape_cast %210 : vector<1x1x17x17xf32> to vector<17x17xf32>
      %212 = tpu.transpose %211, [1, 0] : vector<17x17xf32> -> vector<17x17xf32>
      %cst_98 = arith.constant dense<0.000000e+00> : vector<17x17xf32>
      %213 = tpu.matmul %212, %202, %cst_98 {dimension_numbers = #tpu.dot_dimension_numbers<[1], [0], [0], [1], [0, 0, 1, 1], [], []>} : vector<17x17xf32>, vector<17x17xf32>, vector<17x17xf32> -> vector<17x17xf32>
      %c7_99 = arith.constant 7 : index
      %c1_100 = arith.constant 1 : index
      %c0_101 = arith.constant 0 : index
      %c0_102 = arith.constant 0 : index
      %214 = vector.load %arg4[%c7_99, %c1_100, %c0_101, %c0_102] : memref<8x3x17x17xf32, #tpu.memory_space<vmem>>, vector<1x1x17x17xf32>
      %215 = vector.shape_cast %214 : vector<1x1x17x17xf32> to vector<17x17xf32>
      %216 = vector.shape_cast %213 : vector<17x17xf32> to vector<1x1x17x17xf32>
      tpu.vector_store %arg4[%c7_99, %c1_100, %c0_101, %c0_102], %216 {strides = array<i32>} : memref<8x3x17x17xf32, #tpu.memory_space<vmem>>, vector<1x1x17x17xf32>,
      %c7_103 = arith.constant 7 : index
      %c2 = arith.constant 2 : index
      %c0_104 = arith.constant 0 : index
      %c0_105 = arith.constant 0 : index
      %217 = vector.load %arg2[%c7_103, %c2, %c0_104, %c0_105] : memref<8x3x17x17xf32, #tpu.memory_space<vmem>>, vector<1x1x17x17xf32>
      %218 = vector.shape_cast %217 : vector<1x1x17x17xf32> to vector<17x17xf32>
      %219 = tpu.transpose %218, [1, 0] : vector<17x17xf32> -> vector<17x17xf32>
      %cst_106 = arith.constant dense<0.000000e+00> : vector<17x17xf32>
      %220 = tpu.matmul %219, %202, %cst_106 {dimension_numbers = #tpu.dot_dimension_numbers<[1], [0], [0], [1], [0, 0, 1, 1], [], []>} : vector<17x17xf32>, vector<17x17xf32>, vector<17x17xf32> -> vector<17x17xf32>
      %c7_107 = arith.constant 7 : index
      %c2_108 = arith.constant 2 : index
      %c0_109 = arith.constant 0 : index
      %c0_110 = arith.constant 0 : index
      %221 = vector.load %arg4[%c7_107, %c2_108, %c0_109, %c0_110] : memref<8x3x17x17xf32, #tpu.memory_space<vmem>>, vector<1x1x17x17xf32>
      %222 = vector.shape_cast %221 : vector<1x1x17x17xf32> to vector<17x17xf32>
      %223 = vector.shape_cast %220 : vector<17x17xf32> to vector<1x1x17x17xf32>
      tpu.vector_store %arg4[%c7_107, %c2_108, %c0_109, %c0_110], %223 {strides = array<i32>} : memref<8x3x17x17xf32, #tpu.memory_space<vmem>>, vector<1x1x17x17xf32>,
    } else {
    }
    %c0 = arith.constant 0 : index
    %c0_64 = arith.constant 0 : index
    %121 = vector.load %arg3[%c0, %c0_64] : memref<8x3xf32, #tpu.memory_space<vmem>>, vector<8x3xf32>
    %122 = tpu.iota {dimensions = array<i32: 0>} : vector<8x1xi32>
    %c0_i32_65 = arith.constant 0 : i32
    %123 = vector.broadcast %c0_i32_65 : i32 to vector<8x1xi32>
    %c0_i32_66 = arith.constant 0 : i32
    %124 = vector.broadcast %c0_i32_66 : i32 to vector<8x1xi32>
    %125 = arith.cmpi eq, %122, %124 : vector<8x1xi32>
    %126 = vector.broadcast %3 : i32 to vector<8x1xi32>
    %127 = arith.select %125, %126, %123 : vector<8x1xi1>, vector<8x1xi32>
    %c1_i32_67 = arith.constant 1 : i32
    %128 = vector.broadcast %c1_i32_67 : i32 to vector<8x1xi32>
    %129 = arith.cmpi eq, %122, %128 : vector<8x1xi32>
    %130 = vector.broadcast %6 : i32 to vector<8x1xi32>
    %131 = arith.select %129, %130, %127 : vector<8x1xi1>, vector<8x1xi32>
    %c2_i32_68 = arith.constant 2 : i32
    %132 = vector.broadcast %c2_i32_68 : i32 to vector<8x1xi32>
    %133 = arith.cmpi eq, %122, %132 : vector<8x1xi32>
    %134 = vector.broadcast %9 : i32 to vector<8x1xi32>
    %135 = arith.select %133, %134, %131 : vector<8x1xi1>, vector<8x1xi32>
    %c3_i32_69 = arith.constant 3 : i32
    %136 = vector.broadcast %c3_i32_69 : i32 to vector<8x1xi32>
    %137 = arith.cmpi eq, %122, %136 : vector<8x1xi32>
    %138 = vector.broadcast %12 : i32 to vector<8x1xi32>
    %139 = arith.select %137, %138, %135 : vector<8x1xi1>, vector<8x1xi32>
    %c4_i32_70 = arith.constant 4 : i32
    %140 = vector.broadcast %c4_i32_70 : i32 to vector<8x1xi32>
    %141 = arith.cmpi eq, %122, %140 : vector<8x1xi32>
    %142 = vector.broadcast %15 : i32 to vector<8x1xi32>
    %143 = arith.select %141, %142, %139 : vector<8x1xi1>, vector<8x1xi32>
    %c5_i32_71 = arith.constant 5 : i32
    %144 = vector.broadcast %c5_i32_71 : i32 to vector<8x1xi32>
    %145 = arith.cmpi eq, %122, %144 : vector<8x1xi32>
    %146 = vector.broadcast %18 : i32 to vector<8x1xi32>
    %147 = arith.select %145, %146, %143 : vector<8x1xi1>, vector<8x1xi32>
    %c6_i32_72 = arith.constant 6 : i32
    %148 = vector.broadcast %c6_i32_72 : i32 to vector<8x1xi32>
    %149 = arith.cmpi eq, %122, %148 : vector<8x1xi32>
    %150 = vector.broadcast %21 : i32 to vector<8x1xi32>
    %151 = arith.select %149, %150, %147 : vector<8x1xi1>, vector<8x1xi32>
    %c7_i32_73 = arith.constant 7 : i32
    %152 = vector.broadcast %c7_i32_73 : i32 to vector<8x1xi32>
    %153 = arith.cmpi eq, %122, %152 : vector<8x1xi32>
    %154 = vector.broadcast %24 : i32 to vector<8x1xi32>
    %155 = arith.select %153, %154, %151 : vector<8x1xi1>, vector<8x1xi32>
    %156 = vector.extract_strided_slice %121 {offsets = [0, 1], sizes = [8, 1], strides = [1, 1]} : vector<8x3xf32> to vector<8x1xf32>
    %157 = vector.extract_strided_slice %121 {offsets = [0, 2], sizes = [8, 1], strides = [1, 1]} : vector<8x3xf32> to vector<8x1xf32>
    %c0_i32_74 = arith.constant 0 : i32
    %158 = vector.broadcast %c0_i32_74 : i32 to vector<8x1xi32>
    %159 = arith.cmpi eq, %155, %158 : vector<8x1xi32>
    %c1_i32_75 = arith.constant 1 : i32
    %160 = vector.broadcast %c1_i32_75 : i32 to vector<8x1xi32>
    %161 = arith.cmpi eq, %155, %160 : vector<8x1xi32>
    %cst = arith.constant 1.000000e+00 : f32
    %162 = vector.broadcast %cst : f32 to vector<8x1xf32>
    %163 = arith.subf %162, %157 : vector<8x1xf32>
    %c2_i32_76 = arith.constant 2 : i32
    %164 = vector.broadcast %c2_i32_76 : i32 to vector<8x1xi32>
    %165 = arith.cmpi eq, %155, %164 : vector<8x1xi32>
    %cst_77 = arith.constant 1.000000e+00 : f32
    %166 = vector.broadcast %cst_77 : f32 to vector<8x1xf32>
    %167 = arith.subf %166, %156 : vector<8x1xf32>
    %168 = arith.select %165, %167, %157 : vector<8x1xi1>, vector<8x1xf32>
    %169 = arith.select %161, %163, %168 : vector<8x1xi1>, vector<8x1xf32>
    %170 = arith.select %159, %156, %169 : vector<8x1xi1>, vector<8x1xf32>
    %c0_i32_78 = arith.constant 0 : i32
    %171 = vector.broadcast %c0_i32_78 : i32 to vector<8x1xi32>
    %172 = arith.cmpi eq, %155, %171 : vector<8x1xi32>
    %c1_i32_79 = arith.constant 1 : i32
    %173 = vector.broadcast %c1_i32_79 : i32 to vector<8x1xi32>
    %174 = arith.cmpi eq, %155, %173 : vector<8x1xi32>
    %c2_i32_80 = arith.constant 2 : i32
    %175 = vector.broadcast %c2_i32_80 : i32 to vector<8x1xi32>
    %176 = arith.cmpi eq, %155, %175 : vector<8x1xi32>
    %cst_81 = arith.constant 1.000000e+00 : f32
    %177 = vector.broadcast %cst_81 : f32 to vector<8x1xf32>
    %178 = arith.subf %177, %157 : vector<8x1xf32>
    %cst_82 = arith.constant 1.000000e+00 : f32
    %179 = vector.broadcast %cst_82 : f32 to vector<8x1xf32>
    %180 = arith.subf %179, %156 : vector<8x1xf32>
    %181 = arith.select %176, %178, %180 : vector<8x1xi1>, vector<8x1xf32>
    %182 = arith.select %174, %156, %181 : vector<8x1xi1>, vector<8x1xf32>
    %183 = arith.select %172, %157, %182 : vector<8x1xi1>, vector<8x1xf32>
    %184 = tpu.iota {dimensions = array<i32: 1>} : vector<8x3xi32>
    %c1_i32_83 = arith.constant 1 : i32
    %185 = vector.broadcast %c1_i32_83 : i32 to vector<8x3xi32>
    %186 = arith.cmpi eq, %184, %185 : vector<8x3xi32>
    %c2_i32_84 = arith.constant 2 : i32
    %187 = vector.broadcast %c2_i32_84 : i32 to vector<8x3xi32>
    %188 = arith.cmpi eq, %184, %187 : vector<8x3xi32>
    %189 = vector.shape_cast %183 : vector<8x1xf32> to vector<8x1xf32>
    %190 = vector.broadcast %189 : vector<8x1xf32> to vector<8x3xf32>
    %191 = arith.select %188, %190, %121 : vector<8x3xi1>, vector<8x3xf32>
    %192 = vector.shape_cast %170 : vector<8x1xf32> to vector<8x1xf32>
    %193 = vector.broadcast %192 : vector<8x1xf32> to vector<8x3xf32>
    %194 = arith.select %186, %193, %191 : vector<8x3xi1>, vector<8x3xf32>
    %c0_85 = arith.constant 0 : index
    %c0_86 = arith.constant 0 : index
    %195 = vector.load %arg5[%c0_85, %c0_86] : memref<8x3xf32, #tpu.memory_space<vmem>>, vector<8x3xf32>
    tpu.vector_store %arg5[%c0_85, %c0_86], %194 {strides = array<i32>} : memref<8x3xf32, #tpu.memory_space<vmem>>, vector<8x3xf32>,
    return
  }
  func.func @transform_0(%arg0: i32, %arg1: memref<8xi32, #tpu.memory_space<smem>>) -> (i32, i32, i32, i32) {
    %c0_i32 = arith.constant 0 : i32
    %c0_i32_0 = arith.constant 0 : i32
    %c0_i32_1 = arith.constant 0 : i32
    %c0_i32_2 = arith.constant 0 : i32
    return %arg0, %c0_i32, %c0_i32_0, %c0_i32_1 : i32, i32, i32, i32
  }
  func.func @transform_1(%arg0: i32, %arg1: memref<8xi32, #tpu.memory_space<smem>>) -> (i32, i32) {
    %c0_i32 = arith.constant 0 : i32
    %c0_i32_0 = arith.constant 0 : i32
    return %arg0, %c0_i32 : i32, i32
  }
  func.func @transform_2(%arg0: i32, %arg1: memref<8xi32, #tpu.memory_space<smem>>) -> (i32, i32, i32, i32) {
    %c0_i32 = arith.constant 0 : i32
    %c0_i32_0 = arith.constant 0 : i32
    %c0_i32_1 = arith.constant 0 : i32
    %c0_i32_2 = arith.constant 0 : i32
    return %arg0, %c0_i32, %c0_i32_0, %c0_i32_1 : i32, i32, i32, i32
  }
  func.func @transform_3(%arg0: i32, %arg1: memref<8xi32, #tpu.memory_space<smem>>) -> (i32, i32) {
    %c0_i32 = arith.constant 0 : i32
    %c0_i32_0 = arith.constant 0 : i32
    return %arg0, %c0_i32 : i32, i32
  }
}

</mosaic_0001>

<bundles_post_ra>
// kernel: tpu_custom_call.1
= control target key start
LH: loop header
LB: loop body
LE: loop exit
PB: predicated region body
PF: predicated region fallthrough
CT: control target
= control target key end

     0   :  { %s18881_s0 = inlined_call_operand.vmem [shape: s32[8], index: 0, kind: input, shape index: {}]   ;;  %s18882_s1 = inlined_call_operand.vmem [shape: f32[8,3,17,17], index: 1, kind: input, shape index: {}]   ;;  %s18883_s2 = inlined_call_operand.vmem [shape: f32[8,3], index: 2, kind: input, shape index: {}]   ;;  %s18884_s3 = inlined_call_operand.vmem [shape: f32[8,3,17,17], index: 3, kind: output, shape index: {0}]   ;;  %s18885_s4 = inlined_call_operand.vmem [shape: f32[8,3], index: 4, kind: output, shape index: {1}]  }
   0x1   :  { %s10_s17 = sshll.u32 %s18881_s0, 4  ;;  %s11_s17 = int_to_ptr.vmem [resolvable:$true] %s10_s17 }
   0x2   :  { %s15222_s18 = scalar_lea.vmem %s11_s17, 16  ;;  %p15227_p1 = scmp.lt.s32.totalorder %s11_s17, %s11_s17 }
   0x3   :  { %p15223_p0 = scmp.ne.s32.totalorder %s11_s17, %s15222_s18  ;;  %p15228_p2 = scmp.lt.s32.totalorder %s15222_s18, %s15222_s18 }
   0x5   :  { %p15229_p3 = por %p15228_p2, %p15227_p1 }
   0x7   :  { %p15230_p4 = pnand %p15229_p3, %p15223_p0 }
   0x9   :  { %15233 = shalt.err (!%p15230_p4)  }
   0xa   :  { %s15236_s19 = smov [#allocation3]  }
   0xb   :  { %13 = dma.vmem_to_smem %s11_s17, 16, %s15236_s19, [#allocation2] }
   0xc   :  { %15234 = dma.done.wait [#allocation2], 16 }
   0xd   :  { %15235 = vsyncadd [#allocation2], 4294967280 }
   0xe   :  { %15 = sfence }
   0xf   :  { %s15365_s20 = sld [smem:[#allocation3]]  ;;  %s15367_s21 = sld [smem:[#allocation3 + $0x1]] }
  0x10   :  { %s15369_s22 = sld [smem:[#allocation3 + $0x2]]  ;;  %s15371_s0 = sld [smem:[#allocation3 + $0x3]] }
  0x11   :  { %s15373_s23 = sld [smem:[#allocation3 + $0x4]]  ;;  %s15375_s24 = sld [smem:[#allocation3 + $0x5]] }
  0x12   :  { %s15377_s25 = sld [smem:[#allocation3 + $0x6]]  ;;  %s15379_s26 = sld [smem:[#allocation3 + $0x7]] }
  0x15   :  { %p11578_p5 = scmp.ne.s32.totalorder %s15365_s20, 0 }
  0x16   :  { %v40_v0 = vld [vmem:[%s18882_s1] sm:$0xff] (!%p11578_p5)  ;;  %vm49_vm0 = vcmask (!%p11578_p5), 138240   ;;  %v41_v1 = vld [vmem:[%s18882_s1 + $0x8] sm:$0xff] (!%p11578_p5)  ;;  %v42_v2 = vld [vmem:[%s18882_s1 + $0x10] sm:$0x1] (!%p11578_p5)  ;;  %vm52_vm1 = vcmask (!%p11578_p5), 131072  }
  0x17   :  { %39 = sbr.rel (%p11578_p5) target bundleno = 30 (0x1e), region = 13  ;;  %50 = vst.msk [vmem:[%s18884_s3] sm:$0xff] (!%p11578_p5), %vm49_vm0, %v40_v0  ;;  %51 = vst.msk [vmem:[%s18884_s3 + $0x8] sm:$0xff] (!%p11578_p5), %vm49_vm0, %v41_v1  ;;  %v43_v3 = vld [vmem:[%s18882_s1 + $0x18] sm:$0xff] (!%p11578_p5)  ;;  %v44_v4 = vld [vmem:[%s18882_s1 + $0x20] sm:$0xff] (!%p11578_p5) }
  0x18   :  { %53 = vst.msk [vmem:[%s18884_s3 + $0x10] sm:$0x1] (!%p11578_p5), %vm52_vm1, %v42_v2  ;;  %v45_v5 = vld [vmem:[%s18882_s1 + $0x28] sm:$0x1] (!%p11578_p5)  ;;  %v46_v6 = vld [vmem:[%s18882_s1 + $0x30] sm:$0xff] (!%p11578_p5)  ;;  %v47_v7 = vld [vmem:[%s18882_s1 + $0x38] sm:$0xff] (!%p11578_p5) }
  0x19   :  { %54 = vst.msk [vmem:[%s18884_s3 + $0x18] sm:$0xff] (!%p11578_p5), %vm49_vm0, %v43_v3  ;;  %55 = vst.msk [vmem:[%s18884_s3 + $0x20] sm:$0xff] (!%p11578_p5), %vm49_vm0, %v44_v4  ;;  %v48_v8 = vld [vmem:[%s18882_s1 + $0x40] sm:$0x1] (!%p11578_p5) }
  0x1a   :  { %56 = vst.msk [vmem:[%s18884_s3 + $0x28] sm:$0x1] (!%p11578_p5), %vm52_vm1, %v45_v5  ;;  %59 = vst.msk [vmem:[%s18884_s3 + $0x40] sm:$0x1] (!%p11578_p5), %vm52_vm1, %v48_v8 }
  0x1b   :  { %57 = vst.msk [vmem:[%s18884_s3 + $0x30] sm:$0xff] (!%p11578_p5), %vm49_vm0, %v46_v6  ;;  %58 = vst.msk [vmem:[%s18884_s3 + $0x38] sm:$0xff] (!%p11578_p5), %vm49_vm0, %v47_v7 }
  0x1e PF:  { %p11579_p6 = scmp.ne.s32.totalorder %s15365_s20, 1 }
  0x1f   :  { %v64_v9 = vlaneseq (!%p11579_p6)  ;;  %v15237_v10 = vmov (!%p11579_p6), 0.0|0.0   ;;  %vm15238_vm2 = vmmov (!%p11579_p6), 0   ;;  %v15239_v13 = vmov (!%p11579_p6), 0.0   ;;  %v82_v22 = vld [vmem:[%s18882_s1] sm:$0xff] (!%p11579_p6)  ;;  %v84_v23 = vld [vmem:[%s18882_s1 + $0x10] sm:$0x1] (!%p11579_p6) }
  0x20   :  { %63 = sbr.rel (%p11579_p6) target bundleno = 408 (0x198), region = 17  ;;  %14766 = vmatprep.subr.bf16.mxu0 (!%p11579_p6), %v15237_v10  ;;  %15054 = vmatprep.subr.bf16.mxu1 (!%p11579_p6), %v15237_v10  ;;  %v15240_v20 = vmov (!%p11579_p6), 1.0|1.0   ;;  %vm95_vm7 = vcmask (!%p11579_p6), 1040384   ;;  %vm85_vm8 = vcmask (!%p11579_p6), 138240   ;;  %v83_v24 = vld [vmem:[%s18882_s1 + $0x8] sm:$0xff] (!%p11579_p6) }
  0x21   :  { %v65_v11 = vshrl.u32 (!%p11579_p6), %v64_v9, 7  ;;  %v69_v12 = vand.u32 (!%p11579_p6), 127, %v64_v9  ;;  %13332 = vmatprep.mubr.msk.f32.mxu0 (!%p11579_p6), %vm15238_vm2, %v15239_v13  ;;  %13338 = vmatprep.mubr.msk.f32.mxu1 (!%p11579_p6), %vm15238_vm2, %v15239_v13  ;;  %v11589_v25 = vld [vmem:[%s18882_s1 + $0x18] sm:$0xff] (!%p11579_p6)  ;;  %v11601_v26 = vld [vmem:[%s18882_s1 + $0x30] sm:$0xff] (!%p11579_p6)  ;;  %v11590_v27 = vld [vmem:[%s18882_s1 + $0x20] sm:$0xff] (!%p11579_p6)  ;;  %vm213_vm9 = vcmask (!%p11579_p6), 131072  }
  0x22   :  { %v11602_v28 = vld [vmem:[%s18882_s1 + $0x38] sm:$0xff] (!%p11579_p6)  ;;  %v11591_v29 = vld [vmem:[%s18882_s1 + $0x28] sm:$0x1] (!%p11579_p6)  ;;  %v11603_v30 = vld [vmem:[%s18882_s1 + $0x40] sm:$0x1] (!%p11579_p6) }
  0x23   :  { %v66_v14 = vadd.s32 (!%p11579_p6), 8, %v65_v11  ;;  %v70_v15 = vadd.s32 (!%p11579_p6), %v69_v12, %v65_v11  ;;  %v67_v16 = vadd.s32 (!%p11579_p6), 16, %v65_v11 }
  0x25   :  { %v71_v17 = vadd.s32 (!%p11579_p6), %v69_v12, %v66_v14  ;;  %vm73_vm3 = vcmp.eq.s32.totalorder (!%p11579_p6), %v70_v15, 16  ;;  %v72_v18 = vadd.s32 (!%p11579_p6), %v69_v12, %v67_v16 }
  0x27   :  { %vm74_vm4 = vcmp.eq.s32.totalorder %v71_v17, 16  ;;  %vm75_vm5 = vcmp.eq.s32.totalorder %v72_v18, 16 }
  0x28   :  { %vm15445_vm6 = vmpackc.low %vm74_vm4, %vm73_vm3  ;;  %v11582_v21 = vsel %vm75_vm5, 1.0, %v15239_v13 }
  0x29   :  { %14768 = vmatpush3.bf16.msk.msra.mxu0 %vm15445_vm6, %v15240_v20  ;;  %15056 = vmatpush3.bf16.msk.msra.mxu1 %vm15445_vm6, %v15240_v20 }
  0x2a   :  { %13330 = vmatprep.subr.mxu0 %v15239_v13  ;;  %15055 = vmatprep.subr.mxu1 %v15239_v13 }
  0x2d   :  { %13331 = vmatpush3.msk.msra.mxu0 %vm95_vm7, %v11582_v21  ;;  %15057 = vmatpush3.msk.msra.mxu1 %vm95_vm7, %v11582_v21 }
  0x2e   :  { %13333 = vmatmul.mubr.msk.f32.vlgmr.msra.gmra.mrb[0].mxu0 %vm85_vm8, %v82_v22  ;;  %14772 = vmatprep.subr.bf16.mxu0 %v15237_v10 }
  0x2f   :  { %13335 = vmatprep.mubr.msk.f32.mxu0 %vm15238_vm2, %v15239_v13  ;;  %14774 = vmatpush3.bf16.msk.msra.mxu0 %vm15445_vm6, %v15240_v20 }
  0x30   :  { %13339 = vmatmul.mubr.msk.f32.vlgmr.msra.gmra.mrb[0].mxu1 %vm85_vm8, %v84_v23  ;;  %14769 = vmatprep.subr.bf16.mxu1 %v15237_v10 }
  0x31   :  { %14771 = vmatpush3.bf16.msk.msra.mxu1 %vm15445_vm6, %v15240_v20  ;;  %13360 = vmatprep.subr.mxu0 %v15239_v13 }
  0x32   :  { %13336 = vmatmul.mubr.msk.f32.gmra.mrb[2].mxu0 %vm85_vm8, %v83_v24  ;;  %13345 = vmatprep.subr.mxu1 %v15239_v13 }
  0x33   :  { %13361 = vmatpush3.msk.msra.mxu0 %vm95_vm7, %v11582_v21  ;;  %13347 = vmatprep.mubr.msk.f32.mxu1 %vm15238_vm2, %v15239_v13 }
  0x34   :  { %13362 = vmatprep.mubr.msk.f32.mxu0 %vm15238_vm2, %v15239_v13 }
  0x35   :  { %13346 = vmatpush3.msk.msra.mxu1 %vm95_vm7, %v11582_v21 }
  0x36   :  { %13348 = vmatmul.mubr.msk.f32.vlgmr.msra.gmra.mrb[2].mxu1 %vm85_vm8, %v11589_v25  ;;  %13363 = vmatmul.mubr.msk.f32.vlgmr.msra.gmra.mrb[4].mxu0 %vm85_vm8, %v11601_v26 }
  0x37   :  { %13350 = vmatprep.mubr.msk.f32.mxu1 %vm15238_vm2, %v15239_v13  ;;  %13365 = vmatprep.mubr.msk.f32.mxu0 %vm15238_vm2, %v15239_v13 }
  0x3a   :  { %13351 = vmatmul.mubr.msk.f32.gmra.mrb[4].mxu1 %vm85_vm8, %v11590_v27  ;;  %13366 = vmatmul.mubr.msk.f32.gmra.mrb[6].mxu0 %vm85_vm8, %v11602_v28 }
  0x3b   :  { %13353 = vmatprep.mubr.msk.f32.mxu1 %vm15238_vm2, %v15239_v13  ;;  %13368 = vmatprep.mubr.msk.f32.mxu0 %vm15238_vm2, %v15239_v13 }
  0x3e   :  { %13354 = vmatmul.mubr.msk.f32.gmra.mrb[6].mxu1 %vm85_vm8, %v11591_v29  ;;  %13369 = vmatmul.mubr.msk.f32.gmra.mrb[8].mxu0 %vm85_vm8, %v11603_v30 }
 0x101   :  { %v165_v31 = vpop.f32.mrb[0].mxu0 }
 0x102   :  { %179 = vxpose.xlu0.b32.start [1/3] (short) (narrow) %v165_v31, 24  ;;  %v13334_v32 = vpop.f32.mrb[1].mxu0 }
 0x103   :  { %v175_v33 = vpop.f32.mrb[0].mxu1 }
 0x104   :  { %v13340_v34 = vpop.f32.mrb[1].mxu1 }
 0x105   :  { %v170_v35 = vpop.f32.mrb[2].mxu0 }
 0x106   :  { %180 = vxpose.xlu0.b32.cont [2/3] (short) (narrow) %v170_v35, 24  ;;  %v13337_v36 = vpop.f32.mrb[3].mxu0 }
 0x109   :  { %v294_v37 = vpop.f32.mrb[2].mxu1  ;;  %v423_v38 = vpop.f32.mrb[4].mxu0 }
 0x10a   :  { %181 = vxpose.xlu0.b32.end [3/3] (short) (narrow) %v175_v33, 24  ;;  %v13349_v39 = vpop.f32.mrb[3].mxu1  ;;  %v13364_v40 = vpop.f32.mrb[5].mxu0  ;;  %308 = vxpose.xlu1.b32.start [1/3] (short) (narrow) %v294_v37, 24 }
 0x10d   :  { %v299_v41 = vpop.f32.mrb[4].mxu1  ;;  %v428_v42 = vpop.f32.mrb[6].mxu0 }
 0x10e   :  { %437 = vxpose.xlu0.b32.start [1/3] (short) (narrow) %v423_v38, 24  ;;  %v13352_v43 = vpop.f32.mrb[5].mxu1  ;;  %v13367_v44 = vpop.f32.mrb[7].mxu0  ;;  %309 = vxpose.xlu1.b32.cont [2/3] (short) (narrow) %v299_v41, 24 }
 0x111   :  { %v304_v45 = vpop.f32.mrb[6].mxu1  ;;  %v433_v46 = vpop.f32.mrb[8].mxu0 }
 0x112   :  { %438 = vxpose.xlu0.b32.cont [2/3] (short) (narrow) %v428_v42, 24  ;;  %v13355_v47 = vpop.f32.mrb[7].mxu1  ;;  %v13370_v48 = vpop.f32.mrb[9].mxu0  ;;  %310 = vxpose.xlu1.b32.end [3/3] (short) (narrow) %v304_v45, 24 }
 0x116   :  { %439 = vxpose.xlu0.b32.end [3/3] (short) (narrow) %v433_v46, 24 }
 0x182   :  { %v195_v49 = vpop.trf.xlu0 }
 0x183   :  { %211 = vst.msk [vmem:[%s18884_s3] sm:$0xff] %vm85_vm8, %v195_v49 }
 0x186   :  { %v196_v50 = vpop.trf.xlu0 }
 0x187   :  { %212 = vst.msk [vmem:[%s18884_s3 + $0x8] sm:$0xff] %vm85_vm8, %v196_v50 }
 0x18a   :  { %v197_v51 = vpop.trf.xlu0  ;;  %v324_v52 = vpop.trf.xlu1 }
 0x18b   :  { %214 = vst.msk [vmem:[%s18884_s3 + $0x10] sm:$0x1] %vm213_vm9, %v197_v51 }
 0x18c   :  { %11598 = vst.msk [vmem:[%s18884_s3 + $0x18] sm:$0xff] %vm85_vm8, %v324_v52 }
 0x18e   :  { %v453_v53 = vpop.trf.xlu0  ;;  %v325_v54 = vpop.trf.xlu1 }
 0x18f   :  { %11610 = vst.msk [vmem:[%s18884_s3 + $0x30] sm:$0xff] %vm85_vm8, %v453_v53  ;;  %11599 = vst.msk [vmem:[%s18884_s3 + $0x20] sm:$0xff] %vm85_vm8, %v325_v54 }
 0x192   :  { %v454_v55 = vpop.trf.xlu0  ;;  %v326_v56 = vpop.trf.xlu1 }
 0x193   :  { %11611 = vst.msk [vmem:[%s18884_s3 + $0x38] sm:$0xff] %vm85_vm8, %v454_v55 }
 0x194   :  { %11600 = vst.msk [vmem:[%s18884_s3 + $0x28] sm:$0x1] %vm213_vm9, %v326_v56 }
 0x196   :  { %v455_v57 = vpop.trf.xlu0 }
 0x197   :  { %11612 = vst.msk [vmem:[%s18884_s3 + $0x40] sm:$0x1] %vm213_vm9, %v455_v57 }
 0x198 PF:  { %p11613_p7 = scmp.ne.s32.totalorder %s15365_s20, 2 }
 0x199   :  { %v477_v58 = vlaneseq (!%p11613_p7)  ;;  %v15241_v59 = vmov (!%p11613_p7), 0.0|0.0   ;;  %vm15242_vm10 = vmmov (!%p11613_p7), 0   ;;  %v15243_v62 = vmov (!%p11613_p7), 0.0   ;;  %v495_v7 = vld [vmem:[%s18882_s1] sm:$0xff] (!%p11613_p7)  ;;  %v496_v8 = vld [vmem:[%s18882_s1 + $0x8] sm:$0xff] (!%p11613_p7)  ;;  %v11627_v10 = vld [vmem:[%s18882_s1 + $0x18] sm:$0xff] (!%p11613_p7) }
 0x19a   :  { %476 = sbr.rel (%p11613_p7) target bundleno = 892 (0x37c), region = 21  ;;  %14775 = vmatprep.subr.bf16.mxu0 (!%p11613_p7), %v15241_v59  ;;  %14778 = vmatprep.subr.bf16.mxu1 (!%p11613_p7), %v15241_v59  ;;  %v15244_v5 = vmov (!%p11613_p7), 1.0|1.0   ;;  %vm508_vm15 = vcmask (!%p11613_p7), 1040384   ;;  %vm498_vm0 = vcmask (!%p11613_p7), 138240   ;;  %v11628_v11 = vld [vmem:[%s18882_s1 + $0x20] sm:$0xff] (!%p11613_p7) }
 0x19b   :  { %v478_v60 = vshrl.u32 (!%p11613_p7), %v477_v58, 7  ;;  %v482_v61 = vand.u32 (!%p11613_p7), 127, %v477_v58  ;;  %13377 = vmatprep.mubr.msk.f32.mxu0 (!%p11613_p7), %vm15242_vm10, %v15243_v62  ;;  %13392 = vmatprep.mubr.msk.f32.mxu1 (!%p11613_p7), %vm15242_vm10, %v15243_v62  ;;  %v497_v9 = vld [vmem:[%s18882_s1 + $0x10] sm:$0x1] (!%p11613_p7)  ;;  %v11629_v12 = vld [vmem:[%s18882_s1 + $0x28] sm:$0x1] (!%p11613_p7) }
 0x19c   :  { %v11643_v13 = vld [vmem:[%s18882_s1 + $0x30] sm:$0xff] (!%p11613_p7)  ;;  %v11644_v14 = vld [vmem:[%s18882_s1 + $0x38] sm:$0xff] (!%p11613_p7)  ;;  %v11645_v15 = vld [vmem:[%s18882_s1 + $0x40] sm:$0x1] (!%p11613_p7)  ;;  %vm685_vm1 = vcmask (!%p11613_p7), 131072  }
 0x19d   :  { %v479_v63 = vadd.s32 (!%p11613_p7), 8, %v478_v60  ;;  %v483_v0 = vadd.s32 (!%p11613_p7), %v482_v61, %v478_v60  ;;  %v480_v1 = vadd.s32 (!%p11613_p7), 16, %v478_v60 }
 0x19f   :  { %v15544_v2 = vadd.s32 (!%p11613_p7), %v482_v61, %v479_v63  ;;  %vm486_vm11 = vcmp.eq.s32.totalorder (!%p11613_p7), %v483_v0, 16  ;;  %v485_v3 = vadd.s32 (!%p11613_p7), %v482_v61, %v480_v1 }
 0x1a0   :  { %v11614_v23 = vsel (!%p11613_p7), %vm486_vm11, 1.0, %v15243_v62 }
 0x1a1   :  { %vm487_vm12 = vcmp.eq.s32.totalorder %v15544_v2, 16  ;;  %vm488_vm13 = vcmp.eq.s32.totalorder %v485_v3, 16 }
 0x1a2   :  { %vm15550_vm14 = vmpackc.low %vm487_vm12, %vm486_vm11  ;;  %v15558_v6 = vsel %vm488_vm13, 1.0, %v15243_v62  ;;  %v11615_v26 = vsel %vm487_vm12, 1.0, %v15243_v62 }
 0x1a3   :  { %14777 = vmatpush3.bf16.msk.msra.mxu0 %vm15550_vm14, %v15244_v5 }
 0x1a4   :  { %13375 = vmatprep.subr.mxu0 %v15243_v62 }
 0x1a7   :  { %13376 = vmatpush3.msk.msra.mxu0 %vm508_vm15, %v15558_v6 }
 0x1a8   :  { %13378 = vmatmul.mubr.msk.f32.vlgmr.msra.gmra.mrb[0].mxu0 %vm498_vm0, %v495_v7  ;;  %14781 = vmatprep.subr.bf16.mxu0 %v15241_v59 }
 0x1a9   :  { %13380 = vmatprep.mubr.msk.f32.mxu0 %vm15242_vm10, %v15243_v62  ;;  %14783 = vmatpush3.bf16.msk.msra.mxu0 %vm15550_vm14, %v15244_v5 }
 0x1aa   :  { %13405 = vmatprep.subr.mxu0 %v15243_v62 }
 0x1ac   :  { %13381 = vmatmul.mubr.msk.f32.gmra.mrb[2].mxu0 %vm498_vm0, %v496_v8 }
 0x1ad   :  { %13383 = vmatprep.mubr.msk.f32.mxu0 %vm15242_vm10, %v15243_v62  ;;  %13406 = vmatpush3.msk.msra.mxu0 %vm508_vm15, %v15558_v6 }
 0x1ae   :  { %14787 = vmatprep.subr.bf16.mxu0 %v15241_v59 }
 0x1b0   :  { %13384 = vmatmul.mubr.msk.f32.gmra.mrb[4].mxu0 %vm498_vm0, %v497_v9 }
 0x1b1   :  { %13407 = vmatprep.mubr.msk.f32.mxu0 %vm15242_vm10, %v15243_v62 }
 0x1b4   :  { %13408 = vmatmul.mubr.msk.f32.vlgmr.msra.gmra.mrb[6].mxu0 %vm498_vm0, %v11627_v10 }
 0x1b5   :  { %13410 = vmatprep.mubr.msk.f32.mxu0 %vm15242_vm10, %v15243_v62  ;;  %14789 = vmatpush3.bf16.msk.msra.mxu0 %vm15550_vm14, %v15244_v5 }
 0x1b6   :  { %13435 = vmatprep.subr.mxu0 %v15243_v62 }
 0x1b8   :  { %13411 = vmatmul.mubr.msk.f32.gmra.mrb[8].mxu0 %vm498_vm0, %v11628_v11 }
 0x1b9   :  { %13413 = vmatprep.mubr.msk.f32.mxu0 %vm15242_vm10, %v15243_v62  ;;  %13436 = vmatpush3.msk.msra.mxu0 %vm508_vm15, %v15558_v6 }
 0x1bc   :  { %13414 = vmatmul.mubr.msk.f32.gmra.mrb[10].mxu0 %vm498_vm0, %v11629_v12 }
 0x1bd   :  { %13437 = vmatprep.mubr.msk.f32.mxu0 %vm15242_vm10, %v15243_v62 }
 0x1c0   :  { %13438 = vmatmul.mubr.msk.f32.vlgmr.msra.gmra.mrb[12].mxu0 %vm498_vm0, %v11643_v13 }
 0x1c1   :  { %13440 = vmatprep.mubr.msk.f32.mxu0 %vm15242_vm10, %v15243_v62 }
 0x1c4   :  { %13441 = vmatmul.mubr.msk.f32.gmra.mrb[14].mxu0 %vm498_vm0, %v11644_v14 }
 0x1c5   :  { %13443 = vmatprep.mubr.msk.f32.mxu0 %vm15242_vm10, %v15243_v62 }
 0x1c8   :  { %13444 = vmatmul.mubr.msk.f32.gmra.mrb[16].mxu0 %vm498_vm0, %v11645_v15 }
 0x27b   :  { %v578_v16 = vpop.f32.mrb[0].mxu0 }
 0x27c   :  { %v13379_v17 = vpop.f32.mrb[1].mxu0 }
 0x27f   :  { %v583_v18 = vpop.f32.mrb[2].mxu0 }
 0x280   :  { %v14779_v19 = vpack.c.bf16 %v583_v18, %v578_v16  ;;  %v13382_v20 = vpop.f32.mrb[3].mxu0 }
 0x282   :  { %14780 = vmatpush3.bf16.msra.mxu1 %v14779_v19 }
 0x283   :  { %v588_v21 = vpop.f32.mrb[4].mxu0  ;;  %13390 = vmatprep.subr.mxu1 %v15243_v62 }
 0x284   :  { %v13385_v22 = vpop.f32.mrb[5].mxu0 }
 0x286   :  { %13391 = vmatpush3.msk.msra.mxu1 %vm508_vm15, %v588_v21 }
 0x287   :  { %v766_v24 = vpop.f32.mrb[6].mxu0  ;;  %13393 = vmatmul.mubr.msk.f32.vlgmr.msra.gmra.mrb[0].mxu1 %vm498_vm0, %v11614_v23  ;;  %14784 = vmatprep.subr.bf16.mxu1 %v15241_v59 }
 0x288   :  { %v13409_v25 = vpop.f32.mrb[7].mxu0  ;;  %13395 = vmatprep.mubr.msk.f32.mxu1 %vm15242_vm10, %v15243_v62 }
 0x28b   :  { %v771_v27 = vpop.f32.mrb[8].mxu0  ;;  %13396 = vmatmul.mubr.msk.f32.gmra.mrb[2].mxu1 %vm498_vm0, %v11615_v26 }
 0x28c   :  { %v14785_v28 = vpack.c.bf16 %v771_v27, %v766_v24  ;;  %v13412_v29 = vpop.f32.mrb[9].mxu0  ;;  %13398 = vmatprep.mubr.msk.f32.mxu1 %vm15242_vm10, %v15243_v62 }
 0x28e   :  { %14786 = vmatpush3.bf16.msra.mxu1 %v14785_v28 }
 0x28f   :  { %v776_v30 = vpop.f32.mrb[10].mxu0  ;;  %13420 = vmatprep.subr.mxu1 %v15243_v62  ;;  %13399 = vmatmul.mubr.msk.f32.gmra.mrb[4].mxu1 %vm498_vm0, %v15558_v6 }
 0x290   :  { %v13415_v31 = vpop.f32.mrb[11].mxu0  ;;  %13422 = vmatprep.mubr.msk.f32.mxu1 %vm15242_vm10, %v15243_v62 }
 0x292   :  { %13421 = vmatpush3.msk.msra.mxu1 %vm508_vm15, %v776_v30 }
 0x293   :  { %v946_v32 = vpop.f32.mrb[12].mxu0  ;;  %13423 = vmatmul.mubr.msk.f32.vlgmr.msra.gmra.mrb[6].mxu1 %vm498_vm0, %v11614_v23  ;;  %14790 = vmatprep.subr.bf16.mxu1 %v15241_v59 }
 0x294   :  { %v13439_v33 = vpop.f32.mrb[13].mxu0  ;;  %13425 = vmatprep.mubr.msk.f32.mxu1 %vm15242_vm10, %v15243_v62 }
 0x297   :  { %v951_v34 = vpop.f32.mrb[14].mxu0  ;;  %13426 = vmatmul.mubr.msk.f32.gmra.mrb[8].mxu1 %vm498_vm0, %v11615_v26 }
 0x298   :  { %v14791_v35 = vpack.c.bf16 %v951_v34, %v946_v32  ;;  %v13442_v36 = vpop.f32.mrb[15].mxu0  ;;  %13428 = vmatprep.mubr.msk.f32.mxu1 %vm15242_vm10, %v15243_v62 }
 0x29a   :  { %14792 = vmatpush3.bf16.msra.mxu1 %v14791_v35 }
 0x29b   :  { %v956_v37 = vpop.f32.mrb[16].mxu0  ;;  %13450 = vmatprep.subr.mxu1 %v15243_v62  ;;  %13429 = vmatmul.mubr.msk.f32.gmra.mrb[10].mxu1 %vm498_vm0, %v15558_v6 }
 0x29c   :  { %v13445_v38 = vpop.f32.mrb[17].mxu0  ;;  %13452 = vmatprep.mubr.msk.f32.mxu1 %vm15242_vm10, %v15243_v62 }
 0x29e   :  { %13451 = vmatpush3.msk.msra.mxu1 %vm508_vm15, %v956_v37 }
 0x29f   :  { %13453 = vmatmul.mubr.msk.f32.vlgmr.msra.gmra.mrb[12].mxu1 %vm498_vm0, %v11614_v23 }
 0x2a0   :  { %13455 = vmatprep.mubr.msk.f32.mxu1 %vm15242_vm10, %v15243_v62 }
 0x2a3   :  { %13456 = vmatmul.mubr.msk.f32.gmra.mrb[14].mxu1 %vm498_vm0, %v11615_v26 }
 0x2a4   :  { %13458 = vmatprep.mubr.msk.f32.mxu1 %vm15242_vm10, %v15243_v62 }
 0x2a7   :  { %13459 = vmatmul.mubr.msk.f32.gmra.mrb[16].mxu1 %vm498_vm0, %v15558_v6 }
 0x35a   :  { %v669_v39 = vpop.f32.mrb[0].mxu1 }
 0x35b   :  { %683 = vst.msk [vmem:[%s18884_s3] sm:$0xff] %vm498_vm0, %v669_v39  ;;  %v13394_v40 = vpop.f32.mrb[1].mxu1 }
 0x35e   :  { %v674_v41 = vpop.f32.mrb[2].mxu1 }
 0x35f   :  { %684 = vst.msk [vmem:[%s18884_s3 + $0x8] sm:$0xff] %vm498_vm0, %v674_v41  ;;  %v13397_v42 = vpop.f32.mrb[3].mxu1 }
 0x362   :  { %v679_v43 = vpop.f32.mrb[4].mxu1 }
 0x363   :  { %686 = vst.msk [vmem:[%s18884_s3 + $0x10] sm:$0x1] %vm685_vm1, %v679_v43  ;;  %v13400_v44 = vpop.f32.mrb[5].mxu1 }
 0x366   :  { %v849_v45 = vpop.f32.mrb[6].mxu1 }
 0x367   :  { %11640 = vst.msk [vmem:[%s18884_s3 + $0x18] sm:$0xff] %vm498_vm0, %v849_v45  ;;  %v13424_v46 = vpop.f32.mrb[7].mxu1 }
 0x36a   :  { %v854_v47 = vpop.f32.mrb[8].mxu1 }
 0x36b   :  { %11641 = vst.msk [vmem:[%s18884_s3 + $0x20] sm:$0xff] %vm498_vm0, %v854_v47  ;;  %v13427_v48 = vpop.f32.mrb[9].mxu1 }
 0x36e   :  { %v859_v49 = vpop.f32.mrb[10].mxu1 }
 0x36f   :  { %11642 = vst.msk [vmem:[%s18884_s3 + $0x28] sm:$0x1] %vm685_vm1, %v859_v49  ;;  %v13430_v50 = vpop.f32.mrb[11].mxu1 }
 0x372   :  { %v1029_v51 = vpop.f32.mrb[12].mxu1 }
 0x373   :  { %11656 = vst.msk [vmem:[%s18884_s3 + $0x30] sm:$0xff] %vm498_vm0, %v1029_v51  ;;  %v13454_v52 = vpop.f32.mrb[13].mxu1 }
 0x376   :  { %v1034_v53 = vpop.f32.mrb[14].mxu1 }
 0x377   :  { %11657 = vst.msk [vmem:[%s18884_s3 + $0x38] sm:$0xff] %vm498_vm0, %v1034_v53  ;;  %v13457_v54 = vpop.f32.mrb[15].mxu1 }
 0x37a   :  { %v1039_v55 = vpop.f32.mrb[16].mxu1 }
 0x37b   :  { %11658 = vst.msk [vmem:[%s18884_s3 + $0x40] sm:$0x1] %vm685_vm1, %v1039_v55  ;;  %v13460_v56 = vpop.f32.mrb[17].mxu1 }
 0x37c PF:  { %p11659_p8 = scmp.ne.s32.totalorder %s15365_s20, 3 }
 0x37d   :  { %v1069_v57 = vld [vmem:[%s18882_s1] sm:$0xff] (!%p11659_p8)  ;;  %v1051_v58 = vlaneseq (!%p11659_p8)  ;;  %v11669_v59 = vld [vmem:[%s18882_s1 + $0x18] sm:$0xff] (!%p11659_p8)  ;;  %v15245_v60 = vmov (!%p11659_p8), 0.0|0.0   ;;  %v1070_v61 = vld [vmem:[%s18882_s1 + $0x8] sm:$0xff] (!%p11659_p8)  ;;  %vm15246_vm2 = vmmov (!%p11659_p8), 0   ;;  %v15247_v1 = vmov (!%p11659_p8), 0.0  }
 0x37e   :  { %1050 = sbr.rel (%p11659_p8) target bundleno = 1258 (0x4ea), region = 25  ;;  %1072 = vxpose.xlu0.b32.start [1/3] (short) (narrow) (!%p11659_p8), %v1069_v57, 24  ;;  %14793 = vmatprep.subr.bf16.mxu0 (!%p11659_p8), %v15245_v60  ;;  %v11670_v62 = vld [vmem:[%s18882_s1 + $0x20] sm:$0xff] (!%p11659_p8)  ;;  %v1071_v5 = vld [vmem:[%s18882_s1 + $0x10] sm:$0x1] (!%p11659_p8)  ;;  %vm1114_vm7 = vcmask (!%p11659_p8), 1040384  }
 0x37f   :  { %1206 = vxpose.xlu1.b32.start [1/3] (short) (narrow) (!%p11659_p8), %v11669_v59, 24  ;;  %15058 = vmatprep.subr.bf16.mxu1 (!%p11659_p8), %v15245_v60  ;;  %v1052_v63 = vshrl.u32 (!%p11659_p8), %v1051_v58, 7  ;;  %v1056_v0 = vand.u32 (!%p11659_p8), 127, %v1051_v58  ;;  %v11671_v6 = vld [vmem:[%s18882_s1 + $0x28] sm:$0x1] (!%p11659_p8)  ;;  %v11681_v9 = vld [vmem:[%s18882_s1 + $0x30] sm:$0xff] (!%p11659_p8) }
 0x380   :  { %13467 = vmatprep.mubr.msk.f32.mxu0 (!%p11659_p8), %vm15246_vm2, %v15247_v1  ;;  %13473 = vmatprep.mubr.msk.f32.mxu1 (!%p11659_p8), %vm15246_vm2, %v15247_v1  ;;  %v15248_v11 = vmov (!%p11659_p8), 1.0|1.0   ;;  %v11682_v13 = vld [vmem:[%s18882_s1 + $0x38] sm:$0xff] (!%p11659_p8)  ;;  %v11683_v14 = vld [vmem:[%s18882_s1 + $0x40] sm:$0x1] (!%p11659_p8)  ;;  %vm1104_vm8 = vcmask (!%p11659_p8), 138240  }
 0x381   :  { %v1053_v2 = vadd.s32 (!%p11659_p8), 8, %v1052_v63  ;;  %v1057_v3 = vadd.s32 (!%p11659_p8), %v1056_v0, %v1052_v63  ;;  %v1054_v4 = vadd.s32 (!%p11659_p8), 16, %v1052_v63  ;;  %vm1200_vm9 = vcmask (!%p11659_p8), 131072  }
 0x382   :  { %1073 = vxpose.xlu0.b32.cont [2/3] (short) (narrow) (!%p11659_p8), %v1070_v61, 24 }
 0x383   :  { %1207 = vxpose.xlu1.b32.cont [2/3] (short) (narrow) (!%p11659_p8), %v11670_v62, 24  ;;  %v1058_v7 = vadd.s32 (!%p11659_p8), %v1056_v0, %v1053_v2  ;;  %vm1060_vm3 = vcmp.eq.s32.totalorder (!%p11659_p8), %v1057_v3, 16  ;;  %v1059_v8 = vadd.s32 (!%p11659_p8), %v1056_v0, %v1054_v4 }
 0x385   :  { %vm1061_vm4 = vcmp.eq.s32.totalorder %v1058_v7, 16  ;;  %vm1062_vm5 = vcmp.eq.s32.totalorder %v1059_v8, 16 }
 0x386   :  { %1074 = vxpose.xlu0.b32.end [3/3] (short) (narrow) %v1071_v5, 24  ;;  %vm15729_vm6 = vmpackc.low %vm1061_vm4, %vm1060_vm3  ;;  %v11662_v12 = vsel %vm1062_vm5, 1.0, %v15247_v1 }
 0x387   :  { %1208 = vxpose.xlu1.b32.end [3/3] (short) (narrow) %v11671_v6, 24  ;;  %14795 = vmatpush3.bf16.msk.msra.mxu0 %vm15729_vm6, %v15248_v11 }
 0x388   :  { %15060 = vmatpush3.bf16.msk.msra.mxu1 %vm15729_vm6, %v15248_v11  ;;  %13465 = vmatprep.subr.mxu0 %v15247_v1 }
 0x389   :  { %15059 = vmatprep.subr.mxu1 %v15247_v1 }
 0x38a   :  { %1335 = vxpose.xlu0.b32.start [1/3] (short) (narrow) %v11681_v9, 24 }
 0x38b   :  { %13466 = vmatpush3.msk.msra.mxu0 %vm1114_vm7, %v11662_v12 }
 0x38c   :  { %15061 = vmatpush3.msk.msra.mxu1 %vm1114_vm7, %v11662_v12  ;;  %14799 = vmatprep.subr.bf16.mxu0 %v15245_v60 }
 0x38d   :  { %14796 = vmatprep.subr.bf16.mxu1 %v15245_v60 }
 0x38e   :  { %1336 = vxpose.xlu0.b32.cont [2/3] (short) (narrow) %v11682_v13, 24 }
 0x392   :  { %1337 = vxpose.xlu0.b32.end [3/3] (short) (narrow) %v11683_v14, 24 }
 0x3fe   :  { %v1088_v15 = vpop.trf.xlu0 }
 0x3ff   :  { %13468 = vmatmul.mubr.msk.f32.vlgmr.msra.gmra.mrb[0].mxu0 %vm1104_vm8, %v1088_v15  ;;  %v1222_v18 = vpop.trf.xlu1 }
 0x400   :  { %13470 = vmatprep.mubr.msk.f32.mxu0 %vm15246_vm2, %v15247_v1  ;;  %14801 = vmatpush3.bf16.msk.msra.mxu0 %vm15729_vm6, %v15248_v11 }
 0x401   :  { %13495 = vmatprep.subr.mxu0 %v15247_v1 }
 0x402   :  { %v1089_v16 = vpop.trf.xlu0 }
 0x403   :  { %13471 = vmatmul.mubr.msk.f32.gmra.mrb[2].mxu0 %vm1104_vm8, %v1089_v16  ;;  %v1223_v20 = vpop.trf.xlu1 }
 0x404   :  { %13496 = vmatpush3.msk.msra.mxu0 %vm1114_vm7, %v11662_v12  ;;  %13497 = vmatprep.mubr.msk.f32.mxu0 %vm15246_vm2, %v15247_v1 }
 0x406   :  { %v1090_v17 = vpop.trf.xlu0 }
 0x407   :  { %13474 = vmatmul.mubr.msk.f32.vlgmr.msra.gmra.mrb[0].mxu1 %vm1104_vm8, %v1090_v17  ;;  %v1224_v22 = vpop.trf.xlu1 }
 0x408   :  { %14798 = vmatpush3.bf16.msk.msra.mxu1 %vm15729_vm6, %v15248_v11  ;;  %13482 = vmatprep.mubr.msk.f32.mxu1 %vm15246_vm2, %v15247_v1 }
 0x409   :  { %13480 = vmatprep.subr.mxu1 %v15247_v1 }
 0x40a   :  { %v1351_v19 = vpop.trf.xlu0 }
 0x40b   :  { %13498 = vmatmul.mubr.msk.f32.vlgmr.msra.gmra.mrb[4].mxu0 %vm1104_vm8, %v1351_v19 }
 0x40c   :  { %13481 = vmatpush3.msk.msra.mxu1 %vm1114_vm7, %v11662_v12  ;;  %13500 = vmatprep.mubr.msk.f32.mxu0 %vm15246_vm2, %v15247_v1 }
 0x40d   :  { %13483 = vmatmul.mubr.msk.f32.vlgmr.msra.gmra.mrb[2].mxu1 %vm1104_vm8, %v1222_v18 }
 0x40e   :  { %v1352_v21 = vpop.trf.xlu0  ;;  %13485 = vmatprep.mubr.msk.f32.mxu1 %vm15246_vm2, %v15247_v1 }
 0x40f   :  { %13501 = vmatmul.mubr.msk.f32.gmra.mrb[6].mxu0 %vm1104_vm8, %v1352_v21 }
 0x410   :  { %13503 = vmatprep.mubr.msk.f32.mxu0 %vm15246_vm2, %v15247_v1 }
 0x411   :  { %13486 = vmatmul.mubr.msk.f32.gmra.mrb[4].mxu1 %vm1104_vm8, %v1223_v20 }
 0x412   :  { %v1353_v23 = vpop.trf.xlu0  ;;  %13488 = vmatprep.mubr.msk.f32.mxu1 %vm15246_vm2, %v15247_v1 }
 0x413   :  { %13504 = vmatmul.mubr.msk.f32.gmra.mrb[8].mxu0 %vm1104_vm8, %v1353_v23 }
 0x415   :  { %13489 = vmatmul.mubr.msk.f32.gmra.mrb[6].mxu1 %vm1104_vm8, %v1224_v22 }
 0x4d2   :  { %v1184_v24 = vpop.f32.mrb[0].mxu0 }
 0x4d3   :  { %1198 = vst.msk [vmem:[%s18884_s3] sm:$0xff] %vm1104_vm8, %v1184_v24  ;;  %v13469_v25 = vpop.f32.mrb[1].mxu0 }
 0x4d6   :  { %v1189_v26 = vpop.f32.mrb[2].mxu0 }
 0x4d7   :  { %1199 = vst.msk [vmem:[%s18884_s3 + $0x8] sm:$0xff] %vm1104_vm8, %v1189_v26  ;;  %v13472_v27 = vpop.f32.mrb[3].mxu0 }
 0x4da   :  { %v1194_v28 = vpop.f32.mrb[0].mxu1 }
 0x4db   :  { %1201 = vst.msk [vmem:[%s18884_s3 + $0x10] sm:$0x1] %vm1200_vm9, %v1194_v28  ;;  %v13475_v29 = vpop.f32.mrb[1].mxu1 }
 0x4de   :  { %v1442_v30 = vpop.f32.mrb[4].mxu0 }
 0x4df   :  { %11690 = vst.msk [vmem:[%s18884_s3 + $0x30] sm:$0xff] %vm1104_vm8, %v1442_v30  ;;  %v13499_v31 = vpop.f32.mrb[5].mxu0 }
 0x4e0   :  { %v1313_v32 = vpop.f32.mrb[2].mxu1 }
 0x4e1   :  { %11678 = vst.msk [vmem:[%s18884_s3 + $0x18] sm:$0xff] %vm1104_vm8, %v1313_v32  ;;  %v13484_v33 = vpop.f32.mrb[3].mxu1 }
 0x4e2   :  { %v1447_v34 = vpop.f32.mrb[6].mxu0 }
 0x4e3   :  { %11691 = vst.msk [vmem:[%s18884_s3 + $0x38] sm:$0xff] %vm1104_vm8, %v1447_v34  ;;  %v13502_v35 = vpop.f32.mrb[7].mxu0 }
 0x4e4   :  { %v1318_v36 = vpop.f32.mrb[4].mxu1 }
 0x4e5   :  { %11679 = vst.msk [vmem:[%s18884_s3 + $0x20] sm:$0xff] %vm1104_vm8, %v1318_v36  ;;  %v13487_v37 = vpop.f32.mrb[5].mxu1 }
 0x4e6   :  { %v1452_v38 = vpop.f32.mrb[8].mxu0 }
 0x4e7   :  { %11692 = vst.msk [vmem:[%s18884_s3 + $0x40] sm:$0x1] %vm1200_vm9, %v1452_v38  ;;  %v13505_v39 = vpop.f32.mrb[9].mxu0 }
 0x4e8   :  { %v1323_v40 = vpop.f32.mrb[6].mxu1 }
 0x4e9   :  { %11680 = vst.msk [vmem:[%s18884_s3 + $0x28] sm:$0x1] %vm1200_vm9, %v1323_v40  ;;  %v13490_v41 = vpop.f32.mrb[7].mxu1 }
 0x4ea PF:  { %p11693_p9 = scmp.ne.s32.totalorder %s15367_s21, 0 }
 0x4eb   :  { %v11694_v42 = vld [vmem:[%s18882_s1 + $0x48] sm:$0xff] (!%p11693_p9)  ;;  %vm1475_vm10 = vcmask (!%p11693_p9), 138240   ;;  %v11695_v43 = vld [vmem:[%s18882_s1 + $0x50] sm:$0xff] (!%p11693_p9)  ;;  %v11696_v44 = vld [vmem:[%s18882_s1 + $0x58] sm:$0x1] (!%p11693_p9)  ;;  %vm1478_vm11 = vcmask (!%p11693_p9), 131072  }
 0x4ec   :  { %1463 = sbr.rel (%p11693_p9) target bundleno = 1267 (0x4f3), region = 29  ;;  %11703 = vst.msk [vmem:[%s18884_s3 + $0x48] sm:$0xff] (!%p11693_p9), %vm1475_vm10, %v11694_v42  ;;  %11704 = vst.msk [vmem:[%s18884_s3 + $0x50] sm:$0xff] (!%p11693_p9), %vm1475_vm10, %v11695_v43  ;;  %v11697_v45 = vld [vmem:[%s18882_s1 + $0x60] sm:$0xff] (!%p11693_p9)  ;;  %v11698_v46 = vld [vmem:[%s18882_s1 + $0x68] sm:$0xff] (!%p11693_p9) }
 0x4ed   :  { %11705 = vst.msk [vmem:[%s18884_s3 + $0x58] sm:$0x1] (!%p11693_p9), %vm1478_vm11, %v11696_v44  ;;  %v11699_v47 = vld [vmem:[%s18882_s1 + $0x70] sm:$0x1] (!%p11693_p9)  ;;  %v11700_v48 = vld [vmem:[%s18882_s1 + $0x78] sm:$0xff] (!%p11693_p9)  ;;  %v11701_v49 = vld [vmem:[%s18882_s1 + $0x80] sm:$0xff] (!%p11693_p9) }
 0x4ee   :  { %11706 = vst.msk [vmem:[%s18884_s3 + $0x60] sm:$0xff] (!%p11693_p9), %vm1475_vm10, %v11697_v45  ;;  %11707 = vst.msk [vmem:[%s18884_s3 + $0x68] sm:$0xff] (!%p11693_p9), %vm1475_vm10, %v11698_v46  ;;  %v11702_v50 = vld [vmem:[%s18882_s1 + $0x88] sm:$0x1] (!%p11693_p9) }
 0x4ef   :  { %11708 = vst.msk [vmem:[%s18884_s3 + $0x70] sm:$0x1] (!%p11693_p9), %vm1478_vm11, %v11699_v47  ;;  %11711 = vst.msk [vmem:[%s18884_s3 + $0x88] sm:$0x1] (!%p11693_p9), %vm1478_vm11, %v11702_v50 }
 0x4f0   :  { %11709 = vst.msk [vmem:[%s18884_s3 + $0x78] sm:$0xff] (!%p11693_p9), %vm1475_vm10, %v11700_v48  ;;  %11710 = vst.msk [vmem:[%s18884_s3 + $0x80] sm:$0xff] (!%p11693_p9), %vm1475_vm10, %v11701_v49 }
 0x4f3 PF:  { %p11712_p10 = scmp.ne.s32.totalorder %s15367_s21, 1 }
 0x4f4   :  { %v1490_v51 = vlaneseq (!%p11712_p10)  ;;  %v15249_v52 = vmov (!%p11712_p10), 0.0|0.0   ;;  %vm15250_vm12 = vmmov (!%p11712_p10), 0   ;;  %v15251_v55 = vmov (!%p11712_p10), 0.0   ;;  %v11716_v0 = vld [vmem:[%s18882_s1 + $0x48] sm:$0xff] (!%p11712_p10)  ;;  %v11718_v1 = vld [vmem:[%s18882_s1 + $0x58] sm:$0x1] (!%p11712_p10) }
 0x4f5   :  { %1489 = sbr.rel (%p11712_p10) target bundleno = 1645 (0x66d), region = 33  ;;  %14802 = vmatprep.subr.bf16.mxu0 (!%p11712_p10), %v15249_v52  ;;  %15062 = vmatprep.subr.bf16.mxu1 (!%p11712_p10), %v15249_v52  ;;  %v15252_v62 = vmov (!%p11712_p10), 1.0|1.0   ;;  %vm1522_vm1 = vcmask (!%p11712_p10), 1040384   ;;  %vm1512_vm2 = vcmask (!%p11712_p10), 138240   ;;  %v11717_v2 = vld [vmem:[%s18882_s1 + $0x50] sm:$0xff] (!%p11712_p10) }
 0x4f6   :  { %v1491_v53 = vshrl.u32 (!%p11712_p10), %v1490_v51, 7  ;;  %v1495_v54 = vand.u32 (!%p11712_p10), 127, %v1490_v51  ;;  %13512 = vmatprep.mubr.msk.f32.mxu0 (!%p11712_p10), %vm15250_vm12, %v15251_v55  ;;  %13518 = vmatprep.mubr.msk.f32.mxu1 (!%p11712_p10), %vm15250_vm12, %v15251_v55  ;;  %v11728_v3 = vld [vmem:[%s18882_s1 + $0x60] sm:$0xff] (!%p11712_p10)  ;;  %v11740_v4 = vld [vmem:[%s18882_s1 + $0x78] sm:$0xff] (!%p11712_p10)  ;;  %v11729_v5 = vld [vmem:[%s18882_s1 + $0x68] sm:$0xff] (!%p11712_p10)  ;;  %vm1641_vm3 = vcmask (!%p11712_p10), 131072  }
 0x4f7   :  { %v11741_v6 = vld [vmem:[%s18882_s1 + $0x80] sm:$0xff] (!%p11712_p10)  ;;  %v11730_v7 = vld [vmem:[%s18882_s1 + $0x70] sm:$0x1] (!%p11712_p10)  ;;  %v11742_v8 = vld [vmem:[%s18882_s1 + $0x88] sm:$0x1] (!%p11712_p10) }
 0x4f8   :  { %v1492_v56 = vadd.s32 (!%p11712_p10), 8, %v1491_v53  ;;  %v1496_v57 = vadd.s32 (!%p11712_p10), %v1495_v54, %v1491_v53  ;;  %v1493_v58 = vadd.s32 (!%p11712_p10), 16, %v1491_v53 }
 0x4fa   :  { %v1497_v59 = vadd.s32 (!%p11712_p10), %v1495_v54, %v1492_v56  ;;  %vm1499_vm13 = vcmp.eq.s32.totalorder (!%p11712_p10), %v1496_v57, 16  ;;  %v1498_v60 = vadd.s32 (!%p11712_p10), %v1495_v54, %v1493_v58 }
 0x4fc   :  { %vm1500_vm14 = vcmp.eq.s32.totalorder %v1497_v59, 16  ;;  %vm1501_vm15 = vcmp.eq.s32.totalorder %v1498_v60, 16 }
 0x4fd   :  { %vm15879_vm0 = vmpackc.low %vm1500_vm14, %vm1499_vm13  ;;  %v11715_v63 = vsel %vm1501_vm15, 1.0, %v15251_v55 }
 0x4fe   :  { %14804 = vmatpush3.bf16.msk.msra.mxu0 %vm15879_vm0, %v15252_v62  ;;  %15064 = vmatpush3.bf16.msk.msra.mxu1 %vm15879_vm0, %v15252_v62 }
 0x4ff   :  { %13510 = vmatprep.subr.mxu0 %v15251_v55  ;;  %15063 = vmatprep.subr.mxu1 %v15251_v55 }
 0x502   :  { %13511 = vmatpush3.msk.msra.mxu0 %vm1522_vm1, %v11715_v63  ;;  %15065 = vmatpush3.msk.msra.mxu1 %vm1522_vm1, %v11715_v63 }
 0x503   :  { %13513 = vmatmul.mubr.msk.f32.vlgmr.msra.gmra.mrb[0].mxu0 %vm1512_vm2, %v11716_v0  ;;  %14808 = vmatprep.subr.bf16.mxu0 %v15249_v52 }
 0x504   :  { %13515 = vmatprep.mubr.msk.f32.mxu0 %vm15250_vm12, %v15251_v55  ;;  %14810 = vmatpush3.bf16.msk.msra.mxu0 %vm15879_vm0, %v15252_v62 }
 0x505   :  { %13519 = vmatmul.mubr.msk.f32.vlgmr.msra.gmra.mrb[0].mxu1 %vm1512_vm2, %v11718_v1  ;;  %14805 = vmatprep.subr.bf16.mxu1 %v15249_v52 }
 0x506   :  { %14807 = vmatpush3.bf16.msk.msra.mxu1 %vm15879_vm0, %v15252_v62  ;;  %13540 = vmatprep.subr.mxu0 %v15251_v55 }
 0x507   :  { %13516 = vmatmul.mubr.msk.f32.gmra.mrb[2].mxu0 %vm1512_vm2, %v11717_v2  ;;  %13525 = vmatprep.subr.mxu1 %v15251_v55 }
 0x508   :  { %13541 = vmatpush3.msk.msra.mxu0 %vm1522_vm1, %v11715_v63  ;;  %13527 = vmatprep.mubr.msk.f32.mxu1 %vm15250_vm12, %v15251_v55 }
 0x509   :  { %13542 = vmatprep.mubr.msk.f32.mxu0 %vm15250_vm12, %v15251_v55 }
 0x50a   :  { %13526 = vmatpush3.msk.msra.mxu1 %vm1522_vm1, %v11715_v63 }
 0x50b   :  { %13528 = vmatmul.mubr.msk.f32.vlgmr.msra.gmra.mrb[2].mxu1 %vm1512_vm2, %v11728_v3  ;;  %13543 = vmatmul.mubr.msk.f32.vlgmr.msra.gmra.mrb[4].mxu0 %vm1512_vm2, %v11740_v4 }
 0x50c   :  { %13530 = vmatprep.mubr.msk.f32.mxu1 %vm15250_vm12, %v15251_v55  ;;  %13545 = vmatprep.mubr.msk.f32.mxu0 %vm15250_vm12, %v15251_v55 }
 0x50f   :  { %13531 = vmatmul.mubr.msk.f32.gmra.mrb[4].mxu1 %vm1512_vm2, %v11729_v5  ;;  %13546 = vmatmul.mubr.msk.f32.gmra.mrb[6].mxu0 %vm1512_vm2, %v11741_v6 }
 0x510   :  { %13533 = vmatprep.mubr.msk.f32.mxu1 %vm15250_vm12, %v15251_v55  ;;  %13548 = vmatprep.mubr.msk.f32.mxu0 %vm15250_vm12, %v15251_v55 }
 0x513   :  { %13534 = vmatmul.mubr.msk.f32.gmra.mrb[6].mxu1 %vm1512_vm2, %v11730_v7  ;;  %13549 = vmatmul.mubr.msk.f32.gmra.mrb[8].mxu0 %vm1512_vm2, %v11742_v8 }
 0x5d6   :  { %v1592_v9 = vpop.f32.mrb[0].mxu0 }
 0x5d7   :  { %1606 = vxpose.xlu0.b32.start [1/3] (short) (narrow) %v1592_v9, 24  ;;  %v13514_v10 = vpop.f32.mrb[1].mxu0 }
 0x5d8   :  { %v1602_v11 = vpop.f32.mrb[0].mxu1 }
 0x5d9   :  { %v13520_v12 = vpop.f32.mrb[1].mxu1 }
 0x5da   :  { %v1597_v13 = vpop.f32.mrb[2].mxu0 }
 0x5db   :  { %1607 = vxpose.xlu0.b32.cont [2/3] (short) (narrow) %v1597_v13, 24  ;;  %v13517_v14 = vpop.f32.mrb[3].mxu0 }
 0x5de   :  { %v1722_v15 = vpop.f32.mrb[2].mxu1  ;;  %v1851_v16 = vpop.f32.mrb[4].mxu0 }
 0x5df   :  { %1608 = vxpose.xlu0.b32.end [3/3] (short) (narrow) %v1602_v11, 24  ;;  %v13529_v17 = vpop.f32.mrb[3].mxu1  ;;  %v13544_v18 = vpop.f32.mrb[5].mxu0  ;;  %1736 = vxpose.xlu1.b32.start [1/3] (short) (narrow) %v1722_v15, 24 }
 0x5e2   :  { %v1727_v19 = vpop.f32.mrb[4].mxu1  ;;  %v1856_v20 = vpop.f32.mrb[6].mxu0 }
 0x5e3   :  { %1865 = vxpose.xlu0.b32.start [1/3] (short) (narrow) %v1851_v16, 24  ;;  %v13532_v21 = vpop.f32.mrb[5].mxu1  ;;  %v13547_v22 = vpop.f32.mrb[7].mxu0  ;;  %1737 = vxpose.xlu1.b32.cont [2/3] (short) (narrow) %v1727_v19, 24 }
 0x5e6   :  { %v1732_v23 = vpop.f32.mrb[6].mxu1  ;;  %v1861_v24 = vpop.f32.mrb[8].mxu0 }
 0x5e7   :  { %1866 = vxpose.xlu0.b32.cont [2/3] (short) (narrow) %v1856_v20, 24  ;;  %v13535_v25 = vpop.f32.mrb[7].mxu1  ;;  %v13550_v26 = vpop.f32.mrb[9].mxu0  ;;  %1738 = vxpose.xlu1.b32.end [3/3] (short) (narrow) %v1732_v23, 24 }
 0x5eb   :  { %1867 = vxpose.xlu0.b32.end [3/3] (short) (narrow) %v1861_v24, 24 }
 0x657   :  { %v1622_v27 = vpop.trf.xlu0 }
 0x658   :  { %11725 = vst.msk [vmem:[%s18884_s3 + $0x48] sm:$0xff] %vm1512_vm2, %v1622_v27 }
 0x65b   :  { %v1623_v28 = vpop.trf.xlu0 }
 0x65c   :  { %11726 = vst.msk [vmem:[%s18884_s3 + $0x50] sm:$0xff] %vm1512_vm2, %v1623_v28 }
 0x65f   :  { %v1624_v29 = vpop.trf.xlu0  ;;  %v1752_v30 = vpop.trf.xlu1 }
 0x660   :  { %11727 = vst.msk [vmem:[%s18884_s3 + $0x58] sm:$0x1] %vm1641_vm3, %v1624_v29 }
 0x661   :  { %11737 = vst.msk [vmem:[%s18884_s3 + $0x60] sm:$0xff] %vm1512_vm2, %v1752_v30 }
 0x663   :  { %v1881_v31 = vpop.trf.xlu0  ;;  %v1753_v32 = vpop.trf.xlu1 }
 0x664   :  { %11749 = vst.msk [vmem:[%s18884_s3 + $0x78] sm:$0xff] %vm1512_vm2, %v1881_v31  ;;  %11738 = vst.msk [vmem:[%s18884_s3 + $0x68] sm:$0xff] %vm1512_vm2, %v1753_v32 }
 0x667   :  { %v1882_v33 = vpop.trf.xlu0  ;;  %v1754_v34 = vpop.trf.xlu1 }
 0x668   :  { %11750 = vst.msk [vmem:[%s18884_s3 + $0x80] sm:$0xff] %vm1512_vm2, %v1882_v33 }
 0x669   :  { %11739 = vst.msk [vmem:[%s18884_s3 + $0x70] sm:$0x1] %vm1641_vm3, %v1754_v34 }
 0x66b   :  { %v1883_v35 = vpop.trf.xlu0 }
 0x66c   :  { %11751 = vst.msk [vmem:[%s18884_s3 + $0x88] sm:$0x1] %vm1641_vm3, %v1883_v35 }
 0x66d PF:  { %p11752_p11 = scmp.ne.s32.totalorder %s15367_s21, 2 }
 0x66e   :  { %v1905_v36 = vlaneseq (!%p11752_p11)  ;;  %v15253_v37 = vmov (!%p11752_p11), 0.0|0.0   ;;  %vm15254_vm4 = vmmov (!%p11752_p11), 0   ;;  %v15255_v40 = vmov (!%p11752_p11), 0.0   ;;  %v11756_v49 = vld [vmem:[%s18882_s1 + $0x48] sm:$0xff] (!%p11752_p11)  ;;  %v11757_v50 = vld [vmem:[%s18882_s1 + $0x50] sm:$0xff] (!%p11752_p11)  ;;  %v11772_v52 = vld [vmem:[%s18882_s1 + $0x60] sm:$0xff] (!%p11752_p11) }
 0x66f   :  { %1904 = sbr.rel (%p11752_p11) target bundleno = 2129 (0x851), region = 37  ;;  %14811 = vmatprep.subr.bf16.mxu0 (!%p11752_p11), %v15253_v37  ;;  %14814 = vmatprep.subr.bf16.mxu1 (!%p11752_p11), %v15253_v37  ;;  %v15256_v47 = vmov (!%p11752_p11), 1.0|1.0   ;;  %vm1937_vm9 = vcmask (!%p11752_p11), 1040384   ;;  %vm1927_vm10 = vcmask (!%p11752_p11), 138240   ;;  %v11773_v53 = vld [vmem:[%s18882_s1 + $0x68] sm:$0xff] (!%p11752_p11) }
 0x670   :  { %v1906_v38 = vshrl.u32 (!%p11752_p11), %v1905_v36, 7  ;;  %v1910_v39 = vand.u32 (!%p11752_p11), 127, %v1905_v36  ;;  %13557 = vmatprep.mubr.msk.f32.mxu0 (!%p11752_p11), %vm15254_vm4, %v15255_v40  ;;  %13572 = vmatprep.mubr.msk.f32.mxu1 (!%p11752_p11), %vm15254_vm4, %v15255_v40  ;;  %v11758_v51 = vld [vmem:[%s18882_s1 + $0x58] sm:$0x1] (!%p11752_p11)  ;;  %v11774_v54 = vld [vmem:[%s18882_s1 + $0x70] sm:$0x1] (!%p11752_p11) }
 0x671   :  { %v11788_v55 = vld [vmem:[%s18882_s1 + $0x78] sm:$0xff] (!%p11752_p11)  ;;  %v11789_v56 = vld [vmem:[%s18882_s1 + $0x80] sm:$0xff] (!%p11752_p11)  ;;  %v11790_v57 = vld [vmem:[%s18882_s1 + $0x88] sm:$0x1] (!%p11752_p11)  ;;  %vm2115_vm11 = vcmask (!%p11752_p11), 131072  }
 0x672   :  { %v1907_v41 = vadd.s32 (!%p11752_p11), 8, %v1906_v38  ;;  %v1911_v42 = vadd.s32 (!%p11752_p11), %v1910_v39, %v1906_v38  ;;  %v1908_v43 = vadd.s32 (!%p11752_p11), 16, %v1906_v38 }
 0x674   :  { %v15978_v44 = vadd.s32 (!%p11752_p11), %v1910_v39, %v1907_v41  ;;  %vm1914_vm5 = vcmp.eq.s32.totalorder (!%p11752_p11), %v1911_v42, 16  ;;  %v1913_v45 = vadd.s32 (!%p11752_p11), %v1910_v39, %v1908_v43 }
 0x675   :  { %v11753_v1 = vsel (!%p11752_p11), %vm1914_vm5, 1.0, %v15255_v40 }
 0x676   :  { %vm1915_vm6 = vcmp.eq.s32.totalorder %v15978_v44, 16  ;;  %vm1916_vm7 = vcmp.eq.s32.totalorder %v1913_v45, 16 }
 0x677   :  { %vm15984_vm8 = vmpackc.low %vm1915_vm6, %vm1914_vm5  ;;  %v15992_v48 = vsel %vm1916_vm7, 1.0, %v15255_v40  ;;  %v11754_v4 = vsel %vm1915_vm6, 1.0, %v15255_v40 }
 0x678   :  { %14813 = vmatpush3.bf16.msk.msra.mxu0 %vm15984_vm8, %v15256_v47 }
 0x679   :  { %13555 = vmatprep.subr.mxu0 %v15255_v40 }
 0x67c   :  { %13556 = vmatpush3.msk.msra.mxu0 %vm1937_vm9, %v15992_v48 }
 0x67d   :  { %13558 = vmatmul.mubr.msk.f32.vlgmr.msra.gmra.mrb[0].mxu0 %vm1927_vm10, %v11756_v49  ;;  %14817 = vmatprep.subr.bf16.mxu0 %v15253_v37 }
 0x67e   :  { %13560 = vmatprep.mubr.msk.f32.mxu0 %vm15254_vm4, %v15255_v40  ;;  %14819 = vmatpush3.bf16.msk.msra.mxu0 %vm15984_vm8, %v15256_v47 }
 0x67f   :  { %13585 = vmatprep.subr.mxu0 %v15255_v40 }
 0x681   :  { %13561 = vmatmul.mubr.msk.f32.gmra.mrb[2].mxu0 %vm1927_vm10, %v11757_v50 }
 0x682   :  { %13563 = vmatprep.mubr.msk.f32.mxu0 %vm15254_vm4, %v15255_v40  ;;  %13586 = vmatpush3.msk.msra.mxu0 %vm1937_vm9, %v15992_v48 }
 0x683   :  { %14823 = vmatprep.subr.bf16.mxu0 %v15253_v37 }
 0x685   :  { %13564 = vmatmul.mubr.msk.f32.gmra.mrb[4].mxu0 %vm1927_vm10, %v11758_v51 }
 0x686   :  { %13587 = vmatprep.mubr.msk.f32.mxu0 %vm15254_vm4, %v15255_v40 }
 0x689   :  { %13588 = vmatmul.mubr.msk.f32.vlgmr.msra.gmra.mrb[6].mxu0 %vm1927_vm10, %v11772_v52 }
 0x68a   :  { %13590 = vmatprep.mubr.msk.f32.mxu0 %vm15254_vm4, %v15255_v40  ;;  %14825 = vmatpush3.bf16.msk.msra.mxu0 %vm15984_vm8, %v15256_v47 }
 0x68b   :  { %13615 = vmatprep.subr.mxu0 %v15255_v40 }
 0x68d   :  { %13591 = vmatmul.mubr.msk.f32.gmra.mrb[8].mxu0 %vm1927_vm10, %v11773_v53 }
 0x68e   :  { %13593 = vmatprep.mubr.msk.f32.mxu0 %vm15254_vm4, %v15255_v40  ;;  %13616 = vmatpush3.msk.msra.mxu0 %vm1937_vm9, %v15992_v48 }
 0x691   :  { %13594 = vmatmul.mubr.msk.f32.gmra.mrb[10].mxu0 %vm1927_vm10, %v11774_v54 }
 0x692   :  { %13617 = vmatprep.mubr.msk.f32.mxu0 %vm15254_vm4, %v15255_v40 }
 0x695   :  { %13618 = vmatmul.mubr.msk.f32.vlgmr.msra.gmra.mrb[12].mxu0 %vm1927_vm10, %v11788_v55 }
 0x696   :  { %13620 = vmatprep.mubr.msk.f32.mxu0 %vm15254_vm4, %v15255_v40 }
 0x699   :  { %13621 = vmatmul.mubr.msk.f32.gmra.mrb[14].mxu0 %vm1927_vm10, %v11789_v56 }
 0x69a   :  { %13623 = vmatprep.mubr.msk.f32.mxu0 %vm15254_vm4, %v15255_v40 }
 0x69d   :  { %13624 = vmatmul.mubr.msk.f32.gmra.mrb[16].mxu0 %vm1927_vm10, %v11790_v57 }
 0x750   :  { %v2007_v58 = vpop.f32.mrb[0].mxu0 }
 0x751   :  { %v13559_v59 = vpop.f32.mrb[1].mxu0 }
 0x754   :  { %v2012_v60 = vpop.f32.mrb[2].mxu0 }
 0x755   :  { %v14815_v61 = vpack.c.bf16 %v2012_v60, %v2007_v58  ;;  %v13562_v62 = vpop.f32.mrb[3].mxu0 }
 0x757   :  { %14816 = vmatpush3.bf16.msra.mxu1 %v14815_v61 }
 0x758   :  { %v2017_v63 = vpop.f32.mrb[4].mxu0  ;;  %13570 = vmatprep.subr.mxu1 %v15255_v40 }
 0x759   :  { %v13565_v0 = vpop.f32.mrb[5].mxu0 }
 0x75b   :  { %13571 = vmatpush3.msk.msra.mxu1 %vm1937_vm9, %v2017_v63 }
 0x75c   :  { %v2196_v2 = vpop.f32.mrb[6].mxu0  ;;  %13573 = vmatmul.mubr.msk.f32.vlgmr.msra.gmra.mrb[0].mxu1 %vm1927_vm10, %v11753_v1  ;;  %14820 = vmatprep.subr.bf16.mxu1 %v15253_v37 }
 0x75d   :  { %v13589_v3 = vpop.f32.mrb[7].mxu0  ;;  %13575 = vmatprep.mubr.msk.f32.mxu1 %vm15254_vm4, %v15255_v40 }
 0x760   :  { %v2201_v5 = vpop.f32.mrb[8].mxu0  ;;  %13576 = vmatmul.mubr.msk.f32.gmra.mrb[2].mxu1 %vm1927_vm10, %v11754_v4 }
 0x761   :  { %v14821_v6 = vpack.c.bf16 %v2201_v5, %v2196_v2  ;;  %v13592_v7 = vpop.f32.mrb[9].mxu0  ;;  %13578 = vmatprep.mubr.msk.f32.mxu1 %vm15254_vm4, %v15255_v40 }
 0x763   :  { %14822 = vmatpush3.bf16.msra.mxu1 %v14821_v6 }
 0x764   :  { %v2206_v8 = vpop.f32.mrb[10].mxu0  ;;  %13600 = vmatprep.subr.mxu1 %v15255_v40  ;;  %13579 = vmatmul.mubr.msk.f32.gmra.mrb[4].mxu1 %vm1927_vm10, %v15992_v48 }
 0x765   :  { %v13595_v9 = vpop.f32.mrb[11].mxu0  ;;  %13602 = vmatprep.mubr.msk.f32.mxu1 %vm15254_vm4, %v15255_v40 }
 0x767   :  { %13601 = vmatpush3.msk.msra.mxu1 %vm1937_vm9, %v2206_v8 }
 0x768   :  { %v2376_v10 = vpop.f32.mrb[12].mxu0  ;;  %13603 = vmatmul.mubr.msk.f32.vlgmr.msra.gmra.mrb[6].mxu1 %vm1927_vm10, %v11753_v1  ;;  %14826 = vmatprep.subr.bf16.mxu1 %v15253_v37 }
 0x769   :  { %v13619_v11 = vpop.f32.mrb[13].mxu0  ;;  %13605 = vmatprep.mubr.msk.f32.mxu1 %vm15254_vm4, %v15255_v40 }
 0x76c   :  { %v2381_v12 = vpop.f32.mrb[14].mxu0  ;;  %13606 = vmatmul.mubr.msk.f32.gmra.mrb[8].mxu1 %vm1927_vm10, %v11754_v4 }
 0x76d   :  { %v14827_v13 = vpack.c.bf16 %v2381_v12, %v2376_v10  ;;  %v13622_v14 = vpop.f32.mrb[15].mxu0  ;;  %13608 = vmatprep.mubr.msk.f32.mxu1 %vm15254_vm4, %v15255_v40 }
 0x76f   :  { %14828 = vmatpush3.bf16.msra.mxu1 %v14827_v13 }
 0x770   :  { %v2386_v15 = vpop.f32.mrb[16].mxu0  ;;  %13630 = vmatprep.subr.mxu1 %v15255_v40  ;;  %13609 = vmatmul.mubr.msk.f32.gmra.mrb[10].mxu1 %vm1927_vm10, %v15992_v48 }
 0x771   :  { %v13625_v16 = vpop.f32.mrb[17].mxu0  ;;  %13632 = vmatprep.mubr.msk.f32.mxu1 %vm15254_vm4, %v15255_v40 }
 0x773   :  { %13631 = vmatpush3.msk.msra.mxu1 %vm1937_vm9, %v2386_v15 }
 0x774   :  { %13633 = vmatmul.mubr.msk.f32.vlgmr.msra.gmra.mrb[12].mxu1 %vm1927_vm10, %v11753_v1 }
 0x775   :  { %13635 = vmatprep.mubr.msk.f32.mxu1 %vm15254_vm4, %v15255_v40 }
 0x778   :  { %13636 = vmatmul.mubr.msk.f32.gmra.mrb[14].mxu1 %vm1927_vm10, %v11754_v4 }
 0x779   :  { %13638 = vmatprep.mubr.msk.f32.mxu1 %vm15254_vm4, %v15255_v40 }
 0x77c   :  { %13639 = vmatmul.mubr.msk.f32.gmra.mrb[16].mxu1 %vm1927_vm10, %v15992_v48 }
 0x82f   :  { %v2098_v17 = vpop.f32.mrb[0].mxu1 }
 0x830   :  { %11769 = vst.msk [vmem:[%s18884_s3 + $0x48] sm:$0xff] %vm1927_vm10, %v2098_v17  ;;  %v13574_v18 = vpop.f32.mrb[1].mxu1 }
 0x833   :  { %v2103_v19 = vpop.f32.mrb[2].mxu1 }
 0x834   :  { %11770 = vst.msk [vmem:[%s18884_s3 + $0x50] sm:$0xff] %vm1927_vm10, %v2103_v19  ;;  %v13577_v20 = vpop.f32.mrb[3].mxu1 }
 0x837   :  { %v2108_v21 = vpop.f32.mrb[4].mxu1 }
 0x838   :  { %11771 = vst.msk [vmem:[%s18884_s3 + $0x58] sm:$0x1] %vm2115_vm11, %v2108_v21  ;;  %v13580_v22 = vpop.f32.mrb[5].mxu1 }
 0x83b   :  { %v2279_v23 = vpop.f32.mrb[6].mxu1 }
 0x83c   :  { %11785 = vst.msk [vmem:[%s18884_s3 + $0x60] sm:$0xff] %vm1927_vm10, %v2279_v23  ;;  %v13604_v24 = vpop.f32.mrb[7].mxu1 }
 0x83f   :  { %v2284_v25 = vpop.f32.mrb[8].mxu1 }
 0x840   :  { %11786 = vst.msk [vmem:[%s18884_s3 + $0x68] sm:$0xff] %vm1927_vm10, %v2284_v25  ;;  %v13607_v26 = vpop.f32.mrb[9].mxu1 }
 0x843   :  { %v2289_v27 = vpop.f32.mrb[10].mxu1 }
 0x844   :  { %11787 = vst.msk [vmem:[%s18884_s3 + $0x70] sm:$0x1] %vm2115_vm11, %v2289_v27  ;;  %v13610_v28 = vpop.f32.mrb[11].mxu1 }
 0x847   :  { %v2459_v29 = vpop.f32.mrb[12].mxu1 }
 0x848   :  { %11801 = vst.msk [vmem:[%s18884_s3 + $0x78] sm:$0xff] %vm1927_vm10, %v2459_v29  ;;  %v13634_v30 = vpop.f32.mrb[13].mxu1 }
 0x84b   :  { %v2464_v31 = vpop.f32.mrb[14].mxu1 }
 0x84c   :  { %11802 = vst.msk [vmem:[%s18884_s3 + $0x80] sm:$0xff] %vm1927_vm10, %v2464_v31  ;;  %v13637_v32 = vpop.f32.mrb[15].mxu1 }
 0x84f   :  { %v2469_v33 = vpop.f32.mrb[16].mxu1 }
 0x850   :  { %11803 = vst.msk [vmem:[%s18884_s3 + $0x88] sm:$0x1] %vm2115_vm11, %v2469_v33  ;;  %v13640_v34 = vpop.f32.mrb[17].mxu1 }
 0x851 PF:  { %p11804_p12 = scmp.ne.s32.totalorder %s15367_s21, 3 }
 0x852   :  { %v11808_v35 = vld [vmem:[%s18882_s1 + $0x48] sm:$0xff] (!%p11804_p12)  ;;  %v2481_v36 = vlaneseq (!%p11804_p12)  ;;  %v11820_v37 = vld [vmem:[%s18882_s1 + $0x60] sm:$0xff] (!%p11804_p12)  ;;  %v15257_v38 = vmov (!%p11804_p12), 0.0|0.0   ;;  %v11809_v39 = vld [vmem:[%s18882_s1 + $0x50] sm:$0xff] (!%p11804_p12)  ;;  %vm15258_vm12 = vmmov (!%p11804_p12), 0   ;;  %v15259_v43 = vmov (!%p11804_p12), 0.0  }
 0x853   :  { %2480 = sbr.rel (%p11804_p12) target bundleno = 2495 (0x9bf), region = 41  ;;  %2503 = vxpose.xlu0.b32.start [1/3] (short) (narrow) (!%p11804_p12), %v11808_v35, 24  ;;  %14829 = vmatprep.subr.bf16.mxu0 (!%p11804_p12), %v15257_v38  ;;  %v11821_v40 = vld [vmem:[%s18882_s1 + $0x68] sm:$0xff] (!%p11804_p12)  ;;  %v11810_v47 = vld [vmem:[%s18882_s1 + $0x58] sm:$0x1] (!%p11804_p12)  ;;  %vm2545_vm1 = vcmask (!%p11804_p12), 1040384  }
 0x854   :  { %2638 = vxpose.xlu1.b32.start [1/3] (short) (narrow) (!%p11804_p12), %v11820_v37, 24  ;;  %15066 = vmatprep.subr.bf16.mxu1 (!%p11804_p12), %v15257_v38  ;;  %v2482_v41 = vshrl.u32 (!%p11804_p12), %v2481_v36, 7  ;;  %v2486_v42 = vand.u32 (!%p11804_p12), 127, %v2481_v36  ;;  %v11822_v48 = vld [vmem:[%s18882_s1 + $0x70] sm:$0x1] (!%p11804_p12)  ;;  %v11832_v51 = vld [vmem:[%s18882_s1 + $0x78] sm:$0xff] (!%p11804_p12) }
 0x855   :  { %13647 = vmatprep.mubr.msk.f32.mxu0 (!%p11804_p12), %vm15258_vm12, %v15259_v43  ;;  %13653 = vmatprep.mubr.msk.f32.mxu1 (!%p11804_p12), %vm15258_vm12, %v15259_v43  ;;  %v15260_v53 = vmov (!%p11804_p12), 1.0|1.0   ;;  %v11833_v55 = vld [vmem:[%s18882_s1 + $0x80] sm:$0xff] (!%p11804_p12)  ;;  %v11834_v56 = vld [vmem:[%s18882_s1 + $0x88] sm:$0x1] (!%p11804_p12)  ;;  %vm2535_vm2 = vcmask (!%p11804_p12), 138240  }
 0x856   :  { %v2483_v44 = vadd.s32 (!%p11804_p12), 8, %v2482_v41  ;;  %v2487_v45 = vadd.s32 (!%p11804_p12), %v2486_v42, %v2482_v41  ;;  %v2484_v46 = vadd.s32 (!%p11804_p12), 16, %v2482_v41  ;;  %vm2632_vm3 = vcmask (!%p11804_p12), 131072  }
 0x857   :  { %2504 = vxpose.xlu0.b32.cont [2/3] (short) (narrow) (!%p11804_p12), %v11809_v39, 24 }
 0x858   :  { %2639 = vxpose.xlu1.b32.cont [2/3] (short) (narrow) (!%p11804_p12), %v11821_v40, 24  ;;  %v2488_v49 = vadd.s32 (!%p11804_p12), %v2486_v42, %v2483_v44  ;;  %vm2490_vm13 = vcmp.eq.s32.totalorder (!%p11804_p12), %v2487_v45, 16  ;;  %v2489_v50 = vadd.s32 (!%p11804_p12), %v2486_v42, %v2484_v46 }
 0x85a   :  { %vm2491_vm14 = vcmp.eq.s32.totalorder %v2488_v49, 16  ;;  %vm2492_vm15 = vcmp.eq.s32.totalorder %v2489_v50, 16 }
 0x85b   :  { %2505 = vxpose.xlu0.b32.end [3/3] (short) (narrow) %v11810_v47, 24  ;;  %vm16163_vm0 = vmpackc.low %vm2491_vm14, %vm2490_vm13  ;;  %v11807_v54 = vsel %vm2492_vm15, 1.0, %v15259_v43 }
 0x85c   :  { %2640 = vxpose.xlu1.b32.end [3/3] (short) (narrow) %v11822_v48, 24  ;;  %14831 = vmatpush3.bf16.msk.msra.mxu0 %vm16163_vm0, %v15260_v53 }
 0x85d   :  { %15068 = vmatpush3.bf16.msk.msra.mxu1 %vm16163_vm0, %v15260_v53  ;;  %13645 = vmatprep.subr.mxu0 %v15259_v43 }
 0x85e   :  { %15067 = vmatprep.subr.mxu1 %v15259_v43 }
 0x85f   :  { %2767 = vxpose.xlu0.b32.start [1/3] (short) (narrow) %v11832_v51, 24 }
 0x860   :  { %13646 = vmatpush3.msk.msra.mxu0 %vm2545_vm1, %v11807_v54 }
 0x861   :  { %15069 = vmatpush3.msk.msra.mxu1 %vm2545_vm1, %v11807_v54  ;;  %14835 = vmatprep.subr.bf16.mxu0 %v15257_v38 }
 0x862   :  { %14832 = vmatprep.subr.bf16.mxu1 %v15257_v38 }
 0x863   :  { %2768 = vxpose.xlu0.b32.cont [2/3] (short) (narrow) %v11833_v55, 24 }
 0x867   :  { %2769 = vxpose.xlu0.b32.end [3/3] (short) (narrow) %v11834_v56, 24 }
 0x8d3   :  { %v2519_v57 = vpop.trf.xlu0 }
 0x8d4   :  { %13648 = vmatmul.mubr.msk.f32.vlgmr.msra.gmra.mrb[0].mxu0 %vm2535_vm2, %v2519_v57  ;;  %v2654_v60 = vpop.trf.xlu1 }
 0x8d5   :  { %13650 = vmatprep.mubr.msk.f32.mxu0 %vm15258_vm12, %v15259_v43  ;;  %14837 = vmatpush3.bf16.msk.msra.mxu0 %vm16163_vm0, %v15260_v53 }
 0x8d6   :  { %13675 = vmatprep.subr.mxu0 %v15259_v43 }
 0x8d7   :  { %v2520_v58 = vpop.trf.xlu0 }
 0x8d8   :  { %13651 = vmatmul.mubr.msk.f32.gmra.mrb[2].mxu0 %vm2535_vm2, %v2520_v58  ;;  %v2655_v62 = vpop.trf.xlu1 }
 0x8d9   :  { %13676 = vmatpush3.msk.msra.mxu0 %vm2545_vm1, %v11807_v54  ;;  %13677 = vmatprep.mubr.msk.f32.mxu0 %vm15258_vm12, %v15259_v43 }
 0x8db   :  { %v2521_v59 = vpop.trf.xlu0 }
 0x8dc   :  { %13654 = vmatmul.mubr.msk.f32.vlgmr.msra.gmra.mrb[0].mxu1 %vm2535_vm2, %v2521_v59  ;;  %v2656_v0 = vpop.trf.xlu1 }
 0x8dd   :  { %14834 = vmatpush3.bf16.msk.msra.mxu1 %vm16163_vm0, %v15260_v53  ;;  %13662 = vmatprep.mubr.msk.f32.mxu1 %vm15258_vm12, %v15259_v43 }
 0x8de   :  { %13660 = vmatprep.subr.mxu1 %v15259_v43 }
 0x8df   :  { %v2783_v61 = vpop.trf.xlu0 }
 0x8e0   :  { %13678 = vmatmul.mubr.msk.f32.vlgmr.msra.gmra.mrb[4].mxu0 %vm2535_vm2, %v2783_v61 }
 0x8e1   :  { %13661 = vmatpush3.msk.msra.mxu1 %vm2545_vm1, %v11807_v54  ;;  %13680 = vmatprep.mubr.msk.f32.mxu0 %vm15258_vm12, %v15259_v43 }
 0x8e2   :  { %13663 = vmatmul.mubr.msk.f32.vlgmr.msra.gmra.mrb[2].mxu1 %vm2535_vm2, %v2654_v60 }
 0x8e3   :  { %v2784_v63 = vpop.trf.xlu0  ;;  %13665 = vmatprep.mubr.msk.f32.mxu1 %vm15258_vm12, %v15259_v43 }
 0x8e4   :  { %13681 = vmatmul.mubr.msk.f32.gmra.mrb[6].mxu0 %vm2535_vm2, %v2784_v63 }
 0x8e5   :  { %13683 = vmatprep.mubr.msk.f32.mxu0 %vm15258_vm12, %v15259_v43 }
 0x8e6   :  { %13666 = vmatmul.mubr.msk.f32.gmra.mrb[4].mxu1 %vm2535_vm2, %v2655_v62 }
 0x8e7   :  { %v2785_v1 = vpop.trf.xlu0  ;;  %13668 = vmatprep.mubr.msk.f32.mxu1 %vm15258_vm12, %v15259_v43 }
 0x8e8   :  { %13684 = vmatmul.mubr.msk.f32.gmra.mrb[8].mxu0 %vm2535_vm2, %v2785_v1 }
 0x8ea   :  { %13669 = vmatmul.mubr.msk.f32.gmra.mrb[6].mxu1 %vm2535_vm2, %v2656_v0 }
 0x9a7   :  { %v2615_v2 = vpop.f32.mrb[0].mxu0 }
 0x9a8   :  { %11817 = vst.msk [vmem:[%s18884_s3 + $0x48] sm:$0xff] %vm2535_vm2, %v2615_v2  ;;  %v13649_v3 = vpop.f32.mrb[1].mxu0 }
 0x9ab   :  { %v2620_v4 = vpop.f32.mrb[2].mxu0 }
 0x9ac   :  { %11818 = vst.msk [vmem:[%s18884_s3 + $0x50] sm:$0xff] %vm2535_vm2, %v2620_v4  ;;  %v13652_v5 = vpop.f32.mrb[3].mxu0 }
 0x9af   :  { %v2625_v6 = vpop.f32.mrb[0].mxu1 }
 0x9b0   :  { %11819 = vst.msk [vmem:[%s18884_s3 + $0x58] sm:$0x1] %vm2632_vm3, %v2625_v6  ;;  %v13655_v7 = vpop.f32.mrb[1].mxu1 }
 0x9b3   :  { %v2874_v8 = vpop.f32.mrb[4].mxu0 }
 0x9b4   :  { %11841 = vst.msk [vmem:[%s18884_s3 + $0x78] sm:$0xff] %vm2535_vm2, %v2874_v8  ;;  %v13679_v9 = vpop.f32.mrb[5].mxu0 }
 0x9b5   :  { %v2745_v10 = vpop.f32.mrb[2].mxu1 }
 0x9b6   :  { %11829 = vst.msk [vmem:[%s18884_s3 + $0x60] sm:$0xff] %vm2535_vm2, %v2745_v10  ;;  %v13664_v11 = vpop.f32.mrb[3].mxu1 }
 0x9b7   :  { %v2879_v12 = vpop.f32.mrb[6].mxu0 }
 0x9b8   :  { %11842 = vst.msk [vmem:[%s18884_s3 + $0x80] sm:$0xff] %vm2535_vm2, %v2879_v12  ;;  %v13682_v13 = vpop.f32.mrb[7].mxu0 }
 0x9b9   :  { %v2750_v14 = vpop.f32.mrb[4].mxu1 }
 0x9ba   :  { %11830 = vst.msk [vmem:[%s18884_s3 + $0x68] sm:$0xff] %vm2535_vm2, %v2750_v14  ;;  %v13667_v15 = vpop.f32.mrb[5].mxu1 }
 0x9bb   :  { %v2884_v16 = vpop.f32.mrb[8].mxu0 }
 0x9bc   :  { %11843 = vst.msk [vmem:[%s18884_s3 + $0x88] sm:$0x1] %vm2632_vm3, %v2884_v16  ;;  %v13685_v17 = vpop.f32.mrb[9].mxu0 }
 0x9bd   :  { %v2755_v18 = vpop.f32.mrb[6].mxu1 }
 0x9be   :  { %11831 = vst.msk [vmem:[%s18884_s3 + $0x70] sm:$0x1] %vm2632_vm3, %v2755_v18  ;;  %v13670_v19 = vpop.f32.mrb[7].mxu1 }
 0x9bf PF:  { %p11844_p13 = scmp.ne.s32.totalorder %s15369_s22, 0 }
 0x9c0   :  { %v11845_v20 = vld [vmem:[%s18882_s1 + $0x90] sm:$0xff] (!%p11844_p13)  ;;  %vm2907_vm4 = vcmask (!%p11844_p13), 138240   ;;  %v11846_v21 = vld [vmem:[%s18882_s1 + $0x98] sm:$0xff] (!%p11844_p13)  ;;  %v11847_v22 = vld [vmem:[%s18882_s1 + $0xa0] sm:$0x1] (!%p11844_p13)  ;;  %vm2910_vm5 = vcmask (!%p11844_p13), 131072  }
 0x9c1   :  { %2895 = sbr.rel (%p11844_p13) target bundleno = 2504 (0x9c8), region = 45  ;;  %11854 = vst.msk [vmem:[%s18884_s3 + $0x90] sm:$0xff] (!%p11844_p13), %vm2907_vm4, %v11845_v20  ;;  %11855 = vst.msk [vmem:[%s18884_s3 + $0x98] sm:$0xff] (!%p11844_p13), %vm2907_vm4, %v11846_v21  ;;  %v11848_v23 = vld [vmem:[%s18882_s1 + $0xa8] sm:$0xff] (!%p11844_p13)  ;;  %v11849_v24 = vld [vmem:[%s18882_s1 + $0xb0] sm:$0xff] (!%p11844_p13) }
 0x9c2   :  { %11856 = vst.msk [vmem:[%s18884_s3 + $0xa0] sm:$0x1] (!%p11844_p13), %vm2910_vm5, %v11847_v22  ;;  %v11850_v25 = vld [vmem:[%s18882_s1 + $0xb8] sm:$0x1] (!%p11844_p13)  ;;  %v11851_v26 = vld [vmem:[%s18882_s1 + $0xc0] sm:$0xff] (!%p11844_p13)  ;;  %v11852_v27 = vld [vmem:[%s18882_s1 + $0xc8] sm:$0xff] (!%p11844_p13) }
 0x9c3   :  { %11857 = vst.msk [vmem:[%s18884_s3 + $0xa8] sm:$0xff] (!%p11844_p13), %vm2907_vm4, %v11848_v23  ;;  %11858 = vst.msk [vmem:[%s18884_s3 + $0xb0] sm:$0xff] (!%p11844_p13), %vm2907_vm4, %v11849_v24  ;;  %v11853_v28 = vld [vmem:[%s18882_s1 + $0xd0] sm:$0x1] (!%p11844_p13) }
 0x9c4   :  { %11859 = vst.msk [vmem:[%s18884_s3 + $0xb8] sm:$0x1] (!%p11844_p13), %vm2910_vm5, %v11850_v25  ;;  %11862 = vst.msk [vmem:[%s18884_s3 + $0xd0] sm:$0x1] (!%p11844_p13), %vm2910_vm5, %v11853_v28 }
 0x9c5   :  { %11860 = vst.msk [vmem:[%s18884_s3 + $0xc0] sm:$0xff] (!%p11844_p13), %vm2907_vm4, %v11851_v26  ;;  %11861 = vst.msk [vmem:[%s18884_s3 + $0xc8] sm:$0xff] (!%p11844_p13), %vm2907_vm4, %v11852_v27 }
 0x9c8 PF:  { %p11863_p0 = scmp.ne.s32.totalorder %s15369_s22, 1 }
 0x9c9   :  { %v2922_v29 = vlaneseq (!%p11863_p0)  ;;  %v15261_v30 = vmov (!%p11863_p0), 0.0|0.0   ;;  %vm15262_vm6 = vmmov (!%p11863_p0), 0   ;;  %v15263_v33 = vmov (!%p11863_p0), 0.0   ;;  %v11867_v42 = vld [vmem:[%s18882_s1 + $0x90] sm:$0xff] (!%p11863_p0)  ;;  %v11869_v43 = vld [vmem:[%s18882_s1 + $0xa0] sm:$0x1] (!%p11863_p0) }
 0x9ca   :  { %2921 = sbr.rel (%p11863_p0) target bundleno = 2882 (0xb42), region = 49  ;;  %14838 = vmatprep.subr.bf16.mxu0 (!%p11863_p0), %v15261_v30  ;;  %15070 = vmatprep.subr.bf16.mxu1 (!%p11863_p0), %v15261_v30  ;;  %v15264_v40 = vmov (!%p11863_p0), 1.0|1.0   ;;  %vm2954_vm11 = vcmask (!%p11863_p0), 1040384   ;;  %vm2944_vm12 = vcmask (!%p11863_p0), 138240   ;;  %v11868_v44 = vld [vmem:[%s18882_s1 + $0x98] sm:$0xff] (!%p11863_p0) }
 0x9cb   :  { %v2923_v31 = vshrl.u32 (!%p11863_p0), %v2922_v29, 7  ;;  %v2927_v32 = vand.u32 (!%p11863_p0), 127, %v2922_v29  ;;  %13692 = vmatprep.mubr.msk.f32.mxu0 (!%p11863_p0), %vm15262_vm6, %v15263_v33  ;;  %13698 = vmatprep.mubr.msk.f32.mxu1 (!%p11863_p0), %vm15262_vm6, %v15263_v33  ;;  %v11879_v45 = vld [vmem:[%s18882_s1 + $0xa8] sm:$0xff] (!%p11863_p0)  ;;  %v11891_v46 = vld [vmem:[%s18882_s1 + $0xc0] sm:$0xff] (!%p11863_p0)  ;;  %v11880_v47 = vld [vmem:[%s18882_s1 + $0xb0] sm:$0xff] (!%p11863_p0)  ;;  %vm3073_vm13 = vcmask (!%p11863_p0), 131072  }
 0x9cc   :  { %v11892_v48 = vld [vmem:[%s18882_s1 + $0xc8] sm:$0xff] (!%p11863_p0)  ;;  %v11881_v49 = vld [vmem:[%s18882_s1 + $0xb8] sm:$0x1] (!%p11863_p0)  ;;  %v11893_v50 = vld [vmem:[%s18882_s1 + $0xd0] sm:$0x1] (!%p11863_p0) }
 0x9cd   :  { %v2924_v34 = vadd.s32 (!%p11863_p0), 8, %v2923_v31  ;;  %v2928_v35 = vadd.s32 (!%p11863_p0), %v2927_v32, %v2923_v31  ;;  %v2925_v36 = vadd.s32 (!%p11863_p0), 16, %v2923_v31 }
 0x9cf   :  { %v2929_v37 = vadd.s32 (!%p11863_p0), %v2927_v32, %v2924_v34  ;;  %vm2931_vm7 = vcmp.eq.s32.totalorder (!%p11863_p0), %v2928_v35, 16  ;;  %v2930_v38 = vadd.s32 (!%p11863_p0), %v2927_v32, %v2925_v36 }
 0x9d1   :  { %vm2932_vm8 = vcmp.eq.s32.totalorder %v2929_v37, 16  ;;  %vm2933_vm9 = vcmp.eq.s32.totalorder %v2930_v38, 16 }
 0x9d2   :  { %vm16313_vm10 = vmpackc.low %vm2932_vm8, %vm2931_vm7  ;;  %v11866_v41 = vsel %vm2933_vm9, 1.0, %v15263_v33 }
 0x9d3   :  { %14840 = vmatpush3.bf16.msk.msra.mxu0 %vm16313_vm10, %v15264_v40  ;;  %15072 = vmatpush3.bf16.msk.msra.mxu1 %vm16313_vm10, %v15264_v40 }
 0x9d4   :  { %13690 = vmatprep.subr.mxu0 %v15263_v33  ;;  %15071 = vmatprep.subr.mxu1 %v15263_v33 }
 0x9d7   :  { %13691 = vmatpush3.msk.msra.mxu0 %vm2954_vm11, %v11866_v41  ;;  %15073 = vmatpush3.msk.msra.mxu1 %vm2954_vm11, %v11866_v41 }
 0x9d8   :  { %13693 = vmatmul.mubr.msk.f32.vlgmr.msra.gmra.mrb[0].mxu0 %vm2944_vm12, %v11867_v42  ;;  %14844 = vmatprep.subr.bf16.mxu0 %v15261_v30 }
 0x9d9   :  { %13695 = vmatprep.mubr.msk.f32.mxu0 %vm15262_vm6, %v15263_v33  ;;  %14846 = vmatpush3.bf16.msk.msra.mxu0 %vm16313_vm10, %v15264_v40 }
 0x9da   :  { %13699 = vmatmul.mubr.msk.f32.vlgmr.msra.gmra.mrb[0].mxu1 %vm2944_vm12, %v11869_v43  ;;  %14841 = vmatprep.subr.bf16.mxu1 %v15261_v30 }
 0x9db   :  { %14843 = vmatpush3.bf16.msk.msra.mxu1 %vm16313_vm10, %v15264_v40  ;;  %13720 = vmatprep.subr.mxu0 %v15263_v33 }
 0x9dc   :  { %13696 = vmatmul.mubr.msk.f32.gmra.mrb[2].mxu0 %vm2944_vm12, %v11868_v44  ;;  %13705 = vmatprep.subr.mxu1 %v15263_v33 }
 0x9dd   :  { %13721 = vmatpush3.msk.msra.mxu0 %vm2954_vm11, %v11866_v41  ;;  %13707 = vmatprep.mubr.msk.f32.mxu1 %vm15262_vm6, %v15263_v33 }
 0x9de   :  { %13722 = vmatprep.mubr.msk.f32.mxu0 %vm15262_vm6, %v15263_v33 }
 0x9df   :  { %13706 = vmatpush3.msk.msra.mxu1 %vm2954_vm11, %v11866_v41 }
 0x9e0   :  { %13708 = vmatmul.mubr.msk.f32.vlgmr.msra.gmra.mrb[2].mxu1 %vm2944_vm12, %v11879_v45  ;;  %13723 = vmatmul.mubr.msk.f32.vlgmr.msra.gmra.mrb[4].mxu0 %vm2944_vm12, %v11891_v46 }
 0x9e1   :  { %13710 = vmatprep.mubr.msk.f32.mxu1 %vm15262_vm6, %v15263_v33  ;;  %13725 = vmatprep.mubr.msk.f32.mxu0 %vm15262_vm6, %v15263_v33 }
 0x9e4   :  { %13711 = vmatmul.mubr.msk.f32.gmra.mrb[4].mxu1 %vm2944_vm12, %v11880_v47  ;;  %13726 = vmatmul.mubr.msk.f32.gmra.mrb[6].mxu0 %vm2944_vm12, %v11892_v48 }
 0x9e5   :  { %13713 = vmatprep.mubr.msk.f32.mxu1 %vm15262_vm6, %v15263_v33  ;;  %13728 = vmatprep.mubr.msk.f32.mxu0 %vm15262_vm6, %v15263_v33 }
 0x9e8   :  { %13714 = vmatmul.mubr.msk.f32.gmra.mrb[6].mxu1 %vm2944_vm12, %v11881_v49  ;;  %13729 = vmatmul.mubr.msk.f32.gmra.mrb[8].mxu0 %vm2944_vm12, %v11893_v50 }
 0xaab   :  { %v3024_v51 = vpop.f32.mrb[0].mxu0 }
 0xaac   :  { %3038 = vxpose.xlu0.b32.start [1/3] (short) (narrow) %v3024_v51, 24  ;;  %v13694_v52 = vpop.f32.mrb[1].mxu0 }
 0xaad   :  { %v3034_v53 = vpop.f32.mrb[0].mxu1 }
 0xaae   :  { %v13700_v54 = vpop.f32.mrb[1].mxu1 }
 0xaaf   :  { %v3029_v55 = vpop.f32.mrb[2].mxu0 }
 0xab0   :  { %3039 = vxpose.xlu0.b32.cont [2/3] (short) (narrow) %v3029_v55, 24  ;;  %v13697_v56 = vpop.f32.mrb[3].mxu0 }
 0xab3   :  { %v3154_v57 = vpop.f32.mrb[2].mxu1  ;;  %v3283_v58 = vpop.f32.mrb[4].mxu0 }
 0xab4   :  { %3040 = vxpose.xlu0.b32.end [3/3] (short) (narrow) %v3034_v53, 24  ;;  %v13709_v59 = vpop.f32.mrb[3].mxu1  ;;  %v13724_v60 = vpop.f32.mrb[5].mxu0  ;;  %3168 = vxpose.xlu1.b32.start [1/3] (short) (narrow) %v3154_v57, 24 }
 0xab7   :  { %v3159_v61 = vpop.f32.mrb[4].mxu1  ;;  %v3288_v62 = vpop.f32.mrb[6].mxu0 }
 0xab8   :  { %3297 = vxpose.xlu0.b32.start [1/3] (short) (narrow) %v3283_v58, 24  ;;  %v13712_v63 = vpop.f32.mrb[5].mxu1  ;;  %v13727_v0 = vpop.f32.mrb[7].mxu0  ;;  %3169 = vxpose.xlu1.b32.cont [2/3] (short) (narrow) %v3159_v61, 24 }
 0xabb   :  { %v3164_v1 = vpop.f32.mrb[6].mxu1  ;;  %v3293_v2 = vpop.f32.mrb[8].mxu0 }
 0xabc   :  { %3298 = vxpose.xlu0.b32.cont [2/3] (short) (narrow) %v3288_v62, 24  ;;  %v13715_v3 = vpop.f32.mrb[7].mxu1  ;;  %v13730_v4 = vpop.f32.mrb[9].mxu0  ;;  %3170 = vxpose.xlu1.b32.end [3/3] (short) (narrow) %v3164_v1, 24 }
 0xac0   :  { %3299 = vxpose.xlu0.b32.end [3/3] (short) (narrow) %v3293_v2, 24 }
 0xb2c   :  { %v3054_v5 = vpop.trf.xlu0 }
 0xb2d   :  { %11876 = vst.msk [vmem:[%s18884_s3 + $0x90] sm:$0xff] %vm2944_vm12, %v3054_v5 }
 0xb30   :  { %v3055_v6 = vpop.trf.xlu0 }
 0xb31   :  { %11877 = vst.msk [vmem:[%s18884_s3 + $0x98] sm:$0xff] %vm2944_vm12, %v3055_v6 }
 0xb34   :  { %v3056_v7 = vpop.trf.xlu0  ;;  %v3184_v8 = vpop.trf.xlu1 }
 0xb35   :  { %11878 = vst.msk [vmem:[%s18884_s3 + $0xa0] sm:$0x1] %vm3073_vm13, %v3056_v7 }
 0xb36   :  { %11888 = vst.msk [vmem:[%s18884_s3 + $0xa8] sm:$0xff] %vm2944_vm12, %v3184_v8 }
 0xb38   :  { %v3313_v9 = vpop.trf.xlu0  ;;  %v3185_v10 = vpop.trf.xlu1 }
 0xb39   :  { %11900 = vst.msk [vmem:[%s18884_s3 + $0xc0] sm:$0xff] %vm2944_vm12, %v3313_v9  ;;  %11889 = vst.msk [vmem:[%s18884_s3 + $0xb0] sm:$0xff] %vm2944_vm12, %v3185_v10 }
 0xb3c   :  { %v3314_v11 = vpop.trf.xlu0  ;;  %v3186_v12 = vpop.trf.xlu1 }
 0xb3d   :  { %11901 = vst.msk [vmem:[%s18884_s3 + $0xc8] sm:$0xff] %vm2944_vm12, %v3314_v11 }
 0xb3e   :  { %11890 = vst.msk [vmem:[%s18884_s3 + $0xb8] sm:$0x1] %vm3073_vm13, %v3186_v12 }
 0xb40   :  { %v3315_v13 = vpop.trf.xlu0 }
 0xb41   :  { %11902 = vst.msk [vmem:[%s18884_s3 + $0xd0] sm:$0x1] %vm3073_vm13, %v3315_v13 }
 0xb42 PF:  { %p11903_p1 = scmp.ne.s32.totalorder %s15369_s22, 2 }
 0xb43   :  { %v3337_v14 = vlaneseq (!%p11903_p1)  ;;  %v15265_v15 = vmov (!%p11903_p1), 0.0|0.0   ;;  %vm15266_vm14 = vmmov (!%p11903_p1), 0   ;;  %v15267_v18 = vmov (!%p11903_p1), 0.0   ;;  %v11907_v27 = vld [vmem:[%s18882_s1 + $0x90] sm:$0xff] (!%p11903_p1)  ;;  %v11908_v28 = vld [vmem:[%s18882_s1 + $0x98] sm:$0xff] (!%p11903_p1)  ;;  %v11923_v30 = vld [vmem:[%s18882_s1 + $0xa8] sm:$0xff] (!%p11903_p1) }
 0xb44   :  { %3336 = sbr.rel (%p11903_p1) target bundleno = 3366 (0xd26), region = 53  ;;  %14847 = vmatprep.subr.bf16.mxu0 (!%p11903_p1), %v15265_v15  ;;  %14850 = vmatprep.subr.bf16.mxu1 (!%p11903_p1), %v15265_v15  ;;  %v15268_v25 = vmov (!%p11903_p1), 1.0|1.0   ;;  %vm3369_vm3 = vcmask (!%p11903_p1), 1040384   ;;  %vm3359_vm4 = vcmask (!%p11903_p1), 138240   ;;  %v11924_v31 = vld [vmem:[%s18882_s1 + $0xb0] sm:$0xff] (!%p11903_p1) }
 0xb45   :  { %v3338_v16 = vshrl.u32 (!%p11903_p1), %v3337_v14, 7  ;;  %v3342_v17 = vand.u32 (!%p11903_p1), 127, %v3337_v14  ;;  %13737 = vmatprep.mubr.msk.f32.mxu0 (!%p11903_p1), %vm15266_vm14, %v15267_v18  ;;  %13752 = vmatprep.mubr.msk.f32.mxu1 (!%p11903_p1), %vm15266_vm14, %v15267_v18  ;;  %v11909_v29 = vld [vmem:[%s18882_s1 + $0xa0] sm:$0x1] (!%p11903_p1)  ;;  %v11925_v32 = vld [vmem:[%s18882_s1 + $0xb8] sm:$0x1] (!%p11903_p1) }
 0xb46   :  { %v11939_v33 = vld [vmem:[%s18882_s1 + $0xc0] sm:$0xff] (!%p11903_p1)  ;;  %v11940_v34 = vld [vmem:[%s18882_s1 + $0xc8] sm:$0xff] (!%p11903_p1)  ;;  %v11941_v35 = vld [vmem:[%s18882_s1 + $0xd0] sm:$0x1] (!%p11903_p1)  ;;  %vm3547_vm5 = vcmask (!%p11903_p1), 131072  }
 0xb47   :  { %v3339_v19 = vadd.s32 (!%p11903_p1), 8, %v3338_v16  ;;  %v3343_v20 = vadd.s32 (!%p11903_p1), %v3342_v17, %v3338_v16  ;;  %v3340_v21 = vadd.s32 (!%p11903_p1), 16, %v3338_v16 }
 0xb49   :  { %v16412_v22 = vadd.s32 (!%p11903_p1), %v3342_v17, %v3339_v19  ;;  %vm3346_vm15 = vcmp.eq.s32.totalorder (!%p11903_p1), %v3343_v20, 16  ;;  %v3345_v23 = vadd.s32 (!%p11903_p1), %v3342_v17, %v3340_v21 }
 0xb4a   :  { %v11904_v43 = vsel (!%p11903_p1), %vm3346_vm15, 1.0, %v15267_v18 }
 0xb4b   :  { %vm3347_vm0 = vcmp.eq.s32.totalorder %v16412_v22, 16  ;;  %vm3348_vm1 = vcmp.eq.s32.totalorder %v3345_v23, 16 }
 0xb4c   :  { %vm16418_vm2 = vmpackc.low %vm3347_vm0, %vm3346_vm15  ;;  %v16426_v26 = vsel %vm3348_vm1, 1.0, %v15267_v18  ;;  %v11905_v46 = vsel %vm3347_vm0, 1.0, %v15267_v18 }
 0xb4d   :  { %14849 = vmatpush3.bf16.msk.msra.mxu0 %vm16418_vm2, %v15268_v25 }
 0xb4e   :  { %13735 = vmatprep.subr.mxu0 %v15267_v18 }
 0xb51   :  { %13736 = vmatpush3.msk.msra.mxu0 %vm3369_vm3, %v16426_v26 }
 0xb52   :  { %13738 = vmatmul.mubr.msk.f32.vlgmr.msra.gmra.mrb[0].mxu0 %vm3359_vm4, %v11907_v27  ;;  %14853 = vmatprep.subr.bf16.mxu0 %v15265_v15 }
 0xb53   :  { %13740 = vmatprep.mubr.msk.f32.mxu0 %vm15266_vm14, %v15267_v18  ;;  %14855 = vmatpush3.bf16.msk.msra.mxu0 %vm16418_vm2, %v15268_v25 }
 0xb54   :  { %13765 = vmatprep.subr.mxu0 %v15267_v18 }
 0xb56   :  { %13741 = vmatmul.mubr.msk.f32.gmra.mrb[2].mxu0 %vm3359_vm4, %v11908_v28 }
 0xb57   :  { %13743 = vmatprep.mubr.msk.f32.mxu0 %vm15266_vm14, %v15267_v18  ;;  %13766 = vmatpush3.msk.msra.mxu0 %vm3369_vm3, %v16426_v26 }
 0xb58   :  { %14859 = vmatprep.subr.bf16.mxu0 %v15265_v15 }
 0xb5a   :  { %13744 = vmatmul.mubr.msk.f32.gmra.mrb[4].mxu0 %vm3359_vm4, %v11909_v29 }
 0xb5b   :  { %13767 = vmatprep.mubr.msk.f32.mxu0 %vm15266_vm14, %v15267_v18 }
 0xb5e   :  { %13768 = vmatmul.mubr.msk.f32.vlgmr.msra.gmra.mrb[6].mxu0 %vm3359_vm4, %v11923_v30 }
 0xb5f   :  { %13770 = vmatprep.mubr.msk.f32.mxu0 %vm15266_vm14, %v15267_v18  ;;  %14861 = vmatpush3.bf16.msk.msra.mxu0 %vm16418_vm2, %v15268_v25 }
 0xb60   :  { %13795 = vmatprep.subr.mxu0 %v15267_v18 }
 0xb62   :  { %13771 = vmatmul.mubr.msk.f32.gmra.mrb[8].mxu0 %vm3359_vm4, %v11924_v31 }
 0xb63   :  { %13773 = vmatprep.mubr.msk.f32.mxu0 %vm15266_vm14, %v15267_v18  ;;  %13796 = vmatpush3.msk.msra.mxu0 %vm3369_vm3, %v16426_v26 }
 0xb66   :  { %13774 = vmatmul.mubr.msk.f32.gmra.mrb[10].mxu0 %vm3359_vm4, %v11925_v32 }
 0xb67   :  { %13797 = vmatprep.mubr.msk.f32.mxu0 %vm15266_vm14, %v15267_v18 }
 0xb6a   :  { %13798 = vmatmul.mubr.msk.f32.vlgmr.msra.gmra.mrb[12].mxu0 %vm3359_vm4, %v11939_v33 }
 0xb6b   :  { %13800 = vmatprep.mubr.msk.f32.mxu0 %vm15266_vm14, %v15267_v18 }
 0xb6e   :  { %13801 = vmatmul.mubr.msk.f32.gmra.mrb[14].mxu0 %vm3359_vm4, %v11940_v34 }
 0xb6f   :  { %13803 = vmatprep.mubr.msk.f32.mxu0 %vm15266_vm14, %v15267_v18 }
 0xb72   :  { %13804 = vmatmul.mubr.msk.f32.gmra.mrb[16].mxu0 %vm3359_vm4, %v11941_v35 }
 0xc25   :  { %v3439_v36 = vpop.f32.mrb[0].mxu0 }
 0xc26   :  { %v13739_v37 = vpop.f32.mrb[1].mxu0 }
 0xc29   :  { %v3444_v38 = vpop.f32.mrb[2].mxu0 }
 0xc2a   :  { %v14851_v39 = vpack.c.bf16 %v3444_v38, %v3439_v36  ;;  %v13742_v40 = vpop.f32.mrb[3].mxu0 }
 0xc2c   :  { %14852 = vmatpush3.bf16.msra.mxu1 %v14851_v39 }
 0xc2d   :  { %v3449_v41 = vpop.f32.mrb[4].mxu0  ;;  %13750 = vmatprep.subr.mxu1 %v15267_v18 }
 0xc2e   :  { %v13745_v42 = vpop.f32.mrb[5].mxu0 }
 0xc30   :  { %13751 = vmatpush3.msk.msra.mxu1 %vm3369_vm3, %v3449_v41 }
 0xc31   :  { %v3628_v44 = vpop.f32.mrb[6].mxu0  ;;  %13753 = vmatmul.mubr.msk.f32.vlgmr.msra.gmra.mrb[0].mxu1 %vm3359_vm4, %v11904_v43  ;;  %14856 = vmatprep.subr.bf16.mxu1 %v15265_v15 }
 0xc32   :  { %v13769_v45 = vpop.f32.mrb[7].mxu0  ;;  %13755 = vmatprep.mubr.msk.f32.mxu1 %vm15266_vm14, %v15267_v18 }
 0xc35   :  { %v3633_v47 = vpop.f32.mrb[8].mxu0  ;;  %13756 = vmatmul.mubr.msk.f32.gmra.mrb[2].mxu1 %vm3359_vm4, %v11905_v46 }
 0xc36   :  { %v14857_v48 = vpack.c.bf16 %v3633_v47, %v3628_v44  ;;  %v13772_v49 = vpop.f32.mrb[9].mxu0  ;;  %13758 = vmatprep.mubr.msk.f32.mxu1 %vm15266_vm14, %v15267_v18 }
 0xc38   :  { %14858 = vmatpush3.bf16.msra.mxu1 %v14857_v48 }
 0xc39   :  { %v3638_v50 = vpop.f32.mrb[10].mxu0  ;;  %13780 = vmatprep.subr.mxu1 %v15267_v18  ;;  %13759 = vmatmul.mubr.msk.f32.gmra.mrb[4].mxu1 %vm3359_vm4, %v16426_v26 }
 0xc3a   :  { %v13775_v51 = vpop.f32.mrb[11].mxu0  ;;  %13782 = vmatprep.mubr.msk.f32.mxu1 %vm15266_vm14, %v15267_v18 }
 0xc3c   :  { %13781 = vmatpush3.msk.msra.mxu1 %vm3369_vm3, %v3638_v50 }
 0xc3d   :  { %v3808_v52 = vpop.f32.mrb[12].mxu0  ;;  %13783 = vmatmul.mubr.msk.f32.vlgmr.msra.gmra.mrb[6].mxu1 %vm3359_vm4, %v11904_v43  ;;  %14862 = vmatprep.subr.bf16.mxu1 %v15265_v15 }
 0xc3e   :  { %v13799_v53 = vpop.f32.mrb[13].mxu0  ;;  %13785 = vmatprep.mubr.msk.f32.mxu1 %vm15266_vm14, %v15267_v18 }
 0xc41   :  { %v3813_v54 = vpop.f32.mrb[14].mxu0  ;;  %13786 = vmatmul.mubr.msk.f32.gmra.mrb[8].mxu1 %vm3359_vm4, %v11905_v46 }
 0xc42   :  { %v14863_v55 = vpack.c.bf16 %v3813_v54, %v3808_v52  ;;  %v13802_v56 = vpop.f32.mrb[15].mxu0  ;;  %13788 = vmatprep.mubr.msk.f32.mxu1 %vm15266_vm14, %v15267_v18 }
 0xc44   :  { %14864 = vmatpush3.bf16.msra.mxu1 %v14863_v55 }
 0xc45   :  { %v3818_v57 = vpop.f32.mrb[16].mxu0  ;;  %13810 = vmatprep.subr.mxu1 %v15267_v18  ;;  %13789 = vmatmul.mubr.msk.f32.gmra.mrb[10].mxu1 %vm3359_vm4, %v16426_v26 }
 0xc46   :  { %v13805_v58 = vpop.f32.mrb[17].mxu0  ;;  %13812 = vmatprep.mubr.msk.f32.mxu1 %vm15266_vm14, %v15267_v18 }
 0xc48   :  { %13811 = vmatpush3.msk.msra.mxu1 %vm3369_vm3, %v3818_v57 }
 0xc49   :  { %13813 = vmatmul.mubr.msk.f32.vlgmr.msra.gmra.mrb[12].mxu1 %vm3359_vm4, %v11904_v43 }
 0xc4a   :  { %13815 = vmatprep.mubr.msk.f32.mxu1 %vm15266_vm14, %v15267_v18 }
 0xc4d   :  { %13816 = vmatmul.mubr.msk.f32.gmra.mrb[14].mxu1 %vm3359_vm4, %v11905_v46 }
 0xc4e   :  { %13818 = vmatprep.mubr.msk.f32.mxu1 %vm15266_vm14, %v15267_v18 }
 0xc51   :  { %13819 = vmatmul.mubr.msk.f32.gmra.mrb[16].mxu1 %vm3359_vm4, %v16426_v26 }
 0xd04   :  { %v3530_v59 = vpop.f32.mrb[0].mxu1 }
 0xd05   :  { %11920 = vst.msk [vmem:[%s18884_s3 + $0x90] sm:$0xff] %vm3359_vm4, %v3530_v59  ;;  %v13754_v60 = vpop.f32.mrb[1].mxu1 }
 0xd08   :  { %v3535_v61 = vpop.f32.mrb[2].mxu1 }
 0xd09   :  { %11921 = vst.msk [vmem:[%s18884_s3 + $0x98] sm:$0xff] %vm3359_vm4, %v3535_v61  ;;  %v13757_v62 = vpop.f32.mrb[3].mxu1 }
 0xd0c   :  { %v3540_v63 = vpop.f32.mrb[4].mxu1 }
 0xd0d   :  { %11922 = vst.msk [vmem:[%s18884_s3 + $0xa0] sm:$0x1] %vm3547_vm5, %v3540_v63  ;;  %v13760_v0 = vpop.f32.mrb[5].mxu1 }
 0xd10   :  { %v3711_v1 = vpop.f32.mrb[6].mxu1 }
 0xd11   :  { %11936 = vst.msk [vmem:[%s18884_s3 + $0xa8] sm:$0xff] %vm3359_vm4, %v3711_v1  ;;  %v13784_v2 = vpop.f32.mrb[7].mxu1 }
 0xd14   :  { %v3716_v3 = vpop.f32.mrb[8].mxu1 }
 0xd15   :  { %11937 = vst.msk [vmem:[%s18884_s3 + $0xb0] sm:$0xff] %vm3359_vm4, %v3716_v3  ;;  %v13787_v4 = vpop.f32.mrb[9].mxu1 }
 0xd18   :  { %v3721_v5 = vpop.f32.mrb[10].mxu1 }
 0xd19   :  { %11938 = vst.msk [vmem:[%s18884_s3 + $0xb8] sm:$0x1] %vm3547_vm5, %v3721_v5  ;;  %v13790_v6 = vpop.f32.mrb[11].mxu1 }
 0xd1c   :  { %v3891_v7 = vpop.f32.mrb[12].mxu1 }
 0xd1d   :  { %11952 = vst.msk [vmem:[%s18884_s3 + $0xc0] sm:$0xff] %vm3359_vm4, %v3891_v7  ;;  %v13814_v8 = vpop.f32.mrb[13].mxu1 }
 0xd20   :  { %v3896_v9 = vpop.f32.mrb[14].mxu1 }
 0xd21   :  { %11953 = vst.msk [vmem:[%s18884_s3 + $0xc8] sm:$0xff] %vm3359_vm4, %v3896_v9  ;;  %v13817_v10 = vpop.f32.mrb[15].mxu1 }
 0xd24   :  { %v3901_v11 = vpop.f32.mrb[16].mxu1 }
 0xd25   :  { %11954 = vst.msk [vmem:[%s18884_s3 + $0xd0] sm:$0x1] %vm3547_vm5, %v3901_v11  ;;  %v13820_v12 = vpop.f32.mrb[17].mxu1 }
 0xd26 PF:  { %p11955_p2 = scmp.ne.s32.totalorder %s15369_s22, 3 }
 0xd27   :  { %v11959_v13 = vld [vmem:[%s18882_s1 + $0x90] sm:$0xff] (!%p11955_p2)  ;;  %v3913_v14 = vlaneseq (!%p11955_p2)  ;;  %v11971_v15 = vld [vmem:[%s18882_s1 + $0xa8] sm:$0xff] (!%p11955_p2)  ;;  %v15269_v16 = vmov (!%p11955_p2), 0.0|0.0   ;;  %v11960_v17 = vld [vmem:[%s18882_s1 + $0x98] sm:$0xff] (!%p11955_p2)  ;;  %vm15270_vm6 = vmmov (!%p11955_p2), 0   ;;  %v15271_v21 = vmov (!%p11955_p2), 0.0  }
 0xd28   :  { %3912 = sbr.rel (%p11955_p2) target bundleno = 3732 (0xe94), region = 57  ;;  %3935 = vxpose.xlu0.b32.start [1/3] (short) (narrow) (!%p11955_p2), %v11959_v13, 24  ;;  %14865 = vmatprep.subr.bf16.mxu0 (!%p11955_p2), %v15269_v16  ;;  %v11972_v18 = vld [vmem:[%s18882_s1 + $0xb0] sm:$0xff] (!%p11955_p2)  ;;  %v11961_v25 = vld [vmem:[%s18882_s1 + $0xa0] sm:$0x1] (!%p11955_p2)  ;;  %vm3977_vm11 = vcmask (!%p11955_p2), 1040384  }
 0xd29   :  { %4070 = vxpose.xlu1.b32.start [1/3] (short) (narrow) (!%p11955_p2), %v11971_v15, 24  ;;  %15074 = vmatprep.subr.bf16.mxu1 (!%p11955_p2), %v15269_v16  ;;  %v3914_v19 = vshrl.u32 (!%p11955_p2), %v3913_v14, 7  ;;  %v3918_v20 = vand.u32 (!%p11955_p2), 127, %v3913_v14  ;;  %v11973_v26 = vld [vmem:[%s18882_s1 + $0xb8] sm:$0x1] (!%p11955_p2)  ;;  %v11983_v29 = vld [vmem:[%s18882_s1 + $0xc0] sm:$0xff] (!%p11955_p2) }
 0xd2a   :  { %13827 = vmatprep.mubr.msk.f32.mxu0 (!%p11955_p2), %vm15270_vm6, %v15271_v21  ;;  %13833 = vmatprep.mubr.msk.f32.mxu1 (!%p11955_p2), %vm15270_vm6, %v15271_v21  ;;  %v15272_v31 = vmov (!%p11955_p2), 1.0|1.0   ;;  %v11984_v33 = vld [vmem:[%s18882_s1 + $0xc8] sm:$0xff] (!%p11955_p2)  ;;  %v11985_v34 = vld [vmem:[%s18882_s1 + $0xd0] sm:$0x1] (!%p11955_p2)  ;;  %vm3967_vm12 = vcmask (!%p11955_p2), 138240  }
 0xd2b   :  { %v3915_v22 = vadd.s32 (!%p11955_p2), 8, %v3914_v19  ;;  %v3919_v23 = vadd.s32 (!%p11955_p2), %v3918_v20, %v3914_v19  ;;  %v3916_v24 = vadd.s32 (!%p11955_p2), 16, %v3914_v19  ;;  %vm4064_vm13 = vcmask (!%p11955_p2), 131072  }
 0xd2c   :  { %3936 = vxpose.xlu0.b32.cont [2/3] (short) (narrow) (!%p11955_p2), %v11960_v17, 24 }
 0xd2d   :  { %4071 = vxpose.xlu1.b32.cont [2/3] (short) (narrow) (!%p11955_p2), %v11972_v18, 24  ;;  %v3920_v27 = vadd.s32 (!%p11955_p2), %v3918_v20, %v3915_v22  ;;  %vm3922_vm7 = vcmp.eq.s32.totalorder (!%p11955_p2), %v3919_v23, 16  ;;  %v3921_v28 = vadd.s32 (!%p11955_p2), %v3918_v20, %v3916_v24 }
 0xd2f   :  { %vm3923_vm8 = vcmp.eq.s32.totalorder %v3920_v27, 16  ;;  %vm3924_vm9 = vcmp.eq.s32.totalorder %v3921_v28, 16 }
 0xd30   :  { %3937 = vxpose.xlu0.b32.end [3/3] (short) (narrow) %v11961_v25, 24  ;;  %vm16597_vm10 = vmpackc.low %vm3923_vm8, %vm3922_vm7  ;;  %v11958_v32 = vsel %vm3924_vm9, 1.0, %v15271_v21 }
 0xd31   :  { %4072 = vxpose.xlu1.b32.end [3/3] (short) (narrow) %v11973_v26, 24  ;;  %14867 = vmatpush3.bf16.msk.msra.mxu0 %vm16597_vm10, %v15272_v31 }
 0xd32   :  { %15076 = vmatpush3.bf16.msk.msra.mxu1 %vm16597_vm10, %v15272_v31  ;;  %13825 = vmatprep.subr.mxu0 %v15271_v21 }
 0xd33   :  { %15075 = vmatprep.subr.mxu1 %v15271_v21 }
 0xd34   :  { %4199 = vxpose.xlu0.b32.start [1/3] (short) (narrow) %v11983_v29, 24 }
 0xd35   :  { %13826 = vmatpush3.msk.msra.mxu0 %vm3977_vm11, %v11958_v32 }
 0xd36   :  { %15077 = vmatpush3.msk.msra.mxu1 %vm3977_vm11, %v11958_v32  ;;  %14871 = vmatprep.subr.bf16.mxu0 %v15269_v16 }
 0xd37   :  { %14868 = vmatprep.subr.bf16.mxu1 %v15269_v16 }
 0xd38   :  { %4200 = vxpose.xlu0.b32.cont [2/3] (short) (narrow) %v11984_v33, 24 }
 0xd3c   :  { %4201 = vxpose.xlu0.b32.end [3/3] (short) (narrow) %v11985_v34, 24 }
 0xda8   :  { %v3951_v35 = vpop.trf.xlu0 }
 0xda9   :  { %13828 = vmatmul.mubr.msk.f32.vlgmr.msra.gmra.mrb[0].mxu0 %vm3967_vm12, %v3951_v35  ;;  %v4086_v38 = vpop.trf.xlu1 }
 0xdaa   :  { %13830 = vmatprep.mubr.msk.f32.mxu0 %vm15270_vm6, %v15271_v21  ;;  %14873 = vmatpush3.bf16.msk.msra.mxu0 %vm16597_vm10, %v15272_v31 }
 0xdab   :  { %13855 = vmatprep.subr.mxu0 %v15271_v21 }
 0xdac   :  { %v3952_v36 = vpop.trf.xlu0 }
 0xdad   :  { %13831 = vmatmul.mubr.msk.f32.gmra.mrb[2].mxu0 %vm3967_vm12, %v3952_v36  ;;  %v4087_v40 = vpop.trf.xlu1 }
 0xdae   :  { %13856 = vmatpush3.msk.msra.mxu0 %vm3977_vm11, %v11958_v32  ;;  %13857 = vmatprep.mubr.msk.f32.mxu0 %vm15270_vm6, %v15271_v21 }
 0xdb0   :  { %v3953_v37 = vpop.trf.xlu0 }
 0xdb1   :  { %13834 = vmatmul.mubr.msk.f32.vlgmr.msra.gmra.mrb[0].mxu1 %vm3967_vm12, %v3953_v37  ;;  %v4088_v42 = vpop.trf.xlu1 }
 0xdb2   :  { %14870 = vmatpush3.bf16.msk.msra.mxu1 %vm16597_vm10, %v15272_v31  ;;  %13842 = vmatprep.mubr.msk.f32.mxu1 %vm15270_vm6, %v15271_v21 }
 0xdb3   :  { %13840 = vmatprep.subr.mxu1 %v15271_v21 }
 0xdb4   :  { %v4215_v39 = vpop.trf.xlu0 }
 0xdb5   :  { %13858 = vmatmul.mubr.msk.f32.vlgmr.msra.gmra.mrb[4].mxu0 %vm3967_vm12, %v4215_v39 }
 0xdb6   :  { %13841 = vmatpush3.msk.msra.mxu1 %vm3977_vm11, %v11958_v32  ;;  %13860 = vmatprep.mubr.msk.f32.mxu0 %vm15270_vm6, %v15271_v21 }
 0xdb7   :  { %13843 = vmatmul.mubr.msk.f32.vlgmr.msra.gmra.mrb[2].mxu1 %vm3967_vm12, %v4086_v38 }
 0xdb8   :  { %v4216_v41 = vpop.trf.xlu0  ;;  %13845 = vmatprep.mubr.msk.f32.mxu1 %vm15270_vm6, %v15271_v21 }
 0xdb9   :  { %13861 = vmatmul.mubr.msk.f32.gmra.mrb[6].mxu0 %vm3967_vm12, %v4216_v41 }
 0xdba   :  { %13863 = vmatprep.mubr.msk.f32.mxu0 %vm15270_vm6, %v15271_v21 }
 0xdbb   :  { %13846 = vmatmul.mubr.msk.f32.gmra.mrb[4].mxu1 %vm3967_vm12, %v4087_v40 }
 0xdbc   :  { %v4217_v43 = vpop.trf.xlu0  ;;  %13848 = vmatprep.mubr.msk.f32.mxu1 %vm15270_vm6, %v15271_v21 }
 0xdbd   :  { %13864 = vmatmul.mubr.msk.f32.gmra.mrb[8].mxu0 %vm3967_vm12, %v4217_v43 }
 0xdbf   :  { %13849 = vmatmul.mubr.msk.f32.gmra.mrb[6].mxu1 %vm3967_vm12, %v4088_v42 }
 0xe7c   :  { %v4047_v44 = vpop.f32.mrb[0].mxu0 }
 0xe7d   :  { %11968 = vst.msk [vmem:[%s18884_s3 + $0x90] sm:$0xff] %vm3967_vm12, %v4047_v44  ;;  %v13829_v45 = vpop.f32.mrb[1].mxu0 }
 0xe80   :  { %v4052_v46 = vpop.f32.mrb[2].mxu0 }
 0xe81   :  { %11969 = vst.msk [vmem:[%s18884_s3 + $0x98] sm:$0xff] %vm3967_vm12, %v4052_v46  ;;  %v13832_v47 = vpop.f32.mrb[3].mxu0 }
 0xe84   :  { %v4057_v48 = vpop.f32.mrb[0].mxu1 }
 0xe85   :  { %11970 = vst.msk [vmem:[%s18884_s3 + $0xa0] sm:$0x1] %vm4064_vm13, %v4057_v48  ;;  %v13835_v49 = vpop.f32.mrb[1].mxu1 }
 0xe88   :  { %v4306_v50 = vpop.f32.mrb[4].mxu0 }
 0xe89   :  { %11992 = vst.msk [vmem:[%s18884_s3 + $0xc0] sm:$0xff] %vm3967_vm12, %v4306_v50  ;;  %v13859_v51 = vpop.f32.mrb[5].mxu0 }
 0xe8a   :  { %v4177_v52 = vpop.f32.mrb[2].mxu1 }
 0xe8b   :  { %11980 = vst.msk [vmem:[%s18884_s3 + $0xa8] sm:$0xff] %vm3967_vm12, %v4177_v52  ;;  %v13844_v53 = vpop.f32.mrb[3].mxu1 }
 0xe8c   :  { %v4311_v54 = vpop.f32.mrb[6].mxu0 }
 0xe8d   :  { %11993 = vst.msk [vmem:[%s18884_s3 + $0xc8] sm:$0xff] %vm3967_vm12, %v4311_v54  ;;  %v13862_v55 = vpop.f32.mrb[7].mxu0 }
 0xe8e   :  { %v4182_v56 = vpop.f32.mrb[4].mxu1 }
 0xe8f   :  { %11981 = vst.msk [vmem:[%s18884_s3 + $0xb0] sm:$0xff] %vm3967_vm12, %v4182_v56  ;;  %v13847_v57 = vpop.f32.mrb[5].mxu1 }
 0xe90   :  { %v4316_v58 = vpop.f32.mrb[8].mxu0 }
 0xe91   :  { %11994 = vst.msk [vmem:[%s18884_s3 + $0xd0] sm:$0x1] %vm4064_vm13, %v4316_v58  ;;  %v13865_v59 = vpop.f32.mrb[9].mxu0 }
 0xe92   :  { %v4187_v60 = vpop.f32.mrb[6].mxu1 }
 0xe93   :  { %11982 = vst.msk [vmem:[%s18884_s3 + $0xb8] sm:$0x1] %vm4064_vm13, %v4187_v60  ;;  %v13850_v61 = vpop.f32.mrb[7].mxu1 }
 0xe94 PF:  { %p11995_p3 = scmp.ne.s32.totalorder %s15371_s0, 0 }
 0xe95   :  { %v11996_v62 = vld [vmem:[%s18882_s1 + $0xd8] sm:$0xff] (!%p11995_p3)  ;;  %vm4339_vm14 = vcmask (!%p11995_p3), 138240   ;;  %v11997_v63 = vld [vmem:[%s18882_s1 + $0xe0] sm:$0xff] (!%p11995_p3)  ;;  %v11998_v0 = vld [vmem:[%s18882_s1 + $0xe8] sm:$0x1] (!%p11995_p3)  ;;  %vm4342_vm15 = vcmask (!%p11995_p3), 131072  }
 0xe96   :  { %4327 = sbr.rel (%p11995_p3) target bundleno = 3741 (0xe9d), region = 61  ;;  %12005 = vst.msk [vmem:[%s18884_s3 + $0xd8] sm:$0xff] (!%p11995_p3), %vm4339_vm14, %v11996_v62  ;;  %12006 = vst.msk [vmem:[%s18884_s3 + $0xe0] sm:$0xff] (!%p11995_p3), %vm4339_vm14, %v11997_v63  ;;  %v11999_v1 = vld [vmem:[%s18882_s1 + $0xf0] sm:$0xff] (!%p11995_p3)  ;;  %v12000_v2 = vld [vmem:[%s18882_s1 + $0xf8] sm:$0xff] (!%p11995_p3) }
 0xe97   :  { %12007 = vst.msk [vmem:[%s18884_s3 + $0xe8] sm:$0x1] (!%p11995_p3), %vm4342_vm15, %v11998_v0  ;;  %v12001_v3 = vld [vmem:[%s18882_s1 + $0x100] sm:$0x1] (!%p11995_p3)  ;;  %v12002_v4 = vld [vmem:[%s18882_s1 + $0x108] sm:$0xff] (!%p11995_p3)  ;;  %v12003_v5 = vld [vmem:[%s18882_s1 + $0x110] sm:$0xff] (!%p11995_p3) }
 0xe98   :  { %12008 = vst.msk [vmem:[%s18884_s3 + $0xf0] sm:$0xff] (!%p11995_p3), %vm4339_vm14, %v11999_v1  ;;  %12009 = vst.msk [vmem:[%s18884_s3 + $0xf8] sm:$0xff] (!%p11995_p3), %vm4339_vm14, %v12000_v2  ;;  %v12004_v6 = vld [vmem:[%s18882_s1 + $0x118] sm:$0x1] (!%p11995_p3) }
 0xe99   :  { %12010 = vst.msk [vmem:[%s18884_s3 + $0x100] sm:$0x1] (!%p11995_p3), %vm4342_vm15, %v12001_v3  ;;  %12013 = vst.msk [vmem:[%s18884_s3 + $0x118] sm:$0x1] (!%p11995_p3), %vm4342_vm15, %v12004_v6 }
 0xe9a   :  { %12011 = vst.msk [vmem:[%s18884_s3 + $0x108] sm:$0xff] (!%p11995_p3), %vm4339_vm14, %v12002_v4  ;;  %12012 = vst.msk [vmem:[%s18884_s3 + $0x110] sm:$0xff] (!%p11995_p3), %vm4339_vm14, %v12003_v5 }
 0xe9d PF:  { %p12014_p4 = scmp.ne.s32.totalorder %s15371_s0, 1 }
 0xe9e   :  { %v4354_v7 = vlaneseq (!%p12014_p4)  ;;  %v15273_v8 = vmov (!%p12014_p4), 0.0|0.0   ;;  %vm15274_vm0 = vmmov (!%p12014_p4), 0   ;;  %v15275_v11 = vmov (!%p12014_p4), 0.0   ;;  %v12018_v20 = vld [vmem:[%s18882_s1 + $0xd8] sm:$0xff] (!%p12014_p4)  ;;  %v12020_v21 = vld [vmem:[%s18882_s1 + $0xe8] sm:$0x1] (!%p12014_p4) }
 0xe9f   :  { %4353 = sbr.rel (%p12014_p4) target bundleno = 4119 (0x1017), region = 65  ;;  %14874 = vmatprep.subr.bf16.mxu0 (!%p12014_p4), %v15273_v8  ;;  %15078 = vmatprep.subr.bf16.mxu1 (!%p12014_p4), %v15273_v8  ;;  %v15276_v18 = vmov (!%p12014_p4), 1.0|1.0   ;;  %vm4386_vm5 = vcmask (!%p12014_p4), 1040384   ;;  %vm4376_vm6 = vcmask (!%p12014_p4), 138240   ;;  %v12019_v22 = vld [vmem:[%s18882_s1 + $0xe0] sm:$0xff] (!%p12014_p4) }
 0xea0   :  { %v4355_v9 = vshrl.u32 (!%p12014_p4), %v4354_v7, 7  ;;  %v4359_v10 = vand.u32 (!%p12014_p4), 127, %v4354_v7  ;;  %13872 = vmatprep.mubr.msk.f32.mxu0 (!%p12014_p4), %vm15274_vm0, %v15275_v11  ;;  %13878 = vmatprep.mubr.msk.f32.mxu1 (!%p12014_p4), %vm15274_vm0, %v15275_v11  ;;  %v12030_v23 = vld [vmem:[%s18882_s1 + $0xf0] sm:$0xff] (!%p12014_p4)  ;;  %v12042_v24 = vld [vmem:[%s18882_s1 + $0x108] sm:$0xff] (!%p12014_p4)  ;;  %v12031_v25 = vld [vmem:[%s18882_s1 + $0xf8] sm:$0xff] (!%p12014_p4)  ;;  %vm4505_vm7 = vcmask (!%p12014_p4), 131072  }
 0xea1   :  { %v12043_v26 = vld [vmem:[%s18882_s1 + $0x110] sm:$0xff] (!%p12014_p4)  ;;  %v12032_v27 = vld [vmem:[%s18882_s1 + $0x100] sm:$0x1] (!%p12014_p4)  ;;  %v12044_v28 = vld [vmem:[%s18882_s1 + $0x118] sm:$0x1] (!%p12014_p4) }
 0xea2   :  { %v4356_v12 = vadd.s32 (!%p12014_p4), 8, %v4355_v9  ;;  %v4360_v13 = vadd.s32 (!%p12014_p4), %v4359_v10, %v4355_v9  ;;  %v4357_v14 = vadd.s32 (!%p12014_p4), 16, %v4355_v9 }
 0xea4   :  { %v4361_v15 = vadd.s32 (!%p12014_p4), %v4359_v10, %v4356_v12  ;;  %vm4363_vm1 = vcmp.eq.s32.totalorder (!%p12014_p4), %v4360_v13, 16  ;;  %v4362_v16 = vadd.s32 (!%p12014_p4), %v4359_v10, %v4357_v14 }
 0xea6   :  { %vm4364_vm2 = vcmp.eq.s32.totalorder %v4361_v15, 16  ;;  %vm4365_vm3 = vcmp.eq.s32.totalorder %v4362_v16, 16 }
 0xea7   :  { %vm16747_vm4 = vmpackc.low %vm4364_vm2, %vm4363_vm1  ;;  %v12017_v19 = vsel %vm4365_vm3, 1.0, %v15275_v11 }
 0xea8   :  { %14876 = vmatpush3.bf16.msk.msra.mxu0 %vm16747_vm4, %v15276_v18  ;;  %15080 = vmatpush3.bf16.msk.msra.mxu1 %vm16747_vm4, %v15276_v18 }
 0xea9   :  { %13870 = vmatprep.subr.mxu0 %v15275_v11  ;;  %15079 = vmatprep.subr.mxu1 %v15275_v11 }
 0xeac   :  { %13871 = vmatpush3.msk.msra.mxu0 %vm4386_vm5, %v12017_v19  ;;  %15081 = vmatpush3.msk.msra.mxu1 %vm4386_vm5, %v12017_v19 }
 0xead   :  { %13873 = vmatmul.mubr.msk.f32.vlgmr.msra.gmra.mrb[0].mxu0 %vm4376_vm6, %v12018_v20  ;;  %14880 = vmatprep.subr.bf16.mxu0 %v15273_v8 }
 0xeae   :  { %13875 = vmatprep.mubr.msk.f32.mxu0 %vm15274_vm0, %v15275_v11  ;;  %14882 = vmatpush3.bf16.msk.msra.mxu0 %vm16747_vm4, %v15276_v18 }
 0xeaf   :  { %13879 = vmatmul.mubr.msk.f32.vlgmr.msra.gmra.mrb[0].mxu1 %vm4376_vm6, %v12020_v21  ;;  %14877 = vmatprep.subr.bf16.mxu1 %v15273_v8 }
 0xeb0   :  { %14879 = vmatpush3.bf16.msk.msra.mxu1 %vm16747_vm4, %v15276_v18  ;;  %13900 = vmatprep.subr.mxu0 %v15275_v11 }
 0xeb1   :  { %13876 = vmatmul.mubr.msk.f32.gmra.mrb[2].mxu0 %vm4376_vm6, %v12019_v22  ;;  %13885 = vmatprep.subr.mxu1 %v15275_v11 }
 0xeb2   :  { %13901 = vmatpush3.msk.msra.mxu0 %vm4386_vm5, %v12017_v19  ;;  %13887 = vmatprep.mubr.msk.f32.mxu1 %vm15274_vm0, %v15275_v11 }
 0xeb3   :  { %13902 = vmatprep.mubr.msk.f32.mxu0 %vm15274_vm0, %v15275_v11 }
 0xeb4   :  { %13886 = vmatpush3.msk.msra.mxu1 %vm4386_vm5, %v12017_v19 }
 0xeb5   :  { %13888 = vmatmul.mubr.msk.f32.vlgmr.msra.gmra.mrb[2].mxu1 %vm4376_vm6, %v12030_v23  ;;  %13903 = vmatmul.mubr.msk.f32.vlgmr.msra.gmra.mrb[4].mxu0 %vm4376_vm6, %v12042_v24 }
 0xeb6   :  { %13890 = vmatprep.mubr.msk.f32.mxu1 %vm15274_vm0, %v15275_v11  ;;  %13905 = vmatprep.mubr.msk.f32.mxu0 %vm15274_vm0, %v15275_v11 }
 0xeb9   :  { %13891 = vmatmul.mubr.msk.f32.gmra.mrb[4].mxu1 %vm4376_vm6, %v12031_v25  ;;  %13906 = vmatmul.mubr.msk.f32.gmra.mrb[6].mxu0 %vm4376_vm6, %v12043_v26 }
 0xeba   :  { %13893 = vmatprep.mubr.msk.f32.mxu1 %vm15274_vm0, %v15275_v11  ;;  %13908 = vmatprep.mubr.msk.f32.mxu0 %vm15274_vm0, %v15275_v11 }
 0xebd   :  { %13894 = vmatmul.mubr.msk.f32.gmra.mrb[6].mxu1 %vm4376_vm6, %v12032_v27  ;;  %13909 = vmatmul.mubr.msk.f32.gmra.mrb[8].mxu0 %vm4376_vm6, %v12044_v28 }
 0xf80   :  { %v4456_v29 = vpop.f32.mrb[0].mxu0 }
 0xf81   :  { %4470 = vxpose.xlu0.b32.start [1/3] (short) (narrow) %v4456_v29, 24  ;;  %v13874_v30 = vpop.f32.mrb[1].mxu0 }
 0xf82   :  { %v4466_v31 = vpop.f32.mrb[0].mxu1 }
 0xf83   :  { %v13880_v32 = vpop.f32.mrb[1].mxu1 }
 0xf84   :  { %v4461_v33 = vpop.f32.mrb[2].mxu0 }
 0xf85   :  { %4471 = vxpose.xlu0.b32.cont [2/3] (short) (narrow) %v4461_v33, 24  ;;  %v13877_v34 = vpop.f32.mrb[3].mxu0 }
 0xf88   :  { %v4586_v35 = vpop.f32.mrb[2].mxu1  ;;  %v4715_v36 = vpop.f32.mrb[4].mxu0 }
 0xf89   :  { %4472 = vxpose.xlu0.b32.end [3/3] (short) (narrow) %v4466_v31, 24  ;;  %v13889_v37 = vpop.f32.mrb[3].mxu1  ;;  %v13904_v38 = vpop.f32.mrb[5].mxu0  ;;  %4600 = vxpose.xlu1.b32.start [1/3] (short) (narrow) %v4586_v35, 24 }
 0xf8c   :  { %v4591_v39 = vpop.f32.mrb[4].mxu1  ;;  %v4720_v40 = vpop.f32.mrb[6].mxu0 }
 0xf8d   :  { %4729 = vxpose.xlu0.b32.start [1/3] (short) (narrow) %v4715_v36, 24  ;;  %v13892_v41 = vpop.f32.mrb[5].mxu1  ;;  %v13907_v42 = vpop.f32.mrb[7].mxu0  ;;  %4601 = vxpose.xlu1.b32.cont [2/3] (short) (narrow) %v4591_v39, 24 }
 0xf90   :  { %v4596_v43 = vpop.f32.mrb[6].mxu1  ;;  %v4725_v44 = vpop.f32.mrb[8].mxu0 }
 0xf91   :  { %4730 = vxpose.xlu0.b32.cont [2/3] (short) (narrow) %v4720_v40, 24  ;;  %v13895_v45 = vpop.f32.mrb[7].mxu1  ;;  %v13910_v46 = vpop.f32.mrb[9].mxu0  ;;  %4602 = vxpose.xlu1.b32.end [3/3] (short) (narrow) %v4596_v43, 24 }
 0xf95   :  { %4731 = vxpose.xlu0.b32.end [3/3] (short) (narrow) %v4725_v44, 24 }
0x1001   :  { %v4486_v47 = vpop.trf.xlu0 }
0x1002   :  { %12027 = vst.msk [vmem:[%s18884_s3 + $0xd8] sm:$0xff] %vm4376_vm6, %v4486_v47 }
0x1005   :  { %v4487_v48 = vpop.trf.xlu0 }
0x1006   :  { %12028 = vst.msk [vmem:[%s18884_s3 + $0xe0] sm:$0xff] %vm4376_vm6, %v4487_v48 }
0x1009   :  { %v4488_v49 = vpop.trf.xlu0  ;;  %v4616_v50 = vpop.trf.xlu1 }
0x100a   :  { %12029 = vst.msk [vmem:[%s18884_s3 + $0xe8] sm:$0x1] %vm4505_vm7, %v4488_v49 }
0x100b   :  { %12039 = vst.msk [vmem:[%s18884_s3 + $0xf0] sm:$0xff] %vm4376_vm6, %v4616_v50 }
0x100d   :  { %v4745_v51 = vpop.trf.xlu0  ;;  %v4617_v52 = vpop.trf.xlu1 }
0x100e   :  { %12051 = vst.msk [vmem:[%s18884_s3 + $0x108] sm:$0xff] %vm4376_vm6, %v4745_v51  ;;  %12040 = vst.msk [vmem:[%s18884_s3 + $0xf8] sm:$0xff] %vm4376_vm6, %v4617_v52 }
0x1011   :  { %v4746_v53 = vpop.trf.xlu0  ;;  %v4618_v54 = vpop.trf.xlu1 }
0x1012   :  { %12052 = vst.msk [vmem:[%s18884_s3 + $0x110] sm:$0xff] %vm4376_vm6, %v4746_v53 }
0x1013   :  { %12041 = vst.msk [vmem:[%s18884_s3 + $0x100] sm:$0x1] %vm4505_vm7, %v4618_v54 }
0x1015   :  { %v4747_v55 = vpop.trf.xlu0 }
0x1016   :  { %12053 = vst.msk [vmem:[%s18884_s3 + $0x118] sm:$0x1] %vm4505_vm7, %v4747_v55 }
0x1017 PF:  { %p12054_p5 = scmp.ne.s32.totalorder %s15371_s0, 2 }
0x1018   :  { %v4769_v56 = vlaneseq (!%p12054_p5)  ;;  %v15277_v57 = vmov (!%p12054_p5), 0.0|0.0   ;;  %vm15278_vm8 = vmmov (!%p12054_p5), 0   ;;  %v15279_v60 = vmov (!%p12054_p5), 0.0   ;;  %v12058_v5 = vld [vmem:[%s18882_s1 + $0xd8] sm:$0xff] (!%p12054_p5)  ;;  %v12059_v6 = vld [vmem:[%s18882_s1 + $0xe0] sm:$0xff] (!%p12054_p5)  ;;  %v12074_v8 = vld [vmem:[%s18882_s1 + $0xf0] sm:$0xff] (!%p12054_p5) }
0x1019   :  { %4768 = sbr.rel (%p12054_p5) target bundleno = 4603 (0x11fb), region = 69  ;;  %14883 = vmatprep.subr.bf16.mxu0 (!%p12054_p5), %v15277_v57  ;;  %14886 = vmatprep.subr.bf16.mxu1 (!%p12054_p5), %v15277_v57  ;;  %v15280_v3 = vmov (!%p12054_p5), 1.0|1.0   ;;  %vm4801_vm13 = vcmask (!%p12054_p5), 1040384   ;;  %vm4791_vm14 = vcmask (!%p12054_p5), 138240   ;;  %v12075_v9 = vld [vmem:[%s18882_s1 + $0xf8] sm:$0xff] (!%p12054_p5) }
0x101a   :  { %v4770_v58 = vshrl.u32 (!%p12054_p5), %v4769_v56, 7  ;;  %v4774_v59 = vand.u32 (!%p12054_p5), 127, %v4769_v56  ;;  %13917 = vmatprep.mubr.msk.f32.mxu0 (!%p12054_p5), %vm15278_vm8, %v15279_v60  ;;  %13932 = vmatprep.mubr.msk.f32.mxu1 (!%p12054_p5), %vm15278_vm8, %v15279_v60  ;;  %v12060_v7 = vld [vmem:[%s18882_s1 + $0xe8] sm:$0x1] (!%p12054_p5)  ;;  %v12076_v10 = vld [vmem:[%s18882_s1 + $0x100] sm:$0x1] (!%p12054_p5) }
0x101b   :  { %v12090_v11 = vld [vmem:[%s18882_s1 + $0x108] sm:$0xff] (!%p12054_p5)  ;;  %v12091_v12 = vld [vmem:[%s18882_s1 + $0x110] sm:$0xff] (!%p12054_p5)  ;;  %v12092_v13 = vld [vmem:[%s18882_s1 + $0x118] sm:$0x1] (!%p12054_p5)  ;;  %vm4979_vm15 = vcmask (!%p12054_p5), 131072  }
0x101c   :  { %v4771_v61 = vadd.s32 (!%p12054_p5), 8, %v4770_v58  ;;  %v4775_v62 = vadd.s32 (!%p12054_p5), %v4774_v59, %v4770_v58  ;;  %v4772_v63 = vadd.s32 (!%p12054_p5), 16, %v4770_v58 }
0x101e   :  { %v16846_v0 = vadd.s32 (!%p12054_p5), %v4774_v59, %v4771_v61  ;;  %vm4778_vm9 = vcmp.eq.s32.totalorder (!%p12054_p5), %v4775_v62, 16  ;;  %v4777_v1 = vadd.s32 (!%p12054_p5), %v4774_v59, %v4772_v63 }
0x101f   :  { %v12055_v21 = vsel (!%p12054_p5), %vm4778_vm9, 1.0, %v15279_v60 }
0x1020   :  { %vm4779_vm10 = vcmp.eq.s32.totalorder %v16846_v0, 16  ;;  %vm4780_vm11 = vcmp.eq.s32.totalorder %v4777_v1, 16 }
0x1021   :  { %vm16852_vm12 = vmpackc.low %vm4779_vm10, %vm4778_vm9  ;;  %v16860_v4 = vsel %vm4780_vm11, 1.0, %v15279_v60  ;;  %v12056_v24 = vsel %vm4779_vm10, 1.0, %v15279_v60 }
0x1022   :  { %14885 = vmatpush3.bf16.msk.msra.mxu0 %vm16852_vm12, %v15280_v3 }
0x1023   :  { %13915 = vmatprep.subr.mxu0 %v15279_v60 }
0x1026   :  { %13916 = vmatpush3.msk.msra.mxu0 %vm4801_vm13, %v16860_v4 }
0x1027   :  { %13918 = vmatmul.mubr.msk.f32.vlgmr.msra.gmra.mrb[0].mxu0 %vm4791_vm14, %v12058_v5  ;;  %14889 = vmatprep.subr.bf16.mxu0 %v15277_v57 }
0x1028   :  { %13920 = vmatprep.mubr.msk.f32.mxu0 %vm15278_vm8, %v15279_v60  ;;  %14891 = vmatpush3.bf16.msk.msra.mxu0 %vm16852_vm12, %v15280_v3 }
0x1029   :  { %13945 = vmatprep.subr.mxu0 %v15279_v60 }
0x102b   :  { %13921 = vmatmul.mubr.msk.f32.gmra.mrb[2].mxu0 %vm4791_vm14, %v12059_v6 }
0x102c   :  { %13923 = vmatprep.mubr.msk.f32.mxu0 %vm15278_vm8, %v15279_v60  ;;  %13946 = vmatpush3.msk.msra.mxu0 %vm4801_vm13, %v16860_v4 }
0x102d   :  { %14895 = vmatprep.subr.bf16.mxu0 %v15277_v57 }
0x102f   :  { %13924 = vmatmul.mubr.msk.f32.gmra.mrb[4].mxu0 %vm4791_vm14, %v12060_v7 }
0x1030   :  { %13947 = vmatprep.mubr.msk.f32.mxu0 %vm15278_vm8, %v15279_v60 }
0x1033   :  { %13948 = vmatmul.mubr.msk.f32.vlgmr.msra.gmra.mrb[6].mxu0 %vm4791_vm14, %v12074_v8 }
0x1034   :  { %13950 = vmatprep.mubr.msk.f32.mxu0 %vm15278_vm8, %v15279_v60  ;;  %14897 = vmatpush3.bf16.msk.msra.mxu0 %vm16852_vm12, %v15280_v3 }
0x1035   :  { %13975 = vmatprep.subr.mxu0 %v15279_v60 }
0x1037   :  { %13951 = vmatmul.mubr.msk.f32.gmra.mrb[8].mxu0 %vm4791_vm14, %v12075_v9 }
0x1038   :  { %13953 = vmatprep.mubr.msk.f32.mxu0 %vm15278_vm8, %v15279_v60  ;;  %13976 = vmatpush3.msk.msra.mxu0 %vm4801_vm13, %v16860_v4 }
0x103b   :  { %13954 = vmatmul.mubr.msk.f32.gmra.mrb[10].mxu0 %vm4791_vm14, %v12076_v10 }
0x103c   :  { %13977 = vmatprep.mubr.msk.f32.mxu0 %vm15278_vm8, %v15279_v60 }
0x103f   :  { %13978 = vmatmul.mubr.msk.f32.vlgmr.msra.gmra.mrb[12].mxu0 %vm4791_vm14, %v12090_v11 }
0x1040   :  { %13980 = vmatprep.mubr.msk.f32.mxu0 %vm15278_vm8, %v15279_v60 }
0x1043   :  { %13981 = vmatmul.mubr.msk.f32.gmra.mrb[14].mxu0 %vm4791_vm14, %v12091_v12 }
0x1044   :  { %13983 = vmatprep.mubr.msk.f32.mxu0 %vm15278_vm8, %v15279_v60 }
0x1047   :  { %13984 = vmatmul.mubr.msk.f32.gmra.mrb[16].mxu0 %vm4791_vm14, %v12092_v13 }
0x10fa   :  { %v4871_v14 = vpop.f32.mrb[0].mxu0 }
0x10fb   :  { %v13919_v15 = vpop.f32.mrb[1].mxu0 }
0x10fe   :  { %v4876_v16 = vpop.f32.mrb[2].mxu0 }
0x10ff   :  { %v14887_v17 = vpack.c.bf16 %v4876_v16, %v4871_v14  ;;  %v13922_v18 = vpop.f32.mrb[3].mxu0 }
0x1101   :  { %14888 = vmatpush3.bf16.msra.mxu1 %v14887_v17 }
0x1102   :  { %v4881_v19 = vpop.f32.mrb[4].mxu0  ;;  %13930 = vmatprep.subr.mxu1 %v15279_v60 }
0x1103   :  { %v13925_v20 = vpop.f32.mrb[5].mxu0 }
0x1105   :  { %13931 = vmatpush3.msk.msra.mxu1 %vm4801_vm13, %v4881_v19 }
0x1106   :  { %v5060_v22 = vpop.f32.mrb[6].mxu0  ;;  %13933 = vmatmul.mubr.msk.f32.vlgmr.msra.gmra.mrb[0].mxu1 %vm4791_vm14, %v12055_v21  ;;  %14892 = vmatprep.subr.bf16.mxu1 %v15277_v57 }
0x1107   :  { %v13949_v23 = vpop.f32.mrb[7].mxu0  ;;  %13935 = vmatprep.mubr.msk.f32.mxu1 %vm15278_vm8, %v15279_v60 }
0x110a   :  { %v5065_v25 = vpop.f32.mrb[8].mxu0  ;;  %13936 = vmatmul.mubr.msk.f32.gmra.mrb[2].mxu1 %vm4791_vm14, %v12056_v24 }
0x110b   :  { %v14893_v26 = vpack.c.bf16 %v5065_v25, %v5060_v22  ;;  %v13952_v27 = vpop.f32.mrb[9].mxu0  ;;  %13938 = vmatprep.mubr.msk.f32.mxu1 %vm15278_vm8, %v15279_v60 }
0x110d   :  { %14894 = vmatpush3.bf16.msra.mxu1 %v14893_v26 }
0x110e   :  { %v5070_v28 = vpop.f32.mrb[10].mxu0  ;;  %13960 = vmatprep.subr.mxu1 %v15279_v60  ;;  %13939 = vmatmul.mubr.msk.f32.gmra.mrb[4].mxu1 %vm4791_vm14, %v16860_v4 }
0x110f   :  { %v13955_v29 = vpop.f32.mrb[11].mxu0  ;;  %13962 = vmatprep.mubr.msk.f32.mxu1 %vm15278_vm8, %v15279_v60 }
0x1111   :  { %13961 = vmatpush3.msk.msra.mxu1 %vm4801_vm13, %v5070_v28 }
0x1112   :  { %v5240_v30 = vpop.f32.mrb[12].mxu0  ;;  %13963 = vmatmul.mubr.msk.f32.vlgmr.msra.gmra.mrb[6].mxu1 %vm4791_vm14, %v12055_v21  ;;  %14898 = vmatprep.subr.bf16.mxu1 %v15277_v57 }
0x1113   :  { %v13979_v31 = vpop.f32.mrb[13].mxu0  ;;  %13965 = vmatprep.mubr.msk.f32.mxu1 %vm15278_vm8, %v15279_v60 }
0x1116   :  { %v5245_v32 = vpop.f32.mrb[14].mxu0  ;;  %13966 = vmatmul.mubr.msk.f32.gmra.mrb[8].mxu1 %vm4791_vm14, %v12056_v24 }
0x1117   :  { %v14899_v33 = vpack.c.bf16 %v5245_v32, %v5240_v30  ;;  %v13982_v34 = vpop.f32.mrb[15].mxu0  ;;  %13968 = vmatprep.mubr.msk.f32.mxu1 %vm15278_vm8, %v15279_v60 }
0x1119   :  { %14900 = vmatpush3.bf16.msra.mxu1 %v14899_v33 }
0x111a   :  { %v5250_v35 = vpop.f32.mrb[16].mxu0  ;;  %13990 = vmatprep.subr.mxu1 %v15279_v60  ;;  %13969 = vmatmul.mubr.msk.f32.gmra.mrb[10].mxu1 %vm4791_vm14, %v16860_v4 }
0x111b   :  { %v13985_v36 = vpop.f32.mrb[17].mxu0  ;;  %13992 = vmatprep.mubr.msk.f32.mxu1 %vm15278_vm8, %v15279_v60 }
0x111d   :  { %13991 = vmatpush3.msk.msra.mxu1 %vm4801_vm13, %v5250_v35 }
0x111e   :  { %13993 = vmatmul.mubr.msk.f32.vlgmr.msra.gmra.mrb[12].mxu1 %vm4791_vm14, %v12055_v21 }
0x111f   :  { %13995 = vmatprep.mubr.msk.f32.mxu1 %vm15278_vm8, %v15279_v60 }
0x1122   :  { %13996 = vmatmul.mubr.msk.f32.gmra.mrb[14].mxu1 %vm4791_vm14, %v12056_v24 }
0x1123   :  { %13998 = vmatprep.mubr.msk.f32.mxu1 %vm15278_vm8, %v15279_v60 }
0x1126   :  { %13999 = vmatmul.mubr.msk.f32.gmra.mrb[16].mxu1 %vm4791_vm14, %v16860_v4 }
0x11d9   :  { %v4962_v37 = vpop.f32.mrb[0].mxu1 }
0x11da   :  { %12071 = vst.msk [vmem:[%s18884_s3 + $0xd8] sm:$0xff] %vm4791_vm14, %v4962_v37  ;;  %v13934_v38 = vpop.f32.mrb[1].mxu1 }
0x11dd   :  { %v4967_v39 = vpop.f32.mrb[2].mxu1 }
0x11de   :  { %12072 = vst.msk [vmem:[%s18884_s3 + $0xe0] sm:$0xff] %vm4791_vm14, %v4967_v39  ;;  %v13937_v40 = vpop.f32.mrb[3].mxu1 }
0x11e1   :  { %v4972_v41 = vpop.f32.mrb[4].mxu1 }
0x11e2   :  { %12073 = vst.msk [vmem:[%s18884_s3 + $0xe8] sm:$0x1] %vm4979_vm15, %v4972_v41  ;;  %v13940_v42 = vpop.f32.mrb[5].mxu1 }
0x11e5   :  { %v5143_v43 = vpop.f32.mrb[6].mxu1 }
0x11e6   :  { %12087 = vst.msk [vmem:[%s18884_s3 + $0xf0] sm:$0xff] %vm4791_vm14, %v5143_v43  ;;  %v13964_v44 = vpop.f32.mrb[7].mxu1 }
0x11e9   :  { %v5148_v45 = vpop.f32.mrb[8].mxu1 }
0x11ea   :  { %12088 = vst.msk [vmem:[%s18884_s3 + $0xf8] sm:$0xff] %vm4791_vm14, %v5148_v45  ;;  %v13967_v46 = vpop.f32.mrb[9].mxu1 }
0x11ed   :  { %v5153_v47 = vpop.f32.mrb[10].mxu1 }
0x11ee   :  { %12089 = vst.msk [vmem:[%s18884_s3 + $0x100] sm:$0x1] %vm4979_vm15, %v5153_v47  ;;  %v13970_v48 = vpop.f32.mrb[11].mxu1 }
0x11f1   :  { %v5323_v49 = vpop.f32.mrb[12].mxu1 }
0x11f2   :  { %12103 = vst.msk [vmem:[%s18884_s3 + $0x108] sm:$0xff] %vm4791_vm14, %v5323_v49  ;;  %v13994_v50 = vpop.f32.mrb[13].mxu1 }
0x11f5   :  { %v5328_v51 = vpop.f32.mrb[14].mxu1 }
0x11f6   :  { %12104 = vst.msk [vmem:[%s18884_s3 + $0x110] sm:$0xff] %vm4791_vm14, %v5328_v51  ;;  %v13997_v52 = vpop.f32.mrb[15].mxu1 }
0x11f9   :  { %v5333_v53 = vpop.f32.mrb[16].mxu1 }
0x11fa   :  { %12105 = vst.msk [vmem:[%s18884_s3 + $0x118] sm:$0x1] %vm4979_vm15, %v5333_v53  ;;  %v14000_v54 = vpop.f32.mrb[17].mxu1 }
0x11fb PF:  { %p12106_p6 = scmp.ne.s32.totalorder %s15371_s0, 3 }
0x11fc   :  { %v12110_v55 = vld [vmem:[%s18882_s1 + $0xd8] sm:$0xff] (!%p12106_p6)  ;;  %v5345_v56 = vlaneseq (!%p12106_p6)  ;;  %v12122_v57 = vld [vmem:[%s18882_s1 + $0xf0] sm:$0xff] (!%p12106_p6)  ;;  %v15281_v58 = vmov (!%p12106_p6), 0.0|0.0   ;;  %v12111_v59 = vld [vmem:[%s18882_s1 + $0xe0] sm:$0xff] (!%p12106_p6)  ;;  %vm15282_vm0 = vmmov (!%p12106_p6), 0   ;;  %v15283_v63 = vmov (!%p12106_p6), 0.0  }
0x11fd   :  { %5344 = sbr.rel (%p12106_p6) target bundleno = 4969 (0x1369), region = 73  ;;  %5367 = vxpose.xlu0.b32.start [1/3] (short) (narrow) (!%p12106_p6), %v12110_v55, 24  ;;  %14901 = vmatprep.subr.bf16.mxu0 (!%p12106_p6), %v15281_v58  ;;  %v12123_v60 = vld [vmem:[%s18882_s1 + $0xf8] sm:$0xff] (!%p12106_p6)  ;;  %v12112_v3 = vld [vmem:[%s18882_s1 + $0xe8] sm:$0x1] (!%p12106_p6)  ;;  %vm5409_vm5 = vcmask (!%p12106_p6), 1040384  }
0x11fe   :  { %5502 = vxpose.xlu1.b32.start [1/3] (short) (narrow) (!%p12106_p6), %v12122_v57, 24  ;;  %15082 = vmatprep.subr.bf16.mxu1 (!%p12106_p6), %v15281_v58  ;;  %v5346_v61 = vshrl.u32 (!%p12106_p6), %v5345_v56, 7  ;;  %v5350_v62 = vand.u32 (!%p12106_p6), 127, %v5345_v56  ;;  %v12124_v4 = vld [vmem:[%s18882_s1 + $0x100] sm:$0x1] (!%p12106_p6)  ;;  %v12134_v7 = vld [vmem:[%s18882_s1 + $0x108] sm:$0xff] (!%p12106_p6) }
0x11ff   :  { %14007 = vmatprep.mubr.msk.f32.mxu0 (!%p12106_p6), %vm15282_vm0, %v15283_v63  ;;  %14013 = vmatprep.mubr.msk.f32.mxu1 (!%p12106_p6), %vm15282_vm0, %v15283_v63  ;;  %v15284_v9 = vmov (!%p12106_p6), 1.0|1.0   ;;  %v12135_v11 = vld [vmem:[%s18882_s1 + $0x110] sm:$0xff] (!%p12106_p6)  ;;  %v12136_v12 = vld [vmem:[%s18882_s1 + $0x118] sm:$0x1] (!%p12106_p6)  ;;  %vm5399_vm6 = vcmask (!%p12106_p6), 138240  }
0x1200   :  { %v5347_v0 = vadd.s32 (!%p12106_p6), 8, %v5346_v61  ;;  %v5351_v1 = vadd.s32 (!%p12106_p6), %v5350_v62, %v5346_v61  ;;  %v5348_v2 = vadd.s32 (!%p12106_p6), 16, %v5346_v61  ;;  %vm5496_vm7 = vcmask (!%p12106_p6), 131072  }
0x1201   :  { %5368 = vxpose.xlu0.b32.cont [2/3] (short) (narrow) (!%p12106_p6), %v12111_v59, 24 }
0x1202   :  { %5503 = vxpose.xlu1.b32.cont [2/3] (short) (narrow) (!%p12106_p6), %v12123_v60, 24  ;;  %v5352_v5 = vadd.s32 (!%p12106_p6), %v5350_v62, %v5347_v0  ;;  %vm5354_vm1 = vcmp.eq.s32.totalorder (!%p12106_p6), %v5351_v1, 16  ;;  %v5353_v6 = vadd.s32 (!%p12106_p6), %v5350_v62, %v5348_v2 }
0x1204   :  { %vm5355_vm2 = vcmp.eq.s32.totalorder %v5352_v5, 16  ;;  %vm5356_vm3 = vcmp.eq.s32.totalorder %v5353_v6, 16 }
0x1205   :  { %5369 = vxpose.xlu0.b32.end [3/3] (short) (narrow) %v12112_v3, 24  ;;  %vm17031_vm4 = vmpackc.low %vm5355_vm2, %vm5354_vm1  ;;  %v12109_v10 = vsel %vm5356_vm3, 1.0, %v15283_v63 }
0x1206   :  { %5504 = vxpose.xlu1.b32.end [3/3] (short) (narrow) %v12124_v4, 24  ;;  %14903 = vmatpush3.bf16.msk.msra.mxu0 %vm17031_vm4, %v15284_v9 }
0x1207   :  { %15084 = vmatpush3.bf16.msk.msra.mxu1 %vm17031_vm4, %v15284_v9  ;;  %14005 = vmatprep.subr.mxu0 %v15283_v63 }
0x1208   :  { %15083 = vmatprep.subr.mxu1 %v15283_v63 }
0x1209   :  { %5631 = vxpose.xlu0.b32.start [1/3] (short) (narrow) %v12134_v7, 24 }
0x120a   :  { %14006 = vmatpush3.msk.msra.mxu0 %vm5409_vm5, %v12109_v10 }
0x120b   :  { %15085 = vmatpush3.msk.msra.mxu1 %vm5409_vm5, %v12109_v10  ;;  %14907 = vmatprep.subr.bf16.mxu0 %v15281_v58 }
0x120c   :  { %14904 = vmatprep.subr.bf16.mxu1 %v15281_v58 }
0x120d   :  { %5632 = vxpose.xlu0.b32.cont [2/3] (short) (narrow) %v12135_v11, 24 }
0x1211   :  { %5633 = vxpose.xlu0.b32.end [3/3] (short) (narrow) %v12136_v12, 24 }
0x127d   :  { %v5383_v13 = vpop.trf.xlu0 }
0x127e   :  { %14008 = vmatmul.mubr.msk.f32.vlgmr.msra.gmra.mrb[0].mxu0 %vm5399_vm6, %v5383_v13  ;;  %v5518_v16 = vpop.trf.xlu1 }
0x127f   :  { %14010 = vmatprep.mubr.msk.f32.mxu0 %vm15282_vm0, %v15283_v63  ;;  %14909 = vmatpush3.bf16.msk.msra.mxu0 %vm17031_vm4, %v15284_v9 }
0x1280   :  { %14035 = vmatprep.subr.mxu0 %v15283_v63 }
0x1281   :  { %v5384_v14 = vpop.trf.xlu0 }
0x1282   :  { %14011 = vmatmul.mubr.msk.f32.gmra.mrb[2].mxu0 %vm5399_vm6, %v5384_v14  ;;  %v5519_v18 = vpop.trf.xlu1 }
0x1283   :  { %14036 = vmatpush3.msk.msra.mxu0 %vm5409_vm5, %v12109_v10  ;;  %14037 = vmatprep.mubr.msk.f32.mxu0 %vm15282_vm0, %v15283_v63 }
0x1285   :  { %v5385_v15 = vpop.trf.xlu0 }
0x1286   :  { %14014 = vmatmul.mubr.msk.f32.vlgmr.msra.gmra.mrb[0].mxu1 %vm5399_vm6, %v5385_v15  ;;  %v5520_v20 = vpop.trf.xlu1 }
0x1287   :  { %14906 = vmatpush3.bf16.msk.msra.mxu1 %vm17031_vm4, %v15284_v9  ;;  %14022 = vmatprep.mubr.msk.f32.mxu1 %vm15282_vm0, %v15283_v63 }
0x1288   :  { %14020 = vmatprep.subr.mxu1 %v15283_v63 }
0x1289   :  { %v5647_v17 = vpop.trf.xlu0 }
0x128a   :  { %14038 = vmatmul.mubr.msk.f32.vlgmr.msra.gmra.mrb[4].mxu0 %vm5399_vm6, %v5647_v17 }
0x128b   :  { %14021 = vmatpush3.msk.msra.mxu1 %vm5409_vm5, %v12109_v10  ;;  %14040 = vmatprep.mubr.msk.f32.mxu0 %vm15282_vm0, %v15283_v63 }
0x128c   :  { %14023 = vmatmul.mubr.msk.f32.vlgmr.msra.gmra.mrb[2].mxu1 %vm5399_vm6, %v5518_v16 }
0x128d   :  { %v5648_v19 = vpop.trf.xlu0  ;;  %14025 = vmatprep.mubr.msk.f32.mxu1 %vm15282_vm0, %v15283_v63 }
0x128e   :  { %14041 = vmatmul.mubr.msk.f32.gmra.mrb[6].mxu0 %vm5399_vm6, %v5648_v19 }
0x128f   :  { %14043 = vmatprep.mubr.msk.f32.mxu0 %vm15282_vm0, %v15283_v63 }
0x1290   :  { %14026 = vmatmul.mubr.msk.f32.gmra.mrb[4].mxu1 %vm5399_vm6, %v5519_v18 }
0x1291   :  { %v5649_v21 = vpop.trf.xlu0  ;;  %14028 = vmatprep.mubr.msk.f32.mxu1 %vm15282_vm0, %v15283_v63 }
0x1292   :  { %14044 = vmatmul.mubr.msk.f32.gmra.mrb[8].mxu0 %vm5399_vm6, %v5649_v21 }
0x1294   :  { %14029 = vmatmul.mubr.msk.f32.gmra.mrb[6].mxu1 %vm5399_vm6, %v5520_v20 }
0x1351   :  { %v5479_v22 = vpop.f32.mrb[0].mxu0 }
0x1352   :  { %12119 = vst.msk [vmem:[%s18884_s3 + $0xd8] sm:$0xff] %vm5399_vm6, %v5479_v22  ;;  %v14009_v23 = vpop.f32.mrb[1].mxu0 }
0x1355   :  { %v5484_v24 = vpop.f32.mrb[2].mxu0 }
0x1356   :  { %12120 = vst.msk [vmem:[%s18884_s3 + $0xe0] sm:$0xff] %vm5399_vm6, %v5484_v24  ;;  %v14012_v25 = vpop.f32.mrb[3].mxu0 }
0x1359   :  { %v5489_v26 = vpop.f32.mrb[0].mxu1 }
0x135a   :  { %12121 = vst.msk [vmem:[%s18884_s3 + $0xe8] sm:$0x1] %vm5496_vm7, %v5489_v26  ;;  %v14015_v27 = vpop.f32.mrb[1].mxu1 }
0x135d   :  { %v5738_v28 = vpop.f32.mrb[4].mxu0 }
0x135e   :  { %12143 = vst.msk [vmem:[%s18884_s3 + $0x108] sm:$0xff] %vm5399_vm6, %v5738_v28  ;;  %v14039_v29 = vpop.f32.mrb[5].mxu0 }
0x135f   :  { %v5609_v30 = vpop.f32.mrb[2].mxu1 }
0x1360   :  { %12131 = vst.msk [vmem:[%s18884_s3 + $0xf0] sm:$0xff] %vm5399_vm6, %v5609_v30  ;;  %v14024_v31 = vpop.f32.mrb[3].mxu1 }
0x1361   :  { %v5743_v32 = vpop.f32.mrb[6].mxu0 }
0x1362   :  { %12144 = vst.msk [vmem:[%s18884_s3 + $0x110] sm:$0xff] %vm5399_vm6, %v5743_v32  ;;  %v14042_v33 = vpop.f32.mrb[7].mxu0 }
0x1363   :  { %v5614_v34 = vpop.f32.mrb[4].mxu1 }
0x1364   :  { %12132 = vst.msk [vmem:[%s18884_s3 + $0xf8] sm:$0xff] %vm5399_vm6, %v5614_v34  ;;  %v14027_v35 = vpop.f32.mrb[5].mxu1 }
0x1365   :  { %v5748_v36 = vpop.f32.mrb[8].mxu0 }
0x1366   :  { %12145 = vst.msk [vmem:[%s18884_s3 + $0x118] sm:$0x1] %vm5496_vm7, %v5748_v36  ;;  %v14045_v37 = vpop.f32.mrb[9].mxu0 }
0x1367   :  { %v5619_v38 = vpop.f32.mrb[6].mxu1 }
0x1368   :  { %12133 = vst.msk [vmem:[%s18884_s3 + $0x100] sm:$0x1] %vm5496_vm7, %v5619_v38  ;;  %v14030_v39 = vpop.f32.mrb[7].mxu1 }
0x1369 PF:  { %p12146_p7 = scmp.ne.s32.totalorder %s15373_s23, 0 }
0x136a   :  { %v12147_v40 = vld [vmem:[%s18882_s1 + $0x120] sm:$0xff] (!%p12146_p7)  ;;  %vm5771_vm8 = vcmask (!%p12146_p7), 138240   ;;  %v12148_v41 = vld [vmem:[%s18882_s1 + $0x128] sm:$0xff] (!%p12146_p7)  ;;  %v12149_v42 = vld [vmem:[%s18882_s1 + $0x130] sm:$0x1] (!%p12146_p7)  ;;  %vm5774_vm9 = vcmask (!%p12146_p7), 131072  }
0x136b   :  { %5759 = sbr.rel (%p12146_p7) target bundleno = 4978 (0x1372), region = 77  ;;  %12156 = vst.msk [vmem:[%s18884_s3 + $0x120] sm:$0xff] (!%p12146_p7), %vm5771_vm8, %v12147_v40  ;;  %12157 = vst.msk [vmem:[%s18884_s3 + $0x128] sm:$0xff] (!%p12146_p7), %vm5771_vm8, %v12148_v41  ;;  %v12150_v43 = vld [vmem:[%s18882_s1 + $0x138] sm:$0xff] (!%p12146_p7)  ;;  %v12151_v44 = vld [vmem:[%s18882_s1 + $0x140] sm:$0xff] (!%p12146_p7) }
0x136c   :  { %12158 = vst.msk [vmem:[%s18884_s3 + $0x130] sm:$0x1] (!%p12146_p7), %vm5774_vm9, %v12149_v42  ;;  %v12152_v45 = vld [vmem:[%s18882_s1 + $0x148] sm:$0x1] (!%p12146_p7)  ;;  %v12153_v46 = vld [vmem:[%s18882_s1 + $0x150] sm:$0xff] (!%p12146_p7)  ;;  %v12154_v47 = vld [vmem:[%s18882_s1 + $0x158] sm:$0xff] (!%p12146_p7) }
0x136d   :  { %12159 = vst.msk [vmem:[%s18884_s3 + $0x138] sm:$0xff] (!%p12146_p7), %vm5771_vm8, %v12150_v43  ;;  %12160 = vst.msk [vmem:[%s18884_s3 + $0x140] sm:$0xff] (!%p12146_p7), %vm5771_vm8, %v12151_v44  ;;  %v12155_v48 = vld [vmem:[%s18882_s1 + $0x160] sm:$0x1] (!%p12146_p7) }
0x136e   :  { %12161 = vst.msk [vmem:[%s18884_s3 + $0x148] sm:$0x1] (!%p12146_p7), %vm5774_vm9, %v12152_v45  ;;  %12164 = vst.msk [vmem:[%s18884_s3 + $0x160] sm:$0x1] (!%p12146_p7), %vm5774_vm9, %v12155_v48 }
0x136f   :  { %12162 = vst.msk [vmem:[%s18884_s3 + $0x150] sm:$0xff] (!%p12146_p7), %vm5771_vm8, %v12153_v46  ;;  %12163 = vst.msk [vmem:[%s18884_s3 + $0x158] sm:$0xff] (!%p12146_p7), %vm5771_vm8, %v12154_v47 }
0x1372 PF:  { %p12165_p8 = scmp.ne.s32.totalorder %s15373_s23, 1 }
0x1373   :  { %v5786_v49 = vlaneseq (!%p12165_p8)  ;;  %v15285_v50 = vmov (!%p12165_p8), 0.0|0.0   ;;  %vm15286_vm10 = vmmov (!%p12165_p8), 0   ;;  %v15287_v53 = vmov (!%p12165_p8), 0.0   ;;  %v12169_v62 = vld [vmem:[%s18882_s1 + $0x120] sm:$0xff] (!%p12165_p8)  ;;  %v12171_v63 = vld [vmem:[%s18882_s1 + $0x130] sm:$0x1] (!%p12165_p8) }
0x1374   :  { %5785 = sbr.rel (%p12165_p8) target bundleno = 5356 (0x14ec), region = 81  ;;  %14910 = vmatprep.subr.bf16.mxu0 (!%p12165_p8), %v15285_v50  ;;  %15086 = vmatprep.subr.bf16.mxu1 (!%p12165_p8), %v15285_v50  ;;  %v15288_v60 = vmov (!%p12165_p8), 1.0|1.0   ;;  %vm5818_vm15 = vcmask (!%p12165_p8), 1040384   ;;  %vm5808_vm0 = vcmask (!%p12165_p8), 138240   ;;  %v12170_v0 = vld [vmem:[%s18882_s1 + $0x128] sm:$0xff] (!%p12165_p8) }
0x1375   :  { %v5787_v51 = vshrl.u32 (!%p12165_p8), %v5786_v49, 7  ;;  %v5791_v52 = vand.u32 (!%p12165_p8), 127, %v5786_v49  ;;  %14052 = vmatprep.mubr.msk.f32.mxu0 (!%p12165_p8), %vm15286_vm10, %v15287_v53  ;;  %14058 = vmatprep.mubr.msk.f32.mxu1 (!%p12165_p8), %vm15286_vm10, %v15287_v53  ;;  %v12181_v1 = vld [vmem:[%s18882_s1 + $0x138] sm:$0xff] (!%p12165_p8)  ;;  %v12193_v2 = vld [vmem:[%s18882_s1 + $0x150] sm:$0xff] (!%p12165_p8)  ;;  %v12182_v3 = vld [vmem:[%s18882_s1 + $0x140] sm:$0xff] (!%p12165_p8)  ;;  %vm5937_vm1 = vcmask (!%p12165_p8), 131072  }
0x1376   :  { %v12194_v4 = vld [vmem:[%s18882_s1 + $0x158] sm:$0xff] (!%p12165_p8)  ;;  %v12183_v5 = vld [vmem:[%s18882_s1 + $0x148] sm:$0x1] (!%p12165_p8)  ;;  %v12195_v6 = vld [vmem:[%s18882_s1 + $0x160] sm:$0x1] (!%p12165_p8) }
0x1377   :  { %v5788_v54 = vadd.s32 (!%p12165_p8), 8, %v5787_v51  ;;  %v5792_v55 = vadd.s32 (!%p12165_p8), %v5791_v52, %v5787_v51  ;;  %v5789_v56 = vadd.s32 (!%p12165_p8), 16, %v5787_v51 }
0x1379   :  { %v5793_v57 = vadd.s32 (!%p12165_p8), %v5791_v52, %v5788_v54  ;;  %vm5795_vm11 = vcmp.eq.s32.totalorder (!%p12165_p8), %v5792_v55, 16  ;;  %v5794_v58 = vadd.s32 (!%p12165_p8), %v5791_v52, %v5789_v56 }
0x137b   :  { %vm5796_vm12 = vcmp.eq.s32.totalorder %v5793_v57, 16  ;;  %vm5797_vm13 = vcmp.eq.s32.totalorder %v5794_v58, 16 }
0x137c   :  { %vm17181_vm14 = vmpackc.low %vm5796_vm12, %vm5795_vm11  ;;  %v12168_v61 = vsel %vm5797_vm13, 1.0, %v15287_v53 }
0x137d   :  { %14912 = vmatpush3.bf16.msk.msra.mxu0 %vm17181_vm14, %v15288_v60  ;;  %15088 = vmatpush3.bf16.msk.msra.mxu1 %vm17181_vm14, %v15288_v60 }
0x137e   :  { %14050 = vmatprep.subr.mxu0 %v15287_v53  ;;  %15087 = vmatprep.subr.mxu1 %v15287_v53 }
0x1381   :  { %14051 = vmatpush3.msk.msra.mxu0 %vm5818_vm15, %v12168_v61  ;;  %15089 = vmatpush3.msk.msra.mxu1 %vm5818_vm15, %v12168_v61 }
0x1382   :  { %14053 = vmatmul.mubr.msk.f32.vlgmr.msra.gmra.mrb[0].mxu0 %vm5808_vm0, %v12169_v62  ;;  %14916 = vmatprep.subr.bf16.mxu0 %v15285_v50 }
0x1383   :  { %14055 = vmatprep.mubr.msk.f32.mxu0 %vm15286_vm10, %v15287_v53  ;;  %14918 = vmatpush3.bf16.msk.msra.mxu0 %vm17181_vm14, %v15288_v60 }
0x1384   :  { %14059 = vmatmul.mubr.msk.f32.vlgmr.msra.gmra.mrb[0].mxu1 %vm5808_vm0, %v12171_v63  ;;  %14913 = vmatprep.subr.bf16.mxu1 %v15285_v50 }
0x1385   :  { %14915 = vmatpush3.bf16.msk.msra.mxu1 %vm17181_vm14, %v15288_v60  ;;  %14080 = vmatprep.subr.mxu0 %v15287_v53 }
0x1386   :  { %14056 = vmatmul.mubr.msk.f32.gmra.mrb[2].mxu0 %vm5808_vm0, %v12170_v0  ;;  %14065 = vmatprep.subr.mxu1 %v15287_v53 }
0x1387   :  { %14081 = vmatpush3.msk.msra.mxu0 %vm5818_vm15, %v12168_v61  ;;  %14067 = vmatprep.mubr.msk.f32.mxu1 %vm15286_vm10, %v15287_v53 }
0x1388   :  { %14082 = vmatprep.mubr.msk.f32.mxu0 %vm15286_vm10, %v15287_v53 }
0x1389   :  { %14066 = vmatpush3.msk.msra.mxu1 %vm5818_vm15, %v12168_v61 }
0x138a   :  { %14068 = vmatmul.mubr.msk.f32.vlgmr.msra.gmra.mrb[2].mxu1 %vm5808_vm0, %v12181_v1  ;;  %14083 = vmatmul.mubr.msk.f32.vlgmr.msra.gmra.mrb[4].mxu0 %vm5808_vm0, %v12193_v2 }
0x138b   :  { %14070 = vmatprep.mubr.msk.f32.mxu1 %vm15286_vm10, %v15287_v53  ;;  %14085 = vmatprep.mubr.msk.f32.mxu0 %vm15286_vm10, %v15287_v53 }
0x138e   :  { %14071 = vmatmul.mubr.msk.f32.gmra.mrb[4].mxu1 %vm5808_vm0, %v12182_v3  ;;  %14086 = vmatmul.mubr.msk.f32.gmra.mrb[6].mxu0 %vm5808_vm0, %v12194_v4 }
0x138f   :  { %14073 = vmatprep.mubr.msk.f32.mxu1 %vm15286_vm10, %v15287_v53  ;;  %14088 = vmatprep.mubr.msk.f32.mxu0 %vm15286_vm10, %v15287_v53 }
0x1392   :  { %14074 = vmatmul.mubr.msk.f32.gmra.mrb[6].mxu1 %vm5808_vm0, %v12183_v5  ;;  %14089 = vmatmul.mubr.msk.f32.gmra.mrb[8].mxu0 %vm5808_vm0, %v12195_v6 }
0x1455   :  { %v5888_v7 = vpop.f32.mrb[0].mxu0 }
0x1456   :  { %5902 = vxpose.xlu0.b32.start [1/3] (short) (narrow) %v5888_v7, 24  ;;  %v14054_v8 = vpop.f32.mrb[1].mxu0 }
0x1457   :  { %v5898_v9 = vpop.f32.mrb[0].mxu1 }
0x1458   :  { %v14060_v10 = vpop.f32.mrb[1].mxu1 }
0x1459   :  { %v5893_v11 = vpop.f32.mrb[2].mxu0 }
0x145a   :  { %5903 = vxpose.xlu0.b32.cont [2/3] (short) (narrow) %v5893_v11, 24  ;;  %v14057_v12 = vpop.f32.mrb[3].mxu0 }
0x145d   :  { %v6018_v13 = vpop.f32.mrb[2].mxu1  ;;  %v6147_v14 = vpop.f32.mrb[4].mxu0 }
0x145e   :  { %5904 = vxpose.xlu0.b32.end [3/3] (short) (narrow) %v5898_v9, 24  ;;  %v14069_v15 = vpop.f32.mrb[3].mxu1  ;;  %v14084_v16 = vpop.f32.mrb[5].mxu0  ;;  %6032 = vxpose.xlu1.b32.start [1/3] (short) (narrow) %v6018_v13, 24 }
0x1461   :  { %v6023_v17 = vpop.f32.mrb[4].mxu1  ;;  %v6152_v18 = vpop.f32.mrb[6].mxu0 }
0x1462   :  { %6161 = vxpose.xlu0.b32.start [1/3] (short) (narrow) %v6147_v14, 24  ;;  %v14072_v19 = vpop.f32.mrb[5].mxu1  ;;  %v14087_v20 = vpop.f32.mrb[7].mxu0  ;;  %6033 = vxpose.xlu1.b32.cont [2/3] (short) (narrow) %v6023_v17, 24 }
0x1465   :  { %v6028_v21 = vpop.f32.mrb[6].mxu1  ;;  %v6157_v22 = vpop.f32.mrb[8].mxu0 }
0x1466   :  { %6162 = vxpose.xlu0.b32.cont [2/3] (short) (narrow) %v6152_v18, 24  ;;  %v14075_v23 = vpop.f32.mrb[7].mxu1  ;;  %v14090_v24 = vpop.f32.mrb[9].mxu0  ;;  %6034 = vxpose.xlu1.b32.end [3/3] (short) (narrow) %v6028_v21, 24 }
0x146a   :  { %6163 = vxpose.xlu0.b32.end [3/3] (short) (narrow) %v6157_v22, 24 }
0x14d6   :  { %v5918_v25 = vpop.trf.xlu0 }
0x14d7   :  { %12178 = vst.msk [vmem:[%s18884_s3 + $0x120] sm:$0xff] %vm5808_vm0, %v5918_v25 }
0x14da   :  { %v5919_v26 = vpop.trf.xlu0 }
0x14db   :  { %12179 = vst.msk [vmem:[%s18884_s3 + $0x128] sm:$0xff] %vm5808_vm0, %v5919_v26 }
0x14de   :  { %v5920_v27 = vpop.trf.xlu0  ;;  %v6048_v28 = vpop.trf.xlu1 }
0x14df   :  { %12180 = vst.msk [vmem:[%s18884_s3 + $0x130] sm:$0x1] %vm5937_vm1, %v5920_v27 }
0x14e0   :  { %12190 = vst.msk [vmem:[%s18884_s3 + $0x138] sm:$0xff] %vm5808_vm0, %v6048_v28 }
0x14e2   :  { %v6177_v29 = vpop.trf.xlu0  ;;  %v6049_v30 = vpop.trf.xlu1 }
0x14e3   :  { %12202 = vst.msk [vmem:[%s18884_s3 + $0x150] sm:$0xff] %vm5808_vm0, %v6177_v29  ;;  %12191 = vst.msk [vmem:[%s18884_s3 + $0x140] sm:$0xff] %vm5808_vm0, %v6049_v30 }
0x14e6   :  { %v6178_v31 = vpop.trf.xlu0  ;;  %v6050_v32 = vpop.trf.xlu1 }
0x14e7   :  { %12203 = vst.msk [vmem:[%s18884_s3 + $0x158] sm:$0xff] %vm5808_vm0, %v6178_v31 }
0x14e8   :  { %12192 = vst.msk [vmem:[%s18884_s3 + $0x148] sm:$0x1] %vm5937_vm1, %v6050_v32 }
0x14ea   :  { %v6179_v33 = vpop.trf.xlu0 }
0x14eb   :  { %12204 = vst.msk [vmem:[%s18884_s3 + $0x160] sm:$0x1] %vm5937_vm1, %v6179_v33 }
0x14ec PF:  { %p12205_p9 = scmp.ne.s32.totalorder %s15373_s23, 2 }
0x14ed   :  { %v6201_v34 = vlaneseq (!%p12205_p9)  ;;  %v15289_v35 = vmov (!%p12205_p9), 0.0|0.0   ;;  %vm15290_vm2 = vmmov (!%p12205_p9), 0   ;;  %v15291_v38 = vmov (!%p12205_p9), 0.0   ;;  %v12209_v47 = vld [vmem:[%s18882_s1 + $0x120] sm:$0xff] (!%p12205_p9)  ;;  %v12210_v48 = vld [vmem:[%s18882_s1 + $0x128] sm:$0xff] (!%p12205_p9)  ;;  %v12225_v50 = vld [vmem:[%s18882_s1 + $0x138] sm:$0xff] (!%p12205_p9) }
0x14ee   :  { %6200 = sbr.rel (%p12205_p9) target bundleno = 5840 (0x16d0), region = 85  ;;  %14919 = vmatprep.subr.bf16.mxu0 (!%p12205_p9), %v15289_v35  ;;  %14922 = vmatprep.subr.bf16.mxu1 (!%p12205_p9), %v15289_v35  ;;  %v15292_v45 = vmov (!%p12205_p9), 1.0|1.0   ;;  %vm6233_vm7 = vcmask (!%p12205_p9), 1040384   ;;  %vm6223_vm8 = vcmask (!%p12205_p9), 138240   ;;  %v12226_v51 = vld [vmem:[%s18882_s1 + $0x140] sm:$0xff] (!%p12205_p9) }
0x14ef   :  { %v6202_v36 = vshrl.u32 (!%p12205_p9), %v6201_v34, 7  ;;  %v6206_v37 = vand.u32 (!%p12205_p9), 127, %v6201_v34  ;;  %14097 = vmatprep.mubr.msk.f32.mxu0 (!%p12205_p9), %vm15290_vm2, %v15291_v38  ;;  %14112 = vmatprep.mubr.msk.f32.mxu1 (!%p12205_p9), %vm15290_vm2, %v15291_v38  ;;  %v12211_v49 = vld [vmem:[%s18882_s1 + $0x130] sm:$0x1] (!%p12205_p9)  ;;  %v12227_v52 = vld [vmem:[%s18882_s1 + $0x148] sm:$0x1] (!%p12205_p9) }
0x14f0   :  { %v12241_v53 = vld [vmem:[%s18882_s1 + $0x150] sm:$0xff] (!%p12205_p9)  ;;  %v12242_v54 = vld [vmem:[%s18882_s1 + $0x158] sm:$0xff] (!%p12205_p9)  ;;  %v12243_v55 = vld [vmem:[%s18882_s1 + $0x160] sm:$0x1] (!%p12205_p9)  ;;  %vm6411_vm9 = vcmask (!%p12205_p9), 131072  }
0x14f1   :  { %v6203_v39 = vadd.s32 (!%p12205_p9), 8, %v6202_v36  ;;  %v6207_v40 = vadd.s32 (!%p12205_p9), %v6206_v37, %v6202_v36  ;;  %v6204_v41 = vadd.s32 (!%p12205_p9), 16, %v6202_v36 }
0x14f3   :  { %v17280_v42 = vadd.s32 (!%p12205_p9), %v6206_v37, %v6203_v39  ;;  %vm6210_vm3 = vcmp.eq.s32.totalorder (!%p12205_p9), %v6207_v40, 16  ;;  %v6209_v43 = vadd.s32 (!%p12205_p9), %v6206_v37, %v6204_v41 }
0x14f4   :  { %v12206_v63 = vsel (!%p12205_p9), %vm6210_vm3, 1.0, %v15291_v38 }
0x14f5   :  { %vm6211_vm4 = vcmp.eq.s32.totalorder %v17280_v42, 16  ;;  %vm6212_vm5 = vcmp.eq.s32.totalorder %v6209_v43, 16 }
0x14f6   :  { %vm17286_vm6 = vmpackc.low %vm6211_vm4, %vm6210_vm3  ;;  %v17294_v46 = vsel %vm6212_vm5, 1.0, %v15291_v38  ;;  %v12207_v2 = vsel %vm6211_vm4, 1.0, %v15291_v38 }
0x14f7   :  { %14921 = vmatpush3.bf16.msk.msra.mxu0 %vm17286_vm6, %v15292_v45 }
0x14f8   :  { %14095 = vmatprep.subr.mxu0 %v15291_v38 }
0x14fb   :  { %14096 = vmatpush3.msk.msra.mxu0 %vm6233_vm7, %v17294_v46 }
0x14fc   :  { %14098 = vmatmul.mubr.msk.f32.vlgmr.msra.gmra.mrb[0].mxu0 %vm6223_vm8, %v12209_v47  ;;  %14925 = vmatprep.subr.bf16.mxu0 %v15289_v35 }
0x14fd   :  { %14100 = vmatprep.mubr.msk.f32.mxu0 %vm15290_vm2, %v15291_v38  ;;  %14927 = vmatpush3.bf16.msk.msra.mxu0 %vm17286_vm6, %v15292_v45 }
0x14fe   :  { %14125 = vmatprep.subr.mxu0 %v15291_v38 }
0x1500   :  { %14101 = vmatmul.mubr.msk.f32.gmra.mrb[2].mxu0 %vm6223_vm8, %v12210_v48 }
0x1501   :  { %14103 = vmatprep.mubr.msk.f32.mxu0 %vm15290_vm2, %v15291_v38  ;;  %14126 = vmatpush3.msk.msra.mxu0 %vm6233_vm7, %v17294_v46 }
0x1502   :  { %14931 = vmatprep.subr.bf16.mxu0 %v15289_v35 }
0x1504   :  { %14104 = vmatmul.mubr.msk.f32.gmra.mrb[4].mxu0 %vm6223_vm8, %v12211_v49 }
0x1505   :  { %14127 = vmatprep.mubr.msk.f32.mxu0 %vm15290_vm2, %v15291_v38 }
0x1508   :  { %14128 = vmatmul.mubr.msk.f32.vlgmr.msra.gmra.mrb[6].mxu0 %vm6223_vm8, %v12225_v50 }
0x1509   :  { %14130 = vmatprep.mubr.msk.f32.mxu0 %vm15290_vm2, %v15291_v38  ;;  %14933 = vmatpush3.bf16.msk.msra.mxu0 %vm17286_vm6, %v15292_v45 }
0x150a   :  { %14155 = vmatprep.subr.mxu0 %v15291_v38 }
0x150c   :  { %14131 = vmatmul.mubr.msk.f32.gmra.mrb[8].mxu0 %vm6223_vm8, %v12226_v51 }
0x150d   :  { %14133 = vmatprep.mubr.msk.f32.mxu0 %vm15290_vm2, %v15291_v38  ;;  %14156 = vmatpush3.msk.msra.mxu0 %vm6233_vm7, %v17294_v46 }
0x1510   :  { %14134 = vmatmul.mubr.msk.f32.gmra.mrb[10].mxu0 %vm6223_vm8, %v12227_v52 }
0x1511   :  { %14157 = vmatprep.mubr.msk.f32.mxu0 %vm15290_vm2, %v15291_v38 }
0x1514   :  { %14158 = vmatmul.mubr.msk.f32.vlgmr.msra.gmra.mrb[12].mxu0 %vm6223_vm8, %v12241_v53 }
0x1515   :  { %14160 = vmatprep.mubr.msk.f32.mxu0 %vm15290_vm2, %v15291_v38 }
0x1518   :  { %14161 = vmatmul.mubr.msk.f32.gmra.mrb[14].mxu0 %vm6223_vm8, %v12242_v54 }
0x1519   :  { %14163 = vmatprep.mubr.msk.f32.mxu0 %vm15290_vm2, %v15291_v38 }
0x151c   :  { %14164 = vmatmul.mubr.msk.f32.gmra.mrb[16].mxu0 %vm6223_vm8, %v12243_v55 }
0x15cf   :  { %v6303_v56 = vpop.f32.mrb[0].mxu0 }
0x15d0   :  { %v14099_v57 = vpop.f32.mrb[1].mxu0 }
0x15d3   :  { %v6308_v58 = vpop.f32.mrb[2].mxu0 }
0x15d4   :  { %v14923_v59 = vpack.c.bf16 %v6308_v58, %v6303_v56  ;;  %v14102_v60 = vpop.f32.mrb[3].mxu0 }
0x15d6   :  { %14924 = vmatpush3.bf16.msra.mxu1 %v14923_v59 }
0x15d7   :  { %v6313_v61 = vpop.f32.mrb[4].mxu0  ;;  %14110 = vmatprep.subr.mxu1 %v15291_v38 }
0x15d8   :  { %v14105_v62 = vpop.f32.mrb[5].mxu0 }
0x15da   :  { %14111 = vmatpush3.msk.msra.mxu1 %vm6233_vm7, %v6313_v61 }
0x15db   :  { %v6492_v0 = vpop.f32.mrb[6].mxu0  ;;  %14113 = vmatmul.mubr.msk.f32.vlgmr.msra.gmra.mrb[0].mxu1 %vm6223_vm8, %v12206_v63  ;;  %14928 = vmatprep.subr.bf16.mxu1 %v15289_v35 }
0x15dc   :  { %v14129_v1 = vpop.f32.mrb[7].mxu0  ;;  %14115 = vmatprep.mubr.msk.f32.mxu1 %vm15290_vm2, %v15291_v38 }
0x15df   :  { %v6497_v3 = vpop.f32.mrb[8].mxu0  ;;  %14116 = vmatmul.mubr.msk.f32.gmra.mrb[2].mxu1 %vm6223_vm8, %v12207_v2 }
0x15e0   :  { %v14929_v4 = vpack.c.bf16 %v6497_v3, %v6492_v0  ;;  %v14132_v5 = vpop.f32.mrb[9].mxu0  ;;  %14118 = vmatprep.mubr.msk.f32.mxu1 %vm15290_vm2, %v15291_v38 }
0x15e2   :  { %14930 = vmatpush3.bf16.msra.mxu1 %v14929_v4 }
0x15e3   :  { %v6502_v6 = vpop.f32.mrb[10].mxu0  ;;  %14140 = vmatprep.subr.mxu1 %v15291_v38  ;;  %14119 = vmatmul.mubr.msk.f32.gmra.mrb[4].mxu1 %vm6223_vm8, %v17294_v46 }
0x15e4   :  { %v14135_v7 = vpop.f32.mrb[11].mxu0  ;;  %14142 = vmatprep.mubr.msk.f32.mxu1 %vm15290_vm2, %v15291_v38 }
0x15e6   :  { %14141 = vmatpush3.msk.msra.mxu1 %vm6233_vm7, %v6502_v6 }
0x15e7   :  { %v6672_v8 = vpop.f32.mrb[12].mxu0  ;;  %14143 = vmatmul.mubr.msk.f32.vlgmr.msra.gmra.mrb[6].mxu1 %vm6223_vm8, %v12206_v63  ;;  %14934 = vmatprep.subr.bf16.mxu1 %v15289_v35 }
0x15e8   :  { %v14159_v9 = vpop.f32.mrb[13].mxu0  ;;  %14145 = vmatprep.mubr.msk.f32.mxu1 %vm15290_vm2, %v15291_v38 }
0x15eb   :  { %v6677_v10 = vpop.f32.mrb[14].mxu0  ;;  %14146 = vmatmul.mubr.msk.f32.gmra.mrb[8].mxu1 %vm6223_vm8, %v12207_v2 }
0x15ec   :  { %v14935_v11 = vpack.c.bf16 %v6677_v10, %v6672_v8  ;;  %v14162_v12 = vpop.f32.mrb[15].mxu0  ;;  %14148 = vmatprep.mubr.msk.f32.mxu1 %vm15290_vm2, %v15291_v38 }
0x15ee   :  { %14936 = vmatpush3.bf16.msra.mxu1 %v14935_v11 }
0x15ef   :  { %v6682_v13 = vpop.f32.mrb[16].mxu0  ;;  %14170 = vmatprep.subr.mxu1 %v15291_v38  ;;  %14149 = vmatmul.mubr.msk.f32.gmra.mrb[10].mxu1 %vm6223_vm8, %v17294_v46 }
0x15f0   :  { %v14165_v14 = vpop.f32.mrb[17].mxu0  ;;  %14172 = vmatprep.mubr.msk.f32.mxu1 %vm15290_vm2, %v15291_v38 }
0x15f2   :  { %14171 = vmatpush3.msk.msra.mxu1 %vm6233_vm7, %v6682_v13 }
0x15f3   :  { %14173 = vmatmul.mubr.msk.f32.vlgmr.msra.gmra.mrb[12].mxu1 %vm6223_vm8, %v12206_v63 }
0x15f4   :  { %14175 = vmatprep.mubr.msk.f32.mxu1 %vm15290_vm2, %v15291_v38 }
0x15f7   :  { %14176 = vmatmul.mubr.msk.f32.gmra.mrb[14].mxu1 %vm6223_vm8, %v12207_v2 }
0x15f8   :  { %14178 = vmatprep.mubr.msk.f32.mxu1 %vm15290_vm2, %v15291_v38 }
0x15fb   :  { %14179 = vmatmul.mubr.msk.f32.gmra.mrb[16].mxu1 %vm6223_vm8, %v17294_v46 }
0x16ae   :  { %v6394_v15 = vpop.f32.mrb[0].mxu1 }
0x16af   :  { %12222 = vst.msk [vmem:[%s18884_s3 + $0x120] sm:$0xff] %vm6223_vm8, %v6394_v15  ;;  %v14114_v16 = vpop.f32.mrb[1].mxu1 }
0x16b2   :  { %v6399_v17 = vpop.f32.mrb[2].mxu1 }
0x16b3   :  { %12223 = vst.msk [vmem:[%s18884_s3 + $0x128] sm:$0xff] %vm6223_vm8, %v6399_v17  ;;  %v14117_v18 = vpop.f32.mrb[3].mxu1 }
0x16b6   :  { %v6404_v19 = vpop.f32.mrb[4].mxu1 }
0x16b7   :  { %12224 = vst.msk [vmem:[%s18884_s3 + $0x130] sm:$0x1] %vm6411_vm9, %v6404_v19  ;;  %v14120_v20 = vpop.f32.mrb[5].mxu1 }
0x16ba   :  { %v6575_v21 = vpop.f32.mrb[6].mxu1 }
0x16bb   :  { %12238 = vst.msk [vmem:[%s18884_s3 + $0x138] sm:$0xff] %vm6223_vm8, %v6575_v21  ;;  %v14144_v22 = vpop.f32.mrb[7].mxu1 }
0x16be   :  { %v6580_v23 = vpop.f32.mrb[8].mxu1 }
0x16bf   :  { %12239 = vst.msk [vmem:[%s18884_s3 + $0x140] sm:$0xff] %vm6223_vm8, %v6580_v23  ;;  %v14147_v24 = vpop.f32.mrb[9].mxu1 }
0x16c2   :  { %v6585_v25 = vpop.f32.mrb[10].mxu1 }
0x16c3   :  { %12240 = vst.msk [vmem:[%s18884_s3 + $0x148] sm:$0x1] %vm6411_vm9, %v6585_v25  ;;  %v14150_v26 = vpop.f32.mrb[11].mxu1 }
0x16c6   :  { %v6755_v27 = vpop.f32.mrb[12].mxu1 }
0x16c7   :  { %12254 = vst.msk [vmem:[%s18884_s3 + $0x150] sm:$0xff] %vm6223_vm8, %v6755_v27  ;;  %v14174_v28 = vpop.f32.mrb[13].mxu1 }
0x16ca   :  { %v6760_v29 = vpop.f32.mrb[14].mxu1 }
0x16cb   :  { %12255 = vst.msk [vmem:[%s18884_s3 + $0x158] sm:$0xff] %vm6223_vm8, %v6760_v29  ;;  %v14177_v30 = vpop.f32.mrb[15].mxu1 }
0x16ce   :  { %v6765_v31 = vpop.f32.mrb[16].mxu1 }
0x16cf   :  { %12256 = vst.msk [vmem:[%s18884_s3 + $0x160] sm:$0x1] %vm6411_vm9, %v6765_v31  ;;  %v14180_v32 = vpop.f32.mrb[17].mxu1 }
0x16d0 PF:  { %p12257_p10 = scmp.ne.s32.totalorder %s15373_s23, 3 }
0x16d1   :  { %v12261_v33 = vld [vmem:[%s18882_s1 + $0x120] sm:$0xff] (!%p12257_p10)  ;;  %v6777_v34 = vlaneseq (!%p12257_p10)  ;;  %v12273_v35 = vld [vmem:[%s18882_s1 + $0x138] sm:$0xff] (!%p12257_p10)  ;;  %v15293_v36 = vmov (!%p12257_p10), 0.0|0.0   ;;  %v12262_v37 = vld [vmem:[%s18882_s1 + $0x128] sm:$0xff] (!%p12257_p10)  ;;  %vm15294_vm10 = vmmov (!%p12257_p10), 0   ;;  %v15295_v41 = vmov (!%p12257_p10), 0.0  }
0x16d2   :  { %6776 = sbr.rel (%p12257_p10) target bundleno = 6206 (0x183e), region = 89  ;;  %6799 = vxpose.xlu0.b32.start [1/3] (short) (narrow) (!%p12257_p10), %v12261_v33, 24  ;;  %14937 = vmatprep.subr.bf16.mxu0 (!%p12257_p10), %v15293_v36  ;;  %v12274_v38 = vld [vmem:[%s18882_s1 + $0x140] sm:$0xff] (!%p12257_p10)  ;;  %v12263_v45 = vld [vmem:[%s18882_s1 + $0x130] sm:$0x1] (!%p12257_p10)  ;;  %vm6841_vm15 = vcmask (!%p12257_p10), 1040384  }
0x16d3   :  { %6934 = vxpose.xlu1.b32.start [1/3] (short) (narrow) (!%p12257_p10), %v12273_v35, 24  ;;  %15090 = vmatprep.subr.bf16.mxu1 (!%p12257_p10), %v15293_v36  ;;  %v6778_v39 = vshrl.u32 (!%p12257_p10), %v6777_v34, 7  ;;  %v6782_v40 = vand.u32 (!%p12257_p10), 127, %v6777_v34  ;;  %v12275_v46 = vld [vmem:[%s18882_s1 + $0x148] sm:$0x1] (!%p12257_p10)  ;;  %v12285_v49 = vld [vmem:[%s18882_s1 + $0x150] sm:$0xff] (!%p12257_p10) }
0x16d4   :  { %14187 = vmatprep.mubr.msk.f32.mxu0 (!%p12257_p10), %vm15294_vm10, %v15295_v41  ;;  %14193 = vmatprep.mubr.msk.f32.mxu1 (!%p12257_p10), %vm15294_vm10, %v15295_v41  ;;  %v15296_v51 = vmov (!%p12257_p10), 1.0|1.0   ;;  %v12286_v53 = vld [vmem:[%s18882_s1 + $0x158] sm:$0xff] (!%p12257_p10)  ;;  %v12287_v54 = vld [vmem:[%s18882_s1 + $0x160] sm:$0x1] (!%p12257_p10)  ;;  %vm6831_vm0 = vcmask (!%p12257_p10), 138240  }
0x16d5   :  { %v6779_v42 = vadd.s32 (!%p12257_p10), 8, %v6778_v39  ;;  %v6783_v43 = vadd.s32 (!%p12257_p10), %v6782_v40, %v6778_v39  ;;  %v6780_v44 = vadd.s32 (!%p12257_p10), 16, %v6778_v39  ;;  %vm6928_vm1 = vcmask (!%p12257_p10), 131072  }
0x16d6   :  { %6800 = vxpose.xlu0.b32.cont [2/3] (short) (narrow) (!%p12257_p10), %v12262_v37, 24 }
0x16d7   :  { %6935 = vxpose.xlu1.b32.cont [2/3] (short) (narrow) (!%p12257_p10), %v12274_v38, 24  ;;  %v6784_v47 = vadd.s32 (!%p12257_p10), %v6782_v40, %v6779_v42  ;;  %vm6786_vm11 = vcmp.eq.s32.totalorder (!%p12257_p10), %v6783_v43, 16  ;;  %v6785_v48 = vadd.s32 (!%p12257_p10), %v6782_v40, %v6780_v44 }
0x16d9   :  { %vm6787_vm12 = vcmp.eq.s32.totalorder %v6784_v47, 16  ;;  %vm6788_vm13 = vcmp.eq.s32.totalorder %v6785_v48, 16 }
0x16da   :  { %6801 = vxpose.xlu0.b32.end [3/3] (short) (narrow) %v12263_v45, 24  ;;  %vm17465_vm14 = vmpackc.low %vm6787_vm12, %vm6786_vm11  ;;  %v12260_v52 = vsel %vm6788_vm13, 1.0, %v15295_v41 }
0x16db   :  { %6936 = vxpose.xlu1.b32.end [3/3] (short) (narrow) %v12275_v46, 24  ;;  %14939 = vmatpush3.bf16.msk.msra.mxu0 %vm17465_vm14, %v15296_v51 }
0x16dc   :  { %15092 = vmatpush3.bf16.msk.msra.mxu1 %vm17465_vm14, %v15296_v51  ;;  %14185 = vmatprep.subr.mxu0 %v15295_v41 }
0x16dd   :  { %15091 = vmatprep.subr.mxu1 %v15295_v41 }
0x16de   :  { %7063 = vxpose.xlu0.b32.start [1/3] (short) (narrow) %v12285_v49, 24 }
0x16df   :  { %14186 = vmatpush3.msk.msra.mxu0 %vm6841_vm15, %v12260_v52 }
0x16e0   :  { %15093 = vmatpush3.msk.msra.mxu1 %vm6841_vm15, %v12260_v52  ;;  %14943 = vmatprep.subr.bf16.mxu0 %v15293_v36 }
0x16e1   :  { %14940 = vmatprep.subr.bf16.mxu1 %v15293_v36 }
0x16e2   :  { %7064 = vxpose.xlu0.b32.cont [2/3] (short) (narrow) %v12286_v53, 24 }
0x16e6   :  { %7065 = vxpose.xlu0.b32.end [3/3] (short) (narrow) %v12287_v54, 24 }
0x1752   :  { %v6815_v55 = vpop.trf.xlu0 }
0x1753   :  { %14188 = vmatmul.mubr.msk.f32.vlgmr.msra.gmra.mrb[0].mxu0 %vm6831_vm0, %v6815_v55  ;;  %v6950_v58 = vpop.trf.xlu1 }
0x1754   :  { %14190 = vmatprep.mubr.msk.f32.mxu0 %vm15294_vm10, %v15295_v41  ;;  %14945 = vmatpush3.bf16.msk.msra.mxu0 %vm17465_vm14, %v15296_v51 }
0x1755   :  { %14215 = vmatprep.subr.mxu0 %v15295_v41 }
0x1756   :  { %v6816_v56 = vpop.trf.xlu0 }
0x1757   :  { %14191 = vmatmul.mubr.msk.f32.gmra.mrb[2].mxu0 %vm6831_vm0, %v6816_v56  ;;  %v6951_v60 = vpop.trf.xlu1 }
0x1758   :  { %14216 = vmatpush3.msk.msra.mxu0 %vm6841_vm15, %v12260_v52  ;;  %14217 = vmatprep.mubr.msk.f32.mxu0 %vm15294_vm10, %v15295_v41 }
0x175a   :  { %v6817_v57 = vpop.trf.xlu0 }
0x175b   :  { %14194 = vmatmul.mubr.msk.f32.vlgmr.msra.gmra.mrb[0].mxu1 %vm6831_vm0, %v6817_v57  ;;  %v6952_v62 = vpop.trf.xlu1 }
0x175c   :  { %14942 = vmatpush3.bf16.msk.msra.mxu1 %vm17465_vm14, %v15296_v51  ;;  %14202 = vmatprep.mubr.msk.f32.mxu1 %vm15294_vm10, %v15295_v41 }
0x175d   :  { %14200 = vmatprep.subr.mxu1 %v15295_v41 }
0x175e   :  { %v7079_v59 = vpop.trf.xlu0 }
0x175f   :  { %14218 = vmatmul.mubr.msk.f32.vlgmr.msra.gmra.mrb[4].mxu0 %vm6831_vm0, %v7079_v59 }
0x1760   :  { %14201 = vmatpush3.msk.msra.mxu1 %vm6841_vm15, %v12260_v52  ;;  %14220 = vmatprep.mubr.msk.f32.mxu0 %vm15294_vm10, %v15295_v41 }
0x1761   :  { %14203 = vmatmul.mubr.msk.f32.vlgmr.msra.gmra.mrb[2].mxu1 %vm6831_vm0, %v6950_v58 }
0x1762   :  { %v7080_v61 = vpop.trf.xlu0  ;;  %14205 = vmatprep.mubr.msk.f32.mxu1 %vm15294_vm10, %v15295_v41 }
0x1763   :  { %14221 = vmatmul.mubr.msk.f32.gmra.mrb[6].mxu0 %vm6831_vm0, %v7080_v61 }
0x1764   :  { %14223 = vmatprep.mubr.msk.f32.mxu0 %vm15294_vm10, %v15295_v41 }
0x1765   :  { %14206 = vmatmul.mubr.msk.f32.gmra.mrb[4].mxu1 %vm6831_vm0, %v6951_v60 }
0x1766   :  { %v7081_v63 = vpop.trf.xlu0  ;;  %14208 = vmatprep.mubr.msk.f32.mxu1 %vm15294_vm10, %v15295_v41 }
0x1767   :  { %14224 = vmatmul.mubr.msk.f32.gmra.mrb[8].mxu0 %vm6831_vm0, %v7081_v63 }
0x1769   :  { %14209 = vmatmul.mubr.msk.f32.gmra.mrb[6].mxu1 %vm6831_vm0, %v6952_v62 }
0x1826   :  { %v6911_v0 = vpop.f32.mrb[0].mxu0 }
0x1827   :  { %12270 = vst.msk [vmem:[%s18884_s3 + $0x120] sm:$0xff] %vm6831_vm0, %v6911_v0  ;;  %v14189_v1 = vpop.f32.mrb[1].mxu0 }
0x182a   :  { %v6916_v2 = vpop.f32.mrb[2].mxu0 }
0x182b   :  { %12271 = vst.msk [vmem:[%s18884_s3 + $0x128] sm:$0xff] %vm6831_vm0, %v6916_v2  ;;  %v14192_v3 = vpop.f32.mrb[3].mxu0 }
0x182e   :  { %v6921_v4 = vpop.f32.mrb[0].mxu1 }
0x182f   :  { %12272 = vst.msk [vmem:[%s18884_s3 + $0x130] sm:$0x1] %vm6928_vm1, %v6921_v4  ;;  %v14195_v5 = vpop.f32.mrb[1].mxu1 }
0x1832   :  { %v7170_v6 = vpop.f32.mrb[4].mxu0 }
0x1833   :  { %12294 = vst.msk [vmem:[%s18884_s3 + $0x150] sm:$0xff] %vm6831_vm0, %v7170_v6  ;;  %v14219_v7 = vpop.f32.mrb[5].mxu0 }
0x1834   :  { %v7041_v8 = vpop.f32.mrb[2].mxu1 }
0x1835   :  { %12282 = vst.msk [vmem:[%s18884_s3 + $0x138] sm:$0xff] %vm6831_vm0, %v7041_v8  ;;  %v14204_v9 = vpop.f32.mrb[3].mxu1 }
0x1836   :  { %v7175_v10 = vpop.f32.mrb[6].mxu0 }
0x1837   :  { %12295 = vst.msk [vmem:[%s18884_s3 + $0x158] sm:$0xff] %vm6831_vm0, %v7175_v10  ;;  %v14222_v11 = vpop.f32.mrb[7].mxu0 }
0x1838   :  { %v7046_v12 = vpop.f32.mrb[4].mxu1 }
0x1839   :  { %12283 = vst.msk [vmem:[%s18884_s3 + $0x140] sm:$0xff] %vm6831_vm0, %v7046_v12  ;;  %v14207_v13 = vpop.f32.mrb[5].mxu1 }
0x183a   :  { %v7180_v14 = vpop.f32.mrb[8].mxu0 }
0x183b   :  { %12296 = vst.msk [vmem:[%s18884_s3 + $0x160] sm:$0x1] %vm6928_vm1, %v7180_v14  ;;  %v14225_v15 = vpop.f32.mrb[9].mxu0 }
0x183c   :  { %v7051_v16 = vpop.f32.mrb[6].mxu1 }
0x183d   :  { %12284 = vst.msk [vmem:[%s18884_s3 + $0x148] sm:$0x1] %vm6928_vm1, %v7051_v16  ;;  %v14210_v17 = vpop.f32.mrb[7].mxu1 }
0x183e PF:  { %p12297_p11 = scmp.ne.s32.totalorder %s15375_s24, 0 }
0x183f   :  { %v12298_v18 = vld [vmem:[%s18882_s1 + $0x168] sm:$0xff] (!%p12297_p11)  ;;  %vm7203_vm2 = vcmask (!%p12297_p11), 138240   ;;  %v12299_v19 = vld [vmem:[%s18882_s1 + $0x170] sm:$0xff] (!%p12297_p11)  ;;  %v12300_v20 = vld [vmem:[%s18882_s1 + $0x178] sm:$0x1] (!%p12297_p11)  ;;  %vm7206_vm3 = vcmask (!%p12297_p11), 131072  }
0x1840   :  { %7191 = sbr.rel (%p12297_p11) target bundleno = 6215 (0x1847), region = 93  ;;  %12307 = vst.msk [vmem:[%s18884_s3 + $0x168] sm:$0xff] (!%p12297_p11), %vm7203_vm2, %v12298_v18  ;;  %12308 = vst.msk [vmem:[%s18884_s3 + $0x170] sm:$0xff] (!%p12297_p11), %vm7203_vm2, %v12299_v19  ;;  %v12301_v21 = vld [vmem:[%s18882_s1 + $0x180] sm:$0xff] (!%p12297_p11)  ;;  %v12302_v22 = vld [vmem:[%s18882_s1 + $0x188] sm:$0xff] (!%p12297_p11) }
0x1841   :  { %12309 = vst.msk [vmem:[%s18884_s3 + $0x178] sm:$0x1] (!%p12297_p11), %vm7206_vm3, %v12300_v20  ;;  %v12303_v23 = vld [vmem:[%s18882_s1 + $0x190] sm:$0x1] (!%p12297_p11)  ;;  %v12304_v24 = vld [vmem:[%s18882_s1 + $0x198] sm:$0xff] (!%p12297_p11)  ;;  %v12305_v25 = vld [vmem:[%s18882_s1 + $0x1a0] sm:$0xff] (!%p12297_p11) }
0x1842   :  { %12310 = vst.msk [vmem:[%s18884_s3 + $0x180] sm:$0xff] (!%p12297_p11), %vm7203_vm2, %v12301_v21  ;;  %12311 = vst.msk [vmem:[%s18884_s3 + $0x188] sm:$0xff] (!%p12297_p11), %vm7203_vm2, %v12302_v22  ;;  %v12306_v26 = vld [vmem:[%s18882_s1 + $0x1a8] sm:$0x1] (!%p12297_p11) }
0x1843   :  { %12312 = vst.msk [vmem:[%s18884_s3 + $0x190] sm:$0x1] (!%p12297_p11), %vm7206_vm3, %v12303_v23  ;;  %12315 = vst.msk [vmem:[%s18884_s3 + $0x1a8] sm:$0x1] (!%p12297_p11), %vm7206_vm3, %v12306_v26 }
0x1844   :  { %12313 = vst.msk [vmem:[%s18884_s3 + $0x198] sm:$0xff] (!%p12297_p11), %vm7203_vm2, %v12304_v24  ;;  %12314 = vst.msk [vmem:[%s18884_s3 + $0x1a0] sm:$0xff] (!%p12297_p11), %vm7203_vm2, %v12305_v25 }
0x1847 PF:  { %p12316_p12 = scmp.ne.s32.totalorder %s15375_s24, 1 }
0x1848   :  { %v7218_v27 = vlaneseq (!%p12316_p12)  ;;  %v15297_v28 = vmov (!%p12316_p12), 0.0|0.0   ;;  %vm15298_vm4 = vmmov (!%p12316_p12), 0   ;;  %v15299_v31 = vmov (!%p12316_p12), 0.0   ;;  %v12320_v40 = vld [vmem:[%s18882_s1 + $0x168] sm:$0xff] (!%p12316_p12)  ;;  %v12322_v41 = vld [vmem:[%s18882_s1 + $0x178] sm:$0x1] (!%p12316_p12) }
0x1849   :  { %7217 = sbr.rel (%p12316_p12) target bundleno = 6593 (0x19c1), region = 97  ;;  %14946 = vmatprep.subr.bf16.mxu0 (!%p12316_p12), %v15297_v28  ;;  %15094 = vmatprep.subr.bf16.mxu1 (!%p12316_p12), %v15297_v28  ;;  %v15300_v38 = vmov (!%p12316_p12), 1.0|1.0   ;;  %vm7250_vm9 = vcmask (!%p12316_p12), 1040384   ;;  %vm7240_vm10 = vcmask (!%p12316_p12), 138240   ;;  %v12321_v42 = vld [vmem:[%s18882_s1 + $0x170] sm:$0xff] (!%p12316_p12) }
0x184a   :  { %v7219_v29 = vshrl.u32 (!%p12316_p12), %v7218_v27, 7  ;;  %v7223_v30 = vand.u32 (!%p12316_p12), 127, %v7218_v27  ;;  %14232 = vmatprep.mubr.msk.f32.mxu0 (!%p12316_p12), %vm15298_vm4, %v15299_v31  ;;  %14238 = vmatprep.mubr.msk.f32.mxu1 (!%p12316_p12), %vm15298_vm4, %v15299_v31  ;;  %v12332_v43 = vld [vmem:[%s18882_s1 + $0x180] sm:$0xff] (!%p12316_p12)  ;;  %v12344_v44 = vld [vmem:[%s18882_s1 + $0x198] sm:$0xff] (!%p12316_p12)  ;;  %v12333_v45 = vld [vmem:[%s18882_s1 + $0x188] sm:$0xff] (!%p12316_p12)  ;;  %vm7369_vm11 = vcmask (!%p12316_p12), 131072  }
0x184b   :  { %v12345_v46 = vld [vmem:[%s18882_s1 + $0x1a0] sm:$0xff] (!%p12316_p12)  ;;  %v12334_v47 = vld [vmem:[%s18882_s1 + $0x190] sm:$0x1] (!%p12316_p12)  ;;  %v12346_v48 = vld [vmem:[%s18882_s1 + $0x1a8] sm:$0x1] (!%p12316_p12) }
0x184c   :  { %v7220_v32 = vadd.s32 (!%p12316_p12), 8, %v7219_v29  ;;  %v7224_v33 = vadd.s32 (!%p12316_p12), %v7223_v30, %v7219_v29  ;;  %v7221_v34 = vadd.s32 (!%p12316_p12), 16, %v7219_v29 }
0x184e   :  { %v7225_v35 = vadd.s32 (!%p12316_p12), %v7223_v30, %v7220_v32  ;;  %vm7227_vm5 = vcmp.eq.s32.totalorder (!%p12316_p12), %v7224_v33, 16  ;;  %v7226_v36 = vadd.s32 (!%p12316_p12), %v7223_v30, %v7221_v34 }
0x1850   :  { %vm7228_vm6 = vcmp.eq.s32.totalorder %v7225_v35, 16  ;;  %vm7229_vm7 = vcmp.eq.s32.totalorder %v7226_v36, 16 }
0x1851   :  { %vm17615_vm8 = vmpackc.low %vm7228_vm6, %vm7227_vm5  ;;  %v12319_v39 = vsel %vm7229_vm7, 1.0, %v15299_v31 }
0x1852   :  { %14948 = vmatpush3.bf16.msk.msra.mxu0 %vm17615_vm8, %v15300_v38  ;;  %15096 = vmatpush3.bf16.msk.msra.mxu1 %vm17615_vm8, %v15300_v38 }
0x1853   :  { %14230 = vmatprep.subr.mxu0 %v15299_v31  ;;  %15095 = vmatprep.subr.mxu1 %v15299_v31 }
0x1856   :  { %14231 = vmatpush3.msk.msra.mxu0 %vm7250_vm9, %v12319_v39  ;;  %15097 = vmatpush3.msk.msra.mxu1 %vm7250_vm9, %v12319_v39 }
0x1857   :  { %14233 = vmatmul.mubr.msk.f32.vlgmr.msra.gmra.mrb[0].mxu0 %vm7240_vm10, %v12320_v40  ;;  %14952 = vmatprep.subr.bf16.mxu0 %v15297_v28 }
0x1858   :  { %14235 = vmatprep.mubr.msk.f32.mxu0 %vm15298_vm4, %v15299_v31  ;;  %14954 = vmatpush3.bf16.msk.msra.mxu0 %vm17615_vm8, %v15300_v38 }
0x1859   :  { %14239 = vmatmul.mubr.msk.f32.vlgmr.msra.gmra.mrb[0].mxu1 %vm7240_vm10, %v12322_v41  ;;  %14949 = vmatprep.subr.bf16.mxu1 %v15297_v28 }
0x185a   :  { %14951 = vmatpush3.bf16.msk.msra.mxu1 %vm17615_vm8, %v15300_v38  ;;  %14260 = vmatprep.subr.mxu0 %v15299_v31 }
0x185b   :  { %14236 = vmatmul.mubr.msk.f32.gmra.mrb[2].mxu0 %vm7240_vm10, %v12321_v42  ;;  %14245 = vmatprep.subr.mxu1 %v15299_v31 }
0x185c   :  { %14261 = vmatpush3.msk.msra.mxu0 %vm7250_vm9, %v12319_v39  ;;  %14247 = vmatprep.mubr.msk.f32.mxu1 %vm15298_vm4, %v15299_v31 }
0x185d   :  { %14262 = vmatprep.mubr.msk.f32.mxu0 %vm15298_vm4, %v15299_v31 }
0x185e   :  { %14246 = vmatpush3.msk.msra.mxu1 %vm7250_vm9, %v12319_v39 }
0x185f   :  { %14248 = vmatmul.mubr.msk.f32.vlgmr.msra.gmra.mrb[2].mxu1 %vm7240_vm10, %v12332_v43  ;;  %14263 = vmatmul.mubr.msk.f32.vlgmr.msra.gmra.mrb[4].mxu0 %vm7240_vm10, %v12344_v44 }
0x1860   :  { %14250 = vmatprep.mubr.msk.f32.mxu1 %vm15298_vm4, %v15299_v31  ;;  %14265 = vmatprep.mubr.msk.f32.mxu0 %vm15298_vm4, %v15299_v31 }
0x1863   :  { %14251 = vmatmul.mubr.msk.f32.gmra.mrb[4].mxu1 %vm7240_vm10, %v12333_v45  ;;  %14266 = vmatmul.mubr.msk.f32.gmra.mrb[6].mxu0 %vm7240_vm10, %v12345_v46 }
0x1864   :  { %14253 = vmatprep.mubr.msk.f32.mxu1 %vm15298_vm4, %v15299_v31  ;;  %14268 = vmatprep.mubr.msk.f32.mxu0 %vm15298_vm4, %v15299_v31 }
0x1867   :  { %14254 = vmatmul.mubr.msk.f32.gmra.mrb[6].mxu1 %vm7240_vm10, %v12334_v47  ;;  %14269 = vmatmul.mubr.msk.f32.gmra.mrb[8].mxu0 %vm7240_vm10, %v12346_v48 }
0x192a   :  { %v7320_v49 = vpop.f32.mrb[0].mxu0 }
0x192b   :  { %7334 = vxpose.xlu0.b32.start [1/3] (short) (narrow) %v7320_v49, 24  ;;  %v14234_v50 = vpop.f32.mrb[1].mxu0 }
0x192c   :  { %v7330_v51 = vpop.f32.mrb[0].mxu1 }
0x192d   :  { %v14240_v52 = vpop.f32.mrb[1].mxu1 }
0x192e   :  { %v7325_v53 = vpop.f32.mrb[2].mxu0 }
0x192f   :  { %7335 = vxpose.xlu0.b32.cont [2/3] (short) (narrow) %v7325_v53, 24  ;;  %v14237_v54 = vpop.f32.mrb[3].mxu0 }
0x1932   :  { %v7450_v55 = vpop.f32.mrb[2].mxu1  ;;  %v7579_v56 = vpop.f32.mrb[4].mxu0 }
0x1933   :  { %7336 = vxpose.xlu0.b32.end [3/3] (short) (narrow) %v7330_v51, 24  ;;  %v14249_v57 = vpop.f32.mrb[3].mxu1  ;;  %v14264_v58 = vpop.f32.mrb[5].mxu0  ;;  %7464 = vxpose.xlu1.b32.start [1/3] (short) (narrow) %v7450_v55, 24 }
0x1936   :  { %v7455_v59 = vpop.f32.mrb[4].mxu1  ;;  %v7584_v60 = vpop.f32.mrb[6].mxu0 }
0x1937   :  { %7593 = vxpose.xlu0.b32.start [1/3] (short) (narrow) %v7579_v56, 24  ;;  %v14252_v61 = vpop.f32.mrb[5].mxu1  ;;  %v14267_v62 = vpop.f32.mrb[7].mxu0  ;;  %7465 = vxpose.xlu1.b32.cont [2/3] (short) (narrow) %v7455_v59, 24 }
0x193a   :  { %v7460_v63 = vpop.f32.mrb[6].mxu1  ;;  %v7589_v0 = vpop.f32.mrb[8].mxu0 }
0x193b   :  { %7594 = vxpose.xlu0.b32.cont [2/3] (short) (narrow) %v7584_v60, 24  ;;  %v14255_v1 = vpop.f32.mrb[7].mxu1  ;;  %v14270_v2 = vpop.f32.mrb[9].mxu0  ;;  %7466 = vxpose.xlu1.b32.end [3/3] (short) (narrow) %v7460_v63, 24 }
0x193f   :  { %7595 = vxpose.xlu0.b32.end [3/3] (short) (narrow) %v7589_v0, 24 }
0x19ab   :  { %v7350_v3 = vpop.trf.xlu0 }
0x19ac   :  { %12329 = vst.msk [vmem:[%s18884_s3 + $0x168] sm:$0xff] %vm7240_vm10, %v7350_v3 }
0x19af   :  { %v7351_v4 = vpop.trf.xlu0 }
0x19b0   :  { %12330 = vst.msk [vmem:[%s18884_s3 + $0x170] sm:$0xff] %vm7240_vm10, %v7351_v4 }
0x19b3   :  { %v7352_v5 = vpop.trf.xlu0  ;;  %v7480_v6 = vpop.trf.xlu1 }
0x19b4   :  { %12331 = vst.msk [vmem:[%s18884_s3 + $0x178] sm:$0x1] %vm7369_vm11, %v7352_v5 }
0x19b5   :  { %12341 = vst.msk [vmem:[%s18884_s3 + $0x180] sm:$0xff] %vm7240_vm10, %v7480_v6 }
0x19b7   :  { %v7609_v7 = vpop.trf.xlu0  ;;  %v7481_v8 = vpop.trf.xlu1 }
0x19b8   :  { %12353 = vst.msk [vmem:[%s18884_s3 + $0x198] sm:$0xff] %vm7240_vm10, %v7609_v7  ;;  %12342 = vst.msk [vmem:[%s18884_s3 + $0x188] sm:$0xff] %vm7240_vm10, %v7481_v8 }
0x19bb   :  { %v7610_v9 = vpop.trf.xlu0  ;;  %v7482_v10 = vpop.trf.xlu1 }
0x19bc   :  { %12354 = vst.msk [vmem:[%s18884_s3 + $0x1a0] sm:$0xff] %vm7240_vm10, %v7610_v9 }
0x19bd   :  { %12343 = vst.msk [vmem:[%s18884_s3 + $0x190] sm:$0x1] %vm7369_vm11, %v7482_v10 }
0x19bf   :  { %v7611_v11 = vpop.trf.xlu0 }
0x19c0   :  { %12355 = vst.msk [vmem:[%s18884_s3 + $0x1a8] sm:$0x1] %vm7369_vm11, %v7611_v11 }
0x19c1 PF:  { %p12356_p13 = scmp.ne.s32.totalorder %s15375_s24, 2 }
0x19c2   :  { %v7633_v12 = vlaneseq (!%p12356_p13)  ;;  %v15301_v13 = vmov (!%p12356_p13), 0.0|0.0   ;;  %vm15302_vm12 = vmmov (!%p12356_p13), 0   ;;  %v15303_v16 = vmov (!%p12356_p13), 0.0   ;;  %v12360_v25 = vld [vmem:[%s18882_s1 + $0x168] sm:$0xff] (!%p12356_p13)  ;;  %v12361_v26 = vld [vmem:[%s18882_s1 + $0x170] sm:$0xff] (!%p12356_p13)  ;;  %v12376_v28 = vld [vmem:[%s18882_s1 + $0x180] sm:$0xff] (!%p12356_p13) }
0x19c3   :  { %7632 = sbr.rel (%p12356_p13) target bundleno = 7077 (0x1ba5), region = 101  ;;  %14955 = vmatprep.subr.bf16.mxu0 (!%p12356_p13), %v15301_v13  ;;  %14958 = vmatprep.subr.bf16.mxu1 (!%p12356_p13), %v15301_v13  ;;  %v15304_v23 = vmov (!%p12356_p13), 1.0|1.0   ;;  %vm7665_vm1 = vcmask (!%p12356_p13), 1040384   ;;  %vm7655_vm2 = vcmask (!%p12356_p13), 138240   ;;  %v12377_v29 = vld [vmem:[%s18882_s1 + $0x188] sm:$0xff] (!%p12356_p13) }
0x19c4   :  { %v7634_v14 = vshrl.u32 (!%p12356_p13), %v7633_v12, 7  ;;  %v7638_v15 = vand.u32 (!%p12356_p13), 127, %v7633_v12  ;;  %14277 = vmatprep.mubr.msk.f32.mxu0 (!%p12356_p13), %vm15302_vm12, %v15303_v16  ;;  %14292 = vmatprep.mubr.msk.f32.mxu1 (!%p12356_p13), %vm15302_vm12, %v15303_v16  ;;  %v12362_v27 = vld [vmem:[%s18882_s1 + $0x178] sm:$0x1] (!%p12356_p13)  ;;  %v12378_v30 = vld [vmem:[%s18882_s1 + $0x190] sm:$0x1] (!%p12356_p13) }
0x19c5   :  { %v12392_v31 = vld [vmem:[%s18882_s1 + $0x198] sm:$0xff] (!%p12356_p13)  ;;  %v12393_v32 = vld [vmem:[%s18882_s1 + $0x1a0] sm:$0xff] (!%p12356_p13)  ;;  %v12394_v33 = vld [vmem:[%s18882_s1 + $0x1a8] sm:$0x1] (!%p12356_p13)  ;;  %vm7843_vm3 = vcmask (!%p12356_p13), 131072  }
0x19c6   :  { %v7635_v17 = vadd.s32 (!%p12356_p13), 8, %v7634_v14  ;;  %v7639_v18 = vadd.s32 (!%p12356_p13), %v7638_v15, %v7634_v14  ;;  %v7636_v19 = vadd.s32 (!%p12356_p13), 16, %v7634_v14 }
0x19c8   :  { %v17714_v20 = vadd.s32 (!%p12356_p13), %v7638_v15, %v7635_v17  ;;  %vm7642_vm13 = vcmp.eq.s32.totalorder (!%p12356_p13), %v7639_v18, 16  ;;  %v7641_v21 = vadd.s32 (!%p12356_p13), %v7638_v15, %v7636_v19 }
0x19c9   :  { %v12357_v41 = vsel (!%p12356_p13), %vm7642_vm13, 1.0, %v15303_v16 }
0x19ca   :  { %vm7643_vm14 = vcmp.eq.s32.totalorder %v17714_v20, 16  ;;  %vm7644_vm15 = vcmp.eq.s32.totalorder %v7641_v21, 16 }
0x19cb   :  { %vm17720_vm0 = vmpackc.low %vm7643_vm14, %vm7642_vm13  ;;  %v17728_v24 = vsel %vm7644_vm15, 1.0, %v15303_v16  ;;  %v12358_v44 = vsel %vm7643_vm14, 1.0, %v15303_v16 }
0x19cc   :  { %14957 = vmatpush3.bf16.msk.msra.mxu0 %vm17720_vm0, %v15304_v23 }
0x19cd   :  { %14275 = vmatprep.subr.mxu0 %v15303_v16 }
0x19d0   :  { %14276 = vmatpush3.msk.msra.mxu0 %vm7665_vm1, %v17728_v24 }
0x19d1   :  { %14278 = vmatmul.mubr.msk.f32.vlgmr.msra.gmra.mrb[0].mxu0 %vm7655_vm2, %v12360_v25  ;;  %14961 = vmatprep.subr.bf16.mxu0 %v15301_v13 }
0x19d2   :  { %14280 = vmatprep.mubr.msk.f32.mxu0 %vm15302_vm12, %v15303_v16  ;;  %14963 = vmatpush3.bf16.msk.msra.mxu0 %vm17720_vm0, %v15304_v23 }
0x19d3   :  { %14305 = vmatprep.subr.mxu0 %v15303_v16 }
0x19d5   :  { %14281 = vmatmul.mubr.msk.f32.gmra.mrb[2].mxu0 %vm7655_vm2, %v12361_v26 }
0x19d6   :  { %14283 = vmatprep.mubr.msk.f32.mxu0 %vm15302_vm12, %v15303_v16  ;;  %14306 = vmatpush3.msk.msra.mxu0 %vm7665_vm1, %v17728_v24 }
0x19d7   :  { %14967 = vmatprep.subr.bf16.mxu0 %v15301_v13 }
0x19d9   :  { %14284 = vmatmul.mubr.msk.f32.gmra.mrb[4].mxu0 %vm7655_vm2, %v12362_v27 }
0x19da   :  { %14307 = vmatprep.mubr.msk.f32.mxu0 %vm15302_vm12, %v15303_v16 }
0x19dd   :  { %14308 = vmatmul.mubr.msk.f32.vlgmr.msra.gmra.mrb[6].mxu0 %vm7655_vm2, %v12376_v28 }
0x19de   :  { %14310 = vmatprep.mubr.msk.f32.mxu0 %vm15302_vm12, %v15303_v16  ;;  %14969 = vmatpush3.bf16.msk.msra.mxu0 %vm17720_vm0, %v15304_v23 }
0x19df   :  { %14335 = vmatprep.subr.mxu0 %v15303_v16 }
0x19e1   :  { %14311 = vmatmul.mubr.msk.f32.gmra.mrb[8].mxu0 %vm7655_vm2, %v12377_v29 }
0x19e2   :  { %14313 = vmatprep.mubr.msk.f32.mxu0 %vm15302_vm12, %v15303_v16  ;;  %14336 = vmatpush3.msk.msra.mxu0 %vm7665_vm1, %v17728_v24 }
0x19e5   :  { %14314 = vmatmul.mubr.msk.f32.gmra.mrb[10].mxu0 %vm7655_vm2, %v12378_v30 }
0x19e6   :  { %14337 = vmatprep.mubr.msk.f32.mxu0 %vm15302_vm12, %v15303_v16 }
0x19e9   :  { %14338 = vmatmul.mubr.msk.f32.vlgmr.msra.gmra.mrb[12].mxu0 %vm7655_vm2, %v12392_v31 }
0x19ea   :  { %14340 = vmatprep.mubr.msk.f32.mxu0 %vm15302_vm12, %v15303_v16 }
0x19ed   :  { %14341 = vmatmul.mubr.msk.f32.gmra.mrb[14].mxu0 %vm7655_vm2, %v12393_v32 }
0x19ee   :  { %14343 = vmatprep.mubr.msk.f32.mxu0 %vm15302_vm12, %v15303_v16 }
0x19f1   :  { %14344 = vmatmul.mubr.msk.f32.gmra.mrb[16].mxu0 %vm7655_vm2, %v12394_v33 }
0x1aa4   :  { %v7735_v34 = vpop.f32.mrb[0].mxu0 }
0x1aa5   :  { %v14279_v35 = vpop.f32.mrb[1].mxu0 }
0x1aa8   :  { %v7740_v36 = vpop.f32.mrb[2].mxu0 }
0x1aa9   :  { %v14959_v37 = vpack.c.bf16 %v7740_v36, %v7735_v34  ;;  %v14282_v38 = vpop.f32.mrb[3].mxu0 }
0x1aab   :  { %14960 = vmatpush3.bf16.msra.mxu1 %v14959_v37 }
0x1aac   :  { %v7745_v39 = vpop.f32.mrb[4].mxu0  ;;  %14290 = vmatprep.subr.mxu1 %v15303_v16 }
0x1aad   :  { %v14285_v40 = vpop.f32.mrb[5].mxu0 }
0x1aaf   :  { %14291 = vmatpush3.msk.msra.mxu1 %vm7665_vm1, %v7745_v39 }
0x1ab0   :  { %v7924_v42 = vpop.f32.mrb[6].mxu0  ;;  %14293 = vmatmul.mubr.msk.f32.vlgmr.msra.gmra.mrb[0].mxu1 %vm7655_vm2, %v12357_v41  ;;  %14964 = vmatprep.subr.bf16.mxu1 %v15301_v13 }
0x1ab1   :  { %v14309_v43 = vpop.f32.mrb[7].mxu0  ;;  %14295 = vmatprep.mubr.msk.f32.mxu1 %vm15302_vm12, %v15303_v16 }
0x1ab4   :  { %v7929_v45 = vpop.f32.mrb[8].mxu0  ;;  %14296 = vmatmul.mubr.msk.f32.gmra.mrb[2].mxu1 %vm7655_vm2, %v12358_v44 }
0x1ab5   :  { %v14965_v46 = vpack.c.bf16 %v7929_v45, %v7924_v42  ;;  %v14312_v47 = vpop.f32.mrb[9].mxu0  ;;  %14298 = vmatprep.mubr.msk.f32.mxu1 %vm15302_vm12, %v15303_v16 }
0x1ab7   :  { %14966 = vmatpush3.bf16.msra.mxu1 %v14965_v46 }
0x1ab8   :  { %v7934_v48 = vpop.f32.mrb[10].mxu0  ;;  %14320 = vmatprep.subr.mxu1 %v15303_v16  ;;  %14299 = vmatmul.mubr.msk.f32.gmra.mrb[4].mxu1 %vm7655_vm2, %v17728_v24 }
0x1ab9   :  { %v14315_v49 = vpop.f32.mrb[11].mxu0  ;;  %14322 = vmatprep.mubr.msk.f32.mxu1 %vm15302_vm12, %v15303_v16 }
0x1abb   :  { %14321 = vmatpush3.msk.msra.mxu1 %vm7665_vm1, %v7934_v48 }
0x1abc   :  { %v8104_v50 = vpop.f32.mrb[12].mxu0  ;;  %14323 = vmatmul.mubr.msk.f32.vlgmr.msra.gmra.mrb[6].mxu1 %vm7655_vm2, %v12357_v41  ;;  %14970 = vmatprep.subr.bf16.mxu1 %v15301_v13 }
0x1abd   :  { %v14339_v51 = vpop.f32.mrb[13].mxu0  ;;  %14325 = vmatprep.mubr.msk.f32.mxu1 %vm15302_vm12, %v15303_v16 }
0x1ac0   :  { %v8109_v52 = vpop.f32.mrb[14].mxu0  ;;  %14326 = vmatmul.mubr.msk.f32.gmra.mrb[8].mxu1 %vm7655_vm2, %v12358_v44 }
0x1ac1   :  { %v14971_v53 = vpack.c.bf16 %v8109_v52, %v8104_v50  ;;  %v14342_v54 = vpop.f32.mrb[15].mxu0  ;;  %14328 = vmatprep.mubr.msk.f32.mxu1 %vm15302_vm12, %v15303_v16 }
0x1ac3   :  { %14972 = vmatpush3.bf16.msra.mxu1 %v14971_v53 }
0x1ac4   :  { %v8114_v55 = vpop.f32.mrb[16].mxu0  ;;  %14350 = vmatprep.subr.mxu1 %v15303_v16  ;;  %14329 = vmatmul.mubr.msk.f32.gmra.mrb[10].mxu1 %vm7655_vm2, %v17728_v24 }
0x1ac5   :  { %v14345_v56 = vpop.f32.mrb[17].mxu0  ;;  %14352 = vmatprep.mubr.msk.f32.mxu1 %vm15302_vm12, %v15303_v16 }
0x1ac7   :  { %14351 = vmatpush3.msk.msra.mxu1 %vm7665_vm1, %v8114_v55 }
0x1ac8   :  { %14353 = vmatmul.mubr.msk.f32.vlgmr.msra.gmra.mrb[12].mxu1 %vm7655_vm2, %v12357_v41 }
0x1ac9   :  { %14355 = vmatprep.mubr.msk.f32.mxu1 %vm15302_vm12, %v15303_v16 }
0x1acc   :  { %14356 = vmatmul.mubr.msk.f32.gmra.mrb[14].mxu1 %vm7655_vm2, %v12358_v44 }
0x1acd   :  { %14358 = vmatprep.mubr.msk.f32.mxu1 %vm15302_vm12, %v15303_v16 }
0x1ad0   :  { %14359 = vmatmul.mubr.msk.f32.gmra.mrb[16].mxu1 %vm7655_vm2, %v17728_v24 }
0x1b83   :  { %v7826_v57 = vpop.f32.mrb[0].mxu1 }
0x1b84   :  { %12373 = vst.msk [vmem:[%s18884_s3 + $0x168] sm:$0xff] %vm7655_vm2, %v7826_v57  ;;  %v14294_v58 = vpop.f32.mrb[1].mxu1 }
0x1b87   :  { %v7831_v59 = vpop.f32.mrb[2].mxu1 }
0x1b88   :  { %12374 = vst.msk [vmem:[%s18884_s3 + $0x170] sm:$0xff] %vm7655_vm2, %v7831_v59  ;;  %v14297_v60 = vpop.f32.mrb[3].mxu1 }
0x1b8b   :  { %v7836_v61 = vpop.f32.mrb[4].mxu1 }
0x1b8c   :  { %12375 = vst.msk [vmem:[%s18884_s3 + $0x178] sm:$0x1] %vm7843_vm3, %v7836_v61  ;;  %v14300_v62 = vpop.f32.mrb[5].mxu1 }
0x1b8f   :  { %v8007_v63 = vpop.f32.mrb[6].mxu1 }
0x1b90   :  { %12389 = vst.msk [vmem:[%s18884_s3 + $0x180] sm:$0xff] %vm7655_vm2, %v8007_v63  ;;  %v14324_v0 = vpop.f32.mrb[7].mxu1 }
0x1b93   :  { %v8012_v1 = vpop.f32.mrb[8].mxu1 }
0x1b94   :  { %12390 = vst.msk [vmem:[%s18884_s3 + $0x188] sm:$0xff] %vm7655_vm2, %v8012_v1  ;;  %v14327_v2 = vpop.f32.mrb[9].mxu1 }
0x1b97   :  { %v8017_v3 = vpop.f32.mrb[10].mxu1 }
0x1b98   :  { %12391 = vst.msk [vmem:[%s18884_s3 + $0x190] sm:$0x1] %vm7843_vm3, %v8017_v3  ;;  %v14330_v4 = vpop.f32.mrb[11].mxu1 }
0x1b9b   :  { %v8187_v5 = vpop.f32.mrb[12].mxu1 }
0x1b9c   :  { %12405 = vst.msk [vmem:[%s18884_s3 + $0x198] sm:$0xff] %vm7655_vm2, %v8187_v5  ;;  %v14354_v6 = vpop.f32.mrb[13].mxu1 }
0x1b9f   :  { %v8192_v7 = vpop.f32.mrb[14].mxu1 }
0x1ba0   :  { %12406 = vst.msk [vmem:[%s18884_s3 + $0x1a0] sm:$0xff] %vm7655_vm2, %v8192_v7  ;;  %v14357_v8 = vpop.f32.mrb[15].mxu1 }
0x1ba3   :  { %v8197_v9 = vpop.f32.mrb[16].mxu1 }
0x1ba4   :  { %12407 = vst.msk [vmem:[%s18884_s3 + $0x1a8] sm:$0x1] %vm7843_vm3, %v8197_v9  ;;  %v14360_v10 = vpop.f32.mrb[17].mxu1 }
0x1ba5 PF:  { %p12408_p0 = scmp.ne.s32.totalorder %s15375_s24, 3 }
0x1ba6   :  { %v12412_v11 = vld [vmem:[%s18882_s1 + $0x168] sm:$0xff] (!%p12408_p0)  ;;  %v8209_v12 = vlaneseq (!%p12408_p0)  ;;  %v12424_v13 = vld [vmem:[%s18882_s1 + $0x180] sm:$0xff] (!%p12408_p0)  ;;  %v15305_v14 = vmov (!%p12408_p0), 0.0|0.0   ;;  %v12413_v15 = vld [vmem:[%s18882_s1 + $0x170] sm:$0xff] (!%p12408_p0)  ;;  %vm15306_vm4 = vmmov (!%p12408_p0), 0   ;;  %v15307_v19 = vmov (!%p12408_p0), 0.0  }
0x1ba7   :  { %8208 = sbr.rel (%p12408_p0) target bundleno = 7443 (0x1d13), region = 105  ;;  %8231 = vxpose.xlu0.b32.start [1/3] (short) (narrow) (!%p12408_p0), %v12412_v11, 24  ;;  %14973 = vmatprep.subr.bf16.mxu0 (!%p12408_p0), %v15305_v14  ;;  %v12425_v16 = vld [vmem:[%s18882_s1 + $0x188] sm:$0xff] (!%p12408_p0)  ;;  %v12414_v23 = vld [vmem:[%s18882_s1 + $0x178] sm:$0x1] (!%p12408_p0)  ;;  %vm8273_vm9 = vcmask (!%p12408_p0), 1040384  }
0x1ba8   :  { %8366 = vxpose.xlu1.b32.start [1/3] (short) (narrow) (!%p12408_p0), %v12424_v13, 24  ;;  %15098 = vmatprep.subr.bf16.mxu1 (!%p12408_p0), %v15305_v14  ;;  %v8210_v17 = vshrl.u32 (!%p12408_p0), %v8209_v12, 7  ;;  %v8214_v18 = vand.u32 (!%p12408_p0), 127, %v8209_v12  ;;  %v12426_v24 = vld [vmem:[%s18882_s1 + $0x190] sm:$0x1] (!%p12408_p0)  ;;  %v12436_v27 = vld [vmem:[%s18882_s1 + $0x198] sm:$0xff] (!%p12408_p0) }
0x1ba9   :  { %14367 = vmatprep.mubr.msk.f32.mxu0 (!%p12408_p0), %vm15306_vm4, %v15307_v19  ;;  %14373 = vmatprep.mubr.msk.f32.mxu1 (!%p12408_p0), %vm15306_vm4, %v15307_v19  ;;  %v15308_v29 = vmov (!%p12408_p0), 1.0|1.0   ;;  %v12437_v31 = vld [vmem:[%s18882_s1 + $0x1a0] sm:$0xff] (!%p12408_p0)  ;;  %v12438_v32 = vld [vmem:[%s18882_s1 + $0x1a8] sm:$0x1] (!%p12408_p0)  ;;  %vm8263_vm10 = vcmask (!%p12408_p0), 138240  }
0x1baa   :  { %v8211_v20 = vadd.s32 (!%p12408_p0), 8, %v8210_v17  ;;  %v8215_v21 = vadd.s32 (!%p12408_p0), %v8214_v18, %v8210_v17  ;;  %v8212_v22 = vadd.s32 (!%p12408_p0), 16, %v8210_v17  ;;  %vm8360_vm11 = vcmask (!%p12408_p0), 131072  }
0x1bab   :  { %8232 = vxpose.xlu0.b32.cont [2/3] (short) (narrow) (!%p12408_p0), %v12413_v15, 24 }
0x1bac   :  { %8367 = vxpose.xlu1.b32.cont [2/3] (short) (narrow) (!%p12408_p0), %v12425_v16, 24  ;;  %v8216_v25 = vadd.s32 (!%p12408_p0), %v8214_v18, %v8211_v20  ;;  %vm8218_vm5 = vcmp.eq.s32.totalorder (!%p12408_p0), %v8215_v21, 16  ;;  %v8217_v26 = vadd.s32 (!%p12408_p0), %v8214_v18, %v8212_v22 }
0x1bae   :  { %vm8219_vm6 = vcmp.eq.s32.totalorder %v8216_v25, 16  ;;  %vm8220_vm7 = vcmp.eq.s32.totalorder %v8217_v26, 16 }
0x1baf   :  { %8233 = vxpose.xlu0.b32.end [3/3] (short) (narrow) %v12414_v23, 24  ;;  %vm17899_vm8 = vmpackc.low %vm8219_vm6, %vm8218_vm5  ;;  %v12411_v30 = vsel %vm8220_vm7, 1.0, %v15307_v19 }
0x1bb0   :  { %8368 = vxpose.xlu1.b32.end [3/3] (short) (narrow) %v12426_v24, 24  ;;  %14975 = vmatpush3.bf16.msk.msra.mxu0 %vm17899_vm8, %v15308_v29 }
0x1bb1   :  { %15100 = vmatpush3.bf16.msk.msra.mxu1 %vm17899_vm8, %v15308_v29  ;;  %14365 = vmatprep.subr.mxu0 %v15307_v19 }
0x1bb2   :  { %15099 = vmatprep.subr.mxu1 %v15307_v19 }
0x1bb3   :  { %8495 = vxpose.xlu0.b32.start [1/3] (short) (narrow) %v12436_v27, 24 }
0x1bb4   :  { %14366 = vmatpush3.msk.msra.mxu0 %vm8273_vm9, %v12411_v30 }
0x1bb5   :  { %15101 = vmatpush3.msk.msra.mxu1 %vm8273_vm9, %v12411_v30  ;;  %14979 = vmatprep.subr.bf16.mxu0 %v15305_v14 }
0x1bb6   :  { %14976 = vmatprep.subr.bf16.mxu1 %v15305_v14 }
0x1bb7   :  { %8496 = vxpose.xlu0.b32.cont [2/3] (short) (narrow) %v12437_v31, 24 }
0x1bbb   :  { %8497 = vxpose.xlu0.b32.end [3/3] (short) (narrow) %v12438_v32, 24 }
0x1c27   :  { %v8247_v33 = vpop.trf.xlu0 }
0x1c28   :  { %14368 = vmatmul.mubr.msk.f32.vlgmr.msra.gmra.mrb[0].mxu0 %vm8263_vm10, %v8247_v33  ;;  %v8382_v36 = vpop.trf.xlu1 }
0x1c29   :  { %14370 = vmatprep.mubr.msk.f32.mxu0 %vm15306_vm4, %v15307_v19  ;;  %14981 = vmatpush3.bf16.msk.msra.mxu0 %vm17899_vm8, %v15308_v29 }
0x1c2a   :  { %14395 = vmatprep.subr.mxu0 %v15307_v19 }
0x1c2b   :  { %v8248_v34 = vpop.trf.xlu0 }
0x1c2c   :  { %14371 = vmatmul.mubr.msk.f32.gmra.mrb[2].mxu0 %vm8263_vm10, %v8248_v34  ;;  %v8383_v38 = vpop.trf.xlu1 }
0x1c2d   :  { %14396 = vmatpush3.msk.msra.mxu0 %vm8273_vm9, %v12411_v30  ;;  %14397 = vmatprep.mubr.msk.f32.mxu0 %vm15306_vm4, %v15307_v19 }
0x1c2f   :  { %v8249_v35 = vpop.trf.xlu0 }
0x1c30   :  { %14374 = vmatmul.mubr.msk.f32.vlgmr.msra.gmra.mrb[0].mxu1 %vm8263_vm10, %v8249_v35  ;;  %v8384_v40 = vpop.trf.xlu1 }
0x1c31   :  { %14978 = vmatpush3.bf16.msk.msra.mxu1 %vm17899_vm8, %v15308_v29  ;;  %14382 = vmatprep.mubr.msk.f32.mxu1 %vm15306_vm4, %v15307_v19 }
0x1c32   :  { %14380 = vmatprep.subr.mxu1 %v15307_v19 }
0x1c33   :  { %v8511_v37 = vpop.trf.xlu0 }
0x1c34   :  { %14398 = vmatmul.mubr.msk.f32.vlgmr.msra.gmra.mrb[4].mxu0 %vm8263_vm10, %v8511_v37 }
0x1c35   :  { %14381 = vmatpush3.msk.msra.mxu1 %vm8273_vm9, %v12411_v30  ;;  %14400 = vmatprep.mubr.msk.f32.mxu0 %vm15306_vm4, %v15307_v19 }
0x1c36   :  { %14383 = vmatmul.mubr.msk.f32.vlgmr.msra.gmra.mrb[2].mxu1 %vm8263_vm10, %v8382_v36 }
0x1c37   :  { %v8512_v39 = vpop.trf.xlu0  ;;  %14385 = vmatprep.mubr.msk.f32.mxu1 %vm15306_vm4, %v15307_v19 }
0x1c38   :  { %14401 = vmatmul.mubr.msk.f32.gmra.mrb[6].mxu0 %vm8263_vm10, %v8512_v39 }
0x1c39   :  { %14403 = vmatprep.mubr.msk.f32.mxu0 %vm15306_vm4, %v15307_v19 }
0x1c3a   :  { %14386 = vmatmul.mubr.msk.f32.gmra.mrb[4].mxu1 %vm8263_vm10, %v8383_v38 }
0x1c3b   :  { %v8513_v41 = vpop.trf.xlu0  ;;  %14388 = vmatprep.mubr.msk.f32.mxu1 %vm15306_vm4, %v15307_v19 }
0x1c3c   :  { %14404 = vmatmul.mubr.msk.f32.gmra.mrb[8].mxu0 %vm8263_vm10, %v8513_v41 }
0x1c3e   :  { %14389 = vmatmul.mubr.msk.f32.gmra.mrb[6].mxu1 %vm8263_vm10, %v8384_v40 }
0x1cfb   :  { %v8343_v42 = vpop.f32.mrb[0].mxu0 }
0x1cfc   :  { %12421 = vst.msk [vmem:[%s18884_s3 + $0x168] sm:$0xff] %vm8263_vm10, %v8343_v42  ;;  %v14369_v43 = vpop.f32.mrb[1].mxu0 }
0x1cff   :  { %v8348_v44 = vpop.f32.mrb[2].mxu0 }
0x1d00   :  { %12422 = vst.msk [vmem:[%s18884_s3 + $0x170] sm:$0xff] %vm8263_vm10, %v8348_v44  ;;  %v14372_v45 = vpop.f32.mrb[3].mxu0 }
0x1d03   :  { %v8353_v46 = vpop.f32.mrb[0].mxu1 }
0x1d04   :  { %12423 = vst.msk [vmem:[%s18884_s3 + $0x178] sm:$0x1] %vm8360_vm11, %v8353_v46  ;;  %v14375_v47 = vpop.f32.mrb[1].mxu1 }
0x1d07   :  { %v8602_v48 = vpop.f32.mrb[4].mxu0 }
0x1d08   :  { %12445 = vst.msk [vmem:[%s18884_s3 + $0x198] sm:$0xff] %vm8263_vm10, %v8602_v48  ;;  %v14399_v49 = vpop.f32.mrb[5].mxu0 }
0x1d09   :  { %v8473_v50 = vpop.f32.mrb[2].mxu1 }
0x1d0a   :  { %12433 = vst.msk [vmem:[%s18884_s3 + $0x180] sm:$0xff] %vm8263_vm10, %v8473_v50  ;;  %v14384_v51 = vpop.f32.mrb[3].mxu1 }
0x1d0b   :  { %v8607_v52 = vpop.f32.mrb[6].mxu0 }
0x1d0c   :  { %12446 = vst.msk [vmem:[%s18884_s3 + $0x1a0] sm:$0xff] %vm8263_vm10, %v8607_v52  ;;  %v14402_v53 = vpop.f32.mrb[7].mxu0 }
0x1d0d   :  { %v8478_v54 = vpop.f32.mrb[4].mxu1 }
0x1d0e   :  { %12434 = vst.msk [vmem:[%s18884_s3 + $0x188] sm:$0xff] %vm8263_vm10, %v8478_v54  ;;  %v14387_v55 = vpop.f32.mrb[5].mxu1 }
0x1d0f   :  { %v8612_v56 = vpop.f32.mrb[8].mxu0 }
0x1d10   :  { %12447 = vst.msk [vmem:[%s18884_s3 + $0x1a8] sm:$0x1] %vm8360_vm11, %v8612_v56  ;;  %v14405_v57 = vpop.f32.mrb[9].mxu0 }
0x1d11   :  { %v8483_v58 = vpop.f32.mrb[6].mxu1 }
0x1d12   :  { %12435 = vst.msk [vmem:[%s18884_s3 + $0x190] sm:$0x1] %vm8360_vm11, %v8483_v58  ;;  %v14390_v59 = vpop.f32.mrb[7].mxu1 }
0x1d13 PF:  { %p12448_p1 = scmp.ne.s32.totalorder %s15377_s25, 0 }
0x1d14   :  { %v12449_v60 = vld [vmem:[%s18882_s1 + $0x1b0] sm:$0xff] (!%p12448_p1)  ;;  %vm8635_vm12 = vcmask (!%p12448_p1), 138240   ;;  %v12450_v61 = vld [vmem:[%s18882_s1 + $0x1b8] sm:$0xff] (!%p12448_p1)  ;;  %v12451_v62 = vld [vmem:[%s18882_s1 + $0x1c0] sm:$0x1] (!%p12448_p1)  ;;  %vm8638_vm13 = vcmask (!%p12448_p1), 131072  }
0x1d15   :  { %8623 = sbr.rel (%p12448_p1) target bundleno = 7452 (0x1d1c), region = 109  ;;  %12458 = vst.msk [vmem:[%s18884_s3 + $0x1b0] sm:$0xff] (!%p12448_p1), %vm8635_vm12, %v12449_v60  ;;  %12459 = vst.msk [vmem:[%s18884_s3 + $0x1b8] sm:$0xff] (!%p12448_p1), %vm8635_vm12, %v12450_v61  ;;  %v12452_v63 = vld [vmem:[%s18882_s1 + $0x1c8] sm:$0xff] (!%p12448_p1)  ;;  %v12453_v0 = vld [vmem:[%s18882_s1 + $0x1d0] sm:$0xff] (!%p12448_p1) }
0x1d16   :  { %12460 = vst.msk [vmem:[%s18884_s3 + $0x1c0] sm:$0x1] (!%p12448_p1), %vm8638_vm13, %v12451_v62  ;;  %v12454_v1 = vld [vmem:[%s18882_s1 + $0x1d8] sm:$0x1] (!%p12448_p1)  ;;  %v12455_v2 = vld [vmem:[%s18882_s1 + $0x1e0] sm:$0xff] (!%p12448_p1)  ;;  %v12456_v3 = vld [vmem:[%s18882_s1 + $0x1e8] sm:$0xff] (!%p12448_p1) }
0x1d17   :  { %12461 = vst.msk [vmem:[%s18884_s3 + $0x1c8] sm:$0xff] (!%p12448_p1), %vm8635_vm12, %v12452_v63  ;;  %12462 = vst.msk [vmem:[%s18884_s3 + $0x1d0] sm:$0xff] (!%p12448_p1), %vm8635_vm12, %v12453_v0  ;;  %v12457_v4 = vld [vmem:[%s18882_s1 + $0x1f0] sm:$0x1] (!%p12448_p1) }
0x1d18   :  { %12463 = vst.msk [vmem:[%s18884_s3 + $0x1d8] sm:$0x1] (!%p12448_p1), %vm8638_vm13, %v12454_v1  ;;  %12466 = vst.msk [vmem:[%s18884_s3 + $0x1f0] sm:$0x1] (!%p12448_p1), %vm8638_vm13, %v12457_v4 }
0x1d19   :  { %12464 = vst.msk [vmem:[%s18884_s3 + $0x1e0] sm:$0xff] (!%p12448_p1), %vm8635_vm12, %v12455_v2  ;;  %12465 = vst.msk [vmem:[%s18884_s3 + $0x1e8] sm:$0xff] (!%p12448_p1), %vm8635_vm12, %v12456_v3 }
0x1d1c PF:  { %p12467_p2 = scmp.ne.s32.totalorder %s15377_s25, 1 }
0x1d1d   :  { %v8650_v5 = vlaneseq (!%p12467_p2)  ;;  %v15309_v6 = vmov (!%p12467_p2), 0.0|0.0   ;;  %vm15310_vm14 = vmmov (!%p12467_p2), 0   ;;  %v15311_v9 = vmov (!%p12467_p2), 0.0   ;;  %v12471_v18 = vld [vmem:[%s18882_s1 + $0x1b0] sm:$0xff] (!%p12467_p2)  ;;  %v12473_v19 = vld [vmem:[%s18882_s1 + $0x1c0] sm:$0x1] (!%p12467_p2) }
0x1d1e   :  { %8649 = sbr.rel (%p12467_p2) target bundleno = 7830 (0x1e96), region = 113  ;;  %14982 = vmatprep.subr.bf16.mxu0 (!%p12467_p2), %v15309_v6  ;;  %15102 = vmatprep.subr.bf16.mxu1 (!%p12467_p2), %v15309_v6  ;;  %v15312_v16 = vmov (!%p12467_p2), 1.0|1.0   ;;  %vm8682_vm3 = vcmask (!%p12467_p2), 1040384   ;;  %vm8672_vm4 = vcmask (!%p12467_p2), 138240   ;;  %v12472_v20 = vld [vmem:[%s18882_s1 + $0x1b8] sm:$0xff] (!%p12467_p2) }
0x1d1f   :  { %v8651_v7 = vshrl.u32 (!%p12467_p2), %v8650_v5, 7  ;;  %v8655_v8 = vand.u32 (!%p12467_p2), 127, %v8650_v5  ;;  %14412 = vmatprep.mubr.msk.f32.mxu0 (!%p12467_p2), %vm15310_vm14, %v15311_v9  ;;  %14418 = vmatprep.mubr.msk.f32.mxu1 (!%p12467_p2), %vm15310_vm14, %v15311_v9  ;;  %v12483_v21 = vld [vmem:[%s18882_s1 + $0x1c8] sm:$0xff] (!%p12467_p2)  ;;  %v12495_v22 = vld [vmem:[%s18882_s1 + $0x1e0] sm:$0xff] (!%p12467_p2)  ;;  %v12484_v23 = vld [vmem:[%s18882_s1 + $0x1d0] sm:$0xff] (!%p12467_p2)  ;;  %vm8801_vm5 = vcmask (!%p12467_p2), 131072  }
0x1d20   :  { %v12496_v24 = vld [vmem:[%s18882_s1 + $0x1e8] sm:$0xff] (!%p12467_p2)  ;;  %v12485_v25 = vld [vmem:[%s18882_s1 + $0x1d8] sm:$0x1] (!%p12467_p2)  ;;  %v12497_v26 = vld [vmem:[%s18882_s1 + $0x1f0] sm:$0x1] (!%p12467_p2) }
0x1d21   :  { %v8652_v10 = vadd.s32 (!%p12467_p2), 8, %v8651_v7  ;;  %v8656_v11 = vadd.s32 (!%p12467_p2), %v8655_v8, %v8651_v7  ;;  %v8653_v12 = vadd.s32 (!%p12467_p2), 16, %v8651_v7 }
0x1d23   :  { %v8657_v13 = vadd.s32 (!%p12467_p2), %v8655_v8, %v8652_v10  ;;  %vm8659_vm15 = vcmp.eq.s32.totalorder (!%p12467_p2), %v8656_v11, 16  ;;  %v8658_v14 = vadd.s32 (!%p12467_p2), %v8655_v8, %v8653_v12 }
0x1d25   :  { %vm8660_vm0 = vcmp.eq.s32.totalorder %v8657_v13, 16  ;;  %vm8661_vm1 = vcmp.eq.s32.totalorder %v8658_v14, 16 }
0x1d26   :  { %vm18049_vm2 = vmpackc.low %vm8660_vm0, %vm8659_vm15  ;;  %v12470_v17 = vsel %vm8661_vm1, 1.0, %v15311_v9 }
0x1d27   :  { %14984 = vmatpush3.bf16.msk.msra.mxu0 %vm18049_vm2, %v15312_v16  ;;  %15104 = vmatpush3.bf16.msk.msra.mxu1 %vm18049_vm2, %v15312_v16 }
0x1d28   :  { %14410 = vmatprep.subr.mxu0 %v15311_v9  ;;  %15103 = vmatprep.subr.mxu1 %v15311_v9 }
0x1d2b   :  { %14411 = vmatpush3.msk.msra.mxu0 %vm8682_vm3, %v12470_v17  ;;  %15105 = vmatpush3.msk.msra.mxu1 %vm8682_vm3, %v12470_v17 }
0x1d2c   :  { %14413 = vmatmul.mubr.msk.f32.vlgmr.msra.gmra.mrb[0].mxu0 %vm8672_vm4, %v12471_v18  ;;  %14988 = vmatprep.subr.bf16.mxu0 %v15309_v6 }
0x1d2d   :  { %14415 = vmatprep.mubr.msk.f32.mxu0 %vm15310_vm14, %v15311_v9  ;;  %14990 = vmatpush3.bf16.msk.msra.mxu0 %vm18049_vm2, %v15312_v16 }
0x1d2e   :  { %14419 = vmatmul.mubr.msk.f32.vlgmr.msra.gmra.mrb[0].mxu1 %vm8672_vm4, %v12473_v19  ;;  %14985 = vmatprep.subr.bf16.mxu1 %v15309_v6 }
0x1d2f   :  { %14987 = vmatpush3.bf16.msk.msra.mxu1 %vm18049_vm2, %v15312_v16  ;;  %14440 = vmatprep.subr.mxu0 %v15311_v9 }
0x1d30   :  { %14416 = vmatmul.mubr.msk.f32.gmra.mrb[2].mxu0 %vm8672_vm4, %v12472_v20  ;;  %14425 = vmatprep.subr.mxu1 %v15311_v9 }
0x1d31   :  { %14441 = vmatpush3.msk.msra.mxu0 %vm8682_vm3, %v12470_v17  ;;  %14427 = vmatprep.mubr.msk.f32.mxu1 %vm15310_vm14, %v15311_v9 }
0x1d32   :  { %14442 = vmatprep.mubr.msk.f32.mxu0 %vm15310_vm14, %v15311_v9 }
0x1d33   :  { %14426 = vmatpush3.msk.msra.mxu1 %vm8682_vm3, %v12470_v17 }
0x1d34   :  { %14428 = vmatmul.mubr.msk.f32.vlgmr.msra.gmra.mrb[2].mxu1 %vm8672_vm4, %v12483_v21  ;;  %14443 = vmatmul.mubr.msk.f32.vlgmr.msra.gmra.mrb[4].mxu0 %vm8672_vm4, %v12495_v22 }
0x1d35   :  { %14430 = vmatprep.mubr.msk.f32.mxu1 %vm15310_vm14, %v15311_v9  ;;  %14445 = vmatprep.mubr.msk.f32.mxu0 %vm15310_vm14, %v15311_v9 }
0x1d38   :  { %14431 = vmatmul.mubr.msk.f32.gmra.mrb[4].mxu1 %vm8672_vm4, %v12484_v23  ;;  %14446 = vmatmul.mubr.msk.f32.gmra.mrb[6].mxu0 %vm8672_vm4, %v12496_v24 }
0x1d39   :  { %14433 = vmatprep.mubr.msk.f32.mxu1 %vm15310_vm14, %v15311_v9  ;;  %14448 = vmatprep.mubr.msk.f32.mxu0 %vm15310_vm14, %v15311_v9 }
0x1d3c   :  { %14434 = vmatmul.mubr.msk.f32.gmra.mrb[6].mxu1 %vm8672_vm4, %v12485_v25  ;;  %14449 = vmatmul.mubr.msk.f32.gmra.mrb[8].mxu0 %vm8672_vm4, %v12497_v26 }
0x1dff   :  { %v8752_v27 = vpop.f32.mrb[0].mxu0 }
0x1e00   :  { %8766 = vxpose.xlu0.b32.start [1/3] (short) (narrow) %v8752_v27, 24  ;;  %v14414_v28 = vpop.f32.mrb[1].mxu0 }
0x1e01   :  { %v8762_v29 = vpop.f32.mrb[0].mxu1 }
0x1e02   :  { %v14420_v30 = vpop.f32.mrb[1].mxu1 }
0x1e03   :  { %v8757_v31 = vpop.f32.mrb[2].mxu0 }
0x1e04   :  { %8767 = vxpose.xlu0.b32.cont [2/3] (short) (narrow) %v8757_v31, 24  ;;  %v14417_v32 = vpop.f32.mrb[3].mxu0 }
0x1e07   :  { %v8882_v33 = vpop.f32.mrb[2].mxu1  ;;  %v9011_v34 = vpop.f32.mrb[4].mxu0 }
0x1e08   :  { %8768 = vxpose.xlu0.b32.end [3/3] (short) (narrow) %v8762_v29, 24  ;;  %v14429_v35 = vpop.f32.mrb[3].mxu1  ;;  %v14444_v36 = vpop.f32.mrb[5].mxu0  ;;  %8896 = vxpose.xlu1.b32.start [1/3] (short) (narrow) %v8882_v33, 24 }
0x1e0b   :  { %v8887_v37 = vpop.f32.mrb[4].mxu1  ;;  %v9016_v38 = vpop.f32.mrb[6].mxu0 }
0x1e0c   :  { %9025 = vxpose.xlu0.b32.start [1/3] (short) (narrow) %v9011_v34, 24  ;;  %v14432_v39 = vpop.f32.mrb[5].mxu1  ;;  %v14447_v40 = vpop.f32.mrb[7].mxu0  ;;  %8897 = vxpose.xlu1.b32.cont [2/3] (short) (narrow) %v8887_v37, 24 }
0x1e0f   :  { %v8892_v41 = vpop.f32.mrb[6].mxu1  ;;  %v9021_v42 = vpop.f32.mrb[8].mxu0 }
0x1e10   :  { %9026 = vxpose.xlu0.b32.cont [2/3] (short) (narrow) %v9016_v38, 24  ;;  %v14435_v43 = vpop.f32.mrb[7].mxu1  ;;  %v14450_v44 = vpop.f32.mrb[9].mxu0  ;;  %8898 = vxpose.xlu1.b32.end [3/3] (short) (narrow) %v8892_v41, 24 }
0x1e14   :  { %9027 = vxpose.xlu0.b32.end [3/3] (short) (narrow) %v9021_v42, 24 }
0x1e80   :  { %v8782_v45 = vpop.trf.xlu0 }
0x1e81   :  { %12480 = vst.msk [vmem:[%s18884_s3 + $0x1b0] sm:$0xff] %vm8672_vm4, %v8782_v45 }
0x1e84   :  { %v8783_v46 = vpop.trf.xlu0 }
0x1e85   :  { %12481 = vst.msk [vmem:[%s18884_s3 + $0x1b8] sm:$0xff] %vm8672_vm4, %v8783_v46 }
0x1e88   :  { %v8784_v47 = vpop.trf.xlu0  ;;  %v8912_v48 = vpop.trf.xlu1 }
0x1e89   :  { %12482 = vst.msk [vmem:[%s18884_s3 + $0x1c0] sm:$0x1] %vm8801_vm5, %v8784_v47 }
0x1e8a   :  { %12492 = vst.msk [vmem:[%s18884_s3 + $0x1c8] sm:$0xff] %vm8672_vm4, %v8912_v48 }
0x1e8c   :  { %v9041_v49 = vpop.trf.xlu0  ;;  %v8913_v50 = vpop.trf.xlu1 }
0x1e8d   :  { %12504 = vst.msk [vmem:[%s18884_s3 + $0x1e0] sm:$0xff] %vm8672_vm4, %v9041_v49  ;;  %12493 = vst.msk [vmem:[%s18884_s3 + $0x1d0] sm:$0xff] %vm8672_vm4, %v8913_v50 }
0x1e90   :  { %v9042_v51 = vpop.trf.xlu0  ;;  %v8914_v52 = vpop.trf.xlu1 }
0x1e91   :  { %12505 = vst.msk [vmem:[%s18884_s3 + $0x1e8] sm:$0xff] %vm8672_vm4, %v9042_v51 }
0x1e92   :  { %12494 = vst.msk [vmem:[%s18884_s3 + $0x1d8] sm:$0x1] %vm8801_vm5, %v8914_v52 }
0x1e94   :  { %v9043_v53 = vpop.trf.xlu0 }
0x1e95   :  { %12506 = vst.msk [vmem:[%s18884_s3 + $0x1f0] sm:$0x1] %vm8801_vm5, %v9043_v53 }
0x1e96 PF:  { %p12507_p3 = scmp.ne.s32.totalorder %s15377_s25, 2 }
0x1e97   :  { %v9065_v54 = vlaneseq (!%p12507_p3)  ;;  %v15313_v55 = vmov (!%p12507_p3), 0.0|0.0   ;;  %vm15314_vm6 = vmmov (!%p12507_p3), 0   ;;  %v15315_v58 = vmov (!%p12507_p3), 0.0   ;;  %v12511_v3 = vld [vmem:[%s18882_s1 + $0x1b0] sm:$0xff] (!%p12507_p3)  ;;  %v12512_v4 = vld [vmem:[%s18882_s1 + $0x1b8] sm:$0xff] (!%p12507_p3)  ;;  %v12527_v6 = vld [vmem:[%s18882_s1 + $0x1c8] sm:$0xff] (!%p12507_p3) }
0x1e98   :  { %9064 = sbr.rel (%p12507_p3) target bundleno = 8314 (0x207a), region = 117  ;;  %14991 = vmatprep.subr.bf16.mxu0 (!%p12507_p3), %v15313_v55  ;;  %14994 = vmatprep.subr.bf16.mxu1 (!%p12507_p3), %v15313_v55  ;;  %v15316_v1 = vmov (!%p12507_p3), 1.0|1.0   ;;  %vm9097_vm11 = vcmask (!%p12507_p3), 1040384   ;;  %vm9087_vm12 = vcmask (!%p12507_p3), 138240   ;;  %v12528_v7 = vld [vmem:[%s18882_s1 + $0x1d0] sm:$0xff] (!%p12507_p3) }
0x1e99   :  { %v9066_v56 = vshrl.u32 (!%p12507_p3), %v9065_v54, 7  ;;  %v9070_v57 = vand.u32 (!%p12507_p3), 127, %v9065_v54  ;;  %14457 = vmatprep.mubr.msk.f32.mxu0 (!%p12507_p3), %vm15314_vm6, %v15315_v58  ;;  %14472 = vmatprep.mubr.msk.f32.mxu1 (!%p12507_p3), %vm15314_vm6, %v15315_v58  ;;  %v12513_v5 = vld [vmem:[%s18882_s1 + $0x1c0] sm:$0x1] (!%p12507_p3)  ;;  %v12529_v8 = vld [vmem:[%s18882_s1 + $0x1d8] sm:$0x1] (!%p12507_p3) }
0x1e9a   :  { %v12543_v9 = vld [vmem:[%s18882_s1 + $0x1e0] sm:$0xff] (!%p12507_p3)  ;;  %v12544_v10 = vld [vmem:[%s18882_s1 + $0x1e8] sm:$0xff] (!%p12507_p3)  ;;  %v12545_v11 = vld [vmem:[%s18882_s1 + $0x1f0] sm:$0x1] (!%p12507_p3)  ;;  %vm9275_vm13 = vcmask (!%p12507_p3), 131072  }
0x1e9b   :  { %v9067_v59 = vadd.s32 (!%p12507_p3), 8, %v9066_v56  ;;  %v9071_v60 = vadd.s32 (!%p12507_p3), %v9070_v57, %v9066_v56  ;;  %v9068_v61 = vadd.s32 (!%p12507_p3), 16, %v9066_v56 }
0x1e9d   :  { %v18148_v62 = vadd.s32 (!%p12507_p3), %v9070_v57, %v9067_v59  ;;  %vm9074_vm7 = vcmp.eq.s32.totalorder (!%p12507_p3), %v9071_v60, 16  ;;  %v9073_v63 = vadd.s32 (!%p12507_p3), %v9070_v57, %v9068_v61 }
0x1e9e   :  { %v12508_v19 = vsel (!%p12507_p3), %vm9074_vm7, 1.0, %v15315_v58 }
0x1e9f   :  { %vm9075_vm8 = vcmp.eq.s32.totalorder %v18148_v62, 16  ;;  %vm9076_vm9 = vcmp.eq.s32.totalorder %v9073_v63, 16 }
0x1ea0   :  { %vm18154_vm10 = vmpackc.low %vm9075_vm8, %vm9074_vm7  ;;  %v18162_v2 = vsel %vm9076_vm9, 1.0, %v15315_v58  ;;  %v12509_v22 = vsel %vm9075_vm8, 1.0, %v15315_v58 }
0x1ea1   :  { %14993 = vmatpush3.bf16.msk.msra.mxu0 %vm18154_vm10, %v15316_v1 }
0x1ea2   :  { %14455 = vmatprep.subr.mxu0 %v15315_v58 }
0x1ea5   :  { %14456 = vmatpush3.msk.msra.mxu0 %vm9097_vm11, %v18162_v2 }
0x1ea6   :  { %14458 = vmatmul.mubr.msk.f32.vlgmr.msra.gmra.mrb[0].mxu0 %vm9087_vm12, %v12511_v3  ;;  %14997 = vmatprep.subr.bf16.mxu0 %v15313_v55 }
0x1ea7   :  { %14460 = vmatprep.mubr.msk.f32.mxu0 %vm15314_vm6, %v15315_v58  ;;  %14999 = vmatpush3.bf16.msk.msra.mxu0 %vm18154_vm10, %v15316_v1 }
0x1ea8   :  { %14485 = vmatprep.subr.mxu0 %v15315_v58 }
0x1eaa   :  { %14461 = vmatmul.mubr.msk.f32.gmra.mrb[2].mxu0 %vm9087_vm12, %v12512_v4 }
0x1eab   :  { %14463 = vmatprep.mubr.msk.f32.mxu0 %vm15314_vm6, %v15315_v58  ;;  %14486 = vmatpush3.msk.msra.mxu0 %vm9097_vm11, %v18162_v2 }
0x1eac   :  { %15003 = vmatprep.subr.bf16.mxu0 %v15313_v55 }
0x1eae   :  { %14464 = vmatmul.mubr.msk.f32.gmra.mrb[4].mxu0 %vm9087_vm12, %v12513_v5 }
0x1eaf   :  { %14487 = vmatprep.mubr.msk.f32.mxu0 %vm15314_vm6, %v15315_v58 }
0x1eb2   :  { %14488 = vmatmul.mubr.msk.f32.vlgmr.msra.gmra.mrb[6].mxu0 %vm9087_vm12, %v12527_v6 }
0x1eb3   :  { %14490 = vmatprep.mubr.msk.f32.mxu0 %vm15314_vm6, %v15315_v58  ;;  %15005 = vmatpush3.bf16.msk.msra.mxu0 %vm18154_vm10, %v15316_v1 }
0x1eb4   :  { %14515 = vmatprep.subr.mxu0 %v15315_v58 }
0x1eb6   :  { %14491 = vmatmul.mubr.msk.f32.gmra.mrb[8].mxu0 %vm9087_vm12, %v12528_v7 }
0x1eb7   :  { %14493 = vmatprep.mubr.msk.f32.mxu0 %vm15314_vm6, %v15315_v58  ;;  %14516 = vmatpush3.msk.msra.mxu0 %vm9097_vm11, %v18162_v2 }
0x1eba   :  { %14494 = vmatmul.mubr.msk.f32.gmra.mrb[10].mxu0 %vm9087_vm12, %v12529_v8 }
0x1ebb   :  { %14517 = vmatprep.mubr.msk.f32.mxu0 %vm15314_vm6, %v15315_v58 }
0x1ebe   :  { %14518 = vmatmul.mubr.msk.f32.vlgmr.msra.gmra.mrb[12].mxu0 %vm9087_vm12, %v12543_v9 }
0x1ebf   :  { %14520 = vmatprep.mubr.msk.f32.mxu0 %vm15314_vm6, %v15315_v58 }
0x1ec2   :  { %14521 = vmatmul.mubr.msk.f32.gmra.mrb[14].mxu0 %vm9087_vm12, %v12544_v10 }
0x1ec3   :  { %14523 = vmatprep.mubr.msk.f32.mxu0 %vm15314_vm6, %v15315_v58 }
0x1ec6   :  { %14524 = vmatmul.mubr.msk.f32.gmra.mrb[16].mxu0 %vm9087_vm12, %v12545_v11 }
0x1f79   :  { %v9167_v12 = vpop.f32.mrb[0].mxu0 }
0x1f7a   :  { %v14459_v13 = vpop.f32.mrb[1].mxu0 }
0x1f7d   :  { %v9172_v14 = vpop.f32.mrb[2].mxu0 }
0x1f7e   :  { %v14995_v15 = vpack.c.bf16 %v9172_v14, %v9167_v12  ;;  %v14462_v16 = vpop.f32.mrb[3].mxu0 }
0x1f80   :  { %14996 = vmatpush3.bf16.msra.mxu1 %v14995_v15 }
0x1f81   :  { %v9177_v17 = vpop.f32.mrb[4].mxu0  ;;  %14470 = vmatprep.subr.mxu1 %v15315_v58 }
0x1f82   :  { %v14465_v18 = vpop.f32.mrb[5].mxu0 }
0x1f84   :  { %14471 = vmatpush3.msk.msra.mxu1 %vm9097_vm11, %v9177_v17 }
0x1f85   :  { %v9356_v20 = vpop.f32.mrb[6].mxu0  ;;  %14473 = vmatmul.mubr.msk.f32.vlgmr.msra.gmra.mrb[0].mxu1 %vm9087_vm12, %v12508_v19  ;;  %15000 = vmatprep.subr.bf16.mxu1 %v15313_v55 }
0x1f86   :  { %v14489_v21 = vpop.f32.mrb[7].mxu0  ;;  %14475 = vmatprep.mubr.msk.f32.mxu1 %vm15314_vm6, %v15315_v58 }
0x1f89   :  { %v9361_v23 = vpop.f32.mrb[8].mxu0  ;;  %14476 = vmatmul.mubr.msk.f32.gmra.mrb[2].mxu1 %vm9087_vm12, %v12509_v22 }
0x1f8a   :  { %v15001_v24 = vpack.c.bf16 %v9361_v23, %v9356_v20  ;;  %v14492_v25 = vpop.f32.mrb[9].mxu0  ;;  %14478 = vmatprep.mubr.msk.f32.mxu1 %vm15314_vm6, %v15315_v58 }
0x1f8c   :  { %15002 = vmatpush3.bf16.msra.mxu1 %v15001_v24 }
0x1f8d   :  { %v9366_v26 = vpop.f32.mrb[10].mxu0  ;;  %14500 = vmatprep.subr.mxu1 %v15315_v58  ;;  %14479 = vmatmul.mubr.msk.f32.gmra.mrb[4].mxu1 %vm9087_vm12, %v18162_v2 }
0x1f8e   :  { %v14495_v27 = vpop.f32.mrb[11].mxu0  ;;  %14502 = vmatprep.mubr.msk.f32.mxu1 %vm15314_vm6, %v15315_v58 }
0x1f90   :  { %14501 = vmatpush3.msk.msra.mxu1 %vm9097_vm11, %v9366_v26 }
0x1f91   :  { %v9536_v28 = vpop.f32.mrb[12].mxu0  ;;  %14503 = vmatmul.mubr.msk.f32.vlgmr.msra.gmra.mrb[6].mxu1 %vm9087_vm12, %v12508_v19  ;;  %15006 = vmatprep.subr.bf16.mxu1 %v15313_v55 }
0x1f92   :  { %v14519_v29 = vpop.f32.mrb[13].mxu0  ;;  %14505 = vmatprep.mubr.msk.f32.mxu1 %vm15314_vm6, %v15315_v58 }
0x1f95   :  { %v9541_v30 = vpop.f32.mrb[14].mxu0  ;;  %14506 = vmatmul.mubr.msk.f32.gmra.mrb[8].mxu1 %vm9087_vm12, %v12509_v22 }
0x1f96   :  { %v15007_v31 = vpack.c.bf16 %v9541_v30, %v9536_v28  ;;  %v14522_v32 = vpop.f32.mrb[15].mxu0  ;;  %14508 = vmatprep.mubr.msk.f32.mxu1 %vm15314_vm6, %v15315_v58 }
0x1f98   :  { %15008 = vmatpush3.bf16.msra.mxu1 %v15007_v31 }
0x1f99   :  { %v9546_v33 = vpop.f32.mrb[16].mxu0  ;;  %14530 = vmatprep.subr.mxu1 %v15315_v58  ;;  %14509 = vmatmul.mubr.msk.f32.gmra.mrb[10].mxu1 %vm9087_vm12, %v18162_v2 }
0x1f9a   :  { %v14525_v34 = vpop.f32.mrb[17].mxu0  ;;  %14532 = vmatprep.mubr.msk.f32.mxu1 %vm15314_vm6, %v15315_v58 }
0x1f9c   :  { %14531 = vmatpush3.msk.msra.mxu1 %vm9097_vm11, %v9546_v33 }
0x1f9d   :  { %14533 = vmatmul.mubr.msk.f32.vlgmr.msra.gmra.mrb[12].mxu1 %vm9087_vm12, %v12508_v19 }
0x1f9e   :  { %14535 = vmatprep.mubr.msk.f32.mxu1 %vm15314_vm6, %v15315_v58 }
0x1fa1   :  { %14536 = vmatmul.mubr.msk.f32.gmra.mrb[14].mxu1 %vm9087_vm12, %v12509_v22 }
0x1fa2   :  { %14538 = vmatprep.mubr.msk.f32.mxu1 %vm15314_vm6, %v15315_v58 }
0x1fa5   :  { %14539 = vmatmul.mubr.msk.f32.gmra.mrb[16].mxu1 %vm9087_vm12, %v18162_v2 }
0x2058   :  { %v9258_v35 = vpop.f32.mrb[0].mxu1 }
0x2059   :  { %12524 = vst.msk [vmem:[%s18884_s3 + $0x1b0] sm:$0xff] %vm9087_vm12, %v9258_v35  ;;  %v14474_v36 = vpop.f32.mrb[1].mxu1 }
0x205c   :  { %v9263_v37 = vpop.f32.mrb[2].mxu1 }
0x205d   :  { %12525 = vst.msk [vmem:[%s18884_s3 + $0x1b8] sm:$0xff] %vm9087_vm12, %v9263_v37  ;;  %v14477_v38 = vpop.f32.mrb[3].mxu1 }
0x2060   :  { %v9268_v39 = vpop.f32.mrb[4].mxu1 }
0x2061   :  { %12526 = vst.msk [vmem:[%s18884_s3 + $0x1c0] sm:$0x1] %vm9275_vm13, %v9268_v39  ;;  %v14480_v40 = vpop.f32.mrb[5].mxu1 }
0x2064   :  { %v9439_v41 = vpop.f32.mrb[6].mxu1 }
0x2065   :  { %12540 = vst.msk [vmem:[%s18884_s3 + $0x1c8] sm:$0xff] %vm9087_vm12, %v9439_v41  ;;  %v14504_v42 = vpop.f32.mrb[7].mxu1 }
0x2068   :  { %v9444_v43 = vpop.f32.mrb[8].mxu1 }
0x2069   :  { %12541 = vst.msk [vmem:[%s18884_s3 + $0x1d0] sm:$0xff] %vm9087_vm12, %v9444_v43  ;;  %v14507_v44 = vpop.f32.mrb[9].mxu1 }
0x206c   :  { %v9449_v45 = vpop.f32.mrb[10].mxu1 }
0x206d   :  { %12542 = vst.msk [vmem:[%s18884_s3 + $0x1d8] sm:$0x1] %vm9275_vm13, %v9449_v45  ;;  %v14510_v46 = vpop.f32.mrb[11].mxu1 }
0x2070   :  { %v9619_v47 = vpop.f32.mrb[12].mxu1 }
0x2071   :  { %12556 = vst.msk [vmem:[%s18884_s3 + $0x1e0] sm:$0xff] %vm9087_vm12, %v9619_v47  ;;  %v14534_v48 = vpop.f32.mrb[13].mxu1 }
0x2074   :  { %v9624_v49 = vpop.f32.mrb[14].mxu1 }
0x2075   :  { %12557 = vst.msk [vmem:[%s18884_s3 + $0x1e8] sm:$0xff] %vm9087_vm12, %v9624_v49  ;;  %v14537_v50 = vpop.f32.mrb[15].mxu1 }
0x2078   :  { %v9629_v51 = vpop.f32.mrb[16].mxu1 }
0x2079   :  { %12558 = vst.msk [vmem:[%s18884_s3 + $0x1f0] sm:$0x1] %vm9275_vm13, %v9629_v51  ;;  %v14540_v52 = vpop.f32.mrb[17].mxu1 }
0x207a PF:  { %p12559_p4 = scmp.ne.s32.totalorder %s15377_s25, 3 }
0x207b   :  { %v12563_v53 = vld [vmem:[%s18882_s1 + $0x1b0] sm:$0xff] (!%p12559_p4)  ;;  %v9641_v54 = vlaneseq (!%p12559_p4)  ;;  %v12575_v55 = vld [vmem:[%s18882_s1 + $0x1c8] sm:$0xff] (!%p12559_p4)  ;;  %v15317_v56 = vmov (!%p12559_p4), 0.0|0.0   ;;  %v12564_v57 = vld [vmem:[%s18882_s1 + $0x1b8] sm:$0xff] (!%p12559_p4)  ;;  %vm15318_vm14 = vmmov (!%p12559_p4), 0   ;;  %v15319_v61 = vmov (!%p12559_p4), 0.0  }
0x207c   :  { %9640 = sbr.rel (%p12559_p4) target bundleno = 8680 (0x21e8), region = 121  ;;  %9663 = vxpose.xlu0.b32.start [1/3] (short) (narrow) (!%p12559_p4), %v12563_v53, 24  ;;  %15009 = vmatprep.subr.bf16.mxu0 (!%p12559_p4), %v15317_v56  ;;  %v12576_v58 = vld [vmem:[%s18882_s1 + $0x1d0] sm:$0xff] (!%p12559_p4)  ;;  %v12565_v1 = vld [vmem:[%s18882_s1 + $0x1c0] sm:$0x1] (!%p12559_p4)  ;;  %vm9705_vm3 = vcmask (!%p12559_p4), 1040384  }
0x207d   :  { %9798 = vxpose.xlu1.b32.start [1/3] (short) (narrow) (!%p12559_p4), %v12575_v55, 24  ;;  %15106 = vmatprep.subr.bf16.mxu1 (!%p12559_p4), %v15317_v56  ;;  %v9642_v59 = vshrl.u32 (!%p12559_p4), %v9641_v54, 7  ;;  %v9646_v60 = vand.u32 (!%p12559_p4), 127, %v9641_v54  ;;  %v12577_v2 = vld [vmem:[%s18882_s1 + $0x1d8] sm:$0x1] (!%p12559_p4)  ;;  %v12587_v5 = vld [vmem:[%s18882_s1 + $0x1e0] sm:$0xff] (!%p12559_p4) }
0x207e   :  { %14547 = vmatprep.mubr.msk.f32.mxu0 (!%p12559_p4), %vm15318_vm14, %v15319_v61  ;;  %14553 = vmatprep.mubr.msk.f32.mxu1 (!%p12559_p4), %vm15318_vm14, %v15319_v61  ;;  %v15320_v7 = vmov (!%p12559_p4), 1.0|1.0   ;;  %v12588_v9 = vld [vmem:[%s18882_s1 + $0x1e8] sm:$0xff] (!%p12559_p4)  ;;  %v12589_v10 = vld [vmem:[%s18882_s1 + $0x1f0] sm:$0x1] (!%p12559_p4)  ;;  %vm9695_vm4 = vcmask (!%p12559_p4), 138240  }
0x207f   :  { %v9643_v62 = vadd.s32 (!%p12559_p4), 8, %v9642_v59  ;;  %v9647_v63 = vadd.s32 (!%p12559_p4), %v9646_v60, %v9642_v59  ;;  %v9644_v0 = vadd.s32 (!%p12559_p4), 16, %v9642_v59  ;;  %vm9792_vm5 = vcmask (!%p12559_p4), 131072  }
0x2080   :  { %9664 = vxpose.xlu0.b32.cont [2/3] (short) (narrow) (!%p12559_p4), %v12564_v57, 24 }
0x2081   :  { %9799 = vxpose.xlu1.b32.cont [2/3] (short) (narrow) (!%p12559_p4), %v12576_v58, 24  ;;  %v9648_v3 = vadd.s32 (!%p12559_p4), %v9646_v60, %v9643_v62  ;;  %vm9650_vm15 = vcmp.eq.s32.totalorder (!%p12559_p4), %v9647_v63, 16  ;;  %v9649_v4 = vadd.s32 (!%p12559_p4), %v9646_v60, %v9644_v0 }
0x2083   :  { %vm9651_vm0 = vcmp.eq.s32.totalorder %v9648_v3, 16  ;;  %vm9652_vm1 = vcmp.eq.s32.totalorder %v9649_v4, 16 }
0x2084   :  { %9665 = vxpose.xlu0.b32.end [3/3] (short) (narrow) %v12565_v1, 24  ;;  %vm18333_vm2 = vmpackc.low %vm9651_vm0, %vm9650_vm15  ;;  %v12562_v8 = vsel %vm9652_vm1, 1.0, %v15319_v61 }
0x2085   :  { %9800 = vxpose.xlu1.b32.end [3/3] (short) (narrow) %v12577_v2, 24  ;;  %15011 = vmatpush3.bf16.msk.msra.mxu0 %vm18333_vm2, %v15320_v7 }
0x2086   :  { %15108 = vmatpush3.bf16.msk.msra.mxu1 %vm18333_vm2, %v15320_v7  ;;  %14545 = vmatprep.subr.mxu0 %v15319_v61 }
0x2087   :  { %15107 = vmatprep.subr.mxu1 %v15319_v61 }
0x2088   :  { %9927 = vxpose.xlu0.b32.start [1/3] (short) (narrow) %v12587_v5, 24 }
0x2089   :  { %14546 = vmatpush3.msk.msra.mxu0 %vm9705_vm3, %v12562_v8 }
0x208a   :  { %15109 = vmatpush3.msk.msra.mxu1 %vm9705_vm3, %v12562_v8  ;;  %15015 = vmatprep.subr.bf16.mxu0 %v15317_v56 }
0x208b   :  { %15012 = vmatprep.subr.bf16.mxu1 %v15317_v56 }
0x208c   :  { %9928 = vxpose.xlu0.b32.cont [2/3] (short) (narrow) %v12588_v9, 24 }
0x2090   :  { %9929 = vxpose.xlu0.b32.end [3/3] (short) (narrow) %v12589_v10, 24 }
0x20fc   :  { %v9679_v11 = vpop.trf.xlu0 }
0x20fd   :  { %14548 = vmatmul.mubr.msk.f32.vlgmr.msra.gmra.mrb[0].mxu0 %vm9695_vm4, %v9679_v11  ;;  %v9814_v14 = vpop.trf.xlu1 }
0x20fe   :  { %14550 = vmatprep.mubr.msk.f32.mxu0 %vm15318_vm14, %v15319_v61  ;;  %15017 = vmatpush3.bf16.msk.msra.mxu0 %vm18333_vm2, %v15320_v7 }
0x20ff   :  { %14575 = vmatprep.subr.mxu0 %v15319_v61 }
0x2100   :  { %v9680_v12 = vpop.trf.xlu0 }
0x2101   :  { %14551 = vmatmul.mubr.msk.f32.gmra.mrb[2].mxu0 %vm9695_vm4, %v9680_v12  ;;  %v9815_v16 = vpop.trf.xlu1 }
0x2102   :  { %14576 = vmatpush3.msk.msra.mxu0 %vm9705_vm3, %v12562_v8  ;;  %14577 = vmatprep.mubr.msk.f32.mxu0 %vm15318_vm14, %v15319_v61 }
0x2104   :  { %v9681_v13 = vpop.trf.xlu0 }
0x2105   :  { %14554 = vmatmul.mubr.msk.f32.vlgmr.msra.gmra.mrb[0].mxu1 %vm9695_vm4, %v9681_v13  ;;  %v9816_v18 = vpop.trf.xlu1 }
0x2106   :  { %15014 = vmatpush3.bf16.msk.msra.mxu1 %vm18333_vm2, %v15320_v7  ;;  %14562 = vmatprep.mubr.msk.f32.mxu1 %vm15318_vm14, %v15319_v61 }
0x2107   :  { %14560 = vmatprep.subr.mxu1 %v15319_v61 }
0x2108   :  { %v9943_v15 = vpop.trf.xlu0 }
0x2109   :  { %14578 = vmatmul.mubr.msk.f32.vlgmr.msra.gmra.mrb[4].mxu0 %vm9695_vm4, %v9943_v15 }
0x210a   :  { %14561 = vmatpush3.msk.msra.mxu1 %vm9705_vm3, %v12562_v8  ;;  %14580 = vmatprep.mubr.msk.f32.mxu0 %vm15318_vm14, %v15319_v61 }
0x210b   :  { %14563 = vmatmul.mubr.msk.f32.vlgmr.msra.gmra.mrb[2].mxu1 %vm9695_vm4, %v9814_v14 }
0x210c   :  { %v9944_v17 = vpop.trf.xlu0  ;;  %14565 = vmatprep.mubr.msk.f32.mxu1 %vm15318_vm14, %v15319_v61 }
0x210d   :  { %14581 = vmatmul.mubr.msk.f32.gmra.mrb[6].mxu0 %vm9695_vm4, %v9944_v17 }
0x210e   :  { %14583 = vmatprep.mubr.msk.f32.mxu0 %vm15318_vm14, %v15319_v61 }
0x210f   :  { %14566 = vmatmul.mubr.msk.f32.gmra.mrb[4].mxu1 %vm9695_vm4, %v9815_v16 }
0x2110   :  { %v9945_v19 = vpop.trf.xlu0  ;;  %14568 = vmatprep.mubr.msk.f32.mxu1 %vm15318_vm14, %v15319_v61 }
0x2111   :  { %14584 = vmatmul.mubr.msk.f32.gmra.mrb[8].mxu0 %vm9695_vm4, %v9945_v19 }
0x2113   :  { %14569 = vmatmul.mubr.msk.f32.gmra.mrb[6].mxu1 %vm9695_vm4, %v9816_v18 }
0x21d0   :  { %v9775_v20 = vpop.f32.mrb[0].mxu0 }
0x21d1   :  { %12572 = vst.msk [vmem:[%s18884_s3 + $0x1b0] sm:$0xff] %vm9695_vm4, %v9775_v20  ;;  %v14549_v21 = vpop.f32.mrb[1].mxu0 }
0x21d4   :  { %v9780_v22 = vpop.f32.mrb[2].mxu0 }
0x21d5   :  { %12573 = vst.msk [vmem:[%s18884_s3 + $0x1b8] sm:$0xff] %vm9695_vm4, %v9780_v22  ;;  %v14552_v23 = vpop.f32.mrb[3].mxu0 }
0x21d8   :  { %v9785_v24 = vpop.f32.mrb[0].mxu1 }
0x21d9   :  { %12574 = vst.msk [vmem:[%s18884_s3 + $0x1c0] sm:$0x1] %vm9792_vm5, %v9785_v24  ;;  %v14555_v25 = vpop.f32.mrb[1].mxu1 }
0x21dc   :  { %v10034_v26 = vpop.f32.mrb[4].mxu0 }
0x21dd   :  { %12596 = vst.msk [vmem:[%s18884_s3 + $0x1e0] sm:$0xff] %vm9695_vm4, %v10034_v26  ;;  %v14579_v27 = vpop.f32.mrb[5].mxu0 }
0x21de   :  { %v9905_v28 = vpop.f32.mrb[2].mxu1 }
0x21df   :  { %12584 = vst.msk [vmem:[%s18884_s3 + $0x1c8] sm:$0xff] %vm9695_vm4, %v9905_v28  ;;  %v14564_v29 = vpop.f32.mrb[3].mxu1 }
0x21e0   :  { %v10039_v30 = vpop.f32.mrb[6].mxu0 }
0x21e1   :  { %12597 = vst.msk [vmem:[%s18884_s3 + $0x1e8] sm:$0xff] %vm9695_vm4, %v10039_v30  ;;  %v14582_v31 = vpop.f32.mrb[7].mxu0 }
0x21e2   :  { %v9910_v32 = vpop.f32.mrb[4].mxu1 }
0x21e3   :  { %12585 = vst.msk [vmem:[%s18884_s3 + $0x1d0] sm:$0xff] %vm9695_vm4, %v9910_v32  ;;  %v14567_v33 = vpop.f32.mrb[5].mxu1 }
0x21e4   :  { %v10044_v34 = vpop.f32.mrb[8].mxu0 }
0x21e5   :  { %12598 = vst.msk [vmem:[%s18884_s3 + $0x1f0] sm:$0x1] %vm9792_vm5, %v10044_v34  ;;  %v14585_v35 = vpop.f32.mrb[9].mxu0 }
0x21e6   :  { %v9915_v36 = vpop.f32.mrb[6].mxu1 }
0x21e7   :  { %12586 = vst.msk [vmem:[%s18884_s3 + $0x1d8] sm:$0x1] %vm9792_vm5, %v9915_v36  ;;  %v14570_v37 = vpop.f32.mrb[7].mxu1 }
0x21e8 PF:  { %p12599_p5 = scmp.ne.s32.totalorder %s15379_s26, 0 }
0x21e9   :  { %v12600_v38 = vld [vmem:[%s18882_s1 + $0x1f8] sm:$0xff] (!%p12599_p5)  ;;  %vm10067_vm6 = vcmask (!%p12599_p5), 138240   ;;  %v12601_v39 = vld [vmem:[%s18882_s1 + $0x200] sm:$0xff] (!%p12599_p5)  ;;  %v12602_v40 = vld [vmem:[%s18882_s1 + $0x208] sm:$0x1] (!%p12599_p5)  ;;  %vm10070_vm7 = vcmask (!%p12599_p5), 131072  }
0x21ea   :  { %10055 = sbr.rel (%p12599_p5) target bundleno = 8689 (0x21f1), region = 125  ;;  %12609 = vst.msk [vmem:[%s18884_s3 + $0x1f8] sm:$0xff] (!%p12599_p5), %vm10067_vm6, %v12600_v38  ;;  %12610 = vst.msk [vmem:[%s18884_s3 + $0x200] sm:$0xff] (!%p12599_p5), %vm10067_vm6, %v12601_v39  ;;  %v12603_v41 = vld [vmem:[%s18882_s1 + $0x210] sm:$0xff] (!%p12599_p5)  ;;  %v12604_v42 = vld [vmem:[%s18882_s1 + $0x218] sm:$0xff] (!%p12599_p5) }
0x21eb   :  { %12611 = vst.msk [vmem:[%s18884_s3 + $0x208] sm:$0x1] (!%p12599_p5), %vm10070_vm7, %v12602_v40  ;;  %v12605_v43 = vld [vmem:[%s18882_s1 + $0x220] sm:$0x1] (!%p12599_p5)  ;;  %v12606_v44 = vld [vmem:[%s18882_s1 + $0x228] sm:$0xff] (!%p12599_p5)  ;;  %v12607_v45 = vld [vmem:[%s18882_s1 + $0x230] sm:$0xff] (!%p12599_p5) }
0x21ec   :  { %12612 = vst.msk [vmem:[%s18884_s3 + $0x210] sm:$0xff] (!%p12599_p5), %vm10067_vm6, %v12603_v41  ;;  %12613 = vst.msk [vmem:[%s18884_s3 + $0x218] sm:$0xff] (!%p12599_p5), %vm10067_vm6, %v12604_v42  ;;  %v12608_v46 = vld [vmem:[%s18882_s1 + $0x238] sm:$0x1] (!%p12599_p5) }
0x21ed   :  { %12614 = vst.msk [vmem:[%s18884_s3 + $0x220] sm:$0x1] (!%p12599_p5), %vm10070_vm7, %v12605_v43  ;;  %12617 = vst.msk [vmem:[%s18884_s3 + $0x238] sm:$0x1] (!%p12599_p5), %vm10070_vm7, %v12608_v46 }
0x21ee   :  { %12615 = vst.msk [vmem:[%s18884_s3 + $0x228] sm:$0xff] (!%p12599_p5), %vm10067_vm6, %v12606_v44  ;;  %12616 = vst.msk [vmem:[%s18884_s3 + $0x230] sm:$0xff] (!%p12599_p5), %vm10067_vm6, %v12607_v45 }
0x21f1 PF:  { %p12618_p6 = scmp.ne.s32.totalorder %s15379_s26, 1 }
0x21f2   :  { %v10082_v47 = vlaneseq (!%p12618_p6)  ;;  %v15321_v48 = vmov (!%p12618_p6), 0.0|0.0   ;;  %vm15322_vm8 = vmmov (!%p12618_p6), 0   ;;  %v15323_v51 = vmov (!%p12618_p6), 0.0   ;;  %v12622_v60 = vld [vmem:[%s18882_s1 + $0x1f8] sm:$0xff] (!%p12618_p6)  ;;  %v12624_v61 = vld [vmem:[%s18882_s1 + $0x208] sm:$0x1] (!%p12618_p6) }
0x21f3   :  { %10081 = sbr.rel (%p12618_p6) target bundleno = 9067 (0x236b), region = 129  ;;  %15018 = vmatprep.subr.bf16.mxu0 (!%p12618_p6), %v15321_v48  ;;  %15110 = vmatprep.subr.bf16.mxu1 (!%p12618_p6), %v15321_v48  ;;  %v15324_v58 = vmov (!%p12618_p6), 1.0|1.0   ;;  %vm10114_vm13 = vcmask (!%p12618_p6), 1040384   ;;  %vm10104_vm14 = vcmask (!%p12618_p6), 138240   ;;  %v12623_v62 = vld [vmem:[%s18882_s1 + $0x200] sm:$0xff] (!%p12618_p6) }
0x21f4   :  { %v10083_v49 = vshrl.u32 (!%p12618_p6), %v10082_v47, 7  ;;  %v10087_v50 = vand.u32 (!%p12618_p6), 127, %v10082_v47  ;;  %14592 = vmatprep.mubr.msk.f32.mxu0 (!%p12618_p6), %vm15322_vm8, %v15323_v51  ;;  %14598 = vmatprep.mubr.msk.f32.mxu1 (!%p12618_p6), %vm15322_vm8, %v15323_v51  ;;  %v12634_v63 = vld [vmem:[%s18882_s1 + $0x210] sm:$0xff] (!%p12618_p6)  ;;  %v12646_v0 = vld [vmem:[%s18882_s1 + $0x228] sm:$0xff] (!%p12618_p6)  ;;  %v12635_v1 = vld [vmem:[%s18882_s1 + $0x218] sm:$0xff] (!%p12618_p6)  ;;  %vm10233_vm15 = vcmask (!%p12618_p6), 131072  }
0x21f5   :  { %v12647_v2 = vld [vmem:[%s18882_s1 + $0x230] sm:$0xff] (!%p12618_p6)  ;;  %v12636_v3 = vld [vmem:[%s18882_s1 + $0x220] sm:$0x1] (!%p12618_p6)  ;;  %v12648_v4 = vld [vmem:[%s18882_s1 + $0x238] sm:$0x1] (!%p12618_p6) }
0x21f6   :  { %v10084_v52 = vadd.s32 (!%p12618_p6), 8, %v10083_v49  ;;  %v10088_v53 = vadd.s32 (!%p12618_p6), %v10087_v50, %v10083_v49  ;;  %v10085_v54 = vadd.s32 (!%p12618_p6), 16, %v10083_v49 }
0x21f8   :  { %v10089_v55 = vadd.s32 (!%p12618_p6), %v10087_v50, %v10084_v52  ;;  %vm10091_vm9 = vcmp.eq.s32.totalorder (!%p12618_p6), %v10088_v53, 16  ;;  %v10090_v56 = vadd.s32 (!%p12618_p6), %v10087_v50, %v10085_v54 }
0x21fa   :  { %vm10092_vm10 = vcmp.eq.s32.totalorder %v10089_v55, 16  ;;  %vm10093_vm11 = vcmp.eq.s32.totalorder %v10090_v56, 16 }
0x21fb   :  { %vm18483_vm12 = vmpackc.low %vm10092_vm10, %vm10091_vm9  ;;  %v12621_v59 = vsel %vm10093_vm11, 1.0, %v15323_v51 }
0x21fc   :  { %15020 = vmatpush3.bf16.msk.msra.mxu0 %vm18483_vm12, %v15324_v58  ;;  %15112 = vmatpush3.bf16.msk.msra.mxu1 %vm18483_vm12, %v15324_v58 }
0x21fd   :  { %14590 = vmatprep.subr.mxu0 %v15323_v51  ;;  %15111 = vmatprep.subr.mxu1 %v15323_v51 }
0x2200   :  { %14591 = vmatpush3.msk.msra.mxu0 %vm10114_vm13, %v12621_v59  ;;  %15113 = vmatpush3.msk.msra.mxu1 %vm10114_vm13, %v12621_v59 }
0x2201   :  { %14593 = vmatmul.mubr.msk.f32.vlgmr.msra.gmra.mrb[0].mxu0 %vm10104_vm14, %v12622_v60  ;;  %15024 = vmatprep.subr.bf16.mxu0 %v15321_v48 }
0x2202   :  { %14595 = vmatprep.mubr.msk.f32.mxu0 %vm15322_vm8, %v15323_v51  ;;  %15026 = vmatpush3.bf16.msk.msra.mxu0 %vm18483_vm12, %v15324_v58 }
0x2203   :  { %14599 = vmatmul.mubr.msk.f32.vlgmr.msra.gmra.mrb[0].mxu1 %vm10104_vm14, %v12624_v61  ;;  %15021 = vmatprep.subr.bf16.mxu1 %v15321_v48 }
0x2204   :  { %15023 = vmatpush3.bf16.msk.msra.mxu1 %vm18483_vm12, %v15324_v58  ;;  %14620 = vmatprep.subr.mxu0 %v15323_v51 }
0x2205   :  { %14596 = vmatmul.mubr.msk.f32.gmra.mrb[2].mxu0 %vm10104_vm14, %v12623_v62  ;;  %14605 = vmatprep.subr.mxu1 %v15323_v51 }
0x2206   :  { %14621 = vmatpush3.msk.msra.mxu0 %vm10114_vm13, %v12621_v59  ;;  %14607 = vmatprep.mubr.msk.f32.mxu1 %vm15322_vm8, %v15323_v51 }
0x2207   :  { %14622 = vmatprep.mubr.msk.f32.mxu0 %vm15322_vm8, %v15323_v51 }
0x2208   :  { %14606 = vmatpush3.msk.msra.mxu1 %vm10114_vm13, %v12621_v59 }
0x2209   :  { %14608 = vmatmul.mubr.msk.f32.vlgmr.msra.gmra.mrb[2].mxu1 %vm10104_vm14, %v12634_v63  ;;  %14623 = vmatmul.mubr.msk.f32.vlgmr.msra.gmra.mrb[4].mxu0 %vm10104_vm14, %v12646_v0 }
0x220a   :  { %14610 = vmatprep.mubr.msk.f32.mxu1 %vm15322_vm8, %v15323_v51  ;;  %14625 = vmatprep.mubr.msk.f32.mxu0 %vm15322_vm8, %v15323_v51 }
0x220d   :  { %14611 = vmatmul.mubr.msk.f32.gmra.mrb[4].mxu1 %vm10104_vm14, %v12635_v1  ;;  %14626 = vmatmul.mubr.msk.f32.gmra.mrb[6].mxu0 %vm10104_vm14, %v12647_v2 }
0x220e   :  { %14613 = vmatprep.mubr.msk.f32.mxu1 %vm15322_vm8, %v15323_v51  ;;  %14628 = vmatprep.mubr.msk.f32.mxu0 %vm15322_vm8, %v15323_v51 }
0x2211   :  { %14614 = vmatmul.mubr.msk.f32.gmra.mrb[6].mxu1 %vm10104_vm14, %v12636_v3  ;;  %14629 = vmatmul.mubr.msk.f32.gmra.mrb[8].mxu0 %vm10104_vm14, %v12648_v4 }
0x22d4   :  { %v10184_v5 = vpop.f32.mrb[0].mxu0 }
0x22d5   :  { %10198 = vxpose.xlu0.b32.start [1/3] (short) (narrow) %v10184_v5, 24  ;;  %v14594_v6 = vpop.f32.mrb[1].mxu0 }
0x22d6   :  { %v10194_v7 = vpop.f32.mrb[0].mxu1 }
0x22d7   :  { %v14600_v8 = vpop.f32.mrb[1].mxu1 }
0x22d8   :  { %v10189_v9 = vpop.f32.mrb[2].mxu0 }
0x22d9   :  { %10199 = vxpose.xlu0.b32.cont [2/3] (short) (narrow) %v10189_v9, 24  ;;  %v14597_v10 = vpop.f32.mrb[3].mxu0 }
0x22dc   :  { %v10314_v11 = vpop.f32.mrb[2].mxu1  ;;  %v10443_v12 = vpop.f32.mrb[4].mxu0 }
0x22dd   :  { %10200 = vxpose.xlu0.b32.end [3/3] (short) (narrow) %v10194_v7, 24  ;;  %v14609_v13 = vpop.f32.mrb[3].mxu1  ;;  %v14624_v14 = vpop.f32.mrb[5].mxu0  ;;  %10328 = vxpose.xlu1.b32.start [1/3] (short) (narrow) %v10314_v11, 24 }
0x22e0   :  { %v10319_v15 = vpop.f32.mrb[4].mxu1  ;;  %v10448_v16 = vpop.f32.mrb[6].mxu0 }
0x22e1   :  { %10457 = vxpose.xlu0.b32.start [1/3] (short) (narrow) %v10443_v12, 24  ;;  %v14612_v17 = vpop.f32.mrb[5].mxu1  ;;  %v14627_v18 = vpop.f32.mrb[7].mxu0  ;;  %10329 = vxpose.xlu1.b32.cont [2/3] (short) (narrow) %v10319_v15, 24 }
0x22e4   :  { %v10324_v19 = vpop.f32.mrb[6].mxu1  ;;  %v10453_v20 = vpop.f32.mrb[8].mxu0 }
0x22e5   :  { %10458 = vxpose.xlu0.b32.cont [2/3] (short) (narrow) %v10448_v16, 24  ;;  %v14615_v21 = vpop.f32.mrb[7].mxu1  ;;  %v14630_v22 = vpop.f32.mrb[9].mxu0  ;;  %10330 = vxpose.xlu1.b32.end [3/3] (short) (narrow) %v10324_v19, 24 }
0x22e9   :  { %10459 = vxpose.xlu0.b32.end [3/3] (short) (narrow) %v10453_v20, 24 }
0x2355   :  { %v10214_v23 = vpop.trf.xlu0 }
0x2356   :  { %12631 = vst.msk [vmem:[%s18884_s3 + $0x1f8] sm:$0xff] %vm10104_vm14, %v10214_v23 }
0x2359   :  { %v10215_v24 = vpop.trf.xlu0 }
0x235a   :  { %12632 = vst.msk [vmem:[%s18884_s3 + $0x200] sm:$0xff] %vm10104_vm14, %v10215_v24 }
0x235d   :  { %v10216_v25 = vpop.trf.xlu0  ;;  %v10344_v26 = vpop.trf.xlu1 }
0x235e   :  { %12633 = vst.msk [vmem:[%s18884_s3 + $0x208] sm:$0x1] %vm10233_vm15, %v10216_v25 }
0x235f   :  { %12643 = vst.msk [vmem:[%s18884_s3 + $0x210] sm:$0xff] %vm10104_vm14, %v10344_v26 }
0x2361   :  { %v10473_v27 = vpop.trf.xlu0  ;;  %v10345_v28 = vpop.trf.xlu1 }
0x2362   :  { %12655 = vst.msk [vmem:[%s18884_s3 + $0x228] sm:$0xff] %vm10104_vm14, %v10473_v27  ;;  %12644 = vst.msk [vmem:[%s18884_s3 + $0x218] sm:$0xff] %vm10104_vm14, %v10345_v28 }
0x2365   :  { %v10474_v29 = vpop.trf.xlu0  ;;  %v10346_v30 = vpop.trf.xlu1 }
0x2366   :  { %12656 = vst.msk [vmem:[%s18884_s3 + $0x230] sm:$0xff] %vm10104_vm14, %v10474_v29 }
0x2367   :  { %12645 = vst.msk [vmem:[%s18884_s3 + $0x220] sm:$0x1] %vm10233_vm15, %v10346_v30 }
0x2369   :  { %v10475_v31 = vpop.trf.xlu0 }
0x236a   :  { %12657 = vst.msk [vmem:[%s18884_s3 + $0x238] sm:$0x1] %vm10233_vm15, %v10475_v31 }
0x236b PF:  { %p12658_p7 = scmp.ne.s32.totalorder %s15379_s26, 2 }
0x236c   :  { %v10497_v32 = vlaneseq (!%p12658_p7)  ;;  %v15325_v33 = vmov (!%p12658_p7), 0.0|0.0   ;;  %vm15326_vm0 = vmmov (!%p12658_p7), 0   ;;  %v15327_v36 = vmov (!%p12658_p7), 0.0   ;;  %v12662_v45 = vld [vmem:[%s18882_s1 + $0x1f8] sm:$0xff] (!%p12658_p7)  ;;  %v12663_v46 = vld [vmem:[%s18882_s1 + $0x200] sm:$0xff] (!%p12658_p7)  ;;  %v12678_v48 = vld [vmem:[%s18882_s1 + $0x210] sm:$0xff] (!%p12658_p7) }
0x236d   :  { %10496 = sbr.rel (%p12658_p7) target bundleno = 9551 (0x254f), region = 133  ;;  %15027 = vmatprep.subr.bf16.mxu0 (!%p12658_p7), %v15325_v33  ;;  %15030 = vmatprep.subr.bf16.mxu1 (!%p12658_p7), %v15325_v33  ;;  %v15328_v43 = vmov (!%p12658_p7), 1.0|1.0   ;;  %vm10529_vm5 = vcmask (!%p12658_p7), 1040384   ;;  %vm10519_vm6 = vcmask (!%p12658_p7), 138240   ;;  %v12679_v49 = vld [vmem:[%s18882_s1 + $0x218] sm:$0xff] (!%p12658_p7) }
0x236e   :  { %v10498_v34 = vshrl.u32 (!%p12658_p7), %v10497_v32, 7  ;;  %v10502_v35 = vand.u32 (!%p12658_p7), 127, %v10497_v32  ;;  %14637 = vmatprep.mubr.msk.f32.mxu0 (!%p12658_p7), %vm15326_vm0, %v15327_v36  ;;  %14652 = vmatprep.mubr.msk.f32.mxu1 (!%p12658_p7), %vm15326_vm0, %v15327_v36  ;;  %v12664_v47 = vld [vmem:[%s18882_s1 + $0x208] sm:$0x1] (!%p12658_p7)  ;;  %v12680_v50 = vld [vmem:[%s18882_s1 + $0x220] sm:$0x1] (!%p12658_p7) }
0x236f   :  { %v12694_v51 = vld [vmem:[%s18882_s1 + $0x228] sm:$0xff] (!%p12658_p7)  ;;  %v12695_v52 = vld [vmem:[%s18882_s1 + $0x230] sm:$0xff] (!%p12658_p7)  ;;  %v12696_v53 = vld [vmem:[%s18882_s1 + $0x238] sm:$0x1] (!%p12658_p7)  ;;  %vm10707_vm7 = vcmask (!%p12658_p7), 131072  }
0x2370   :  { %v10499_v37 = vadd.s32 (!%p12658_p7), 8, %v10498_v34  ;;  %v10503_v38 = vadd.s32 (!%p12658_p7), %v10502_v35, %v10498_v34  ;;  %v10500_v39 = vadd.s32 (!%p12658_p7), 16, %v10498_v34 }
0x2372   :  { %v18582_v40 = vadd.s32 (!%p12658_p7), %v10502_v35, %v10499_v37  ;;  %vm10506_vm1 = vcmp.eq.s32.totalorder (!%p12658_p7), %v10503_v38, 16  ;;  %v10505_v41 = vadd.s32 (!%p12658_p7), %v10502_v35, %v10500_v39 }
0x2373   :  { %v12659_v61 = vsel (!%p12658_p7), %vm10506_vm1, 1.0, %v15327_v36 }
0x2374   :  { %vm10507_vm2 = vcmp.eq.s32.totalorder %v18582_v40, 16  ;;  %vm10508_vm3 = vcmp.eq.s32.totalorder %v10505_v41, 16 }
0x2375   :  { %vm18588_vm4 = vmpackc.low %vm10507_vm2, %vm10506_vm1  ;;  %v18596_v44 = vsel %vm10508_vm3, 1.0, %v15327_v36  ;;  %v12660_v0 = vsel %vm10507_vm2, 1.0, %v15327_v36 }
0x2376   :  { %15029 = vmatpush3.bf16.msk.msra.mxu0 %vm18588_vm4, %v15328_v43 }
0x2377   :  { %14635 = vmatprep.subr.mxu0 %v15327_v36 }
0x237a   :  { %14636 = vmatpush3.msk.msra.mxu0 %vm10529_vm5, %v18596_v44 }
0x237b   :  { %14638 = vmatmul.mubr.msk.f32.vlgmr.msra.gmra.mrb[0].mxu0 %vm10519_vm6, %v12662_v45  ;;  %15033 = vmatprep.subr.bf16.mxu0 %v15325_v33 }
0x237c   :  { %14640 = vmatprep.mubr.msk.f32.mxu0 %vm15326_vm0, %v15327_v36  ;;  %15035 = vmatpush3.bf16.msk.msra.mxu0 %vm18588_vm4, %v15328_v43 }
0x237d   :  { %14665 = vmatprep.subr.mxu0 %v15327_v36 }
0x237f   :  { %14641 = vmatmul.mubr.msk.f32.gmra.mrb[2].mxu0 %vm10519_vm6, %v12663_v46 }
0x2380   :  { %14643 = vmatprep.mubr.msk.f32.mxu0 %vm15326_vm0, %v15327_v36  ;;  %14666 = vmatpush3.msk.msra.mxu0 %vm10529_vm5, %v18596_v44 }
0x2381   :  { %15039 = vmatprep.subr.bf16.mxu0 %v15325_v33 }
0x2383   :  { %14644 = vmatmul.mubr.msk.f32.gmra.mrb[4].mxu0 %vm10519_vm6, %v12664_v47 }
0x2384   :  { %14667 = vmatprep.mubr.msk.f32.mxu0 %vm15326_vm0, %v15327_v36 }
0x2387   :  { %14668 = vmatmul.mubr.msk.f32.vlgmr.msra.gmra.mrb[6].mxu0 %vm10519_vm6, %v12678_v48 }
0x2388   :  { %14670 = vmatprep.mubr.msk.f32.mxu0 %vm15326_vm0, %v15327_v36  ;;  %15041 = vmatpush3.bf16.msk.msra.mxu0 %vm18588_vm4, %v15328_v43 }
0x2389   :  { %14695 = vmatprep.subr.mxu0 %v15327_v36 }
0x238b   :  { %14671 = vmatmul.mubr.msk.f32.gmra.mrb[8].mxu0 %vm10519_vm6, %v12679_v49 }
0x238c   :  { %14673 = vmatprep.mubr.msk.f32.mxu0 %vm15326_vm0, %v15327_v36  ;;  %14696 = vmatpush3.msk.msra.mxu0 %vm10529_vm5, %v18596_v44 }
0x238f   :  { %14674 = vmatmul.mubr.msk.f32.gmra.mrb[10].mxu0 %vm10519_vm6, %v12680_v50 }
0x2390   :  { %14697 = vmatprep.mubr.msk.f32.mxu0 %vm15326_vm0, %v15327_v36 }
0x2393   :  { %14698 = vmatmul.mubr.msk.f32.vlgmr.msra.gmra.mrb[12].mxu0 %vm10519_vm6, %v12694_v51 }
0x2394   :  { %14700 = vmatprep.mubr.msk.f32.mxu0 %vm15326_vm0, %v15327_v36 }
0x2397   :  { %14701 = vmatmul.mubr.msk.f32.gmra.mrb[14].mxu0 %vm10519_vm6, %v12695_v52 }
0x2398   :  { %14703 = vmatprep.mubr.msk.f32.mxu0 %vm15326_vm0, %v15327_v36 }
0x239b   :  { %14704 = vmatmul.mubr.msk.f32.gmra.mrb[16].mxu0 %vm10519_vm6, %v12696_v53 }
0x244e   :  { %v10599_v54 = vpop.f32.mrb[0].mxu0 }
0x244f   :  { %v14639_v55 = vpop.f32.mrb[1].mxu0 }
0x2452   :  { %v10604_v56 = vpop.f32.mrb[2].mxu0 }
0x2453   :  { %v15031_v57 = vpack.c.bf16 %v10604_v56, %v10599_v54  ;;  %v14642_v58 = vpop.f32.mrb[3].mxu0 }
0x2455   :  { %15032 = vmatpush3.bf16.msra.mxu1 %v15031_v57 }
0x2456   :  { %v10609_v59 = vpop.f32.mrb[4].mxu0  ;;  %14650 = vmatprep.subr.mxu1 %v15327_v36 }
0x2457   :  { %v14645_v60 = vpop.f32.mrb[5].mxu0 }
0x2459   :  { %14651 = vmatpush3.msk.msra.mxu1 %vm10529_vm5, %v10609_v59 }
0x245a   :  { %v10788_v62 = vpop.f32.mrb[6].mxu0  ;;  %14653 = vmatmul.mubr.msk.f32.vlgmr.msra.gmra.mrb[0].mxu1 %vm10519_vm6, %v12659_v61  ;;  %15036 = vmatprep.subr.bf16.mxu1 %v15325_v33 }
0x245b   :  { %v14669_v63 = vpop.f32.mrb[7].mxu0  ;;  %14655 = vmatprep.mubr.msk.f32.mxu1 %vm15326_vm0, %v15327_v36 }
0x245e   :  { %v10793_v1 = vpop.f32.mrb[8].mxu0  ;;  %14656 = vmatmul.mubr.msk.f32.gmra.mrb[2].mxu1 %vm10519_vm6, %v12660_v0 }
0x245f   :  { %v15037_v2 = vpack.c.bf16 %v10793_v1, %v10788_v62  ;;  %v14672_v3 = vpop.f32.mrb[9].mxu0  ;;  %14658 = vmatprep.mubr.msk.f32.mxu1 %vm15326_vm0, %v15327_v36 }
0x2461   :  { %15038 = vmatpush3.bf16.msra.mxu1 %v15037_v2 }
0x2462   :  { %v10798_v4 = vpop.f32.mrb[10].mxu0  ;;  %14680 = vmatprep.subr.mxu1 %v15327_v36  ;;  %14659 = vmatmul.mubr.msk.f32.gmra.mrb[4].mxu1 %vm10519_vm6, %v18596_v44 }
0x2463   :  { %v14675_v5 = vpop.f32.mrb[11].mxu0  ;;  %14682 = vmatprep.mubr.msk.f32.mxu1 %vm15326_vm0, %v15327_v36 }
0x2465   :  { %14681 = vmatpush3.msk.msra.mxu1 %vm10529_vm5, %v10798_v4 }
0x2466   :  { %v10968_v6 = vpop.f32.mrb[12].mxu0  ;;  %14683 = vmatmul.mubr.msk.f32.vlgmr.msra.gmra.mrb[6].mxu1 %vm10519_vm6, %v12659_v61  ;;  %15042 = vmatprep.subr.bf16.mxu1 %v15325_v33 }
0x2467   :  { %v14699_v7 = vpop.f32.mrb[13].mxu0  ;;  %14685 = vmatprep.mubr.msk.f32.mxu1 %vm15326_vm0, %v15327_v36 }
0x246a   :  { %v10973_v8 = vpop.f32.mrb[14].mxu0  ;;  %14686 = vmatmul.mubr.msk.f32.gmra.mrb[8].mxu1 %vm10519_vm6, %v12660_v0 }
0x246b   :  { %v15043_v9 = vpack.c.bf16 %v10973_v8, %v10968_v6  ;;  %v14702_v10 = vpop.f32.mrb[15].mxu0  ;;  %14688 = vmatprep.mubr.msk.f32.mxu1 %vm15326_vm0, %v15327_v36 }
0x246d   :  { %15044 = vmatpush3.bf16.msra.mxu1 %v15043_v9 }
0x246e   :  { %v10978_v11 = vpop.f32.mrb[16].mxu0  ;;  %14710 = vmatprep.subr.mxu1 %v15327_v36  ;;  %14689 = vmatmul.mubr.msk.f32.gmra.mrb[10].mxu1 %vm10519_vm6, %v18596_v44 }
0x246f   :  { %v14705_v12 = vpop.f32.mrb[17].mxu0  ;;  %14712 = vmatprep.mubr.msk.f32.mxu1 %vm15326_vm0, %v15327_v36 }
0x2471   :  { %14711 = vmatpush3.msk.msra.mxu1 %vm10529_vm5, %v10978_v11 }
0x2472   :  { %14713 = vmatmul.mubr.msk.f32.vlgmr.msra.gmra.mrb[12].mxu1 %vm10519_vm6, %v12659_v61 }
0x2473   :  { %14715 = vmatprep.mubr.msk.f32.mxu1 %vm15326_vm0, %v15327_v36 }
0x2476   :  { %14716 = vmatmul.mubr.msk.f32.gmra.mrb[14].mxu1 %vm10519_vm6, %v12660_v0 }
0x2477   :  { %14718 = vmatprep.mubr.msk.f32.mxu1 %vm15326_vm0, %v15327_v36 }
0x247a   :  { %14719 = vmatmul.mubr.msk.f32.gmra.mrb[16].mxu1 %vm10519_vm6, %v18596_v44 }
0x252d   :  { %v10690_v13 = vpop.f32.mrb[0].mxu1 }
0x252e   :  { %12675 = vst.msk [vmem:[%s18884_s3 + $0x1f8] sm:$0xff] %vm10519_vm6, %v10690_v13  ;;  %v14654_v14 = vpop.f32.mrb[1].mxu1 }
0x2531   :  { %v10695_v15 = vpop.f32.mrb[2].mxu1 }
0x2532   :  { %12676 = vst.msk [vmem:[%s18884_s3 + $0x200] sm:$0xff] %vm10519_vm6, %v10695_v15  ;;  %v14657_v16 = vpop.f32.mrb[3].mxu1 }
0x2535   :  { %v10700_v17 = vpop.f32.mrb[4].mxu1 }
0x2536   :  { %12677 = vst.msk [vmem:[%s18884_s3 + $0x208] sm:$0x1] %vm10707_vm7, %v10700_v17  ;;  %v14660_v18 = vpop.f32.mrb[5].mxu1 }
0x2539   :  { %v10871_v19 = vpop.f32.mrb[6].mxu1 }
0x253a   :  { %12691 = vst.msk [vmem:[%s18884_s3 + $0x210] sm:$0xff] %vm10519_vm6, %v10871_v19  ;;  %v14684_v20 = vpop.f32.mrb[7].mxu1 }
0x253d   :  { %v10876_v21 = vpop.f32.mrb[8].mxu1 }
0x253e   :  { %12692 = vst.msk [vmem:[%s18884_s3 + $0x218] sm:$0xff] %vm10519_vm6, %v10876_v21  ;;  %v14687_v22 = vpop.f32.mrb[9].mxu1 }
0x2541   :  { %v10881_v23 = vpop.f32.mrb[10].mxu1 }
0x2542   :  { %12693 = vst.msk [vmem:[%s18884_s3 + $0x220] sm:$0x1] %vm10707_vm7, %v10881_v23  ;;  %v14690_v24 = vpop.f32.mrb[11].mxu1 }
0x2545   :  { %v11051_v25 = vpop.f32.mrb[12].mxu1 }
0x2546   :  { %12707 = vst.msk [vmem:[%s18884_s3 + $0x228] sm:$0xff] %vm10519_vm6, %v11051_v25  ;;  %v14714_v26 = vpop.f32.mrb[13].mxu1 }
0x2549   :  { %v11056_v27 = vpop.f32.mrb[14].mxu1 }
0x254a   :  { %12708 = vst.msk [vmem:[%s18884_s3 + $0x230] sm:$0xff] %vm10519_vm6, %v11056_v27  ;;  %v14717_v28 = vpop.f32.mrb[15].mxu1 }
0x254d   :  { %v11061_v29 = vpop.f32.mrb[16].mxu1 }
0x254e   :  { %12709 = vst.msk [vmem:[%s18884_s3 + $0x238] sm:$0x1] %vm10707_vm7, %v11061_v29  ;;  %v14720_v30 = vpop.f32.mrb[17].mxu1 }
0x254f PF:  { %p12710_p8 = scmp.ne.s32.totalorder %s15379_s26, 3 }
0x2550   :  { %v12714_v31 = vld [vmem:[%s18882_s1 + $0x1f8] sm:$0xff] (!%p12710_p8)  ;;  %v11073_v32 = vlaneseq (!%p12710_p8)  ;;  %v12726_v33 = vld [vmem:[%s18882_s1 + $0x210] sm:$0xff] (!%p12710_p8)  ;;  %v15329_v34 = vmov (!%p12710_p8), 0.0|0.0   ;;  %v12715_v35 = vld [vmem:[%s18882_s1 + $0x200] sm:$0xff] (!%p12710_p8)  ;;  %vm15330_vm8 = vmmov (!%p12710_p8), 0   ;;  %v15331_v39 = vmov (!%p12710_p8), 0.0  }
0x2551   :  { %11072 = sbr.rel (%p12710_p8) target bundleno = 9917 (0x26bd), region = 137  ;;  %11095 = vxpose.xlu0.b32.start [1/3] (short) (narrow) (!%p12710_p8), %v12714_v31, 24  ;;  %15045 = vmatprep.subr.bf16.mxu0 (!%p12710_p8), %v15329_v34  ;;  %v12727_v36 = vld [vmem:[%s18882_s1 + $0x218] sm:$0xff] (!%p12710_p8)  ;;  %v12716_v43 = vld [vmem:[%s18882_s1 + $0x208] sm:$0x1] (!%p12710_p8)  ;;  %vm11137_vm13 = vcmask (!%p12710_p8), 1040384  }
0x2552   :  { %11230 = vxpose.xlu1.b32.start [1/3] (short) (narrow) (!%p12710_p8), %v12726_v33, 24  ;;  %15114 = vmatprep.subr.bf16.mxu1 (!%p12710_p8), %v15329_v34  ;;  %v11074_v37 = vshrl.u32 (!%p12710_p8), %v11073_v32, 7  ;;  %v11078_v38 = vand.u32 (!%p12710_p8), 127, %v11073_v32  ;;  %v12728_v44 = vld [vmem:[%s18882_s1 + $0x220] sm:$0x1] (!%p12710_p8)  ;;  %v12738_v47 = vld [vmem:[%s18882_s1 + $0x228] sm:$0xff] (!%p12710_p8) }
0x2553   :  { %14727 = vmatprep.mubr.msk.f32.mxu0 (!%p12710_p8), %vm15330_vm8, %v15331_v39  ;;  %14733 = vmatprep.mubr.msk.f32.mxu1 (!%p12710_p8), %vm15330_vm8, %v15331_v39  ;;  %v15332_v49 = vmov (!%p12710_p8), 1.0|1.0   ;;  %v12739_v51 = vld [vmem:[%s18882_s1 + $0x230] sm:$0xff] (!%p12710_p8)  ;;  %v12740_v52 = vld [vmem:[%s18882_s1 + $0x238] sm:$0x1] (!%p12710_p8)  ;;  %vm11127_vm14 = vcmask (!%p12710_p8), 138240  }
0x2554   :  { %v11075_v40 = vadd.s32 (!%p12710_p8), 8, %v11074_v37  ;;  %v11079_v41 = vadd.s32 (!%p12710_p8), %v11078_v38, %v11074_v37  ;;  %v11076_v42 = vadd.s32 (!%p12710_p8), 16, %v11074_v37  ;;  %vm11224_vm15 = vcmask (!%p12710_p8), 131072  }
0x2555   :  { %11096 = vxpose.xlu0.b32.cont [2/3] (short) (narrow) (!%p12710_p8), %v12715_v35, 24 }
0x2556   :  { %11231 = vxpose.xlu1.b32.cont [2/3] (short) (narrow) (!%p12710_p8), %v12727_v36, 24  ;;  %v11080_v45 = vadd.s32 (!%p12710_p8), %v11078_v38, %v11075_v40  ;;  %vm11082_vm9 = vcmp.eq.s32.totalorder (!%p12710_p8), %v11079_v41, 16  ;;  %v11081_v46 = vadd.s32 (!%p12710_p8), %v11078_v38, %v11076_v42 }
0x2558   :  { %vm11083_vm10 = vcmp.eq.s32.totalorder %v11080_v45, 16  ;;  %vm11084_vm11 = vcmp.eq.s32.totalorder %v11081_v46, 16 }
0x2559   :  { %11097 = vxpose.xlu0.b32.end [3/3] (short) (narrow) %v12716_v43, 24  ;;  %vm18767_vm12 = vmpackc.low %vm11083_vm10, %vm11082_vm9  ;;  %v12713_v50 = vsel %vm11084_vm11, 1.0, %v15331_v39 }
0x255a   :  { %11232 = vxpose.xlu1.b32.end [3/3] (short) (narrow) %v12728_v44, 24  ;;  %15047 = vmatpush3.bf16.msk.msra.mxu0 %vm18767_vm12, %v15332_v49 }
0x255b   :  { %15116 = vmatpush3.bf16.msk.msra.mxu1 %vm18767_vm12, %v15332_v49  ;;  %14725 = vmatprep.subr.mxu0 %v15331_v39 }
0x255c   :  { %15115 = vmatprep.subr.mxu1 %v15331_v39 }
0x255d   :  { %11359 = vxpose.xlu0.b32.start [1/3] (short) (narrow) %v12738_v47, 24 }
0x255e   :  { %14726 = vmatpush3.msk.msra.mxu0 %vm11137_vm13, %v12713_v50 }
0x255f   :  { %15117 = vmatpush3.msk.msra.mxu1 %vm11137_vm13, %v12713_v50  ;;  %15051 = vmatprep.subr.bf16.mxu0 %v15329_v34 }
0x2560   :  { %15048 = vmatprep.subr.bf16.mxu1 %v15329_v34 }
0x2561   :  { %11360 = vxpose.xlu0.b32.cont [2/3] (short) (narrow) %v12739_v51, 24 }
0x2565   :  { %11361 = vxpose.xlu0.b32.end [3/3] (short) (narrow) %v12740_v52, 24 }
0x25d1   :  { %v11111_v53 = vpop.trf.xlu0 }
0x25d2   :  { %14728 = vmatmul.mubr.msk.f32.vlgmr.msra.gmra.mrb[0].mxu0 %vm11127_vm14, %v11111_v53  ;;  %v11246_v56 = vpop.trf.xlu1 }
0x25d3   :  { %14730 = vmatprep.mubr.msk.f32.mxu0 %vm15330_vm8, %v15331_v39  ;;  %15053 = vmatpush3.bf16.msk.msra.mxu0 %vm18767_vm12, %v15332_v49 }
0x25d4   :  { %14755 = vmatprep.subr.mxu0 %v15331_v39 }
0x25d5   :  { %v11112_v54 = vpop.trf.xlu0 }
0x25d6   :  { %14731 = vmatmul.mubr.msk.f32.gmra.mrb[2].mxu0 %vm11127_vm14, %v11112_v54  ;;  %v11247_v58 = vpop.trf.xlu1 }
0x25d7   :  { %14756 = vmatpush3.msk.msra.mxu0 %vm11137_vm13, %v12713_v50  ;;  %14757 = vmatprep.mubr.msk.f32.mxu0 %vm15330_vm8, %v15331_v39 }
0x25d9   :  { %v11113_v55 = vpop.trf.xlu0 }
0x25da   :  { %14734 = vmatmul.mubr.msk.f32.vlgmr.msra.gmra.mrb[0].mxu1 %vm11127_vm14, %v11113_v55  ;;  %v11248_v60 = vpop.trf.xlu1 }
0x25db   :  { %15050 = vmatpush3.bf16.msk.msra.mxu1 %vm18767_vm12, %v15332_v49  ;;  %14742 = vmatprep.mubr.msk.f32.mxu1 %vm15330_vm8, %v15331_v39 }
0x25dc   :  { %14740 = vmatprep.subr.mxu1 %v15331_v39 }
0x25dd   :  { %v11375_v57 = vpop.trf.xlu0 }
0x25de   :  { %14758 = vmatmul.mubr.msk.f32.vlgmr.msra.gmra.mrb[4].mxu0 %vm11127_vm14, %v11375_v57 }
0x25df   :  { %14741 = vmatpush3.msk.msra.mxu1 %vm11137_vm13, %v12713_v50  ;;  %14760 = vmatprep.mubr.msk.f32.mxu0 %vm15330_vm8, %v15331_v39 }
0x25e0   :  { %14743 = vmatmul.mubr.msk.f32.vlgmr.msra.gmra.mrb[2].mxu1 %vm11127_vm14, %v11246_v56 }
0x25e1   :  { %v11376_v59 = vpop.trf.xlu0  ;;  %14745 = vmatprep.mubr.msk.f32.mxu1 %vm15330_vm8, %v15331_v39 }
0x25e2   :  { %14761 = vmatmul.mubr.msk.f32.gmra.mrb[6].mxu0 %vm11127_vm14, %v11376_v59 }
0x25e3   :  { %14763 = vmatprep.mubr.msk.f32.mxu0 %vm15330_vm8, %v15331_v39 }
0x25e4   :  { %14746 = vmatmul.mubr.msk.f32.gmra.mrb[4].mxu1 %vm11127_vm14, %v11247_v58 }
0x25e5   :  { %v11377_v61 = vpop.trf.xlu0  ;;  %14748 = vmatprep.mubr.msk.f32.mxu1 %vm15330_vm8, %v15331_v39 }
0x25e6   :  { %14764 = vmatmul.mubr.msk.f32.gmra.mrb[8].mxu0 %vm11127_vm14, %v11377_v61 }
0x25e8   :  { %14749 = vmatmul.mubr.msk.f32.gmra.mrb[6].mxu1 %vm11127_vm14, %v11248_v60 }
0x26a5   :  { %v11207_v62 = vpop.f32.mrb[0].mxu0 }
0x26a6   :  { %12723 = vst.msk [vmem:[%s18884_s3 + $0x1f8] sm:$0xff] %vm11127_vm14, %v11207_v62  ;;  %v14729_v63 = vpop.f32.mrb[1].mxu0 }
0x26a9   :  { %v11212_v0 = vpop.f32.mrb[2].mxu0 }
0x26aa   :  { %12724 = vst.msk [vmem:[%s18884_s3 + $0x200] sm:$0xff] %vm11127_vm14, %v11212_v0  ;;  %v14732_v1 = vpop.f32.mrb[3].mxu0 }
0x26ad   :  { %v11217_v2 = vpop.f32.mrb[0].mxu1 }
0x26ae   :  { %12725 = vst.msk [vmem:[%s18884_s3 + $0x208] sm:$0x1] %vm11224_vm15, %v11217_v2  ;;  %v14735_v3 = vpop.f32.mrb[1].mxu1 }
0x26b1   :  { %v11466_v4 = vpop.f32.mrb[4].mxu0 }
0x26b2   :  { %12747 = vst.msk [vmem:[%s18884_s3 + $0x228] sm:$0xff] %vm11127_vm14, %v11466_v4  ;;  %v14759_v5 = vpop.f32.mrb[5].mxu0 }
0x26b3   :  { %v11337_v6 = vpop.f32.mrb[2].mxu1 }
0x26b4   :  { %12735 = vst.msk [vmem:[%s18884_s3 + $0x210] sm:$0xff] %vm11127_vm14, %v11337_v6  ;;  %v14744_v7 = vpop.f32.mrb[3].mxu1 }
0x26b5   :  { %v11471_v8 = vpop.f32.mrb[6].mxu0 }
0x26b6   :  { %12748 = vst.msk [vmem:[%s18884_s3 + $0x230] sm:$0xff] %vm11127_vm14, %v11471_v8  ;;  %v14762_v9 = vpop.f32.mrb[7].mxu0 }
0x26b7   :  { %v11342_v10 = vpop.f32.mrb[4].mxu1 }
0x26b8   :  { %12736 = vst.msk [vmem:[%s18884_s3 + $0x218] sm:$0xff] %vm11127_vm14, %v11342_v10  ;;  %v14747_v11 = vpop.f32.mrb[5].mxu1 }
0x26b9   :  { %v11476_v12 = vpop.f32.mrb[8].mxu0 }
0x26ba   :  { %12749 = vst.msk [vmem:[%s18884_s3 + $0x238] sm:$0x1] %vm11224_vm15, %v11476_v12  ;;  %v14765_v13 = vpop.f32.mrb[9].mxu0 }
0x26bb   :  { %v11347_v14 = vpop.f32.mrb[6].mxu1 }
0x26bc   :  { %12737 = vst.msk [vmem:[%s18884_s3 + $0x220] sm:$0x1] %vm11224_vm15, %v11347_v14  ;;  %v14750_v15 = vpop.f32.mrb[7].mxu1 }
0x26bd PF:  { %v18856_v16 = vld [vmem:[%s18883_s2] sm:$0xff]  ;;  %s15333_s1 = smov 1   ;;  %s15334_s14 = smov 127   ;;  %v11485_v18 = vlaneseq  ;;  %v11488_v20 = vstv %s15365_s20  ;;  %v11491_v22 = vstv %s15367_s21  ;;  %v11494_v24 = vstv %s15369_s22 }
0x26be   :  { %v11513_v17 = vsub.f32 1.0, %v18856_v16  ;;  %v11497_v26 = vstv %s15371_s0  ;;  %v11500_v28 = vstv %s15373_s23  ;;  %v11503_v30 = vstv %s15375_s24 }
0x26bf   :  { %v11486_v19 = vshrl.u32 %v11485_v18, 7  ;;  %v11506_v32 = vstv %s15377_s25  ;;  %v11509_v34 = vstv %s15379_s26  ;;  %v15335_v40 = vmov 2  }
0x26c0   :  { %11531 = vrot.lane.b32.xlu0 %v11513_v17, %s15333_s1  ;;  %v15336_v41 = vmov 1   ;;  %v11546_v50 = vand.u32 127, %v11485_v18  ;;  %vm11561_vm13 = vcmask 23552  }
0x26c1   :  { %vm11487_vm0 = vcmp.eq.s32.totalorder %v11486_v19, 0  ;;  %vm11490_vm1 = vcmp.eq.s32.totalorder %v11486_v19, 1  ;;  %vm11493_vm2 = vcmp.eq.s32.totalorder %v11486_v19, 2  ;;  %vm11496_vm3 = vcmp.eq.s32.totalorder %v11486_v19, 3  ;;  %15219 = vset.pattern.permute.xlu0 %v15335_v40  ;;  %15220 = vset.pattern.permute.xlu1 %v15336_v41 }
0x26c2   :  { %v11489_v21 = vsel %vm11487_vm0, %v11488_v20, 0  ;;  %vm11499_vm4 = vcmp.eq.s32.totalorder %v11486_v19, 4  ;;  %vm11502_vm5 = vcmp.eq.s32.totalorder %v11486_v19, 5  ;;  %vm11505_vm6 = vcmp.eq.s32.totalorder %v11486_v19, 6 }
0x26c3   :  { %v11492_v23 = vsel %vm11490_vm1, %v11491_v22, %v11489_v21  ;;  %vm11508_vm7 = vcmp.eq.s32.totalorder %v11486_v19, 7  ;;  %vm11548_vm11 = vcmp.eq.s32.totalorder %v11546_v50, 2  ;;  %vm11547_vm12 = vcmp.eq.s32.totalorder %v11546_v50, 1 }
0x26c4   :  { %11516 = vrot.lane.b32.xlu0 %v18856_v16, %s15334_s14  ;;  %v11495_v25 = vsel %vm11493_vm2, %v11494_v24, %v11492_v23 }
0x26c5   :  { %v11498_v27 = vsel %vm11496_vm3, %v11497_v26, %v11495_v25 }
0x26c6   :  { %v11501_v29 = vsel %vm11499_vm4, %v11500_v28, %v11498_v27 }
0x26c7   :  { %v11504_v31 = vsel %vm11502_vm5, %v11503_v30, %v11501_v29 }
0x26c8   :  { %v11507_v33 = vsel %vm11505_vm6, %v11506_v32, %v11504_v31 }
0x26c9   :  { %v11510_v35 = vsel %vm11508_vm7, %v11509_v34, %v11507_v33 }
0x26ca   :  { %vm11514_vm8 = vcmp.eq.s32.totalorder %v11510_v35, 2  ;;  %vm11512_vm9 = vcmp.eq.s32.totalorder %v11510_v35, 1  ;;  %vm11511_vm10 = vcmp.eq.s32.totalorder %v11510_v35, 0 }
0x2732   :  { %v11532_v36 = vpop.permute.xlu0 %11531 }
0x2733   :  { %v11534_v37 = vsel %vm11514_vm8, %v11513_v17, %v11532_v36 }
0x2734   :  { %11536 = vrot.lane.b32.xlu1 %v11534_v37, %s15334_s14 }
0x2736   :  { %v11517_v38 = vpop.permute.xlu0 %11516 }
0x2737   :  { %v11519_v39 = vsel %vm11514_vm8, %v11513_v17, %v11517_v38 }
0x2738   :  { %11521 = vrot.lane.b32.xlu1 %v11519_v39, %s15333_s1 }
0x27a6   :  { %v11537_v42 = vpop.permute.xlu1 %11536 }
0x27a7   :  { %v11539_v43 = vsel %vm11512_vm9, %v18856_v16, %v11537_v42 }
0x27a8   :  { %11541 = vrot.lane.b32.xlu0 %v11539_v43, %s15333_s1 }
0x27aa   :  { %v11522_v44 = vpop.permute.xlu1 %11521 }
0x27ab   :  { %v11524_v45 = vsel %vm11512_vm9, %v11513_v17, %v11522_v44 }
0x27ac   :  { %11526 = vrot.lane.b32.xlu1 %v11524_v45, %s15334_s14 }
0x281a   :  { %v11542_v46 = vpop.permute.xlu0 %11541 }
0x281b   :  { %v11544_v47 = vsel %vm11511_vm10, %v18856_v16, %v11542_v46 }
0x281c   :  { %11551 = vperm.xlu0 %15219, %v11544_v47  }
0x281e   :  { %v11527_v48 = vpop.permute.xlu1 %11526 }
0x281f   :  { %v11529_v49 = vsel %vm11511_vm10, %v18856_v16, %v11527_v48 }
0x2820   :  { %11557 = vperm.xlu1 %15220, %v11529_v49   ;;  %15221 = vset.pattern.permute.xlu0 %v15336_v41 }
0x289b   :  { %v11552_v51 = vpop.permute.xlu0 %11551 }
0x289c   :  { %v11554_v52 = vsel %vm11548_vm11, %v11552_v51, %v18856_v16 }
0x289f   :  { %v11558_v53 = vpop.permute.xlu1 %11557 }
0x28a0   :  { %v11560_v54 = vsel %vm11547_vm12, %v11558_v53, %v11554_v52 }
0x28a1   :  { %11562 = vst.msk [vmem:[%s18885_s4] sm:$0xff] %vm11561_vm13, %v11560_v54 }

</bundles_post_ra>
